<compile_context>
chip_gen: v5e
topology: v5e:2x2
jax: 0.10.0
libtpu: 0.0.40
codegen_flags: <defaults>
</compile_context>

<pallas_src>
import numpy as np
import jax
import jax.numpy as jnp
from jax.experimental import pallas as pl
from jax.experimental.pallas import tpu as pltpu


# ---------------------------------------------------------------------------
# Kernel
# ---------------------------------------------------------------------------
def basic_block_kernel(x_ref, w1_ref, b1_ref, w2_ref, b2_ref, o_ref,
                       xpad_ref, midpad_ref):
    """out = relu(bn2(conv2(relu(bn1(conv1(x))))) + x), BN folded into w/b.

    Scratch layout: flat padded image, shape ((H+3)*Wp, Cp) with Wp = W+2.
    Padded image row r lives at flat rows [r*Wp, (r+1)*Wp); row 0 and rows
    H+1..H+2 are zero spatial padding (row H+2 is slack so every tap's slab
    slice stays in bounds).
    """
    _, H, W, Cp = o_ref.shape
    Wp = W + 2
    M = H * Wp                       # rows of each per-tap matmul operand
    cdt = xpad_ref.dtype             # bf16 compute dtype for MXU operands

    x = x_ref[0]                     # (H, W, Cp) f32 — also the residual

    # Re-zero only the border rows each step (cheap; everything else is fully
    # overwritten below).  Unconditional so it is correct even if the batch
    # axis is sharded across TensorCores (per-core scratch may never see
    # grid step 0).
    for ref in (xpad_ref, midpad_ref):
        ref[0:Wp, :] = jnp.zeros((Wp, Cp), cdt)                        # top pad row
        ref[(H + 1) * Wp:(H + 3) * Wp, :] = jnp.zeros((2 * Wp, Cp), cdt)  # bottom pad

    zcol = jnp.zeros((H, 1, Cp), cdt)        # left / right column padding

    def write_padded(dst_ref, img_f32):
        """Store img (H, W, Cp) into padded rows 1..H with zero column pads."""
        row = jnp.concatenate([zcol, img_f32.astype(cdt), zcol], axis=1)  # (H, Wp, Cp)
        dst_ref[Wp:(H + 1) * Wp, :] = row.reshape(M, Cp)

    def conv3x3(src_ref, w_ref):
        """3x3 'same' conv (stride 1) as 9 accumulated slab matmuls -> (H, W, Cp) f32."""
        acc = jnp.zeros((M, Cp), jnp.float32)
        for dy in range(3):
            for dx in range(3):
                off = dy * Wp + dx
                slab = src_ref[off:off + M, :]               # contiguous VMEM view
                acc = acc + jnp.dot(slab, w_ref[dy * 3 + dx],
                                    preferred_element_type=jnp.float32)
        return acc.reshape(H, Wp, Cp)[:, :W, :]              # drop junk columns

    # ---- conv1 + bn1 + relu ----------------------------------------------
    write_padded(xpad_ref, x)
    y1 = jnp.maximum(conv3x3(xpad_ref, w1_ref) + b1_ref[0], 0.0)

    # ---- conv2 + bn2 + residual add + relu (intermediate stays in VMEM) ---
    write_padded(midpad_ref, y1)
    y2 = conv3x3(midpad_ref, w2_ref) + b2_ref[0] + x
    o_ref[0] = jnp.maximum(y2, 0.0).astype(o_ref.dtype)


# ---------------------------------------------------------------------------
# Wrapper (BN folding, channel padding, BlockSpecs)
# ---------------------------------------------------------------------------
def _round_up(v, m):
    return (v + m - 1) // m * m


def _fold_bn_into_conv(w_hwio, gamma, beta, mean, var, c, cp, eps=1e-5):
    """Fold eval-mode BatchNorm into the conv (f32), then cast weights to bf16.

    Returns (9, Cp, Cp) bf16 weights with tap index dy*3+dx, and (1, Cp) f32 bias.
    """
    scale = gamma / jnp.sqrt(var + eps)                        # (C,)
    bias = beta - mean * scale                                 # (C,)
    w = w_hwio.astype(jnp.float32) * scale[None, None, None, :]
    w = jnp.pad(w, ((0, 0), (0, 0), (0, cp - c), (0, cp - c)))
    bias = jnp.pad(bias, (0, cp - c))
    return (w.reshape(9, cp, cp).astype(jnp.bfloat16),
            bias.reshape(1, cp).astype(jnp.float32))


def basic_block_forward_nhwc(x_nhwc_padded, w1_mat, b1_vec, w2_mat, b2_vec):
    """Fused BasicBlock on NHWC, channel-padded (Cp multiple of 128) input."""
    N, H, W, Cp = x_nhwc_padded.shape
    grid_spec = pltpu.PrefetchScalarGridSpec(
        num_scalar_prefetch=0,
        grid=(N,),
        in_specs=[
            pl.BlockSpec((1, H, W, Cp), lambda n: (n, 0, 0, 0)),   # x (also residual)
            pl.BlockSpec((9, Cp, Cp), lambda n: (0, 0, 0)),        # w1 (resident)
            pl.BlockSpec((1, Cp), lambda n: (0, 0)),               # b1 (resident)
            pl.BlockSpec((9, Cp, Cp), lambda n: (0, 0, 0)),        # w2 (resident)
            pl.BlockSpec((1, Cp), lambda n: (0, 0)),               # b2 (resident)
        ],
        out_specs=pl.BlockSpec((1, H, W, Cp), lambda n: (n, 0, 0, 0)),
        scratch_shapes=[
            pltpu.VMEM(((H + 3) * (W + 2), Cp), jnp.bfloat16),     # flat padded x
            pltpu.VMEM(((H + 3) * (W + 2), Cp), jnp.bfloat16),     # flat padded act1
        ],
    )
    return pl.pallas_call(
        basic_block_kernel,
        out_shape=jax.ShapeDtypeStruct((N, H, W, Cp), jnp.float32),
        grid_spec=grid_spec,
        compiler_params=pltpu.CompilerParams(
            dimension_semantics=("parallel",),       # batch axis across cores
            vmem_limit_bytes=32 * 1024 * 1024,
        ),
    )(x_nhwc_padded, w1_mat, b1_vec, w2_mat, b2_vec)


def basic_block_forward(x_nchw, params):
    """NCHW boundary wrapper (layout conversion + BN folding + channel pad)."""
    N, Cin, H, W = x_nchw.shape
    Cout = params["w1"].shape[-1]
    assert Cin == Cout, "stride=1 / downsample=None path requires inplanes == planes"
    C = Cout
    # NOTE: padding channels to 128 is wasteful for the toy C=4 test config;
    # the kernel is intended for real ResNet widths (C >= 64).
    Cp = _round_up(C, 128)

    # NCHW -> NHWC, zero-pad channels (zeros propagate harmlessly through the
    # zero weight columns / bias and the zero residual channels).
    x = jnp.transpose(x_nchw, (0, 2, 3, 1)).astype(jnp.float32)
    x = jnp.pad(x, ((0, 0), (0, 0), (0, 0), (0, Cp - C)))

    w1_mat, b1_vec = _fold_bn_into_conv(params["w1"], params["g1"], params["b1"],
                                        params["m1"], params["v1"], C, Cp)
    w2_mat, b2_vec = _fold_bn_into_conv(params["w2"], params["g2"], params["b2"],
                                        params["m2"], params["v2"], C, Cp)

    out_p = basic_block_forward_nhwc(x, w1_mat, b1_vec, w2_mat, b2_vec)
    out = out_p[..., :C]                                   # drop channel padding
    return jnp.transpose(out, (0, 3, 1, 2))                # back to NCHW


# ---------------------------------------------------------------------------
# Pure-JAX f32 reference (same semantics as the PyTorch module in eval mode)
# ---------------------------------------------------------------------------
def ref_basic_block(x_nchw, params, eps=1e-5):
    x = jnp.transpose(x_nchw, (0, 2, 3, 1)).astype(jnp.float32)
    dn = ("NHWC", "HWIO", "NHWC")

    def conv(v, w):
        return jax.lax.conv_general_dilated(v, w, (1, 1), ((1, 1), (1, 1)),
                                            dimension_numbers=dn)

    def bn(v, g, b, m, var):
        return (v - m) / jnp.sqrt(var + eps) * g + b

    out = jax.nn.relu(bn(conv(x, params["w1"]),
                         params["g1"], params["b1"], params["m1"], params["v1"]))
    out = bn(conv(out, params["w2"]),
             params["g2"], params["b2"], params["m2"], params["v2"]) + x
    out = jax.nn.relu(out)
    return jnp.transpose(out, (0, 3, 1, 2))


# ---------------------------------------------------------------------------
# Main
# ---------------------------------------------------------------------------
if __name__ == "__main__":
    inplanes, planes = 4, 4           # stride=1, downsample=None
    N, H, W = 2, 16, 16

    key = jax.random.PRNGKey(0)
    keys = jax.random.split(key, 11)

    params = {
        # conv weights in HWIO layout: (3, 3, Cin, Cout)
        "w1": jax.random.normal(keys[0], (3, 3, inplanes, planes), jnp.float32) * 0.1,
        "w2": jax.random.normal(keys[1], (3, 3, planes, planes), jnp.float32) * 0.1,
        # BatchNorm2d params (eval mode: running stats)
        "g1": 1.0 + 0.1 * jax.random.normal(keys[2], (planes,), jnp.float32),
        "b1": 0.1 * jax.random.normal(keys[3], (planes,), jnp.float32),
        "m1": 0.1 * jax.random.normal(keys[4], (planes,), jnp.float32),
        "v1": 0.5 + jax.random.uniform(keys[5], (planes,), jnp.float32),
        "g2": 1.0 + 0.1 * jax.random.normal(keys[6], (planes,), jnp.float32),
        "b2": 0.1 * jax.random.normal(keys[7], (planes,), jnp.float32),
        "m2": 0.1 * jax.random.normal(keys[8], (planes,), jnp.float32),
        "v2": 0.5 + jax.random.uniform(keys[9], (planes,), jnp.float32),
    }

    x = jax.random.normal(keys[10], (N, inplanes, H, W), jnp.float32)   # NCHW input

    out = jax.block_until_ready(basic_block_forward(x, params))
    ref = jax.block_until_ready(ref_basic_block(x, params))

    assert out.shape == (N, planes, H, W), out.shape
    # Tolerance reflects bf16 MXU operands (accumulation / bias / residual /
    # relu stay f32); reference is pure f32.
    np.testing.assert_allclose(np.asarray(out), np.asarray(ref), rtol=3e-2, atol=3e-2)
    print("KERNEL_OK")
</pallas_src>

<mosaic_0001>
module attributes {stable_mosaic.version = 11 : i64} {
  func.func @basic_block_kernel(%arg0: i32, %arg1: memref<1x16x16x128xf32, #tpu.memory_space<vmem>>, %arg2: memref<9x128x128xbf16, #tpu.memory_space<vmem>>, %arg3: memref<1x128xf32, #tpu.memory_space<vmem>>, %arg4: memref<9x128x128xbf16, #tpu.memory_space<vmem>>, %arg5: memref<1x128xf32, #tpu.memory_space<vmem>>, %arg6: memref<1x16x16x128xf32, #tpu.memory_space<vmem>>, %arg7: memref<342x128xbf16, #tpu.memory_space<vmem>>, %arg8: memref<342x128xbf16, #tpu.memory_space<vmem>>) attributes {dimension_semantics = [#tpu.dimension_semantics<parallel>], iteration_bounds = array<i64: 2>, scalar_prefetch = 0 : i64, scratch_operands = 2 : i64, tpu.core_type = #tpu.core_type<tc>, window_params = [{transform_indices = @transform_0, window_bounds = array<i64: 1, 16, 16, 128>}, {pipeline_mode = #tpu.pipeline_mode<synchronous>, transform_indices = @transform_1, window_bounds = array<i64: 9, 128, 128>}, {pipeline_mode = #tpu.pipeline_mode<synchronous>, transform_indices = @transform_2, window_bounds = array<i64: 1, 128>}, {pipeline_mode = #tpu.pipeline_mode<synchronous>, transform_indices = @transform_3, window_bounds = array<i64: 9, 128, 128>}, {pipeline_mode = #tpu.pipeline_mode<synchronous>, transform_indices = @transform_4, window_bounds = array<i64: 1, 128>}, {transform_indices = @transform_5, window_bounds = array<i64: 1, 16, 16, 128>}]} {
    %c0 = arith.constant 0 : index
    %c0_0 = arith.constant 0 : index
    %c0_1 = arith.constant 0 : index
    %c0_2 = arith.constant 0 : index
    %0 = vector.load %arg1[%c0, %c0_0, %c0_1, %c0_2] : memref<1x16x16x128xf32, #tpu.memory_space<vmem>>, vector<1x16x16x128xf32>
    %1 = vector.shape_cast %0 : vector<1x16x16x128xf32> to vector<16x16x128xf32>
    %cst = arith.constant 0.000000e+00 : bf16
    %2 = vector.broadcast %cst : bf16 to vector<18x128xbf16>
    %c0_3 = arith.constant 0 : index
    %c0_4 = arith.constant 0 : index
    %3 = vector.load %arg7[%c0_3, %c0_4] : memref<342x128xbf16, #tpu.memory_space<vmem>>, vector<18x128xbf16>
    tpu.vector_store %arg7[%c0_3, %c0_4], %2 {strides = array<i32>} : memref<342x128xbf16, #tpu.memory_space<vmem>>, vector<18x128xbf16>,
    %cst_5 = arith.constant 0.000000e+00 : bf16
    %4 = vector.broadcast %cst_5 : bf16 to vector<36x128xbf16>
    %c306 = arith.constant 306 : index
    %c0_6 = arith.constant 0 : index
    %5 = vector.load %arg7[%c306, %c0_6] : memref<342x128xbf16, #tpu.memory_space<vmem>>, vector<36x128xbf16>
    tpu.vector_store %arg7[%c306, %c0_6], %4 {strides = array<i32>} : memref<342x128xbf16, #tpu.memory_space<vmem>>, vector<36x128xbf16>,
    %cst_7 = arith.constant 0.000000e+00 : bf16
    %6 = vector.broadcast %cst_7 : bf16 to vector<18x128xbf16>
    %c0_8 = arith.constant 0 : index
    %c0_9 = arith.constant 0 : index
    %7 = vector.load %arg8[%c0_8, %c0_9] : memref<342x128xbf16, #tpu.memory_space<vmem>>, vector<18x128xbf16>
    tpu.vector_store %arg8[%c0_8, %c0_9], %6 {strides = array<i32>} : memref<342x128xbf16, #tpu.memory_space<vmem>>, vector<18x128xbf16>,
    %cst_10 = arith.constant 0.000000e+00 : bf16
    %8 = vector.broadcast %cst_10 : bf16 to vector<36x128xbf16>
    %c306_11 = arith.constant 306 : index
    %c0_12 = arith.constant 0 : index
    %9 = vector.load %arg8[%c306_11, %c0_12] : memref<342x128xbf16, #tpu.memory_space<vmem>>, vector<36x128xbf16>
    tpu.vector_store %arg8[%c306_11, %c0_12], %8 {strides = array<i32>} : memref<342x128xbf16, #tpu.memory_space<vmem>>, vector<36x128xbf16>,
    %cst_13 = arith.constant 0.000000e+00 : bf16
    %10 = vector.broadcast %cst_13 : bf16 to vector<16x1x128xbf16>
    %11 = arith.truncf %1 : vector<16x16x128xf32> to vector<16x16x128xbf16>
    %12 = tpu.concatenate %10, %11, %10 in 1 : vector<16x1x128xbf16>, vector<16x16x128xbf16>, vector<16x1x128xbf16> -> vector<16x18x128xbf16>
    %13 = vector.shape_cast %12 : vector<16x18x128xbf16> to vector<288x128xbf16>
    %c18 = arith.constant 18 : index
    %c0_14 = arith.constant 0 : index
    %14 = vector.load %arg7[%c18, %c0_14] : memref<342x128xbf16, #tpu.memory_space<vmem>>, vector<288x128xbf16>
    tpu.vector_store %arg7[%c18, %c0_14], %13 {strides = array<i32>} : memref<342x128xbf16, #tpu.memory_space<vmem>>, vector<288x128xbf16>,
    %cst_15 = arith.constant 0.000000e+00 : f32
    %15 = vector.broadcast %cst_15 : f32 to vector<288x128xf32>
    %c0_16 = arith.constant 0 : index
    %c0_17 = arith.constant 0 : index
    %16 = vector.load %arg7[%c0_16, %c0_17] : memref<342x128xbf16, #tpu.memory_space<vmem>>, vector<288x128xbf16>
    %c0_18 = arith.constant 0 : index
    %c0_19 = arith.constant 0 : index
    %c0_20 = arith.constant 0 : index
    %17 = vector.load %arg2[%c0_18, %c0_19, %c0_20] : memref<9x128x128xbf16, #tpu.memory_space<vmem>>, vector<1x128x128xbf16>
    %18 = vector.shape_cast %17 : vector<1x128x128xbf16> to vector<128x128xbf16>
    %cst_21 = arith.constant dense<0.000000e+00> : vector<288x128xf32>
    %19 = tpu.matmul %16, %18, %cst_21 {dimension_numbers = #tpu.dot_dimension_numbers<[1], [0], [0], [1], [0, 0, 1, 1], [], []>} : vector<288x128xbf16>, vector<128x128xbf16>, vector<288x128xf32> -> vector<288x128xf32>
    %20 = arith.addf %15, %19 : vector<288x128xf32>
    %c1 = arith.constant 1 : index
    %c0_22 = arith.constant 0 : index
    %21 = vector.load %arg7[%c1, %c0_22] : memref<342x128xbf16, #tpu.memory_space<vmem>>, vector<288x128xbf16>
    %c1_23 = arith.constant 1 : index
    %c0_24 = arith.constant 0 : index
    %c0_25 = arith.constant 0 : index
    %22 = vector.load %arg2[%c1_23, %c0_24, %c0_25] : memref<9x128x128xbf16, #tpu.memory_space<vmem>>, vector<1x128x128xbf16>
    %23 = vector.shape_cast %22 : vector<1x128x128xbf16> to vector<128x128xbf16>
    %cst_26 = arith.constant dense<0.000000e+00> : vector<288x128xf32>
    %24 = tpu.matmul %21, %23, %cst_26 {dimension_numbers = #tpu.dot_dimension_numbers<[1], [0], [0], [1], [0, 0, 1, 1], [], []>} : vector<288x128xbf16>, vector<128x128xbf16>, vector<288x128xf32> -> vector<288x128xf32>
    %25 = arith.addf %20, %24 : vector<288x128xf32>
    %c2 = arith.constant 2 : index
    %c0_27 = arith.constant 0 : index
    %26 = vector.load %arg7[%c2, %c0_27] : memref<342x128xbf16, #tpu.memory_space<vmem>>, vector<288x128xbf16>
    %c2_28 = arith.constant 2 : index
    %c0_29 = arith.constant 0 : index
    %c0_30 = arith.constant 0 : index
    %27 = vector.load %arg2[%c2_28, %c0_29, %c0_30] : memref<9x128x128xbf16, #tpu.memory_space<vmem>>, vector<1x128x128xbf16>
    %28 = vector.shape_cast %27 : vector<1x128x128xbf16> to vector<128x128xbf16>
    %cst_31 = arith.constant dense<0.000000e+00> : vector<288x128xf32>
    %29 = tpu.matmul %26, %28, %cst_31 {dimension_numbers = #tpu.dot_dimension_numbers<[1], [0], [0], [1], [0, 0, 1, 1], [], []>} : vector<288x128xbf16>, vector<128x128xbf16>, vector<288x128xf32> -> vector<288x128xf32>
    %30 = arith.addf %25, %29 : vector<288x128xf32>
    %c18_32 = arith.constant 18 : index
    %c0_33 = arith.constant 0 : index
    %31 = vector.load %arg7[%c18_32, %c0_33] : memref<342x128xbf16, #tpu.memory_space<vmem>>, vector<288x128xbf16>
    %c3 = arith.constant 3 : index
    %c0_34 = arith.constant 0 : index
    %c0_35 = arith.constant 0 : index
    %32 = vector.load %arg2[%c3, %c0_34, %c0_35] : memref<9x128x128xbf16, #tpu.memory_space<vmem>>, vector<1x128x128xbf16>
    %33 = vector.shape_cast %32 : vector<1x128x128xbf16> to vector<128x128xbf16>
    %cst_36 = arith.constant dense<0.000000e+00> : vector<288x128xf32>
    %34 = tpu.matmul %31, %33, %cst_36 {dimension_numbers = #tpu.dot_dimension_numbers<[1], [0], [0], [1], [0, 0, 1, 1], [], []>} : vector<288x128xbf16>, vector<128x128xbf16>, vector<288x128xf32> -> vector<288x128xf32>
    %35 = arith.addf %30, %34 : vector<288x128xf32>
    %c19 = arith.constant 19 : index
    %c0_37 = arith.constant 0 : index
    %36 = vector.load %arg7[%c19, %c0_37] : memref<342x128xbf16, #tpu.memory_space<vmem>>, vector<288x128xbf16>
    %c4 = arith.constant 4 : index
    %c0_38 = arith.constant 0 : index
    %c0_39 = arith.constant 0 : index
    %37 = vector.load %arg2[%c4, %c0_38, %c0_39] : memref<9x128x128xbf16, #tpu.memory_space<vmem>>, vector<1x128x128xbf16>
    %38 = vector.shape_cast %37 : vector<1x128x128xbf16> to vector<128x128xbf16>
    %cst_40 = arith.constant dense<0.000000e+00> : vector<288x128xf32>
    %39 = tpu.matmul %36, %38, %cst_40 {dimension_numbers = #tpu.dot_dimension_numbers<[1], [0], [0], [1], [0, 0, 1, 1], [], []>} : vector<288x128xbf16>, vector<128x128xbf16>, vector<288x128xf32> -> vector<288x128xf32>
    %40 = arith.addf %35, %39 : vector<288x128xf32>
    %c20 = arith.constant 20 : index
    %c0_41 = arith.constant 0 : index
    %41 = vector.load %arg7[%c20, %c0_41] : memref<342x128xbf16, #tpu.memory_space<vmem>>, vector<288x128xbf16>
    %c5 = arith.constant 5 : index
    %c0_42 = arith.constant 0 : index
    %c0_43 = arith.constant 0 : index
    %42 = vector.load %arg2[%c5, %c0_42, %c0_43] : memref<9x128x128xbf16, #tpu.memory_space<vmem>>, vector<1x128x128xbf16>
    %43 = vector.shape_cast %42 : vector<1x128x128xbf16> to vector<128x128xbf16>
    %cst_44 = arith.constant dense<0.000000e+00> : vector<288x128xf32>
    %44 = tpu.matmul %41, %43, %cst_44 {dimension_numbers = #tpu.dot_dimension_numbers<[1], [0], [0], [1], [0, 0, 1, 1], [], []>} : vector<288x128xbf16>, vector<128x128xbf16>, vector<288x128xf32> -> vector<288x128xf32>
    %45 = arith.addf %40, %44 : vector<288x128xf32>
    %c36 = arith.constant 36 : index
    %c0_45 = arith.constant 0 : index
    %46 = vector.load %arg7[%c36, %c0_45] : memref<342x128xbf16, #tpu.memory_space<vmem>>, vector<288x128xbf16>
    %c6 = arith.constant 6 : index
    %c0_46 = arith.constant 0 : index
    %c0_47 = arith.constant 0 : index
    %47 = vector.load %arg2[%c6, %c0_46, %c0_47] : memref<9x128x128xbf16, #tpu.memory_space<vmem>>, vector<1x128x128xbf16>
    %48 = vector.shape_cast %47 : vector<1x128x128xbf16> to vector<128x128xbf16>
    %cst_48 = arith.constant dense<0.000000e+00> : vector<288x128xf32>
    %49 = tpu.matmul %46, %48, %cst_48 {dimension_numbers = #tpu.dot_dimension_numbers<[1], [0], [0], [1], [0, 0, 1, 1], [], []>} : vector<288x128xbf16>, vector<128x128xbf16>, vector<288x128xf32> -> vector<288x128xf32>
    %50 = arith.addf %45, %49 : vector<288x128xf32>
    %c37 = arith.constant 37 : index
    %c0_49 = arith.constant 0 : index
    %51 = vector.load %arg7[%c37, %c0_49] : memref<342x128xbf16, #tpu.memory_space<vmem>>, vector<288x128xbf16>
    %c7 = arith.constant 7 : index
    %c0_50 = arith.constant 0 : index
    %c0_51 = arith.constant 0 : index
    %52 = vector.load %arg2[%c7, %c0_50, %c0_51] : memref<9x128x128xbf16, #tpu.memory_space<vmem>>, vector<1x128x128xbf16>
    %53 = vector.shape_cast %52 : vector<1x128x128xbf16> to vector<128x128xbf16>
    %cst_52 = arith.constant dense<0.000000e+00> : vector<288x128xf32>
    %54 = tpu.matmul %51, %53, %cst_52 {dimension_numbers = #tpu.dot_dimension_numbers<[1], [0], [0], [1], [0, 0, 1, 1], [], []>} : vector<288x128xbf16>, vector<128x128xbf16>, vector<288x128xf32> -> vector<288x128xf32>
    %55 = arith.addf %50, %54 : vector<288x128xf32>
    %c38 = arith.constant 38 : index
    %c0_53 = arith.constant 0 : index
    %56 = vector.load %arg7[%c38, %c0_53] : memref<342x128xbf16, #tpu.memory_space<vmem>>, vector<288x128xbf16>
    %c8 = arith.constant 8 : index
    %c0_54 = arith.constant 0 : index
    %c0_55 = arith.constant 0 : index
    %57 = vector.load %arg2[%c8, %c0_54, %c0_55] : memref<9x128x128xbf16, #tpu.memory_space<vmem>>, vector<1x128x128xbf16>
    %58 = vector.shape_cast %57 : vector<1x128x128xbf16> to vector<128x128xbf16>
    %cst_56 = arith.constant dense<0.000000e+00> : vector<288x128xf32>
    %59 = tpu.matmul %56, %58, %cst_56 {dimension_numbers = #tpu.dot_dimension_numbers<[1], [0], [0], [1], [0, 0, 1, 1], [], []>} : vector<288x128xbf16>, vector<128x128xbf16>, vector<288x128xf32> -> vector<288x128xf32>
    %60 = arith.addf %55, %59 : vector<288x128xf32>
    %61 = vector.shape_cast %60 : vector<288x128xf32> to vector<16x18x128xf32>
    %62 = vector.extract_strided_slice %61 {offsets = [0, 0, 0], sizes = [16, 16, 128], strides = [1, 1, 1]} : vector<16x18x128xf32> to vector<16x16x128xf32>
    %c0_57 = arith.constant 0 : index
    %c0_58 = arith.constant 0 : index
    %63 = vector.load %arg3[%c0_57, %c0_58] : memref<1x128xf32, #tpu.memory_space<vmem>>, vector<1x128xf32>
    %64 = vector.shape_cast %63 : vector<1x128xf32> to vector<128xf32>
    %65 = vector.shape_cast %64 : vector<128xf32> to vector<1x1x128xf32>
    %66 = vector.broadcast %65 : vector<1x1x128xf32> to vector<16x16x128xf32>
    %67 = arith.addf %62, %66 : vector<16x16x128xf32>
    %cst_59 = arith.constant 0.000000e+00 : f32
    %68 = vector.broadcast %cst_59 : f32 to vector<16x16x128xf32>
    %69 = arith.maximumf %67, %68 : vector<16x16x128xf32>
    %70 = arith.truncf %69 : vector<16x16x128xf32> to vector<16x16x128xbf16>
    %71 = tpu.concatenate %10, %70, %10 in 1 : vector<16x1x128xbf16>, vector<16x16x128xbf16>, vector<16x1x128xbf16> -> vector<16x18x128xbf16>
    %72 = vector.shape_cast %71 : vector<16x18x128xbf16> to vector<288x128xbf16>
    %c18_60 = arith.constant 18 : index
    %c0_61 = arith.constant 0 : index
    %73 = vector.load %arg8[%c18_60, %c0_61] : memref<342x128xbf16, #tpu.memory_space<vmem>>, vector<288x128xbf16>
    tpu.vector_store %arg8[%c18_60, %c0_61], %72 {strides = array<i32>} : memref<342x128xbf16, #tpu.memory_space<vmem>>, vector<288x128xbf16>,
    %cst_62 = arith.constant 0.000000e+00 : f32
    %74 = vector.broadcast %cst_62 : f32 to vector<288x128xf32>
    %c0_63 = arith.constant 0 : index
    %c0_64 = arith.constant 0 : index
    %75 = vector.load %arg8[%c0_63, %c0_64] : memref<342x128xbf16, #tpu.memory_space<vmem>>, vector<288x128xbf16>
    %c0_65 = arith.constant 0 : index
    %c0_66 = arith.constant 0 : index
    %c0_67 = arith.constant 0 : index
    %76 = vector.load %arg4[%c0_65, %c0_66, %c0_67] : memref<9x128x128xbf16, #tpu.memory_space<vmem>>, vector<1x128x128xbf16>
    %77 = vector.shape_cast %76 : vector<1x128x128xbf16> to vector<128x128xbf16>
    %cst_68 = arith.constant dense<0.000000e+00> : vector<288x128xf32>
    %78 = tpu.matmul %75, %77, %cst_68 {dimension_numbers = #tpu.dot_dimension_numbers<[1], [0], [0], [1], [0, 0, 1, 1], [], []>} : vector<288x128xbf16>, vector<128x128xbf16>, vector<288x128xf32> -> vector<288x128xf32>
    %79 = arith.addf %74, %78 : vector<288x128xf32>
    %c1_69 = arith.constant 1 : index
    %c0_70 = arith.constant 0 : index
    %80 = vector.load %arg8[%c1_69, %c0_70] : memref<342x128xbf16, #tpu.memory_space<vmem>>, vector<288x128xbf16>
    %c1_71 = arith.constant 1 : index
    %c0_72 = arith.constant 0 : index
    %c0_73 = arith.constant 0 : index
    %81 = vector.load %arg4[%c1_71, %c0_72, %c0_73] : memref<9x128x128xbf16, #tpu.memory_space<vmem>>, vector<1x128x128xbf16>
    %82 = vector.shape_cast %81 : vector<1x128x128xbf16> to vector<128x128xbf16>
    %cst_74 = arith.constant dense<0.000000e+00> : vector<288x128xf32>
    %83 = tpu.matmul %80, %82, %cst_74 {dimension_numbers = #tpu.dot_dimension_numbers<[1], [0], [0], [1], [0, 0, 1, 1], [], []>} : vector<288x128xbf16>, vector<128x128xbf16>, vector<288x128xf32> -> vector<288x128xf32>
    %84 = arith.addf %79, %83 : vector<288x128xf32>
    %c2_75 = arith.constant 2 : index
    %c0_76 = arith.constant 0 : index
    %85 = vector.load %arg8[%c2_75, %c0_76] : memref<342x128xbf16, #tpu.memory_space<vmem>>, vector<288x128xbf16>
    %c2_77 = arith.constant 2 : index
    %c0_78 = arith.constant 0 : index
    %c0_79 = arith.constant 0 : index
    %86 = vector.load %arg4[%c2_77, %c0_78, %c0_79] : memref<9x128x128xbf16, #tpu.memory_space<vmem>>, vector<1x128x128xbf16>
    %87 = vector.shape_cast %86 : vector<1x128x128xbf16> to vector<128x128xbf16>
    %cst_80 = arith.constant dense<0.000000e+00> : vector<288x128xf32>
    %88 = tpu.matmul %85, %87, %cst_80 {dimension_numbers = #tpu.dot_dimension_numbers<[1], [0], [0], [1], [0, 0, 1, 1], [], []>} : vector<288x128xbf16>, vector<128x128xbf16>, vector<288x128xf32> -> vector<288x128xf32>
    %89 = arith.addf %84, %88 : vector<288x128xf32>
    %c18_81 = arith.constant 18 : index
    %c0_82 = arith.constant 0 : index
    %90 = vector.load %arg8[%c18_81, %c0_82] : memref<342x128xbf16, #tpu.memory_space<vmem>>, vector<288x128xbf16>
    %c3_83 = arith.constant 3 : index
    %c0_84 = arith.constant 0 : index
    %c0_85 = arith.constant 0 : index
    %91 = vector.load %arg4[%c3_83, %c0_84, %c0_85] : memref<9x128x128xbf16, #tpu.memory_space<vmem>>, vector<1x128x128xbf16>
    %92 = vector.shape_cast %91 : vector<1x128x128xbf16> to vector<128x128xbf16>
    %cst_86 = arith.constant dense<0.000000e+00> : vector<288x128xf32>
    %93 = tpu.matmul %90, %92, %cst_86 {dimension_numbers = #tpu.dot_dimension_numbers<[1], [0], [0], [1], [0, 0, 1, 1], [], []>} : vector<288x128xbf16>, vector<128x128xbf16>, vector<288x128xf32> -> vector<288x128xf32>
    %94 = arith.addf %89, %93 : vector<288x128xf32>
    %c19_87 = arith.constant 19 : index
    %c0_88 = arith.constant 0 : index
    %95 = vector.load %arg8[%c19_87, %c0_88] : memref<342x128xbf16, #tpu.memory_space<vmem>>, vector<288x128xbf16>
    %c4_89 = arith.constant 4 : index
    %c0_90 = arith.constant 0 : index
    %c0_91 = arith.constant 0 : index
    %96 = vector.load %arg4[%c4_89, %c0_90, %c0_91] : memref<9x128x128xbf16, #tpu.memory_space<vmem>>, vector<1x128x128xbf16>
    %97 = vector.shape_cast %96 : vector<1x128x128xbf16> to vector<128x128xbf16>
    %cst_92 = arith.constant dense<0.000000e+00> : vector<288x128xf32>
    %98 = tpu.matmul %95, %97, %cst_92 {dimension_numbers = #tpu.dot_dimension_numbers<[1], [0], [0], [1], [0, 0, 1, 1], [], []>} : vector<288x128xbf16>, vector<128x128xbf16>, vector<288x128xf32> -> vector<288x128xf32>
    %99 = arith.addf %94, %98 : vector<288x128xf32>
    %c20_93 = arith.constant 20 : index
    %c0_94 = arith.constant 0 : index
    %100 = vector.load %arg8[%c20_93, %c0_94] : memref<342x128xbf16, #tpu.memory_space<vmem>>, vector<288x128xbf16>
    %c5_95 = arith.constant 5 : index
    %c0_96 = arith.constant 0 : index
    %c0_97 = arith.constant 0 : index
    %101 = vector.load %arg4[%c5_95, %c0_96, %c0_97] : memref<9x128x128xbf16, #tpu.memory_space<vmem>>, vector<1x128x128xbf16>
    %102 = vector.shape_cast %101 : vector<1x128x128xbf16> to vector<128x128xbf16>
    %cst_98 = arith.constant dense<0.000000e+00> : vector<288x128xf32>
    %103 = tpu.matmul %100, %102, %cst_98 {dimension_numbers = #tpu.dot_dimension_numbers<[1], [0], [0], [1], [0, 0, 1, 1], [], []>} : vector<288x128xbf16>, vector<128x128xbf16>, vector<288x128xf32> -> vector<288x128xf32>
    %104 = arith.addf %99, %103 : vector<288x128xf32>
    %c36_99 = arith.constant 36 : index
    %c0_100 = arith.constant 0 : index
    %105 = vector.load %arg8[%c36_99, %c0_100] : memref<342x128xbf16, #tpu.memory_space<vmem>>, vector<288x128xbf16>
    %c6_101 = arith.constant 6 : index
    %c0_102 = arith.constant 0 : index
    %c0_103 = arith.constant 0 : index
    %106 = vector.load %arg4[%c6_101, %c0_102, %c0_103] : memref<9x128x128xbf16, #tpu.memory_space<vmem>>, vector<1x128x128xbf16>
    %107 = vector.shape_cast %106 : vector<1x128x128xbf16> to vector<128x128xbf16>
    %cst_104 = arith.constant dense<0.000000e+00> : vector<288x128xf32>
    %108 = tpu.matmul %105, %107, %cst_104 {dimension_numbers = #tpu.dot_dimension_numbers<[1], [0], [0], [1], [0, 0, 1, 1], [], []>} : vector<288x128xbf16>, vector<128x128xbf16>, vector<288x128xf32> -> vector<288x128xf32>
    %109 = arith.addf %104, %108 : vector<288x128xf32>
    %c37_105 = arith.constant 37 : index
    %c0_106 = arith.constant 0 : index
    %110 = vector.load %arg8[%c37_105, %c0_106] : memref<342x128xbf16, #tpu.memory_space<vmem>>, vector<288x128xbf16>
    %c7_107 = arith.constant 7 : index
    %c0_108 = arith.constant 0 : index
    %c0_109 = arith.constant 0 : index
    %111 = vector.load %arg4[%c7_107, %c0_108, %c0_109] : memref<9x128x128xbf16, #tpu.memory_space<vmem>>, vector<1x128x128xbf16>
    %112 = vector.shape_cast %111 : vector<1x128x128xbf16> to vector<128x128xbf16>
    %cst_110 = arith.constant dense<0.000000e+00> : vector<288x128xf32>
    %113 = tpu.matmul %110, %112, %cst_110 {dimension_numbers = #tpu.dot_dimension_numbers<[1], [0], [0], [1], [0, 0, 1, 1], [], []>} : vector<288x128xbf16>, vector<128x128xbf16>, vector<288x128xf32> -> vector<288x128xf32>
    %114 = arith.addf %109, %113 : vector<288x128xf32>
    %c38_111 = arith.constant 38 : index
    %c0_112 = arith.constant 0 : index
    %115 = vector.load %arg8[%c38_111, %c0_112] : memref<342x128xbf16, #tpu.memory_space<vmem>>, vector<288x128xbf16>
    %c8_113 = arith.constant 8 : index
    %c0_114 = arith.constant 0 : index
    %c0_115 = arith.constant 0 : index
    %116 = vector.load %arg4[%c8_113, %c0_114, %c0_115] : memref<9x128x128xbf16, #tpu.memory_space<vmem>>, vector<1x128x128xbf16>
    %117 = vector.shape_cast %116 : vector<1x128x128xbf16> to vector<128x128xbf16>
    %cst_116 = arith.constant dense<0.000000e+00> : vector<288x128xf32>
    %118 = tpu.matmul %115, %117, %cst_116 {dimension_numbers = #tpu.dot_dimension_numbers<[1], [0], [0], [1], [0, 0, 1, 1], [], []>} : vector<288x128xbf16>, vector<128x128xbf16>, vector<288x128xf32> -> vector<288x128xf32>
    %119 = arith.addf %114, %118 : vector<288x128xf32>
    %120 = vector.shape_cast %119 : vector<288x128xf32> to vector<16x18x128xf32>
    %121 = vector.extract_strided_slice %120 {offsets = [0, 0, 0], sizes = [16, 16, 128], strides = [1, 1, 1]} : vector<16x18x128xf32> to vector<16x16x128xf32>
    %c0_117 = arith.constant 0 : index
    %c0_118 = arith.constant 0 : index
    %122 = vector.load %arg5[%c0_117, %c0_118] : memref<1x128xf32, #tpu.memory_space<vmem>>, vector<1x128xf32>
    %123 = vector.shape_cast %122 : vector<1x128xf32> to vector<128xf32>
    %124 = vector.shape_cast %123 : vector<128xf32> to vector<1x1x128xf32>
    %125 = vector.broadcast %124 : vector<1x1x128xf32> to vector<16x16x128xf32>
    %126 = arith.addf %121, %125 : vector<16x16x128xf32>
    %127 = arith.addf %126, %1 : vector<16x16x128xf32>
    %cst_119 = arith.constant 0.000000e+00 : f32
    %128 = vector.broadcast %cst_119 : f32 to vector<16x16x128xf32>
    %129 = arith.maximumf %127, %128 : vector<16x16x128xf32>
    %c0_120 = arith.constant 0 : index
    %c0_121 = arith.constant 0 : index
    %c0_122 = arith.constant 0 : index
    %c0_123 = arith.constant 0 : index
    %130 = vector.load %arg6[%c0_120, %c0_121, %c0_122, %c0_123] : memref<1x16x16x128xf32, #tpu.memory_space<vmem>>, vector<1x16x16x128xf32>
    %131 = vector.shape_cast %130 : vector<1x16x16x128xf32> to vector<16x16x128xf32>
    %132 = vector.shape_cast %129 : vector<16x16x128xf32> to vector<1x16x16x128xf32>
    tpu.vector_store %arg6[%c0_120, %c0_121, %c0_122, %c0_123], %132 {strides = array<i32>} : memref<1x16x16x128xf32, #tpu.memory_space<vmem>>, vector<1x16x16x128xf32>,
    return
  }
  func.func @transform_0(%arg0: i32) -> (i32, i32, i32, i32) {
    %c0_i32 = arith.constant 0 : i32
    %c0_i32_0 = arith.constant 0 : i32
    %c0_i32_1 = arith.constant 0 : i32
    %c0_i32_2 = arith.constant 0 : i32
    return %arg0, %c0_i32, %c0_i32_0, %c0_i32_1 : i32, i32, i32, i32
  }
  func.func @transform_1(%arg0: i32) -> (i32, i32, i32) {
    %c0_i32 = arith.constant 0 : i32
    %c0_i32_0 = arith.constant 0 : i32
    %c0_i32_1 = arith.constant 0 : i32
    %c0_i32_2 = arith.constant 0 : i32
    return %c0_i32, %c0_i32_0, %c0_i32_1 : i32, i32, i32
  }
  func.func @transform_2(%arg0: i32) -> (i32, i32) {
    %c0_i32 = arith.constant 0 : i32
    %c0_i32_0 = arith.constant 0 : i32
    %c0_i32_1 = arith.constant 0 : i32
    return %c0_i32, %c0_i32_0 : i32, i32
  }
  func.func @transform_3(%arg0: i32) -> (i32, i32, i32) {
    %c0_i32 = arith.constant 0 : i32
    %c0_i32_0 = arith.constant 0 : i32
    %c0_i32_1 = arith.constant 0 : i32
    %c0_i32_2 = arith.constant 0 : i32
    return %c0_i32, %c0_i32_0, %c0_i32_1 : i32, i32, i32
  }
  func.func @transform_4(%arg0: i32) -> (i32, i32) {
    %c0_i32 = arith.constant 0 : i32
    %c0_i32_0 = arith.constant 0 : i32
    %c0_i32_1 = arith.constant 0 : i32
    return %c0_i32, %c0_i32_0 : i32, i32
  }
  func.func @transform_5(%arg0: i32) -> (i32, i32, i32, i32) {
    %c0_i32 = arith.constant 0 : i32
    %c0_i32_0 = arith.constant 0 : i32
    %c0_i32_1 = arith.constant 0 : i32
    %c0_i32_2 = arith.constant 0 : i32
    return %arg0, %c0_i32, %c0_i32_0, %c0_i32_1 : i32, i32, i32, i32
  }
}

</mosaic_0001>

<bundles_post_ra>
// kernel: tpu_custom_call.1
= control target key start
LH: loop header
LB: loop body
LE: loop exit
PB: predicated region body
PF: predicated region fallthrough
CT: control target
= control target key end

     0   :  { %10 = vsyncpa [#allocation5], 0  ;;  %s14966_s0 = inlined_call_operand.hbm [shape: f32[2,16,16,128], index: 0, kind: input, shape index: {}]   ;;  %s14967_s1 = inlined_call_operand.hbm [shape: bf16[9,128,128], index: 1, kind: input, shape index: {}]   ;;  %s14968_s2 = inlined_call_operand.vmem [shape: f32[1,128], index: 2, kind: input, shape index: {}]   ;;  %s14969_s3 = inlined_call_operand.hbm [shape: bf16[9,128,128], index: 3, kind: input, shape index: {}]   ;;  %s14970_s4 = inlined_call_operand.vmem [shape: f32[1,128], index: 4, kind: input, shape index: {}]   ;;  %s14971_s5 = inlined_call_operand.hbm [shape: f32[2,16,16,128], index: 5, kind: output, shape index: {}]  }
   0x1   :  { %12 = vsyncpa [#allocation5 + $0x1], 0 }
   0x2   :  { %13 = vsyncpa [#allocation8], 0 }
   0x3   :  { %14 = vsyncpa [#allocation6], 0 }
   0x4   :  { %16 = vsyncpa [#allocation6 + $0x1], 0  ;;  %s11675_s18 = smov 0   ;;  %s11677_s19 = smov 0  }
   0x5   :  { %s11679_s20 = smov 0   ;;  %s11681_s21 = smov 0  }
   0x6 LB: > { %s11696_s22 = sadd.s32 4294967295, %s11634_s21   ;;  %s10058_s23 = sadd.s32 4294967294, %s11634_s21   ;;  %s11634_s21 = sphi %s11681_s21, %s15174_s21   ;;  %s11630_s20 = sphi %s11679_s20, %s15173_s20   ;;  %s11626_s19 = sphi %s11677_s19, %s15172_s19   ;;  %s11622_s18 = sphi %s11675_s18, %s15171_s18  }
   0x7   : > { %p42_p0 = scmp.ne.s32.totalorder %s11626_s19, %s11622_s18  ;;  %p43_p1 = scmp.eq.s32.totalorder %s11696_s22, 0 }
   0x8   : > { %p150_p2 = scmp.eq.s32.totalorder %s11696_s22, 1  ;;  %p156_p3 = scmp.eq.s32.totalorder %s10058_s23, 1 }
   0x9   : > { %p11705_p4 = por %p43_p1, %p42_p0  ;;  %p10059_p5 = scmp.ge.s32.totalorder %s11634_s21, 1 }
   0xa   : > { %p11710_p6 = por %p156_p3, %p42_p0  ;;  %p163_p7 = scmp.lt.s32.totalorder %s11634_s21, 3 }
   0xb   : > { %s174_s28 = sshll.u32 %s14967_s1, 4  ;;  %s11636_s30 = smov [#allocation7]   ;;  %s175_s28 = int_to_ptr.hbm [resolvable:$true] %s174_s28 }
   0xc   : > { %p11718_p8 = pnand %p10059_p5, %p163_p7  ;;  %s176_s6 = sshll.u32 %s11636_s30, 4  ;;  %s177_s6 = int_to_ptr.vmem [resolvable:$true] %s176_s6 }
   0xd   : > { %s191_s9 = sshll.u32 %s14969_s3, 4  ;;  %s11637_s10 = smov 64   ;;  %s192_s9 = int_to_ptr.hbm [resolvable:$true] %s191_s9 }
   0xe   : > { %p11350_p9 = pneg %p11718_p8  ;;  %s11638_s11 = smov 4  }
   0xf   : > { %s11639_s12 = smov [#allocation9]   ;;  %s11731_s14 = sadd.s32 1, %s11634_s21  }
  0x10   : > { %p11351_p10 = pnand %p11350_p9, %p43_p1  ;;  %s193_s13 = sshll.u32 %s11639_s12, 4  ;;  %s194_s13 = int_to_ptr.vmem [resolvable:$true] %s193_s13 }
  0x11   : > { %s29_s15 = sadd.s32 1, %s11630_s20  ;;  %s26_s16 = ssub.s32 %s11634_s21, %s11731_s14 }
  0x12   : > { %11353 = dma.hbm_to_vmem [thread:$0]  (!%p11351_p10), %s175_s28, 9216, %s177_s6, [#allocation8], %s11637_s10, %s11637_s10, %s11638_s11  }
  0x13   : > { %11356 = dma.hbm_to_vmem [thread:$0]  (!%p11351_p10), %s192_s9, 9216, %s194_s13, [#allocation8], %s11637_s10, %s11637_s10, %s11638_s11  }
  0x14   : > { %p36_p12 = scmp.ne.s32.totalorder %s11630_s20, %s11626_s19  ;;  %p27_p13 = scmp.eq.s32.totalorder %s26_s16, 0 }
  0x15   : > { %p37_p0 = scmp.eq.s32.totalorder %s11634_s21, 0  ;;  %p11367_p5 = scmp.lt.s32.totalorder %s11634_s21, 2 }
  0x16   : > { %p11741_p3 = por %p150_p2, %p36_p12  ;;  %s210_s26 = sand.u32 1, %s11630_s20  }
  0x17   : > { %s11747_s23 = scalar_select %p27_p13, %s11630_s20, %s29_s15  }
  0x18   : > { %p38_p7 = por %p37_p0, %p36_p12  ;;  %s10063_s27 = sshll.u32 %s210_s26, 8 }
  0x19   : > { %s11060_s28 = sshll.u32 %s11634_s21, 8  ;;  %s214_s8 = scalar_lea.vmem [#allocation4], %s10063_s27 }
  0x1a   : > { %s219_s7 = scalar_lea.hbm %s14966_s0, %s11060_s28  ;;  %s222_s9 = sshll.u32 %s214_s8, 4  ;;  %s223_s9 = int_to_ptr.vmem [resolvable:$true] %s222_s9 }
  0x1b   : > { %s220_s10 = sshll.u32 %s219_s7, 4  ;;  %p11754_p2 = pnand %p11367_p5, %p38_p7  ;;  %s221_s10 = int_to_ptr.hbm [resolvable:$true] %s220_s10 }
  0x1c   : > { %s211_s12 = scalar_lea.sflag [#allocation5], %s210_s26  ;;  %s11534_s13 = sshra.s32 %s221_s10, 4  ;;  %s11535_s13 = int_to_ptr.hbm [resolvable:$true] %s11534_s13 }
  0x1d   : > { %s11536_s15 = scalar_lea.hbm %s11535_s13, 256  ;;  %p11538_p10 = pneg %p11754_p2 }
  0x1e   : > { %p11537_p9 = scmp.ne.s32.totalorder %s11535_s13, %s11536_s15  ;;  %s11541_s28 = scalar_lea.hbm %s14966_s0, 512 }
  0x1f   : > { %p11542_p0 = scmp.lt.s32.totalorder %s11535_s13, %s14966_s0  ;;  %p11543_p5 = scmp.lt.s32.totalorder %s11541_s28, %s11536_s15 }
  0x20   : > { %p11539_p12 = pnand %p11538_p10, %p11537_p9 }
  0x21   : > { %p11544_p7 = por %p11543_p5, %p11542_p0 }
  0x22   : > { %p11540_p13 = pneg %p11539_p12 }
  0x24   : > { %p11545_p11 = pnand %p11544_p7, %p11540_p13 }
  0x26   : > { %11548 = shalt.err (!%p11545_p11)
}
  0x27   : > { %s11640_s26 = smov 128   ;;  %s11641_s7 = smov 8  }
  0x28   : > { %11360 = dma.hbm_to_vmem [thread:$0]  (!%p11754_p2), %s221_s10, 4096, %s223_s9, %s211_s12, %s11640_s26, %s11640_s26, %s11641_s7  }
  0x29   : > { %234 = sbr.rel (%p11718_p8) target bundleno = 2103 (0x837), region = 40 }
  0x2e   : > { %s11771_s8 = sand.u32 1, %s11626_s19  }
  0x2f   : > { %s10067_s13 = sshll.u32 %s11771_s8, 8  ;;  %s237_s15 = scalar_lea.sflag [#allocation5], %s11771_s8 }
  0x30   : > { %s11777_s16 = scalar_lea.vmem [#allocation4], %s10067_s13 }
  0x31   : > { %11609 = dma.done.wait (%p11705_p4), %s237_s15, 4096  }
  0x32   : > { %11611 = vsyncadd (%p11705_p4), %s237_s15, 4294963200 }
  0x33   : > { %11613 = dma.done.wait (%p43_p1), [#allocation8], 18432  }
  0x34   : > { %11615 = vsyncadd (%p43_p1), [#allocation8], 4294948864  ;;  %v11085_v0 = vld [vmem:[#allocation7 + $0x38] sm:$0xff]  ;;  %v11084_v2 = vld [vmem:[#allocation7 + $0x30] sm:$0xff]  ;;  %vm583_vm0 = vcmask 1040384   ;;  %v15003_v32 = vmov 0 }
  0x35   : > { %v11093_v1 = vld [vmem:[#allocation7 + $0x78] sm:$0xff]  ;;  %11330 = vmatpush.bf16.msra.mxu3 %v11085_v0  ;;  %v11092_v3 = vld [vmem:[#allocation7 + $0x70] sm:$0xff]  ;;  %1695 = vmatpush.bf16.msra.mxu1 %v11085_v0  ;;  %v279_v4 = vld [vmem:[%s11777_s16] sm:$0xff]  ;;  %vm584_vm1 = vsmask.f32 256  ;;  %vm1815_vm4 = vcmask 1046528  }
  0x36   : > { %11322 = vmatpush.bf16.msra.mxu2 %v11093_v1  ;;  %1530 = vmatpush.bf16.msra.mxu0 %v11093_v1  ;;  %v280_v5 = vld [vmem:[%s11777_s16 + $0x8] sm:$0xff]  ;;  %v327_v8 = vpack.c.bf16 %v279_v4, %v279_v4  ;;  %v281_v10 = vld [vmem:[%s11777_s16 + $0x10] sm:$0xff]  ;;  %v282_v11 = vld [vmem:[%s11777_s16 + $0x18] sm:$0xff]  ;;  %vm1315_vm3 = vsmask.f32 7424  ;;  %vm2853_vm5 = vcmask 1045504  }
  0x37   : > { %v11083_v6 = vld [vmem:[#allocation7 + $0x28] sm:$0xff]  ;;  %v328_v9 = vpack.c.bf16 %v280_v5, %v280_v5  ;;  %v11082_v12 = vld [vmem:[#allocation7 + $0x20] sm:$0xff]  ;;  %v329_v16 = vpack.c.bf16 %v281_v10, %v281_v10  ;;  %v330_v17 = vpack.c.bf16 %v282_v11, %v282_v11  ;;  %v11081_v18 = vld [vmem:[#allocation7 + $0x18] sm:$0xff]  ;;  %vm2460_vm6 = vsmask.f32 6400  ;;  %s14479_s27 = scalar_lea.vmem [#allocation10], %s10067_s13 }
  0x38   : > { %v11091_v7 = vld [vmem:[#allocation7 + $0x68] sm:$0xff]  ;;  %v11090_v13 = vld [vmem:[#allocation7 + $0x60] sm:$0xff]  ;;  %v391_v14 = vunpack.c.l.b16 %v327_v8  ;;  %v11089_v19 = vld [vmem:[#allocation7 + $0x58] sm:$0xff]  ;;  %vm3498_vm7 = vsmask.f32 5376  ;;  %vm3891_vm8 = vcmask 1044480  }
  0x39   : > { %11331 = vmatpush.bf16.msra.mxu3 %v11084_v2  ;;  %1696 = vmatpush.bf16.msra.mxu1 %v11084_v2  ;;  %v392_v15 = vunpack.c.l.b16 %v328_v9  ;;  %v393_v21 = vunpack.c.l.b16 %v329_v16  ;;  %v394_v22 = vunpack.c.l.b16 %v330_v17  ;;  %v11080_v25 = vld [vmem:[#allocation7 + $0x10] sm:$0xff]  ;;  %v283_v29 = vld [vmem:[%s11777_s16 + $0x20] sm:$0xff]  ;;  %v284_v30 = vld [vmem:[%s11777_s16 + $0x28] sm:$0xff]  ;;  %s11307_s6 = sshll.u32 %s11696_s22, 8  ;;  %s9963_s15 = sshll.u32 %s14479_s27, 4  ;;  %s9964_s15 = int_to_ptr.vmem [resolvable:$true] %s9963_s15 }
  0x3a   : > { %11323 = vmatpush.bf16.msra.mxu2 %v11092_v3  ;;  %1531 = vmatpush.bf16.msra.mxu0 %v11092_v3  ;;  %v11088_v26 = vld [vmem:[#allocation7 + $0x50] sm:$0xff]  ;;  %vm11793_vm2 = vmand %vm583_vm0, %vm584_vm1  ;;  %v11079_v33 = vld [vmem:[#allocation7 + $0x8] sm:$0xff]  ;;  %v331_v35 = vpack.c.bf16 %v283_v29, %v283_v29  ;;  %v332_v36 = vpack.c.bf16 %v284_v30, %v284_v30  ;;  %s9962_s13 = scalar_lea.hbm %s14971_s5, %s11307_s6  ;;  %s9951_s22 = scalar_lea.sflag [#allocation6], %s11771_s8 }
  0x3b   : > { %v423_v20 = vpack.c.b16 %v392_v15, %v391_v14  ;;  %v424_v28 = vpack.c.b16 %v394_v22, %v393_v21  ;;  %v15004_v32 = vsel %vm11793_vm2, 4294967295, %v15003_v32  ;;  %v11087_v34 = vld [vmem:[#allocation7 + $0x48] sm:$0xff]  ;;  %v11078_v39 = vld [vmem:[#allocation7] sm:$0xff]  ;;  %v285_v49 = vld [vmem:[%s11777_s16 + $0x30] sm:$0xff]  ;;  %s11584_s11 = scalar_lea.hbm %s14971_s5, 512 }
  0x3c   : > { %15005 = vst [vmem:[#allocation14_spill] sm:$0xff] %v15004_v32  ;;  %v395_v40 = vunpack.c.l.b16 %v331_v35  ;;  %v396_v41 = vunpack.c.l.b16 %v332_v36  ;;  %v286_v53 = vld [vmem:[%s11777_s16 + $0x38] sm:$0xff]  ;;  %v333_v54 = vpack.c.bf16 %v285_v49, %v285_v49  ;;  %v288_v10 = vld [vmem:[%s11777_s16 + $0x48] sm:$0xff] }
  0x3d   : > { %11332 = vmatpush.bf16.msra.mxu3 %v11083_v6  ;;  %1697 = vmatpush.bf16.msra.mxu1 %v11083_v6  ;;  %v440_v23 = vshrl.u32 %v423_v20, 16  ;;  %v443_v24 = vshll.u32 %v423_v20, 16  ;;  %v447_v37 = vshrl.u32 %v424_v28, 16  ;;  %v450_v43 = vshll.u32 %v424_v28, 16  ;;  %v289_v28 = vld [vmem:[%s11777_s16 + $0x50] sm:$0xff] }
  0x3e   : > { %11324 = vmatpush.bf16.msra.mxu2 %v11091_v7  ;;  %1532 = vmatpush.bf16.msra.mxu0 %v11091_v7  ;;  %v425_v50 = vpack.c.b16 %v396_v41, %v395_v40  ;;  %v334_v55 = vpack.c.bf16 %v286_v53, %v286_v53  ;;  %v397_v60 = vunpack.c.l.b16 %v333_v54  ;;  %v287_v7 = vld [vmem:[%s11777_s16 + $0x40] sm:$0xff] }
  0x3f   : > { %v442_v27 = vrot.slane %v440_v23, 7  ;;  %v11799_v42 = vrot.slane %v447_v37, 7  ;;  %v335_v11 = vpack.c.bf16 %v287_v7, %v287_v7 }
  0x40   : > { %v454_v56 = vshrl.u32 %v425_v50, 16  ;;  %v398_v63 = vunpack.c.l.b16 %v334_v55  ;;  %v457_v1 = vshll.u32 %v425_v50, 16  ;;  %v291_v55 = vld [vmem:[%s11777_s16 + $0x60] sm:$0xff] }
  0x41   : > { %11333 = vmatpush.bf16.msra.mxu3 %v11082_v12  ;;  %1698 = vmatpush.bf16.msra.mxu1 %v11082_v12  ;;  %v445_v31 = vor.u32 %v443_v24, %v442_v27  ;;  %v452_v51 = vor.u32 %v450_v43, %v11799_v42  ;;  %v602_v59 = vsel %vm11793_vm2, %v442_v27, 0  ;;  %v603_v17 = vsel %vm11793_vm2, %v11799_v42, 0 }
  0x42   : > { %11325 = vmatpush.bf16.msra.mxu2 %v11090_v13  ;;  %1533 = vmatpush.bf16.msra.mxu0 %v11090_v13  ;;  %v11808_v0 = vrot.slane %v454_v56, 7  ;;  %v426_v8 = vpack.c.b16 %v398_v63, %v397_v60  ;;  %v336_v13 = vpack.c.bf16 %v288_v10, %v288_v10  ;;  %v292_v56 = vld [vmem:[%s11777_s16 + $0x68] sm:$0xff] }
  0x43   : > { %v586_v38 = vsel %vm11793_vm2, 0, %v445_v31  ;;  %v587_v57 = vsel %vm11793_vm2, 0, %v452_v51  ;;  %v290_v31 = vld [vmem:[%s11777_s16 + $0x58] sm:$0xff]  ;;  %v340_v63 = vpack.c.bf16 %v292_v56, %v292_v56 }
  0x44   : > { %748 = vst [vmem:[#allocation1 + $0x1] ss:$4 sm:$0xff] %v586_v38  ;;  %v634_v44 = vrot.slane %v586_v38, 1  ;;  %v635_v45 = vrot.slane %v586_v38, 2  ;;  %v636_v46 = vrot.slane %v586_v38, 3  ;;  %v637_v47 = vrot.slane %v586_v38, 4 }
  0x45   : > { %11334 = vmatpush.bf16.msra.mxu3 %v11081_v18  ;;  %1699 = vmatpush.bf16.msra.mxu1 %v11081_v18  ;;  %v638_v48 = vrot.slane %v586_v38, 5  ;;  %v639_v52 = vrot.slane %v586_v38, 6  ;;  %v640_v58 = vrot.slane %v586_v38, 7  ;;  %v641_v61 = vrot.slane %v587_v57, 1 }
  0x46   : > { %11326 = vmatpush.bf16.msra.mxu2 %v11089_v19  ;;  %1534 = vmatpush.bf16.msra.mxu0 %v11089_v19  ;;  %751 = vst [vmem:[#allocation1 + $0x2] ss:$4 sm:$0xff] %v634_v44  ;;  %v642_v2 = vrot.slane %v587_v57, 2  ;;  %v643_v3 = vrot.slane %v587_v57, 3  ;;  %v644_v4 = vrot.slane %v587_v57, 4  ;;  %v645_v5 = vrot.slane %v587_v57, 5 }
  0x47   : > { %754 = vst [vmem:[#allocation1 + $0x3] ss:$4 sm:$0xff] %v635_v45  ;;  %v459_v9 = vor.u32 %v457_v1, %v11808_v0  ;;  %v646_v12 = vrot.slane %v587_v57, 6  ;;  %v461_v14 = vshrl.u32 %v426_v8, 16  ;;  %v647_v16 = vrot.slane %v587_v57, 7 }
  0x48   : > { %757 = vst [vmem:[#allocation1 + $0x20] ss:$4 sm:$0xff] %v636_v46  ;;  %v399_v19 = vunpack.c.l.b16 %v335_v11  ;;  %v400_v21 = vunpack.c.l.b16 %v336_v13  ;;  %v464_v23 = vshll.u32 %v426_v8, 16  ;;  %v338_v36 = vpack.c.bf16 %v290_v31, %v290_v31  ;;  %v293_v11 = vld [vmem:[%s11777_s16 + $0x70] sm:$0xff] }
  0x49   : > { %11335 = vmatpush.bf16.msra.mxu3 %v11080_v25  ;;  %1700 = vmatpush.bf16.msra.mxu1 %v11080_v25  ;;  %760 = vst [vmem:[#allocation1 + $0x21] ss:$4 sm:$0xff] %v637_v47  ;;  %v588_v15 = vsel %vm11793_vm2, 0, %v459_v9  ;;  %v11818_v22 = vrot.slane %v461_v14, 7  ;;  %v604_v41 = vsel %vm11793_vm2, %v11808_v0, 0 }
  0x4a   : > { %11327 = vmatpush.bf16.msra.mxu2 %v11088_v26  ;;  %1535 = vmatpush.bf16.msra.mxu0 %v11088_v26  ;;  %763 = vst [vmem:[#allocation1 + $0x22] ss:$4 sm:$0xff] %v638_v48  ;;  %v648_v20 = vrot.slane %v588_v15, 1  ;;  %v649_v24 = vrot.slane %v588_v15, 2  ;;  %v650_v25 = vrot.slane %v588_v15, 3  ;;  %v651_v26 = vrot.slane %v588_v15, 4 }
  0x4b   : > { %766 = vst [vmem:[#allocation1 + $0x23] ss:$4 sm:$0xff] %v639_v52  ;;  %v427_v29 = vpack.c.b16 %v400_v21, %v399_v19  ;;  %v466_v30 = vor.u32 %v464_v23, %v11818_v22  ;;  %v653_v35 = vrot.slane %v588_v15, 6  ;;  %v402_v44 = vunpack.c.l.b16 %v338_v36 }
  0x4d   : > { %11336 = vmatpush.bf16.msra.mxu3 %v11079_v33  ;;  %1701 = vmatpush.bf16.msra.mxu1 %v11079_v33  ;;  %v652_v33 = vrot.slane %v588_v15, 5  ;;  %v468_v37 = vshrl.u32 %v427_v29, 16  ;;  %v589_v38 = vsel %vm11793_vm2, 0, %v466_v30  ;;  %v471_v46 = vshll.u32 %v427_v29, 16 }
  0x4e   : > { %11328 = vmatpush.bf16.msra.mxu2 %v11087_v34  ;;  %1536 = vmatpush.bf16.msra.mxu0 %v11087_v34  ;;  %v767_v62 = vld [vmem:[#allocation1] sm:$0xff]  ;;  %v337_v34 = vpack.c.bf16 %v289_v28, %v289_v28  ;;  %v655_v43 = vrot.slane %v589_v38, 1  ;;  %v656_v47 = vrot.slane %v589_v38, 2  ;;  %v657_v48 = vrot.slane %v589_v38, 3 }
  0x4f   : > { %770 = vst [vmem:[#allocation1] ss:$4 sm:$0xff] %v640_v58  ;;  %v11828_v45 = vrot.slane %v468_v37, 7  ;;  %v658_v52 = vrot.slane %v589_v38, 4  ;;  %v659_v53 = vrot.slane %v589_v38, 5  ;;  %v660_v54 = vrot.slane %v589_v38, 6 }
  0x50   : > { %772 = vst [vmem:[#allocation1 + $0x1] ss:$4 sm:$0xff] %v602_v59  ;;  %v401_v42 = vunpack.c.l.b16 %v337_v34  ;;  %v661_v59 = vrot.slane %v589_v38, 7 }
  0x51   : > { %11337 = vmatpush.bf16.msra.mxu3 %v11078_v39  ;;  %1702 = vmatpush.bf16.msra.mxu1 %v11078_v39  ;;  %774 = vst [vmem:[#allocation1 + $0x2] ss:$4 sm:$0xff] %v587_v57  ;;  %v654_v39 = vrot.slane %v588_v15, 7  ;;  %v473_v51 = vor.u32 %v471_v46, %v11828_v45  ;;  %v606_v19 = vsel %vm11793_vm2, %v11828_v45, 0 }
  0x52   : > { %v768_v6 = vld [vmem:[#allocation1 + $0x20] sm:$0xff]  ;;  %776 = vst [vmem:[#allocation1 + $0x3] ss:$4 sm:$0xff] %v641_v61  ;;  %v428_v50 = vpack.c.b16 %v402_v44, %v401_v42  ;;  %v605_v61 = vsel %vm11793_vm2, %v11818_v22, 0 }
  0x53   : > { %778 = vst [vmem:[#allocation1 + $0x20] ss:$4 sm:$0xff] %v642_v2  ;;  %v590_v58 = vsel %vm11793_vm2, 0, %v473_v51 }
  0x54   : > { %780 = vst [vmem:[#allocation1 + $0x21] ss:$4 sm:$0xff] %v643_v3  ;;  %v475_v57 = vshrl.u32 %v428_v50, 16  ;;  %v662_v0 = vrot.slane %v590_v58, 1  ;;  %v478_v2 = vshll.u32 %v428_v50, 16  ;;  %v663_v3 = vrot.slane %v590_v58, 2 }
  0x55   : > { %782 = vst [vmem:[#allocation1 + $0x22] ss:$4 sm:$0xff] %v644_v4  ;;  %v664_v8 = vrot.slane %v590_v58, 3  ;;  %v665_v9 = vrot.slane %v590_v58, 4  ;;  %v666_v10 = vrot.slane %v590_v58, 5  ;;  %v667_v13 = vrot.slane %v590_v58, 6 }
  0x56   : > { %784 = vst [vmem:[#allocation1 + $0x23] ss:$4 sm:$0xff] %v645_v5  ;;  %v11838_v1 = vrot.slane %v475_v57, 7 }
  0x57   : > { %1115 = vst [vmem:[#allocation2 + $0x8] sm:$0xe] %v767_v62  ;;  %v339_v62 = vpack.c.bf16 %v291_v55, %v291_v55 }
  0x58   : > { %1116 = vst [vmem:[#allocation2 + $0xc] sm:$0xf] %v768_v6  ;;  %v404_v6 = vunpack.c.l.b16 %v340_v63  ;;  %v480_v7 = vor.u32 %v478_v2, %v11838_v1 }
  0x59   : > { %v785_v18 = vld [vmem:[#allocation1] sm:$0xff]  ;;  %v403_v5 = vunpack.c.l.b16 %v339_v62 }
  0x5a   : > { %788 = vst [vmem:[#allocation1] ss:$4 sm:$0xff] %v646_v12 }
  0x5b   : > { %790 = vst [vmem:[#allocation1 + $0x1] ss:$4 sm:$0xff] %v647_v16  ;;  %v429_v12 = vpack.c.b16 %v404_v6, %v403_v5  ;;  %v591_v16 = vsel %vm11793_vm2, 0, %v480_v7  ;;  %v11642_v7 = vmov 0  }
  0x5c   : > { %792 = vst [vmem:[#allocation1 + $0x2] ss:$4 sm:$0xff] %v603_v17  ;;  %v668_v17 = vrot.slane %v590_v58, 7  ;;  %v669_v22 = vrot.slane %v591_v16, 1  ;;  %v670_v28 = vrot.slane %v591_v16, 2  ;;  %v671_v29 = vrot.slane %v591_v16, 3 }
  0x5d   : > { %v786_v27 = vld [vmem:[#allocation1 + $0x20] sm:$0xff]  ;;  %794 = vst [vmem:[#allocation1 + $0x3] ss:$4 sm:$0xff] %v588_v15  ;;  %v294_v15 = vld [vmem:[%s11777_s16 + $0x78] sm:$0xff]  ;;  %v482_v21 = vshrl.u32 %v429_v12, 16  ;;  %v672_v30 = vrot.slane %v591_v16, 4 }
  0x5e   : > { %796 = vst [vmem:[#allocation1 + $0x20] ss:$4 sm:$0xff] %v648_v20  ;;  %v342_v20 = vpack.c.bf16 %v294_v15, %v294_v15  ;;  %v673_v31 = vrot.slane %v591_v16, 5  ;;  %v674_v36 = vrot.slane %v591_v16, 6  ;;  %v675_v37 = vrot.slane %v591_v16, 7  ;;  %v298_v15 = vld [vmem:[%s11777_s16 + $0x98] sm:$0xff] }
  0x5f   : > { %798 = vst [vmem:[#allocation1 + $0x21] ss:$4 sm:$0xff] %v649_v24 }
  0x60   : > { %800 = vst [vmem:[#allocation1 + $0x22] ss:$4 sm:$0xff] %v650_v25  ;;  %v406_v25 = vunpack.c.l.b16 %v342_v20 }
  0x61   : > { %802 = vst [vmem:[#allocation1 + $0x23] ss:$4 sm:$0xff] %v651_v26  ;;  %v484_v26 = vrot.slane %v482_v21, 7 }
  0x62   : > { %1117 = vst [vmem:[#allocation2 + $0x10] sm:$0xf] %v785_v18  ;;  %v341_v18 = vpack.c.bf16 %v293_v11, %v293_v11 }
  0x63   : > { %1118 = vst [vmem:[#allocation2 + $0x14] sm:$0xf] %v786_v27  ;;  %v485_v27 = vshll.u32 %v429_v12, 16  ;;  %v608_v62 = vsel %vm11793_vm2, %v484_v26, 0 }
  0x64   : > { %v803_v40 = vld [vmem:[#allocation1] sm:$0xff]  ;;  %v405_v24 = vunpack.c.l.b16 %v341_v18  ;;  %311 = vst [vmem:[#allocation2] sm:$0xf] %v11642_v7  ;;  %v346_v18 = vpack.c.bf16 %v298_v15, %v298_v15 }
  0x65   : > { %806 = vst [vmem:[#allocation1] ss:$4 sm:$0xff] %v652_v33 }
  0x66   : > { %808 = vst [vmem:[#allocation1 + $0x1] ss:$4 sm:$0xff] %v653_v35  ;;  %v430_v34 = vpack.c.b16 %v406_v25, %v405_v24  ;;  %v487_v35 = vor.u32 %v485_v27, %v484_v26  ;;  %v11134_v24 = vld [vmem:[#allocation7 + $0x138] sm:$0xff]  ;;  %v410_v26 = vunpack.c.l.b16 %v346_v18 }
  0x67   : > { %810 = vst [vmem:[#allocation1 + $0x2] ss:$4 sm:$0xff] %v654_v39  ;;  %v296_v39 = vld [vmem:[%s11777_s16 + $0x88] sm:$0xff] }
  0x68   : > { %v804_v49 = vld [vmem:[#allocation1 + $0x20] sm:$0xff]  ;;  %812 = vst [vmem:[#allocation1 + $0x3] ss:$4 sm:$0xff] %v604_v41  ;;  %v489_v42 = vshrl.u32 %v430_v34, 16  ;;  %v344_v45 = vpack.c.bf16 %v296_v39, %v296_v39 }
  0x69   : > { %814 = vst [vmem:[#allocation1 + $0x20] ss:$4 sm:$0xff] %v589_v38  ;;  %v295_v38 = vld [vmem:[%s11777_s16 + $0x80] sm:$0xff] }
  0x6a   : > { %816 = vst [vmem:[#allocation1 + $0x21] ss:$4 sm:$0xff] %v655_v43  ;;  %v592_v43 = vsel %vm11793_vm2, 0, %v487_v35  ;;  %v343_v44 = vpack.c.bf16 %v295_v38, %v295_v38  ;;  %v300_v38 = vld [vmem:[%s11777_s16 + $0xa8] sm:$0xff] }
  0x6b   : > { %818 = vst [vmem:[#allocation1 + $0x22] ss:$4 sm:$0xff] %v656_v47  ;;  %v676_v46 = vrot.slane %v592_v43, 1  ;;  %v11855_v47 = vrot.slane %v489_v42, 7  ;;  %v678_v50 = vrot.slane %v592_v43, 3  ;;  %v680_v55 = vrot.slane %v592_v43, 5 }
  0x6c   : > { %820 = vst [vmem:[#allocation1 + $0x23] ss:$4 sm:$0xff] %v657_v48  ;;  %v492_v48 = vshll.u32 %v430_v34, 16  ;;  %v407_v51 = vunpack.c.l.b16 %v343_v44  ;;  %v681_v57 = vrot.slane %v592_v43, 6 }
  0x6d   : > { %1119 = vst [vmem:[#allocation2 + $0x18] sm:$0xf] %v803_v40  ;;  %v607_v40 = vsel %vm11793_vm2, %v11838_v1, 0 }
  0x6e   : > { %1120 = vst [vmem:[#allocation2 + $0x1c] sm:$0xf] %v804_v49  ;;  %v677_v49 = vrot.slane %v592_v43, 2  ;;  %v494_v56 = vor.u32 %v492_v48, %v11855_v47 }
  0x6f   : > { %v821_v60 = vld [vmem:[#allocation1] sm:$0xff]  ;;  %312 = vst [vmem:[#allocation2 + $0x4] sm:$0xf] %v11642_v7 }
  0x70   : > { %824 = vst [vmem:[#allocation1] ss:$4 sm:$0xff] %v658_v52  ;;  %v408_v52 = vunpack.c.l.b16 %v344_v45  ;;  %v593_v63 = vsel %vm11793_vm2, 0, %v494_v56  ;;  %v348_v45 = vpack.c.bf16 %v300_v38, %v300_v38 }
  0x71   : > { %826 = vst [vmem:[#allocation1 + $0x1] ss:$4 sm:$0xff] %v659_v53  ;;  %v679_v53 = vrot.slane %v592_v43, 4  ;;  %v683_v1 = vrot.slane %v593_v63, 1  ;;  %v684_v2 = vrot.slane %v593_v63, 2  ;;  %v689_v11 = vrot.slane %v593_v63, 7 }
  0x72   : > { %828 = vst [vmem:[#allocation1 + $0x2] ss:$4 sm:$0xff] %v660_v54 }
  0x73   : > { %v822_v4 = vld [vmem:[#allocation1 + $0x20] sm:$0xff]  ;;  %830 = vst [vmem:[#allocation1 + $0x3] ss:$4 sm:$0xff] %v661_v59  ;;  %v431_v59 = vpack.c.b16 %v408_v52, %v407_v51  ;;  %v412_v51 = vunpack.c.l.b16 %v348_v45 }
  0x74   : > { %832 = vst [vmem:[#allocation1 + $0x20] ss:$4 sm:$0xff] %v605_v61  ;;  %v11086_v61 = vld [vmem:[#allocation7 + $0x40] sm:$0xff] }
  0x75   : > { %834 = vst [vmem:[#allocation1 + $0x21] ss:$4 sm:$0xff] %v590_v58  ;;  %v682_v58 = vrot.slane %v592_v43, 7  ;;  %11329 = vmatpush.bf16.msra.mxu2 %v11086_v61  ;;  %1537 = vmatpush.bf16.msra.mxu0 %v11086_v61  ;;  %v499_v6 = vshll.u32 %v431_v59, 16 }
  0x76   : > { %836 = vst [vmem:[#allocation1 + $0x22] ss:$4 sm:$0xff] %v662_v0  ;;  %v496_v0 = vshrl.u32 %v431_v59, 16  ;;  %v11309_v35 = vld [vmem:[#allocation2] sm:$0xff]  }
  0x77   : > { %838 = vst [vmem:[#allocation1 + $0x23] ss:$4 sm:$0xff] %v663_v3  ;;  %v685_v3 = vrot.slane %v593_v63, 3  ;;  %1703 = vmatmul.bf16.vlgmr.msra.gmra.mxu1 %v11309_v35 }
  0x78   : > { %1121 = vst [vmem:[#allocation2 + $0x20] sm:$0xf] %v821_v60  ;;  %v11862_v5 = vrot.slane %v496_v0, 7 }
  0x79   : > { %1122 = vst [vmem:[#allocation2 + $0x24] sm:$0xf] %v822_v4  ;;  %2697 = vmatpush.bf16.msrb.mxu0 %v11134_v24 }
  0x7a   : > { %v839_v14 = vld [vmem:[#allocation1] sm:$0xff]  ;;  %313 = vst [vmem:[#allocation2 + $0x8] sm:$0x1] %v11642_v7 }
  0x7b   : > { %842 = vst [vmem:[#allocation1] ss:$4 sm:$0xff] %v664_v8  ;;  %v686_v8 = vrot.slane %v593_v63, 4 }
  0x7c   : > { %844 = vst [vmem:[#allocation1 + $0x1] ss:$4 sm:$0xff] %v665_v9  ;;  %v687_v9 = vrot.slane %v593_v63, 5 }
  0x7d   : > { %846 = vst [vmem:[#allocation1 + $0x2] ss:$4 sm:$0xff] %v666_v10  ;;  %v688_v10 = vrot.slane %v593_v63, 6 }
  0x7e   : > { %v840_v23 = vld [vmem:[#allocation1 + $0x20] sm:$0xff]  ;;  %848 = vst [vmem:[#allocation1 + $0x3] ss:$4 sm:$0xff] %v667_v13  ;;  %v501_v13 = vor.u32 %v499_v6, %v11862_v5  ;;  %v610_v6 = vsel %vm11793_vm2, %v11862_v5, 0 }
  0x7f   : > { %850 = vst [vmem:[#allocation1 + $0x20] ss:$4 sm:$0xff] %v668_v17 }
  0x80   : > { %852 = vst [vmem:[#allocation1 + $0x21] ss:$4 sm:$0xff] %v606_v19  ;;  %v609_v19 = vsel %vm11793_vm2, %v11855_v47, 0 }
  0x81   : > { %854 = vst [vmem:[#allocation1 + $0x22] ss:$4 sm:$0xff] %v591_v16  ;;  %v11870_v16 = vsel %vm11793_vm2, 0, %v501_v13  ;;  %v11890_v52 = vld [vmem:[#allocation2 + $0x8] sm:$0xff] }
  0x82   : > { %856 = vst [vmem:[#allocation1 + $0x23] ss:$4 sm:$0xff] %v669_v22  ;;  %v690_v21 = vrot.slane %v11870_v16, 1  ;;  %v11101_v22 = vld [vmem:[#allocation7 + $0xb8] sm:$0xff]  ;;  %v691_v27 = vrot.slane %v11870_v16, 2  ;;  %v695_v34 = vrot.slane %v11870_v16, 6 }
  0x83   : > { %1123 = vst [vmem:[#allocation2 + $0x28] sm:$0xf] %v839_v14  ;;  %v297_v14 = vld [vmem:[%s11777_s16 + $0x90] sm:$0xff]  ;;  %1919 = vmatpush.bf16.msrb.mxu2 %v11101_v22  ;;  %v696_v59 = vrot.slane %v11870_v16, 7 }
  0x84   : > { %1124 = vst [vmem:[#allocation2 + $0x2c] sm:$0xf] %v840_v23  ;;  %v345_v17 = vpack.c.bf16 %v297_v14, %v297_v14  ;;  %v11126_v23 = vld [vmem:[#allocation7 + $0xf8] sm:$0xff] }
  0x85   : > { %v857_v33 = vld [vmem:[#allocation1] sm:$0xff]  ;;  %2304 = vmatpush.bf16.msrb.mxu3 %v11126_v23  ;;  %314 = vst [vmem:[#allocation2 + $0x98] sm:$0xe] %v11642_v7 }
  0x86   : > { %860 = vst [vmem:[#allocation1] ss:$4 sm:$0xff] %v670_v28  ;;  %v409_v25 = vunpack.c.l.b16 %v345_v17  ;;  %v692_v28 = vrot.slane %v11870_v16, 3 }
  0x87   : > { %862 = vst [vmem:[#allocation1 + $0x1] ss:$4 sm:$0xff] %v671_v29  ;;  %1708 = vmatmul.bf16.gmra.mxu1 %v11890_v52 }
  0x88   : > { %864 = vst [vmem:[#allocation1 + $0x2] ss:$4 sm:$0xff] %v672_v30  ;;  %v693_v30 = vrot.slane %v11870_v16, 4 }
  0x89   : > { %v858_v41 = vld [vmem:[#allocation1 + $0x20] sm:$0xff]  ;;  %866 = vst [vmem:[#allocation1 + $0x3] ss:$4 sm:$0xff] %v673_v31  ;;  %v694_v31 = vrot.slane %v11870_v16, 5 }
  0x8a   : > { %868 = vst [vmem:[#allocation1 + $0x20] ss:$4 sm:$0xff] %v674_v36 }
  0x8b   : > { %870 = vst [vmem:[#allocation1 + $0x21] ss:$4 sm:$0xff] %v675_v37  ;;  %v299_v37 = vld [vmem:[%s11777_s16 + $0xa0] sm:$0xff] }
  0x8c   : > { %872 = vst [vmem:[#allocation1 + $0x22] ss:$4 sm:$0xff] %v607_v40  ;;  %v1319_v40 = vshll.u32 %v11309_v35, 16  ;;  %v347_v44 = vpack.c.bf16 %v299_v37, %v299_v37  ;;  %v304_v37 = vld [vmem:[%s11777_s16 + $0xc8] sm:$0xff] }
  0x8d   : > { %874 = vst [vmem:[#allocation1 + $0x23] ss:$4 sm:$0xff] %v592_v43 }
  0x8e   : > { %1125 = vst [vmem:[#allocation2 + $0x30] sm:$0xf] %v857_v33  ;;  %v432_v33 = vpack.c.b16 %v410_v26, %v409_v25  ;;  %v1321_v47 = vrot.slane %v1319_v40, 1  ;;  %v11099_v40 = vld [vmem:[#allocation7 + $0xa8] sm:$0xff] }
  0x8f   : > { %1126 = vst [vmem:[#allocation2 + $0x34] sm:$0xf] %v858_v41 }
  0x90   : > { %v875_v54 = vld [vmem:[#allocation1] sm:$0xff]  ;;  %v503_v36 = vshrl.u32 %v432_v33, 16  ;;  %v506_v43 = vshll.u32 %v432_v33, 16  ;;  %315 = vst [vmem:[#allocation2 + $0x9c] sm:$0xf] %v11642_v7 }
  0x91   : > { %878 = vst [vmem:[#allocation1] ss:$4 sm:$0xff] %v676_v46  ;;  %v1317_v46 = vshrl.u32 %v11309_v35, 16 }
  0x92   : > { %880 = vst [vmem:[#allocation1 + $0x1] ss:$4 sm:$0xff] %v677_v49  ;;  %v11886_v42 = vrot.slane %v503_v36, 7  ;;  %v303_v36 = vld [vmem:[%s11777_s16 + $0xc0] sm:$0xff] }
  0x93   : > { %882 = vst [vmem:[#allocation1 + $0x2] ss:$4 sm:$0xff] %v678_v50  ;;  %v411_v50 = vunpack.c.l.b16 %v347_v44 }
  0x94   : > { %v876_v60 = vld [vmem:[#allocation1 + $0x20] sm:$0xff]  ;;  %884 = vst [vmem:[#allocation1 + $0x3] ss:$4 sm:$0xff] %v679_v53  ;;  %v508_v49 = vor.u32 %v506_v43, %v11886_v42  ;;  %v611_v35 = vsel %vm11793_vm2, %v11886_v42, 0  ;;  %v11132_v43 = vld [vmem:[#allocation7 + $0x128] sm:$0xff] }
  0x95   : > { %886 = vst [vmem:[#allocation1 + $0x20] ss:$4 sm:$0xff] %v680_v55  ;;  %v1324_v55 = vshll.u32 %v11890_v52, 16 }
  0x96   : > { %888 = vst [vmem:[#allocation1 + $0x21] ss:$4 sm:$0xff] %v681_v57  ;;  %v11898_v56 = vsel %vm11793_vm2, 0, %v508_v49  ;;  %v433_v57 = vpack.c.b16 %v412_v51, %v411_v50 }
  0x97   : > { %890 = vst [vmem:[#allocation1 + $0x22] ss:$4 sm:$0xff] %v682_v58  ;;  %v1326_v58 = vrot.slane %v1324_v55, 1  ;;  %v699_v5 = vrot.slane %v11898_v56, 3 }
  0x98   : > { %892 = vst [vmem:[#allocation1 + $0x23] ss:$4 sm:$0xff] %v608_v62  ;;  %v301_v62 = vld [vmem:[%s11777_s16 + $0xb0] sm:$0xff]  ;;  %v513_v18 = vshll.u32 %v433_v57, 16 }
  0x99   : > { %1127 = vst [vmem:[#allocation2 + $0x38] sm:$0xf] %v875_v54  ;;  %v1322_v54 = vor.u32 %v1321_v47, %v1317_v46  ;;  %v349_v14 = vpack.c.bf16 %v301_v62, %v301_v62  ;;  %v351_v46 = vpack.c.bf16 %v303_v36, %v303_v36  ;;  %v352_v47 = vpack.c.bf16 %v304_v37, %v304_v37 }
  0x9a   : > { %1128 = vst [vmem:[#allocation2 + $0x3c] sm:$0xf] %v876_v60 }
  0x9b   : > { %v893_v4 = vld [vmem:[#allocation1] sm:$0xff]  ;;  %316 = vst [vmem:[#allocation2 + $0xa0] sm:$0xf] %v11642_v7  ;;  %v1327_v0 = vsel %vm1315_vm3, %v1322_v54, %v1326_v58  ;;  %v413_v23 = vunpack.c.l.b16 %v349_v14  ;;  %v416_v54 = vunpack.c.l.b16 %v352_v47 }
  0x9c   : > { %896 = vst [vmem:[#allocation1] ss:$4 sm:$0xff] %v593_v63  ;;  %v302_v63 = vld [vmem:[%s11777_s16 + $0xb8] sm:$0xff]  ;;  %1538 = vmatmul.bf16.vlgmr.msra.gmra.mxu0 %v1327_v0 }
  0x9d   : > { %898 = vst [vmem:[#allocation1 + $0x1] ss:$4 sm:$0xff] %v683_v1  ;;  %v11100_v1 = vld [vmem:[#allocation7 + $0xb0] sm:$0xff]  ;;  %v350_v15 = vpack.c.bf16 %v302_v63, %v302_v63 }
  0x9e   : > { %900 = vst [vmem:[#allocation1 + $0x2] ss:$4 sm:$0xff] %v684_v2  ;;  %v11125_v2 = vld [vmem:[#allocation7 + $0xf0] sm:$0xff]  ;;  %1920 = vmatpush.bf16.msrb.mxu2 %v11100_v1 }
  0x9f   : > { %v894_v12 = vld [vmem:[#allocation1 + $0x20] sm:$0xff]  ;;  %902 = vst [vmem:[#allocation1 + $0x3] ss:$4 sm:$0xff] %v685_v3  ;;  %v11133_v3 = vld [vmem:[#allocation7 + $0x130] sm:$0xff]  ;;  %2305 = vmatpush.bf16.msrb.mxu3 %v11125_v2  ;;  %v414_v24 = vunpack.c.l.b16 %v350_v15 }
  0xa0   : > { %904 = vst [vmem:[#allocation1 + $0x20] ss:$4 sm:$0xff] %v686_v8  ;;  %v510_v8 = vshrl.u32 %v433_v57, 16  ;;  %2698 = vmatpush.bf16.msrb.mxu0 %v11133_v3 }
  0xa1   : > { %906 = vst [vmem:[#allocation1 + $0x21] ss:$4 sm:$0xff] %v687_v9  ;;  %v697_v9 = vrot.slane %v11898_v56, 1 }
  0xa2   : > { %908 = vst [vmem:[#allocation1 + $0x22] ss:$4 sm:$0xff] %v688_v10  ;;  %v698_v10 = vrot.slane %v11898_v56, 2  ;;  %v11928_v17 = vrot.slane %v510_v8, 7  ;;  %1921 = vmatpush.bf16.msrb.mxu2 %v11099_v40 }
  0xa3   : > { %910 = vst [vmem:[#allocation1 + $0x23] ss:$4 sm:$0xff] %v689_v11  ;;  %v11919_v11 = vld [vmem:[#allocation2 + $0x10] sm:$0xff] }
  0xa4   : > { %1129 = vst [vmem:[#allocation2 + $0x40] sm:$0xf] %v893_v4  ;;  %v515_v25 = vor.u32 %v513_v18, %v11928_v17  ;;  %1713 = vmatmul.bf16.gmra.mxu1 %v11919_v11  ;;  %2699 = vmatpush.bf16.msrb.mxu0 %v11132_v43  ;;  %v1336_v55 = vshrl.u32 %v11919_v11, 16 }
  0xa5   : > { %1130 = vst [vmem:[#allocation2 + $0x44] sm:$0xf] %v894_v12 }
  0xa6   : > { %v911_v20 = vld [vmem:[#allocation1] sm:$0xff]  ;;  %319 = vst [vmem:[#allocation3] sm:$0xf] %v11642_v7  ;;  %v11941_v33 = vsel %vm11793_vm2, 0, %v515_v25  ;;  %v11985_v25 = vld [vmem:[#allocation2 + $0x20] sm:$0xff] }
  0xa7   : > { %1131 = vst [vmem:[#allocation2 + $0x48] sm:$0xf] %v911_v20  ;;  %v1328_v20 = vshrl.u32 %v11890_v52, 16  ;;  %v705_v45 = vrot.slane %v11941_v33, 2  ;;  %v706_v42 = vrot.slane %v11941_v33, 3  ;;  %v707_v49 = vrot.slane %v11941_v33, 4 }
  0xa8   : > { %914 = vst [vmem:[#allocation1] ss:$4 sm:$0xff] %v609_v19  ;;  %v701_v19 = vrot.slane %v11898_v56, 5  ;;  %v709_v62 = vrot.slane %v11941_v33, 6  ;;  %v710_v3 = vrot.slane %v11941_v33, 7 }
  0xa9   : > { %916 = vst [vmem:[#allocation1 + $0x1] ss:$4 sm:$0xff] %v11870_v16  ;;  %v700_v16 = vrot.slane %v11898_v56, 4  ;;  %v1330_v26 = vor.u32 %v1328_v20, %v1326_v58 }
  0xaa   : > { %v912_v29 = vld [vmem:[#allocation1 + $0x20] sm:$0xff]  ;;  %918 = vst [vmem:[#allocation1 + $0x2] ss:$4 sm:$0xff] %v690_v21  ;;  %v1332_v21 = vshll.u32 %v11919_v11, 16 }
  0xab   : > { %1132 = vst [vmem:[#allocation2 + $0x4c] sm:$0xf] %v912_v29  ;;  %v434_v29 = vpack.c.b16 %v414_v24, %v413_v23 }
  0xac   : > { %920 = vst [vmem:[#allocation1 + $0x3] ss:$4 sm:$0xff] %v691_v27  ;;  %v1334_v27 = vrot.slane %v1332_v21, 1 }
  0xad   : > { %922 = vst [vmem:[#allocation1 + $0x20] ss:$4 sm:$0xff] %v692_v28  ;;  %v702_v28 = vrot.slane %v11898_v56, 6  ;;  %v517_v38 = vshrl.u32 %v434_v29, 16  ;;  %v520_v51 = vshll.u32 %v434_v29, 16 }
  0xae   : > { %924 = vst [vmem:[#allocation1 + $0x21] ss:$4 sm:$0xff] %v693_v30  ;;  %v703_v30 = vrot.slane %v11898_v56, 7  ;;  %v1338_v1 = vor.u32 %v1336_v55, %v1334_v27  ;;  %v307_v55 = vld [vmem:[%s11777_s16 + $0xe0] sm:$0xff] }
  0xaf   : > { %926 = vst [vmem:[#allocation1 + $0x22] ss:$4 sm:$0xff] %v694_v31  ;;  %v11957_v50 = vrot.slane %v517_v38, 7 }
  0xb0   : > { %928 = vst [vmem:[#allocation1 + $0x23] ss:$4 sm:$0xff] %v695_v34  ;;  %v1335_v34 = vsel %vm1315_vm3, %v1330_v26, %v1334_v27 }
  0xb1   : > { %320 = vst [vmem:[#allocation3 + $0x4] sm:$0xf] %v11642_v7  ;;  %1543 = vmatmul.bf16.gmra.mxu0 %v1335_v34  ;;  %v522_v58 = vor.u32 %v520_v51, %v11957_v50  ;;  %v1348_v34 = vshll.u32 %v11985_v25, 16 }
  0xb2   : > { %v11069_v39 = vld [vmem:[#allocation2 + $0x48] sm:$0xff]  ;;  %321 = vst [vmem:[#allocation3 + $0x8] sm:$0x1] %v11642_v7 }
  0xb3   : > { %v929_v41 = vld [vmem:[#allocation1] sm:$0xff]  ;;  %1748 = vmatmul.bf16.vlgmr.msra.gmra.mxu3 %v11069_v39  ;;  %v1388_v53 = vshll.u32 %v11069_v39, 16  ;;  %v1392_v61 = vshrl.u32 %v11069_v39, 16  ;;  %322 = vst [vmem:[#allocation3 + $0x98] sm:$0xe] %v11642_v7  ;;  %v704_v39 = vrot.slane %v11941_v33, 1 }
  0xb4   : > { %1133 = vst [vmem:[#allocation2 + $0x50] sm:$0xf] %v929_v41  ;;  %v11124_v41 = vld [vmem:[#allocation7 + $0xe8] sm:$0xff] }
  0xb5   : > { %v11902_v60 = vrot.slane %v1388_v53, 1  ;;  %323 = vst [vmem:[#allocation3 + $0x9c] sm:$0xf] %v11642_v7  ;;  %2306 = vmatpush.bf16.msrb.mxu3 %v11124_v41  ;;  %v415_v53 = vunpack.c.l.b16 %v351_v46  ;;  %v1350_v46 = vrot.slane %v1348_v34, 1 }
  0xb6   : > { %324 = vst [vmem:[#allocation3 + $0xa0] sm:$0xf] %v11642_v7 }
  0xb7   : > { %v930_v48 = vld [vmem:[#allocation1 + $0x20] sm:$0xff]  ;;  %v1394_v12 = vor.u32 %v1392_v61, %v11902_v60  ;;  %932 = vst [vmem:[#allocation1] ss:$4 sm:$0xff] %v696_v59  ;;  %v708_v59 = vrot.slane %v11941_v33, 5  ;;  %v435_v63 = vpack.c.b16 %v416_v54, %v415_v53 }
  0xb8   : > { %1134 = vst [vmem:[#allocation2 + $0x54] sm:$0xf] %v930_v48  ;;  %v11953_v48 = vld [vmem:[#allocation2 + $0x18] sm:$0xff] }
  0xb9   : > { %934 = vst [vmem:[#allocation1 + $0x1] ss:$4 sm:$0xff] %v610_v6  ;;  %v524_v14 = vshrl.u32 %v435_v63, 16  ;;  %1718 = vmatmul.bf16.gmra.mxu1 %v11953_v48  ;;  %v527_v24 = vshll.u32 %v435_v63, 16  ;;  %v355_v63 = vpack.c.bf16 %v307_v55, %v307_v55  ;;  %v309_v55 = vld [vmem:[%s11777_s16 + $0xf0] sm:$0xff] }
  0xba   : > { %936 = vst [vmem:[#allocation1 + $0x2] ss:$4 sm:$0xff] %v11898_v56  ;;  %v1340_v56 = vshll.u32 %v11953_v48, 16 }
  0xbb   : > { %938 = vst [vmem:[#allocation1 + $0x3] ss:$4 sm:$0xff] %v697_v9  ;;  %v305_v9 = vld [vmem:[%s11777_s16 + $0xd0] sm:$0xff]  ;;  %v11983_v23 = vrot.slane %v524_v14, 7 }
  0xbc   : > { %940 = vst [vmem:[#allocation1 + $0x20] ss:$4 sm:$0xff] %v698_v10  ;;  %v1342_v2 = vrot.slane %v1340_v56, 1  ;;  %v306_v10 = vld [vmem:[%s11777_s16 + $0xd8] sm:$0xff]  ;;  %v308_v56 = vld [vmem:[%s11777_s16 + $0xe8] sm:$0xff] }
  0xbd   : > { %942 = vst [vmem:[#allocation1 + $0x21] ss:$4 sm:$0xff] %v699_v5  ;;  %v354_v20 = vpack.c.bf16 %v306_v10, %v306_v10  ;;  %v529_v29 = vor.u32 %v527_v24, %v11983_v23  ;;  %v419_v10 = vunpack.c.l.b16 %v355_v63  ;;  %v357_v63 = vpack.c.bf16 %v309_v55, %v309_v55 }
  0xbe   : > { %944 = vst [vmem:[#allocation1 + $0x22] ss:$4 sm:$0xff] %v700_v16  ;;  %v1343_v5 = vsel %vm1315_vm3, %v1338_v1, %v1342_v2  ;;  %v12015_v1 = vld [vmem:[#allocation2 + $0x28] sm:$0xff] }
  0xbf   : > { %v11910_v4 = vld [vmem:[#allocation2 + $0x50] sm:$0xff]  ;;  %946 = vst [vmem:[#allocation1 + $0x23] ss:$4 sm:$0xff] %v701_v19  ;;  %v353_v19 = vpack.c.bf16 %v305_v9, %v305_v9  ;;  %v418_v27 = vunpack.c.l.b16 %v354_v20  ;;  %v11998_v41 = vsel %vm11793_vm2, 0, %v529_v29 }
  0xc0   : > { %v1396_v13 = vshll.u32 %v11910_v4, 16  ;;  %v1400_v57 = vshrl.u32 %v11910_v4, 16  ;;  %v718_v51 = vrot.slane %v11998_v41, 1  ;;  %v719_v54 = vrot.slane %v11998_v41, 2 }
  0xc1   : > { %1548 = vmatmul.bf16.gmra.mxu0 %v1343_v5  ;;  %v417_v26 = vunpack.c.l.b16 %v353_v19  ;;  %v722_v9 = vrot.slane %v11998_v41, 5  ;;  %v1356_v5 = vshll.u32 %v12015_v1, 16 }
  0xc2   : > { %v11924_v7 = vrot.slane %v1396_v13, 1  ;;  %v947_v31 = vld [vmem:[#allocation1] sm:$0xff]  ;;  %v612_v13 = vsel %vm11793_vm2, %v11928_v17, 0 }
  0xc3   : > { %1753 = vmatmul.bf16.gmra.mxu3 %v11910_v4  ;;  %1135 = vst [vmem:[#allocation2 + $0x58] sm:$0xf] %v947_v31  ;;  %v11969_v4 = vsel %vm11793_vm2, 0, %v522_v58  ;;  %v11098_v17 = vld [vmem:[#allocation7 + $0xa0] sm:$0xff]  ;;  %v436_v38 = vpack.c.b16 %v418_v27, %v417_v26  ;;  %v1358_v26 = vrot.slane %v1356_v5, 1  ;;  %v11120_v5 = vld [vmem:[#allocation7 + $0xc8] sm:$0xff] }
  0xc4   : > { %v1399_v22 = vsel %vm1315_vm3, %v1394_v12, %v11924_v7  ;;  %950 = vst [vmem:[#allocation1] ss:$4 sm:$0xff] %v702_v28  ;;  %v1402_v6 = vor.u32 %v1400_v57, %v11924_v7  ;;  %v711_v7 = vrot.slane %v11969_v4, 1  ;;  %v712_v18 = vrot.slane %v11969_v4, 2  ;;  %1922 = vmatpush.bf16.msrb.mxu2 %v11098_v17 }
  0xc5   : > { %1583 = vmatmul.bf16.vlgmr.msra.gmra.mxu2 %v1399_v22  ;;  %952 = vst [vmem:[#allocation1 + $0x1] ss:$4 sm:$0xff] %v703_v30  ;;  %v713_v21 = vrot.slane %v11969_v4, 3  ;;  %v11123_v22 = vld [vmem:[#allocation7 + $0xe0] sm:$0xff]  ;;  %v714_v30 = vrot.slane %v11969_v4, 4  ;;  %v716_v37 = vrot.slane %v11969_v4, 6 }
  0xc6   : > { %v948_v44 = vld [vmem:[#allocation1 + $0x20] sm:$0xff]  ;;  %954 = vst [vmem:[#allocation1 + $0x2] ss:$4 sm:$0xff] %v611_v35  ;;  %2307 = vmatpush.bf16.msrb.mxu3 %v11123_v22  ;;  %v715_v35 = vrot.slane %v11969_v4, 5  ;;  %v717_v43 = vrot.slane %v11969_v4, 7  ;;  %v614_v22 = vsel %vm11793_vm2, %v11983_v23, 0 }
  0xc7   : > { %1136 = vst [vmem:[#allocation2 + $0x5c] sm:$0xf] %v948_v44  ;;  %v11130_v23 = vld [vmem:[#allocation7 + $0x118] sm:$0xff] }
  0xc8   : > { %956 = vst [vmem:[#allocation1 + $0x3] ss:$4 sm:$0xff] %v11941_v33  ;;  %v1344_v33 = vshrl.u32 %v11953_v48, 16 }
  0xc9   : > { %958 = vst [vmem:[#allocation1 + $0x20] ss:$4 sm:$0xff] %v704_v39  ;;  %1723 = vmatmul.bf16.gmra.mxu1 %v11985_v25 }
  0xca   : > { %960 = vst [vmem:[#allocation1 + $0x21] ss:$4 sm:$0xff] %v705_v45  ;;  %v1346_v45 = vor.u32 %v1344_v33, %v1342_v2  ;;  %v720_v2 = vrot.slane %v11998_v41, 3  ;;  %v11096_v33 = vld [vmem:[#allocation7 + $0x90] sm:$0xff] }
  0xcb   : > { %962 = vst [vmem:[#allocation1 + $0x22] ss:$4 sm:$0xff] %v706_v42  ;;  %v613_v42 = vsel %vm11793_vm2, %v11957_v50, 0  ;;  %v534_v50 = vshll.u32 %v436_v38, 16 }
  0xcc   : > { %964 = vst [vmem:[#allocation1 + $0x23] ss:$4 sm:$0xff] %v707_v49  ;;  %v531_v49 = vshrl.u32 %v436_v38, 16  ;;  %v1351_v57 = vsel %vm1315_vm3, %v1346_v45, %v1350_v46 }
  0xce   : > { %v11071_v61 = vld [vmem:[#allocation2 + $0x58] sm:$0xff]  ;;  %v12012_v58 = vrot.slane %v531_v49, 7 }
  0xcf   : > { %v965_v0 = vld [vmem:[#allocation1] sm:$0xff]  ;;  %v1404_v8 = vshll.u32 %v11071_v61, 16  ;;  %v1408_v28 = vshrl.u32 %v11071_v61, 16 }
  0xd0   : > { %1137 = vst [vmem:[#allocation2 + $0x60] sm:$0xf] %v965_v0  ;;  %v356_v0 = vpack.c.bf16 %v308_v56, %v308_v56  ;;  %v310_v56 = vld [vmem:[%s11777_s16 + $0xf8] sm:$0xff] }
  0xd1   : > { %968 = vst [vmem:[#allocation1] ss:$4 sm:$0xff] %v708_v59  ;;  %v1406_v12 = vrot.slane %v1404_v8, 1  ;;  %v11131_v59 = vld [vmem:[#allocation7 + $0x120] sm:$0xff]  ;;  %1553 = vmatmul.bf16.gmra.mxu0 %v1351_v57  ;;  %v721_v8 = vrot.slane %v11998_v41, 4 }
  0xd2   : > { %970 = vst [vmem:[#allocation1 + $0x1] ss:$4 sm:$0xff] %v709_v62  ;;  %v11122_v62 = vld [vmem:[#allocation7 + $0xd8] sm:$0xff]  ;;  %2700 = vmatpush.bf16.msrb.mxu0 %v11131_v59 }
  0xd3   : > { %1758 = vmatmul.bf16.gmra.mxu3 %v11071_v61  ;;  %v966_v15 = vld [vmem:[#allocation1 + $0x20] sm:$0xff]  ;;  %972 = vst [vmem:[#allocation1 + $0x2] ss:$4 sm:$0xff] %v710_v3  ;;  %v1407_v16 = vsel %vm1315_vm3, %v1402_v6, %v1406_v12  ;;  %v1410_v40 = vor.u32 %v1408_v28, %v1406_v12  ;;  %v11097_v61 = vld [vmem:[#allocation7 + $0x98] sm:$0xff]  ;;  %v536_v6 = vor.u32 %v534_v50, %v12012_v58  ;;  %v420_v12 = vunpack.c.l.b16 %v356_v0 }
  0xd4   : > { %1138 = vst [vmem:[#allocation2 + $0x64] sm:$0xf] %v966_v15  ;;  %1923 = vmatpush.bf16.msrb.mxu2 %v11097_v61  ;;  %2308 = vmatpush.bf16.msrb.mxu3 %v11122_v62  ;;  %v1352_v15 = vshrl.u32 %v11985_v25, 16  ;;  %v358_v0 = vpack.c.bf16 %v310_v56, %v310_v56 }
  0xd5   : > { %1588 = vmatmul.bf16.gmra.mxu2 %v1407_v16  ;;  %974 = vst [vmem:[#allocation1 + $0x3] ss:$4 sm:$0xff] %v612_v13  ;;  %v599_v16 = vsel %vm11793_vm2, 0, %v536_v6  ;;  %v437_v20 = vpack.c.b16 %v420_v12, %v419_v10 }
  0xd6   : > { %976 = vst [vmem:[#allocation1 + $0x20] ss:$4 sm:$0xff] %v11969_v4  ;;  %v1354_v24 = vor.u32 %v1352_v15, %v1350_v46  ;;  %v725_v27 = vrot.slane %v599_v16, 1  ;;  %2701 = vmatpush.bf16.msrb.mxu0 %v11130_v23  ;;  %v730_v45 = vrot.slane %v599_v16, 6  ;;  %v731_v49 = vrot.slane %v599_v16, 7  ;;  %v11095_v15 = vld [vmem:[#allocation7 + $0x88] sm:$0xff] }
  0xd7   : > { %978 = vst [vmem:[#allocation1 + $0x21] ss:$4 sm:$0xff] %v711_v7  ;;  %v723_v7 = vrot.slane %v11998_v41, 6  ;;  %v538_v28 = vshrl.u32 %v437_v20, 16 }
  0xd8   : > { %980 = vst [vmem:[#allocation1 + $0x22] ss:$4 sm:$0xff] %v712_v18  ;;  %v724_v18 = vrot.slane %v11998_v41, 7  ;;  %1924 = vmatpush.bf16.msrb.mxu2 %v11096_v33 }
  0xd9   : > { %982 = vst [vmem:[#allocation1 + $0x23] ss:$4 sm:$0xff] %v713_v21  ;;  %1728 = vmatmul.bf16.gmra.mxu1 %v12015_v1  ;;  %v12038_v34 = vrot.slane %v538_v28, 7 }
  0xdb   : > { %v11989_v31 = vld [vmem:[#allocation2 + $0x60] sm:$0xff] }
  0xdc   : > { %v983_v36 = vld [vmem:[#allocation1] sm:$0xff]  ;;  %v1412_v39 = vshll.u32 %v11989_v31, 16  ;;  %v1416_v13 = vshrl.u32 %v11989_v31, 16  ;;  %1925 = vmatpush.bf16.msrb.mxu2 %v11095_v15  ;;  %v2054_v15 = vld [vmem:[#allocation2 + $0x8] sm:$0xe] }
  0xdd   : > { %1139 = vst [vmem:[#allocation2 + $0x68] sm:$0xf] %v983_v36  ;;  %v727_v36 = vrot.slane %v599_v16, 3 }
  0xde   : > { %986 = vst [vmem:[#allocation1] ss:$4 sm:$0xff] %v714_v30  ;;  %v1414_v44 = vrot.slane %v1412_v39, 1  ;;  %v1359_v30 = vsel %vm1315_vm3, %v1354_v24, %v1358_v26  ;;  %v11121_v39 = vld [vmem:[#allocation7 + $0xd0] sm:$0xff] }
  0xdf   : > { %988 = vst [vmem:[#allocation1 + $0x1] ss:$4 sm:$0xff] %v715_v35  ;;  %v541_v35 = vshll.u32 %v437_v20, 16  ;;  %2309 = vmatpush.bf16.msrb.mxu3 %v11121_v39 }
  0xe0   : > { %v984_v47 = vld [vmem:[#allocation1 + $0x20] sm:$0xff]  ;;  %990 = vst [vmem:[#allocation1 + $0x2] ss:$4 sm:$0xff] %v716_v37  ;;  %v1415_v53 = vsel %vm1315_vm3, %v1410_v40, %v1414_v44  ;;  %v1418_v21 = vor.u32 %v1416_v13, %v1414_v44  ;;  %v728_v40 = vrot.slane %v599_v16, 4 }
  0xe1   : > { %1140 = vst [vmem:[#allocation2 + $0x6c] sm:$0xf] %v984_v47  ;;  %1558 = vmatmul.bf16.gmra.mxu0 %v1359_v30  ;;  %v543_v44 = vor.u32 %v541_v35, %v12038_v34 }
  0xe2   : > { %992 = vst [vmem:[#allocation1 + $0x3] ss:$4 sm:$0xff] %v717_v43  ;;  %v729_v43 = vrot.slane %v599_v16, 5 }
  0xe3   : > { %1763 = vmatmul.bf16.gmra.mxu3 %v11989_v31  ;;  %994 = vst [vmem:[#allocation1 + $0x20] ss:$4 sm:$0xff] %v613_v42  ;;  %v726_v31 = vrot.slane %v599_v16, 2  ;;  %v600_v57 = vsel %vm11793_vm2, 0, %v543_v44 }
  0xe4   : > { %996 = vst [vmem:[#allocation1 + $0x21] ss:$4 sm:$0xff] %v11998_v41  ;;  %v12042_v41 = vld [vmem:[#allocation2 + $0x30] sm:$0xff]  ;;  %v734_v10 = vrot.slane %v600_v57, 3  ;;  %v735_v13 = vrot.slane %v600_v57, 4  ;;  %2310 = vmatpush.bf16.msrb.mxu3 %v11120_v5  ;;  %v738_v24 = vrot.slane %v600_v57, 7 }
  0xe5   : > { %1593 = vmatmul.bf16.gmra.mxu2 %v1415_v53  ;;  %998 = vst [vmem:[#allocation1 + $0x22] ss:$4 sm:$0xff] %v718_v51  ;;  %v1360_v51 = vshrl.u32 %v12015_v1, 16  ;;  %v1364_v53 = vshll.u32 %v12042_v41, 16  ;;  %v1368_v30 = vshrl.u32 %v12042_v41, 16 }
  0xe6   : > { %1000 = vst [vmem:[#allocation1 + $0x23] ss:$4 sm:$0xff] %v719_v54  ;;  %v615_v54 = vsel %vm11793_vm2, %v12012_v58, 0  ;;  %v421_v58 = vunpack.c.l.b16 %v357_v63  ;;  %v2055_v5 = vld [vmem:[#allocation2 + $0xc] sm:$0xf] }
  0xe7   : > { %v1362_v61 = vor.u32 %v1360_v51, %v1358_v26  ;;  %v1366_v62 = vrot.slane %v1364_v53, 1  ;;  %v12082_v51 = vld [vmem:[#allocation2 + $0x40] sm:$0xff] }
  0xe8   : > { %v12018_v3 = vld [vmem:[#allocation2 + $0x68] sm:$0xff]  ;;  %v1380_v56 = vshll.u32 %v12082_v51, 16 }
  0xe9   : > { %v1001_v4 = vld [vmem:[#allocation1] sm:$0xff]  ;;  %v1420_v14 = vshll.u32 %v12018_v3, 16  ;;  %v1424_v46 = vshrl.u32 %v12018_v3, 16  ;;  %1733 = vmatmul.bf16.gmra.mxu1 %v12042_v41 }
  0xea   : > { %1141 = vst [vmem:[#allocation2 + $0x70] sm:$0xf] %v1001_v4  ;;  %v1367_v4 = vsel %vm1315_vm3, %v1362_v61, %v1366_v62 }
  0xeb   : > { %1004 = vst [vmem:[#allocation1] ss:$4 sm:$0xff] %v720_v2  ;;  %v1422_v17 = vrot.slane %v1420_v14, 1  ;;  %v732_v2 = vrot.slane %v600_v57, 1  ;;  %v11129_v14 = vld [vmem:[#allocation7 + $0x110] sm:$0xff] }
  0xec   : > { %1006 = vst [vmem:[#allocation1 + $0x1] ss:$4 sm:$0xff] %v721_v8  ;;  %v733_v8 = vrot.slane %v600_v57, 2  ;;  %2702 = vmatpush.bf16.msrb.mxu0 %v11129_v14  ;;  %v1384_v14 = vshrl.u32 %v12082_v51, 16 }
  0xed   : > { %v1002_v19 = vld [vmem:[#allocation1 + $0x20] sm:$0xff]  ;;  %1008 = vst [vmem:[#allocation1 + $0x2] ss:$4 sm:$0xff] %v722_v9  ;;  %v1423_v29 = vsel %vm1315_vm3, %v1418_v21, %v1422_v17  ;;  %v1426_v50 = vor.u32 %v1424_v46, %v1422_v17  ;;  %v737_v17 = vrot.slane %v600_v57, 6  ;;  %v11128_v46 = vld [vmem:[#allocation7 + $0x108] sm:$0xff] }
  0xee   : > { %1142 = vst [vmem:[#allocation2 + $0x74] sm:$0xf] %v1002_v19  ;;  %v12060_v21 = vld [vmem:[#allocation2 + $0x38] sm:$0xff] }
  0xef   : > { %1010 = vst [vmem:[#allocation1 + $0x3] ss:$4 sm:$0xff] %v723_v7  ;;  %v1376_v55 = vshrl.u32 %v12060_v21, 16 }
  0xf0   : > { %1012 = vst [vmem:[#allocation1 + $0x20] ss:$4 sm:$0xff] %v724_v18  ;;  %v736_v18 = vrot.slane %v600_v57, 5  ;;  %2703 = vmatpush.bf16.msrb.mxu0 %v11128_v46  ;;  %v11136_v46 = vld [vmem:[#allocation7 + $0x148] sm:$0xff] }
  0xf1   : > { %1014 = vst [vmem:[#allocation1 + $0x21] ss:$4 sm:$0xff] %v614_v22  ;;  %1563 = vmatmul.bf16.gmra.mxu0 %v1367_v4  ;;  %v11127_v4 = vld [vmem:[#allocation7 + $0x100] sm:$0xff] }
  0xf2   : > { %1016 = vst [vmem:[#allocation1 + $0x22] ss:$4 sm:$0xff] %v599_v16 }
  0xf3   : > { %1768 = vmatmul.bf16.gmra.mxu3 %v12018_v3  ;;  %1018 = vst [vmem:[#allocation1 + $0x23] ss:$4 sm:$0xff] %v725_v27  ;;  %v422_v3 = vunpack.c.l.b16 %v358_v0 }
  0xf4   : > { %v1704_v0 = vpop.f32.mrf.mxu1  ;;  %2704 = vmatpush.bf16.msrb.mxu0 %v11127_v4 }
  0xf5   : > { %1598 = vmatmul.bf16.gmra.mxu2 %v1423_v29  ;;  %v12040_v37 = vld [vmem:[#allocation2 + $0x70] sm:$0xff]  ;;  %v438_v12 = vpack.c.b16 %v422_v3, %v421_v58  ;;  %v616_v29 = vsel %vm11793_vm2, %v12038_v34, 0  ;;  %v11141_v58 = vld [vmem:[#allocation7 + $0x170] sm:$0xff]  ;;  %v11119_v3 = vld [vmem:[#allocation7 + $0xc0] sm:$0xff] }
  0xf6   : > { %v1019_v38 = vld [vmem:[#allocation1] sm:$0xff]  ;;  %v1428_v47 = vshll.u32 %v12040_v37, 16  ;;  %v1432_v27 = vshrl.u32 %v12040_v37, 16  ;;  %2311 = vmatpush.bf16.msrb.mxu3 %v11119_v3 }
  0xf7   : > { %1143 = vst [vmem:[#allocation2 + $0x78] sm:$0xf] %v1019_v38  ;;  %v545_v7 = vshrl.u32 %v438_v12, 16  ;;  %v548_v19 = vshll.u32 %v438_v12, 16 }
  0xf8   : > { %1022 = vst [vmem:[#allocation1] ss:$4 sm:$0xff] %v726_v31  ;;  %v1430_v59 = vrot.slane %v1428_v47, 1  ;;  %v1372_v31 = vshll.u32 %v12060_v21, 16  ;;  %v11142_v47 = vld [vmem:[#allocation7 + $0x178] sm:$0xff] }
  0xf9   : > { %1024 = vst [vmem:[#allocation1 + $0x1] ss:$4 sm:$0xff] %v727_v36  ;;  %v12062_v22 = vrot.slane %v545_v7, 7  ;;  %v1370_v36 = vor.u32 %v1368_v30, %v1366_v62  ;;  %1738 = vmatmul.bf16.gmra.mxu1 %v12060_v21  ;;  %v1382_v62 = vrot.slane %v1380_v56, 1 }
  0xfa   : > { %v1020_v42 = vld [vmem:[#allocation1 + $0x20] sm:$0xff]  ;;  %1026 = vst [vmem:[#allocation1 + $0x2] ss:$4 sm:$0xff] %v728_v40  ;;  %v1431_v6 = vsel %vm1315_vm3, %v1426_v50, %v1430_v59  ;;  %v1434_v33 = vor.u32 %v1432_v27, %v1430_v59  ;;  %2957 = vmatpush.bf16.msrb.mxu1 %v11142_v47 }
  0xfb   : > { %1144 = vst [vmem:[#allocation2 + $0x7c] sm:$0xf] %v1020_v42  ;;  %v550_v26 = vor.u32 %v548_v19, %v12062_v22  ;;  %v11094_v42 = vld [vmem:[#allocation7 + $0x80] sm:$0xff]  ;;  %v11138_v19 = vld [vmem:[#allocation7 + $0x158] sm:$0xff] }
  0xfc   : > { %1028 = vst [vmem:[#allocation1 + $0x3] ss:$4 sm:$0xff] %v729_v43  ;;  %1926 = vmatpush.bf16.msrb.mxu2 %v11094_v42  ;;  %v1706_v12 = vpop.f32.mrf.mxu1 }
  0xfd   : > { %1030 = vst [vmem:[#allocation1 + $0x20] ss:$4 sm:$0xff] %v730_v45  ;;  %v12073_v23 = vsel %vm11793_vm2, 0, %v550_v26  ;;  %v2146_v26 = vunpack.c.l.b16 %v2055_v5 }
  0xfe   : > { %1032 = vst [vmem:[#allocation1 + $0x21] ss:$4 sm:$0xff] %v731_v49  ;;  %v739_v38 = vrot.slane %v12073_v23, 1  ;;  %v740_v39 = vrot.slane %v12073_v23, 2  ;;  %v741_v43 = vrot.slane %v12073_v23, 3  ;;  %2958 = vmatpush.bf16.msrb.mxu1 %v11141_v58 }
  0xff   : > { %1034 = vst [vmem:[#allocation1 + $0x22] ss:$4 sm:$0xff] %v615_v54 }
 0x100   : > { %1036 = vst [vmem:[#allocation1 + $0x23] ss:$4 sm:$0xff] %v600_v57 }
 0x102   : > { %v11075_v16 = vld [vmem:[#allocation2 + $0x78] sm:$0xff] }
 0x103   : > { %1773 = vmatmul.bf16.gmra.mxu3 %v12040_v37  ;;  %v1037_v9 = vld [vmem:[#allocation1] sm:$0xff]  ;;  %v1436_v28 = vshll.u32 %v11075_v16, 16  ;;  %v1374_v37 = vrot.slane %v1372_v31, 1  ;;  %v1440_v53 = vshrl.u32 %v11075_v16, 16 }
 0x104   : > { %1145 = vst [vmem:[#allocation2 + $0x80] sm:$0xf] %v1037_v9 }
 0x105   : > { %1603 = vmatmul.bf16.gmra.mxu2 %v1431_v6  ;;  %1040 = vst [vmem:[#allocation1] ss:$4 sm:$0xff] %v732_v2  ;;  %v1438_v35 = vrot.slane %v1436_v28, 1  ;;  %v1375_v44 = vsel %vm1315_vm3, %v1370_v36, %v1374_v37  ;;  %v1378_v61 = vor.u32 %v1376_v55, %v1374_v37  ;;  %v11137_v36 = vld [vmem:[#allocation7 + $0x150] sm:$0xff]  ;;  %v12101_v37 = vld [vmem:[#allocation2 + $0x10] sm:$0xff] }
 0x106   : > { %1042 = vst [vmem:[#allocation1 + $0x1] ss:$4 sm:$0xff] %v733_v8  ;;  %1568 = vmatmul.bf16.gmra.mxu0 %v1375_v44  ;;  %v11140_v8 = vld [vmem:[#allocation7 + $0x168] sm:$0xff]  ;;  %v2855_v4 = vrot.slane %v12101_v37, 2 }
 0x107   : > { %v1038_v20 = vld [vmem:[#allocation1 + $0x20] sm:$0xff]  ;;  %1044 = vst [vmem:[#allocation1 + $0x2] ss:$4 sm:$0xff] %v734_v10  ;;  %v1439_v40 = vsel %vm1315_vm3, %v1434_v33, %v1438_v35  ;;  %v1442_v50 = vor.u32 %v1440_v53, %v1438_v35  ;;  %v1383_v2 = vsel %vm1315_vm3, %v1378_v61, %v1382_v62  ;;  %2959 = vmatpush.bf16.msrb.mxu1 %v11140_v8  ;;  %v11183_v53 = vld [vmem:[#allocation7 + $0x238] sm:$0xff] }
 0x108   : > { %1146 = vst [vmem:[#allocation2 + $0x84] sm:$0xf] %v1038_v20  ;;  %3995 = vmatpush.bf16.msra.mxu0 %v11183_v53 }
 0x109   : > { %1046 = vst [vmem:[#allocation1 + $0x3] ss:$4 sm:$0xff] %v735_v13  ;;  %1743 = vmatmul.bf16.gmra.mxu1 %v12082_v51  ;;  %v11139_v13 = vld [vmem:[#allocation7 + $0x160] sm:$0xff] }
 0x10a   : > { %1048 = vst [vmem:[#allocation1 + $0x20] ss:$4 sm:$0xff] %v736_v18 }
 0x10b   : > { %1050 = vst [vmem:[#allocation1 + $0x21] ss:$4 sm:$0xff] %v737_v17  ;;  %2960 = vmatpush.bf16.msrb.mxu1 %v11139_v13  ;;  %v1386_v17 = vor.u32 %v1384_v14, %v1382_v62 }
 0x10c   : > { %1052 = vst [vmem:[#allocation1 + $0x22] ss:$4 sm:$0xff] %v738_v24  ;;  %v2145_v24 = vunpack.c.l.b16 %v2054_v15 }
 0x10d   : > { %1054 = vst [vmem:[#allocation1 + $0x23] ss:$4 sm:$0xff] %v616_v29  ;;  %v1709_v29 = vpop.f32.mrf.mxu1  ;;  %v1391_v31 = vsel %vm1315_vm3, %v1386_v17, %v11902_v60  ;;  %v2473_v60 = vshll.u32 %v12101_v37, 16 }
 0x10e   : > { %v2182_v35 = vpack.c.b16 %v2146_v26, %v2145_v24  ;;  %v11103_v24 = vld [vmem:[#allocation2 + $0x18] sm:$0xff] }
 0x10f   : > { %v11076_v49 = vld [vmem:[#allocation2 + $0x80] sm:$0xff]  ;;  %2961 = vmatpush.bf16.msrb.mxu1 %v11138_v19 }
 0x110   : > { %v1055_v34 = vld [vmem:[#allocation1] sm:$0xff]  ;;  %v1444_v54 = vshll.u32 %v11076_v49, 16  ;;  %v1448_v9 = vshrl.u32 %v11076_v49, 16  ;;  %v2465_v44 = vshll.u32 %v2182_v35, 16  ;;  %v2201_v42 = vrot.slane %v2182_v35, 1 }
 0x111   : > { %1147 = vst [vmem:[#allocation2 + $0x88] sm:$0xf] %v1055_v34  ;;  %v11175_v34 = vld [vmem:[#allocation7 + $0x1f8] sm:$0xff] }
 0x112   : > { %1058 = vst [vmem:[#allocation1] ss:$4 sm:$0xff] %v12073_v23  ;;  %v1446_v59 = vrot.slane %v1444_v54, 1  ;;  %3735 = vmatpush.bf16.msra.mxu3 %v11175_v34  ;;  %v2467_v61 = vrot.slane %v2465_v44, 2 }
 0x113   : > { %1778 = vmatmul.bf16.gmra.mxu3 %v11075_v16  ;;  %1060 = vst [vmem:[#allocation1 + $0x1] ss:$4 sm:$0xff] %v739_v38  ;;  %v11167_v38 = vld [vmem:[#allocation7 + $0x1b8] sm:$0xff]  ;;  %2962 = vmatpush.bf16.msrb.mxu1 %v11137_v36  ;;  %v2204_v36 = vrot.slane %v11103_v24, 1 }
 0x114   : > { %v1056_v45 = vld [vmem:[#allocation1 + $0x20] sm:$0xff]  ;;  %1062 = vst [vmem:[#allocation1 + $0x2] ss:$4 sm:$0xff] %v740_v39  ;;  %v1447_v63 = vsel %vm1315_vm3, %v1442_v50, %v1446_v59  ;;  %v1450_v7 = vor.u32 %v1448_v9, %v1446_v59  ;;  %3342 = vmatpush.bf16.msra.mxu2 %v11167_v38  ;;  %v2832_v50 = vld [vmem:[#allocation2 + $0x8] sm:$0xc] }
 0x115   : > { %1608 = vmatmul.bf16.gmra.mxu2 %v1439_v40  ;;  %1148 = vst [vmem:[#allocation2 + $0x8c] sm:$0xf] %v1056_v45  ;;  %v2470_v45 = vshrl.u32 %v12101_v37, 16  ;;  %v1711_v56 = vpop.f32.mrf.mxu1 }
 0x116   : > { %1064 = vst [vmem:[#allocation1 + $0x3] ss:$4 sm:$0xff] %v741_v43  ;;  %1573 = vmatmul.bf16.gmra.mxu0 %v1383_v2  ;;  %v2462_v43 = vshrl.u32 %v2182_v35, 16 }
 0x117   : > { %2963 = vmatpush.bf16.msrb.mxu1 %v11136_v46  ;;  %v2472_v62 = vrot.slane %v2470_v45, 1  ;;  %v1817_v46 = vrot.slane %v11890_v52, 1 }
 0x118   : > { %v2464_v55 = vrot.slane %v2462_v43, 1 }
 0x119   : > { %v1539_v30 = vpop.f32.mrf.mxu0 }
 0x11a   : > { %v12099_v33 = vadd.f32 %v1704_v0, %v1539_v30  ;;  %v2851_v0 = vunpack.c.l.b16 %v2832_v50  ;;  %v2482_v30 = vshll.u32 %v11103_v24, 16 }
 0x11c   : > { %v12089_v6 = vld [vmem:[#allocation2 + $0x88] sm:$0xff]  ;;  %v2852_v3 = vpack.c.b16 %v2146_v26, %v2851_v0  ;;  %v11316_v26 = vld [vmem:[#allocation2] sm:$0xf0]  ;;  %v2484_v44 = vrot.slane %v2482_v30, 2 }
 0x11d   : > { %v1073_v57 = vld [vmem:[#allocation1] sm:$0xff]  ;;  %v1452_v10 = vshll.u32 %v12089_v6, 16  ;;  %v1456_v47 = vshrl.u32 %v12089_v6, 16  ;;  %v11166_v0 = vld [vmem:[#allocation7 + $0x1b0] sm:$0xff] }
 0x11e   : > { %1149 = vst [vmem:[#allocation2 + $0x90] sm:$0xf] %v1073_v57  ;;  %v11135_v57 = vld [vmem:[#allocation7 + $0x140] sm:$0xff]  ;;  %v2854_v14 = vrot.slane %v2852_v3, 2  ;;  %3343 = vmatpush.bf16.msra.mxu2 %v11166_v0 }
 0x11f   : > { %v1454_v16 = vrot.slane %v1452_v10, 1  ;;  %2964 = vmatpush.bf16.msrb.mxu1 %v11135_v57  ;;  %v2468_v10 = vor.u32 %v2467_v61, %v2464_v55 }
 0x121   : > { %v1455_v27 = vsel %vm1315_vm3, %v1450_v7, %v1454_v16  ;;  %v1541_v59 = vpop.f32.mrf.mxu0 }
 0x122   : > { %v12110_v2 = vadd.f32 %v1706_v12, %v1541_v59  ;;  %v2856_v12 = vsel %vm2853_vm5, %v2854_v14, %v2855_v4 }
 0x123   : > { %1783 = vmatmul.bf16.gmra.mxu3 %v11076_v49  ;;  %v2202_v49 = vrot.slane %v12101_v37, 1  ;;  %2965 = vmatmul.bf16.vlgmr.msrb.gmra.mxu1 %v2856_v12 }
 0x125   : > { %1613 = vmatmul.bf16.gmra.mxu2 %v1447_v63  ;;  %v1204_v20 = vld [vmem:[#allocation2 + $0x90] sm:$0x1]  ;;  %v2475_v63 = vrot.slane %v2473_v60, 2  ;;  %v2203_v58 = vsel %vm1815_vm4, %v2201_v42, %v2202_v49 }
 0x126   : > { %v1295_v28 = vunpack.c.l.b16 %v1204_v20  ;;  %1578 = vmatmul.bf16.gmra.mxu0 %v1391_v31 }
 0x127   : > { %v2476_v13 = vor.u32 %v2475_v63, %v2472_v62 }
 0x128   : > { %v12103_v39 = vpack.c.b16 %v1295_v28, %v1295_v28  ;;  %v2479_v28 = vshrl.u32 %v11103_v24, 16 }
 0x129   : > { %v2477_v20 = vsel %vm2460_vm6, %v2468_v10, %v2476_v13 }
 0x12a   : > { %v1460_v54 = vshll.u32 %v12103_v39, 16  ;;  %v2481_v43 = vrot.slane %v2479_v28, 1 }
 0x12c   : > { %v1462_v8 = vrot.slane %v1460_v54, 1  ;;  %v2485_v42 = vor.u32 %v2484_v44, %v2481_v43 }
 0x12e   : > { %v1544_v19 = vpop.f32.mrf.mxu0  ;;  %v2486_v50 = vsel %vm2460_vm6, %v2476_v13, %v2485_v42 }
 0x12f   : > { %v12120_v17 = vadd.f32 %v1709_v29, %v1544_v19  ;;  %v2205_v29 = vsel %vm1815_vm4, %v2202_v49, %v2204_v36  ;;  %v11104_v49 = vld [vmem:[#allocation2 + $0x20] sm:$0xff] }
 0x130   : > { %v2488_v59 = vshrl.u32 %v11104_v49, 16  ;;  %v2491_v52 = vshll.u32 %v11104_v49, 16  ;;  %v2206_v63 = vrot.slane %v11104_v49, 1  ;;  %v2859_v12 = vrot.slane %v11104_v49, 2 }
 0x132   : > { %v2493_v10 = vrot.slane %v2491_v52, 2  ;;  %v2207_v14 = vsel %vm1815_vm4, %v2204_v36, %v2206_v63 }
 0x133   : > { %1788 = vmatmul.bf16.gmra.mxu3 %v12089_v6  ;;  %v1458_v6 = vor.u32 %v1456_v47, %v1454_v16  ;;  %v1714_v16 = vpop.f32.mrf.mxu1  ;;  %v2857_v47 = vrot.slane %v11103_v24, 2 }
 0x135   : > { %1618 = vmatmul.bf16.gmra.mxu2 %v1455_v27  ;;  %v1463_v7 = vsel %vm1315_vm3, %v1458_v6, %v1462_v8  ;;  %v11317_v27 = vld [vmem:[#allocation2] sm:$0xe] }
 0x136   : > { %v12093_v18 = vpop.f32.mrf.mxu3  ;;  %2705 = vmatmul.bf16.vlgmr.msrb.gmra.mxu0 %v2477_v20  ;;  %v11318_v37 = vor.u32 %v11317_v27, %v11316_v26  ;;  %v1546_v34 = vpop.f32.mrf.mxu0  ;;  %v11182_v20 = vld [vmem:[#allocation7 + $0x230] sm:$0xff] }
 0x137   : > { %v12124_v45 = vadd.f32 %v1711_v56, %v1546_v34  ;;  %3996 = vmatpush.bf16.msra.mxu0 %v11182_v20 }
 0x138   : > { %v1816_v60 = vrot.slane %v11318_v37, 1 }
 0x13a   : > { %v1818_v53 = vsel %vm1815_vm4, %v1816_v60, %v1817_v46 }
 0x13b   : > { %v1716_v38 = vpop.f32.mrf.mxu1 }
 0x13e   : > { %v1751_v40 = vpop.f32.mrf.mxu3  ;;  %v1549_v57 = vpop.f32.mrf.mxu0 }
 0x13f   : > { %v12131_v56 = vadd.f32 %v1714_v16, %v1549_v57  ;;  %v2860_v16 = vsel %vm2853_vm5, %v2857_v47, %v2859_v12 }
 0x143   : > { %2312 = vmatmul.bf16.vlgmr.msrb.gmra.mxu3 %v2203_v58  ;;  %v1719_v54 = vpop.f32.mrf.mxu1  ;;  %v11174_v58 = vld [vmem:[#allocation7 + $0x1f0] sm:$0xff] }
 0x144   : > { %3736 = vmatpush.bf16.msra.mxu3 %v11174_v58 }
 0x145   : > { %1623 = vmatmul.bf16.gmra.mxu2 %v1463_v7 }
 0x146   : > { %v1754_v9 = vpop.f32.mrf.mxu3  ;;  %2710 = vmatmul.bf16.gmra.mxu0 %v2486_v50  ;;  %v1551_v8 = vpop.f32.mrf.mxu0 }
 0x147   : > { %v12135_v13 = vadd.f32 %v1716_v38, %v1551_v8 }
 0x148   : > { %v1584_v15 = vpop.f32.mrf.mxu2 }
 0x149   : > { %v12115_v5 = vadd.f32 %v12093_v18, %v1584_v15  ;;  %v1819_v15 = vrot.slane %v11919_v11, 1  ;;  %v11105_v11 = vld [vmem:[#allocation2 + $0x28] sm:$0xff] }
 0x14a   : > { %v2497_v36 = vshrl.u32 %v11105_v11, 16  ;;  %v2500_v37 = vshll.u32 %v11105_v11, 16  ;;  %v2208_v34 = vrot.slane %v11105_v11, 1 }
 0x14b   : > { %v1721_v3 = vpop.f32.mrf.mxu1  ;;  %v1820_v24 = vsel %vm1815_vm4, %v1817_v46, %v1819_v15 }
 0x14c   : > { %v2499_v60 = vrot.slane %v2497_v36, 1  ;;  %v2502_v46 = vrot.slane %v2500_v37, 2 }
 0x14e   : > { %v1756_v35 = vpop.f32.mrf.mxu3  ;;  %v1554_v28 = vpop.f32.mrf.mxu0 }
 0x150   : > { %v1586_v18 = vpop.f32.mrf.mxu2 }
 0x151   : > { %v12122_v31 = vadd.f32 %v1751_v40, %v1586_v18  ;;  %v2858_v40 = vsel %vm2853_vm5, %v2855_v4, %v2857_v47  ;;  %v2490_v4 = vrot.slane %v2488_v59, 1  ;;  %v12144_v18 = vadd.f32 %v1719_v54, %v1554_v28 }
 0x152   : > { %2970 = vmatmul.bf16.gmra.mxu1 %v2858_v40  ;;  %v1821_v40 = vrot.slane %v11953_v48, 1  ;;  %v2503_v54 = vor.u32 %v2502_v46, %v2499_v60  ;;  %v11106_v48 = vld [vmem:[#allocation2 + $0x30] sm:$0xff] }
 0x153   : > { %2317 = vmatmul.bf16.gmra.mxu3 %v2205_v29  ;;  %v2494_v7 = vor.u32 %v2493_v10, %v2490_v4  ;;  %v1724_v26 = vpop.f32.mrf.mxu1  ;;  %v11165_v10 = vld [vmem:[#allocation7 + $0x1a8] sm:$0xff]  ;;  %v2863_v28 = vrot.slane %v11106_v48, 2 }
 0x154   : > { %v1822_v49 = vsel %vm1815_vm4, %v1819_v15, %v1821_v40  ;;  %3344 = vmatpush.bf16.msra.mxu2 %v11165_v10 }
 0x155   : > { %1927 = vmatmul.bf16.vlgmr.msrb.gmra.mxu2 %v1818_v53  ;;  %v2495_v30 = vsel %vm2460_vm6, %v2485_v42, %v2494_v7  ;;  %v2209_v42 = vsel %vm1815_vm4, %v2206_v63, %v2208_v34  ;;  %v2861_v53 = vrot.slane %v11105_v11, 2  ;;  %v2504_v0 = vsel %vm2460_vm6, %v2494_v7, %v2503_v54 }
 0x156   : > { %v1759_v55 = vpop.f32.mrf.mxu3  ;;  %2715 = vmatmul.bf16.gmra.mxu0 %v2495_v30  ;;  %v1556_v29 = vpop.f32.mrf.mxu0  ;;  %v2506_v63 = vshrl.u32 %v11106_v48, 16 }
 0x157   : > { %v12148_v47 = vadd.f32 %v1721_v3, %v1556_v29  ;;  %v2862_v50 = vsel %vm2853_vm5, %v2859_v12, %v2861_v53  ;;  %v2509_v3 = vshll.u32 %v11106_v48, 16  ;;  %v2864_v11 = vsel %vm2853_vm5, %v2861_v53, %v2863_v28 }
 0x158   : > { %v1589_v61 = vpop.f32.mrf.mxu2 }
 0x159   : > { %v12133_v62 = vadd.f32 %v1754_v9, %v1589_v61 }
 0x15b   : > { %v1726_v43 = vpop.f32.mrf.mxu1 }
 0x15e   : > { %v1761_v6 = vpop.f32.mrf.mxu3  ;;  %v1559_v61 = vpop.f32.mrf.mxu0 }
 0x15f   : > { %v12157_v58 = vadd.f32 %v1724_v26, %v1559_v61  ;;  %v1823_v26 = vrot.slane %v11985_v25, 1  ;;  %v11181_v25 = vld [vmem:[#allocation7 + $0x228] sm:$0xff] }
 0x160   : > { %v1591_v9 = vpop.f32.mrf.mxu2  ;;  %3997 = vmatpush.bf16.msra.mxu0 %v11181_v25 }
 0x161   : > { %v12140_v19 = vadd.f32 %v1756_v35, %v1591_v9  ;;  %v2508_v9 = vrot.slane %v2506_v63, 1  ;;  %v1824_v37 = vsel %vm1815_vm4, %v1821_v40, %v1823_v26 }
 0x162   : > { %2975 = vmatmul.bf16.gmra.mxu1 %v2860_v16  ;;  %v2511_v16 = vrot.slane %v2509_v3, 2 }
 0x163   : > { %2322 = vmatmul.bf16.gmra.mxu3 %v2207_v14  ;;  %v1729_v59 = vpop.f32.mrf.mxu1  ;;  %v11173_v14 = vld [vmem:[#allocation7 + $0x1e8] sm:$0xff] }
 0x164   : > { %3737 = vmatpush.bf16.msra.mxu3 %v11173_v14  ;;  %v2512_v30 = vor.u32 %v2511_v16, %v2508_v9 }
 0x165   : > { %1932 = vmatmul.bf16.gmra.mxu2 %v1820_v24 }
 0x166   : > { %v1764_v27 = vpop.f32.mrf.mxu3  ;;  %2720 = vmatmul.bf16.gmra.mxu0 %v2504_v0  ;;  %v1561_v12 = vpop.f32.mrf.mxu0 }
 0x167   : > { %v12161_v7 = vadd.f32 %v1726_v43, %v1561_v12  ;;  %v2513_v43 = vsel %vm2460_vm6, %v2503_v54, %v2512_v30 }
 0x168   : > { %v1594_v38 = vpop.f32.mrf.mxu2 }
 0x169   : > { %v12146_v35 = vadd.f32 %v1759_v55, %v1594_v38 }
 0x16b   : > { %v1731_v20 = vpop.f32.mrf.mxu1 }
 0x16e   : > { %v1766_v44 = vpop.f32.mrf.mxu3  ;;  %v1564_v29 = vpop.f32.mrf.mxu0 }
 0x16f   : > { %v12170_v60 = vadd.f32 %v1729_v59, %v1564_v29  ;;  %v1825_v59 = vrot.slane %v12015_v1, 1  ;;  %v11108_v1 = vld [vmem:[#allocation2 + $0x40] sm:$0xff] }
 0x170   : > { %v1596_v57 = vpop.f32.mrf.mxu2 }
 0x171   : > { %v12153_v55 = vadd.f32 %v1761_v6, %v1596_v57  ;;  %v2210_v6 = vrot.slane %v11106_v48, 1  ;;  %v1826_v12 = vsel %vm1815_vm4, %v1823_v26, %v1825_v59 }
 0x172   : > { %2980 = vmatmul.bf16.gmra.mxu1 %v2862_v50 }
 0x173   : > { %2327 = vmatmul.bf16.gmra.mxu3 %v2209_v42  ;;  %v2211_v24 = vsel %vm1815_vm4, %v2208_v34, %v2210_v6  ;;  %v11107_v34 = vld [vmem:[#allocation2 + $0x38] sm:$0xff]  ;;  %v1734_v46 = vpop.f32.mrf.mxu1 }
 0x174   : > { %v2515_v42 = vshrl.u32 %v11107_v34, 16  ;;  %v2518_v57 = vshll.u32 %v11107_v34, 16  ;;  %v2212_v50 = vrot.slane %v11107_v34, 1  ;;  %v2865_v63 = vrot.slane %v11107_v34, 2 }
 0x175   : > { %1937 = vmatmul.bf16.gmra.mxu2 %v1822_v49 }
 0x176   : > { %v1769_v52 = vpop.f32.mrf.mxu3  ;;  %2725 = vmatmul.bf16.gmra.mxu0 %v2513_v43  ;;  %v1566_v49 = vpop.f32.mrf.mxu0  ;;  %v2517_v61 = vrot.slane %v2515_v42, 1  ;;  %v2520_v0 = vrot.slane %v2518_v57, 2  ;;  %v2213_v54 = vsel %vm1815_vm4, %v2210_v6, %v2212_v50  ;;  %v2866_v14 = vsel %vm2853_vm5, %v2863_v28, %v2865_v63 }
 0x177   : > { %v12174_v48 = vadd.f32 %v1731_v20, %v1566_v49  ;;  %v2524_v6 = vshrl.u32 %v11108_v1, 16  ;;  %v2214_v28 = vrot.slane %v11108_v1, 1  ;;  %v2867_v42 = vrot.slane %v11108_v1, 2 }
 0x178   : > { %v1599_v8 = vpop.f32.mrf.mxu2  ;;  %v2521_v3 = vor.u32 %v2520_v0, %v2517_v61  ;;  %v11164_v61 = vld [vmem:[#allocation7 + $0x1a0] sm:$0xff] }
 0x179   : > { %v12159_v4 = vadd.f32 %v1764_v27, %v1599_v8  ;;  %v2526_v26 = vrot.slane %v2524_v6, 1  ;;  %v2868_v49 = vsel %vm2853_vm5, %v2865_v63, %v2867_v42  ;;  %v11172_v0 = vld [vmem:[#allocation7 + $0x1e0] sm:$0xff]  ;;  %3345 = vmatpush.bf16.msra.mxu2 %v11164_v61 }
 0x17a   : > { %v2522_v20 = vsel %vm2460_vm6, %v2512_v30, %v2521_v3  ;;  %v2215_v30 = vsel %vm1815_vm4, %v2212_v50, %v2214_v28  ;;  %3738 = vmatpush.bf16.msra.mxu3 %v11172_v0 }
 0x17b   : > { %v1736_v10 = vpop.f32.mrf.mxu1 }
 0x17e   : > { %v1771_v15 = vpop.f32.mrf.mxu3 }
 0x180   : > { %v1601_v27 = vpop.f32.mrf.mxu2 }
 0x181   : > { %v12166_v36 = vadd.f32 %v1766_v44, %v1601_v27  ;;  %v2527_v27 = vshll.u32 %v11108_v1, 16 }
 0x182   : > { %2985 = vmatmul.bf16.gmra.mxu1 %v2864_v11 }
 0x183   : > { %2332 = vmatmul.bf16.gmra.mxu3 %v2211_v24  ;;  %v1569_v16 = vpop.f32.mrf.mxu0  ;;  %v2529_v34 = vrot.slane %v2527_v27, 2 }
 0x184   : > { %v12183_v24 = vadd.f32 %v1734_v46, %v1569_v16  ;;  %v1827_v46 = vrot.slane %v12042_v41, 1 }
 0x185   : > { %1942 = vmatmul.bf16.gmra.mxu2 %v1824_v37  ;;  %v2530_v57 = vor.u32 %v2529_v34, %v2526_v26  ;;  %v1829_v26 = vrot.slane %v12060_v21, 1  ;;  %v11110_v21 = vld [vmem:[#allocation2 + $0x50] sm:$0xff] }
 0x186   : > { %v1774_v38 = vpop.f32.mrf.mxu3  ;;  %2730 = vmatmul.bf16.gmra.mxu0 %v2522_v20 }
 0x187   : > { %v1830_v0 = vsel %vm1815_vm4, %v1827_v46, %v1829_v26 }
 0x188   : > { %v1604_v53 = vpop.f32.mrf.mxu2 }
 0x189   : > { %v12172_v44 = vadd.f32 %v1769_v52, %v1604_v53 }
 0x18b   : > { %v1571_v43 = vpop.f32.mrf.mxu0 }
 0x18c   : > { %v12187_v25 = vadd.f32 %v1736_v10, %v1571_v43 }
 0x18e   : > { %v1776_v40 = vpop.f32.mrf.mxu3 }
 0x190   : > { %v1606_v8 = vpop.f32.mrf.mxu2 }
 0x191   : > { %v12179_v52 = vadd.f32 %v1771_v15, %v1606_v8  ;;  %v1739_v15 = vpop.f32.mrf.mxu1 }
 0x192   : > { %2990 = vmatmul.bf16.gmra.mxu1 %v2866_v14  ;;  %v2531_v14 = vsel %vm2460_vm6, %v2521_v3, %v2530_v57 }
 0x193   : > { %2337 = vmatmul.bf16.gmra.mxu3 %v2213_v54  ;;  %v1828_v54 = vsel %vm1815_vm4, %v1825_v59, %v1827_v46  ;;  %v1574_v10 = vpop.f32.mrf.mxu0  ;;  %v11180_v59 = vld [vmem:[#allocation7 + $0x220] sm:$0xff] }
 0x194   : > { %v12196_v41 = vadd.f32 %v1739_v15, %v1574_v10  ;;  %3998 = vmatpush.bf16.msra.mxu0 %v11180_v59 }
 0x195   : > { %1947 = vmatmul.bf16.gmra.mxu2 %v1826_v12  ;;  %v11109_v12 = vld [vmem:[#allocation2 + $0x48] sm:$0xff] }
 0x196   : > { %v1779_v9 = vpop.f32.mrf.mxu3  ;;  %2735 = vmatmul.bf16.gmra.mxu0 %v2531_v14  ;;  %v2533_v63 = vshrl.u32 %v11109_v12, 16  ;;  %v2216_v1 = vrot.slane %v11109_v12, 1  ;;  %v2869_v34 = vrot.slane %v11109_v12, 2 }
 0x198   : > { %v1609_v11 = vpop.f32.mrf.mxu2  ;;  %v2217_v15 = vsel %vm1815_vm4, %v2214_v28, %v2216_v1  ;;  %v2542_v28 = vshrl.u32 %v11110_v21, 16 }
 0x199   : > { %v12185_v37 = vadd.f32 %v1774_v38, %v1609_v11  ;;  %v1741_v50 = vpop.f32.mrf.mxu1  ;;  %v2535_v11 = vrot.slane %v2533_v63, 1 }
 0x19a   : > { %v2544_v46 = vrot.slane %v2542_v28, 1 }
 0x19b   : > { %15006 = vst [vmem:[#allocation15_spill] sm:$0xff] %v12185_v37  ;;  %v1576_v27 = vpop.f32.mrf.mxu0 }
 0x19c   : > { %v12200_v3 = vadd.f32 %v1741_v50, %v1576_v27 }
 0x19e   : > { %v1781_v29 = vpop.f32.mrf.mxu3 }
 0x1a0   : > { %v1611_v53 = vpop.f32.mrf.mxu2 }
 0x1a1   : > { %v12192_v38 = vadd.f32 %v1776_v40, %v1611_v53  ;;  %v2536_v40 = vshll.u32 %v11109_v12, 16  ;;  %v2545_v12 = vshll.u32 %v11110_v21, 16 }
 0x1a2   : > { %2995 = vmatmul.bf16.gmra.mxu1 %v2868_v49 }
 0x1a3   : > { %2342 = vmatmul.bf16.gmra.mxu3 %v2215_v30  ;;  %15007 = vst [vmem:[#allocation16_spill] sm:$0xff] %v12192_v38  ;;  %v2538_v43 = vrot.slane %v2536_v40, 2  ;;  %v1744_v30 = vpop.f32.mrf.mxu1  ;;  %v1579_v10 = vpop.f32.mrf.mxu0  ;;  %v2547_v27 = vrot.slane %v2545_v12, 2  ;;  %v11111_v12 = vld [vmem:[#allocation2 + $0x58] sm:$0xff] }
 0x1a4   : > { %v12209_v50 = vadd.f32 %v1744_v30, %v1579_v10 }
 0x1a5   : > { %1952 = vmatmul.bf16.gmra.mxu2 %v1828_v54  ;;  %v2539_v53 = vor.u32 %v2538_v43, %v2535_v11  ;;  %v1831_v43 = vrot.slane %v12082_v51, 1  ;;  %v2548_v30 = vor.u32 %v2547_v27, %v2544_v46 }
 0x1a6   : > { %v1784_v8 = vpop.f32.mrf.mxu3 }
 0x1a7   : > { %v2540_v14 = vsel %vm2460_vm6, %v2530_v57, %v2539_v53  ;;  %v2549_v28 = vsel %vm2460_vm6, %v2539_v53, %v2548_v30 }
 0x1a8   : > { %v1614_v16 = vpop.f32.mrf.mxu2  ;;  %2740 = vmatmul.bf16.gmra.mxu0 %v2540_v14 }
 0x1a9   : > { %v12198_v20 = vadd.f32 %v1779_v9, %v1614_v16  ;;  %v2870_v9 = vsel %vm2853_vm5, %v2867_v42, %v2869_v34 }
 0x1ab   : > { %15008 = vst [vmem:[#allocation17_spill] sm:$0xff] %v12198_v20  ;;  %v1746_v42 = vpop.f32.mrf.mxu1  ;;  %v1581_v59 = vpop.f32.mrf.mxu0  ;;  %v11415_v20 = vld [vmem:[#allocation2 + $0x50] sm:$0xff] }
 0x1ac   : > { %v12213_v11 = vadd.f32 %v1746_v42, %v1581_v59  ;;  %v11171_v42 = vld [vmem:[#allocation7 + $0x1d8] sm:$0xff] }
 0x1ad   : > { %3739 = vmatpush.bf16.msra.mxu3 %v11171_v42 }
 0x1ae   : > { %v1786_v6 = vpop.f32.mrf.mxu3 }
 0x1b0   : > { %v1616_v49 = vpop.f32.mrf.mxu2 }
 0x1b1   : > { %v12205_v61 = vadd.f32 %v1781_v29, %v1616_v49  ;;  %v2218_v29 = vrot.slane %v11110_v21, 1 }
 0x1b2   : > { %3000 = vmatmul.bf16.gmra.mxu1 %v2870_v9 }
 0x1b3   : > { %2347 = vmatmul.bf16.gmra.mxu3 %v2217_v15  ;;  %15009 = vst [vmem:[#allocation18_spill] sm:$0xff] %v12205_v61  ;;  %v2219_v57 = vsel %vm1815_vm4, %v2216_v1, %v2218_v29  ;;  %v2871_v15 = vrot.slane %v11110_v21, 2  ;;  %v2706_v14 = vpop.f32.mrf.mxu0  ;;  %v11163_v1 = vld [vmem:[#allocation7 + $0x198] sm:$0xff]  ;;  %v2966_v51 = vpop.f32.mrf.mxu1  ;;  %v2551_v21 = vshrl.u32 %v11111_v12, 16 }
 0x1b4   : > { %3346 = vmatpush.bf16.msra.mxu2 %v11163_v1 }
 0x1b5   : > { %1957 = vmatmul.bf16.gmra.mxu2 %v1830_v0  ;;  %v2872_v9 = vsel %vm2853_vm5, %v2869_v34, %v2871_v15  ;;  %v1832_v0 = vsel %vm1815_vm4, %v1829_v26, %v1831_v43  ;;  %v2553_v27 = vrot.slane %v2551_v21, 1 }
 0x1b6   : > { %v1789_v54 = vpop.f32.mrf.mxu3 }
 0x1b8   : > { %v1619_v63 = vpop.f32.mrf.mxu2  ;;  %2745 = vmatmul.bf16.gmra.mxu0 %v2549_v28 }
 0x1b9   : > { %v12211_v40 = vadd.f32 %v1784_v8, %v1619_v63  ;;  %v2554_v63 = vshll.u32 %v11111_v12, 16 }
 0x1bb   : > { %15010 = vst [vmem:[#allocation19_spill] sm:$0xff] %v12211_v40  ;;  %v2708_v46 = vpop.f32.mrf.mxu0  ;;  %v2968_v40 = vpop.f32.mrf.mxu1 }
 0x1be   : > { %v1791_v16 = vpop.f32.mrf.mxu3 }
 0x1c0   : > { %v1621_v49 = vpop.f32.mrf.mxu2 }
 0x1c1   : > { %v12218_v8 = vadd.f32 %v1786_v6, %v1621_v49  ;;  %v2220_v6 = vrot.slane %v11111_v12, 1  ;;  %v11414_v49 = vld [vmem:[#allocation2 + $0x48] sm:$0xff] }
 0x1c2   : > { %3005 = vmatmul.bf16.gmra.mxu1 %v2872_v9  ;;  %v1833_v9 = vrot.slane %v11414_v49, 1 }
 0x1c3   : > { %2352 = vmatmul.bf16.gmra.mxu3 %v2219_v57  ;;  %15011 = vst [vmem:[#allocation20_spill] sm:$0xff] %v12218_v8  ;;  %v2556_v57 = vrot.slane %v2554_v63, 2  ;;  %v2221_v53 = vsel %vm1815_vm4, %v2218_v29, %v2220_v6  ;;  %v11179_v8 = vld [vmem:[#allocation7 + $0x218] sm:$0xff]  ;;  %v2711_v63 = vpop.f32.mrf.mxu0 }
 0x1c4   : > { %3999 = vmatpush.bf16.msra.mxu0 %v11179_v8  ;;  %v1834_v42 = vsel %vm1815_vm4, %v1831_v43, %v1833_v9 }
 0x1c5   : > { %1962 = vmatmul.bf16.gmra.mxu2 %v1832_v0  ;;  %v2873_v0 = vrot.slane %v11111_v12, 2  ;;  %v2557_v28 = vor.u32 %v2556_v57, %v2553_v27 }
 0x1c6   : > { %v2313_v10 = vpop.f32.mrf.mxu3 }
 0x1c7   : > { %v2874_v61 = vsel %vm2853_vm5, %v2871_v15, %v2873_v0  ;;  %v2558_v29 = vsel %vm2460_vm6, %v2548_v30, %v2557_v28  ;;  %v1835_v30 = vrot.slane %v11415_v20, 1 }
 0x1c8   : > { %v1624_v59 = vpop.f32.mrf.mxu2  ;;  %2750 = vmatmul.bf16.gmra.mxu0 %v2558_v29 }
 0x1c9   : > { %v12222_v34 = vadd.f32 %v1789_v54, %v1624_v59  ;;  %v11112_v59 = vld [vmem:[#allocation2 + $0x60] sm:$0xff] }
 0x1ca   : > { %v2560_v12 = vshrl.u32 %v11112_v59, 16  ;;  %v2563_v27 = vshll.u32 %v11112_v59, 16  ;;  %v2222_v49 = vrot.slane %v11112_v59, 1 }
 0x1cb   : > { %15012 = vst [vmem:[#allocation21_spill] sm:$0xff] %v12222_v34  ;;  %v2713_v8 = vpop.f32.mrf.mxu0 }
 0x1cc   : > { %v2565_v43 = vrot.slane %v2563_v27, 2  ;;  %v2223_v34 = vsel %vm1815_vm4, %v2220_v6, %v2222_v49 }
 0x1ce   : > { %v2315_v26 = vpop.f32.mrf.mxu3 }
 0x1cf   : > { %v2971_v15 = vpop.f32.mrf.mxu1 }
 0x1d0   : > { %v1626_v1 = vpop.f32.mrf.mxu2 }
 0x1d1   : > { %v12226_v54 = vadd.f32 %v1791_v16, %v1626_v1 }
 0x1d2   : > { %3010 = vmatmul.bf16.gmra.mxu1 %v2874_v61 }
 0x1d3   : > { %2357 = vmatmul.bf16.gmra.mxu3 %v2221_v53  ;;  %15013 = vst [vmem:[#allocation22_spill] sm:$0xff] %v12226_v54  ;;  %v2562_v54 = vrot.slane %v2560_v12, 1 }
 0x1d5   : > { %1967 = vmatmul.bf16.gmra.mxu2 %v1834_v42  ;;  %v2875_v42 = vrot.slane %v11112_v59, 2  ;;  %v2566_v29 = vor.u32 %v2565_v43, %v2562_v54 }
 0x1d6   : > { %v2318_v21 = vpop.f32.mrf.mxu3 }
 0x1d7   : > { %v2567_v6 = vsel %vm2460_vm6, %v2557_v28, %v2566_v29 }
 0x1d8   : > { %v1928_v57 = vpop.f32.mrf.mxu2  ;;  %2755 = vmatmul.bf16.gmra.mxu0 %v2567_v6 }
 0x1d9   : > { %v2018_v53 = vadd.f32 %v1928_v57, %v12099_v33  ;;  %v2876_v33 = vsel %vm2853_vm5, %v2873_v0, %v2875_v42 }
 0x1db   : > { %v2403_v16 = vadd.f32 %v2313_v10, %v2018_v53  ;;  %v1836_v10 = vsel %vm1815_vm4, %v1833_v9, %v1835_v30  ;;  %v2973_v53 = vpop.f32.mrf.mxu1 }
 0x1dd   : > { %v2796_v61 = vadd.f32 %v2706_v14, %v2403_v16  ;;  %v2716_v14 = vpop.f32.mrf.mxu0 }
 0x1de   : > { %v2320_v1 = vpop.f32.mrf.mxu3 }
 0x1df   : > { %v12232_v38 = vadd.f32 %v2966_v51, %v2796_v61  ;;  %v12238_v51 = vld [vmem:[#allocation2 + $0x68] sm:$0xff] }
 0x1e0   : > { %v1930_v37 = vpop.f32.mrf.mxu2  ;;  %v11170_v61 = vld [vmem:[#allocation7 + $0x1d0] sm:$0xff]  ;;  %v2877_v6 = vrot.slane %v12238_v51, 2 }
 0x1e1   : > { %v2019_v57 = vadd.f32 %v1930_v37, %v12110_v2  ;;  %v2572_v2 = vshll.u32 %v12238_v51, 16  ;;  %3740 = vmatpush.bf16.msra.mxu3 %v11170_v61 }
 0x1e2   : > { %3015 = vmatmul.bf16.gmra.mxu1 %v2876_v33 }
 0x1e3   : > { %2362 = vmatmul.bf16.gmra.mxu3 %v2223_v34  ;;  %v2404_v12 = vadd.f32 %v2315_v26, %v2019_v57  ;;  %v2569_v34 = vshrl.u32 %v12238_v51, 16  ;;  %v2224_v26 = vrot.slane %v12238_v51, 1  ;;  %v2574_v43 = vrot.slane %v2572_v2, 2  ;;  %v11416_v57 = vld [vmem:[#allocation2 + $0x58] sm:$0xff] }
 0x1e5   : > { %1972 = vmatmul.bf16.gmra.mxu2 %v1836_v10  ;;  %v2797_v20 = vadd.f32 %v2708_v46, %v2404_v12  ;;  %v2718_v28 = vpop.f32.mrf.mxu0  ;;  %v2571_v16 = vrot.slane %v2569_v34, 1  ;;  %v11162_v46 = vld [vmem:[#allocation7 + $0x190] sm:$0xff]  ;;  %v1837_v10 = vrot.slane %v11416_v57, 1  ;;  %v2976_v12 = vpop.f32.mrf.mxu1  ;;  %v2878_v34 = vsel %vm2853_vm5, %v2875_v42, %v2877_v6 }
 0x1e6   : > { %v2323_v27 = vpop.f32.mrf.mxu3  ;;  %3347 = vmatpush.bf16.msra.mxu2 %v11162_v46  ;;  %v11178_v46 = vld [vmem:[#allocation7 + $0x210] sm:$0xff] }
 0x1e7   : > { %v12240_v54 = vadd.f32 %v2968_v40, %v2797_v20  ;;  %v2225_v40 = vsel %vm1815_vm4, %v2222_v49, %v2224_v26  ;;  %v2575_v20 = vor.u32 %v2574_v43, %v2571_v16  ;;  %4000 = vmatpush.bf16.msra.mxu0 %v11178_v46 }
 0x1e8   : > { %v1933_v37 = vpop.f32.mrf.mxu2 }
 0x1e9   : > { %v2020_v9 = vadd.f32 %v1933_v37, %v12120_v17 }
 0x1eb   : > { %v2405_v0 = vadd.f32 %v2318_v21, %v2020_v9 }
 0x1ed   : > { %v2798_v33 = vadd.f32 %v2711_v63, %v2405_v0  ;;  %v1838_v63 = vsel %vm1815_vm4, %v1835_v30, %v1837_v10  ;;  %v2721_v9 = vpop.f32.mrf.mxu0  ;;  %v2576_v0 = vsel %vm2460_vm6, %v2566_v29, %v2575_v20  ;;  %v2978_v43 = vpop.f32.mrf.mxu1 }
 0x1ee   : > { %v2325_v59 = vpop.f32.mrf.mxu3  ;;  %2760 = vmatmul.bf16.gmra.mxu0 %v2576_v0 }
 0x1ef   : > { %v12248_v17 = vadd.f32 %v2971_v15, %v2798_v33  ;;  %v12254_v15 = vld [vmem:[#allocation2 + $0x70] sm:$0xff] }
 0x1f0   : > { %v1935_v21 = vpop.f32.mrf.mxu2  ;;  %v2578_v42 = vshrl.u32 %v12254_v15, 16  ;;  %v2226_v61 = vrot.slane %v12254_v15, 1 }
 0x1f1   : > { %v2021_v2 = vadd.f32 %v1935_v21, %v12124_v45  ;;  %v2581_v45 = vshll.u32 %v12254_v15, 16 }
 0x1f2   : > { %3020 = vmatmul.bf16.gmra.mxu1 %v2878_v34  ;;  %v2227_v34 = vsel %vm1815_vm4, %v2224_v26, %v2226_v61 }
 0x1f3   : > { %2367 = vmatmul.bf16.gmra.mxu3 %v2225_v40  ;;  %v2406_v49 = vadd.f32 %v2320_v1, %v2021_v2  ;;  %v2583_v57 = vrot.slane %v2581_v45, 2 }
 0x1f5   : > { %1977 = vmatmul.bf16.gmra.mxu2 %v1838_v63  ;;  %v2799_v51 = vadd.f32 %v2713_v8, %v2406_v49  ;;  %v2723_v40 = vpop.f32.mrf.mxu0  ;;  %v2580_v8 = vrot.slane %v2578_v42, 1  ;;  %v2879_v63 = vrot.slane %v12254_v15, 2  ;;  %v2981_v42 = vpop.f32.mrf.mxu1  ;;  %v12272_v15 = vld [vmem:[#allocation2 + $0x78] sm:$0xff] }
 0x1f6   : > { %v2328_v37 = vpop.f32.mrf.mxu3 }
 0x1f7   : > { %v12256_v16 = vadd.f32 %v2973_v53, %v2799_v51  ;;  %v11417_v53 = vld [vmem:[#allocation2 + $0x60] sm:$0xff]  ;;  %v2584_v0 = vor.u32 %v2583_v57, %v2580_v8 }
 0x1f8   : > { %v1938_v30 = vpop.f32.mrf.mxu2  ;;  %v1839_v2 = vrot.slane %v11417_v53, 1 }
 0x1f9   : > { %v2022_v1 = vadd.f32 %v1938_v30, %v12131_v56  ;;  %v2880_v56 = vsel %vm2853_vm5, %v2877_v6, %v2879_v63  ;;  %v2585_v30 = vsel %vm2460_vm6, %v2575_v20, %v2584_v0  ;;  %v2587_v6 = vshrl.u32 %v12272_v15, 16 }
 0x1fa   : > { %v1840_v51 = vsel %vm1815_vm4, %v1837_v10, %v1839_v2 }
 0x1fb   : > { %v2407_v29 = vadd.f32 %v2323_v27, %v2022_v1 }
 0x1fd   : > { %v2800_v21 = vadd.f32 %v2716_v14, %v2407_v29  ;;  %v12269_v26 = vpop.f32.mrf.mxu0  ;;  %v2983_v53 = vpop.f32.mrf.mxu1 }
 0x1fe   : > { %v2330_v33 = vpop.f32.mrf.mxu3  ;;  %2765 = vmatmul.bf16.gmra.mxu0 %v2585_v30 }
 0x1ff   : > { %v12264_v49 = vadd.f32 %v2976_v12, %v2800_v21 }
 0x200   : > { %v1940_v46 = vpop.f32.mrf.mxu2 }
 0x201   : > { %v2023_v27 = vadd.f32 %v1940_v46, %v12135_v13  ;;  %v2590_v13 = vshll.u32 %v12272_v15, 16 }
 0x202   : > { %3025 = vmatmul.bf16.gmra.mxu1 %v2880_v56  ;;  %v11418_v56 = vld [vmem:[#allocation2 + $0x68] sm:$0xff] }
 0x203   : > { %2372 = vmatmul.bf16.gmra.mxu3 %v2227_v34  ;;  %v2408_v14 = vadd.f32 %v2325_v59, %v2023_v27  ;;  %v2228_v59 = vrot.slane %v12272_v15, 1  ;;  %v2592_v21 = vrot.slane %v2590_v13, 2  ;;  %v11161_v34 = vld [vmem:[#allocation7 + $0x188] sm:$0xff]  ;;  %v1841_v27 = vrot.slane %v11418_v56, 1 }
 0x204   : > { %3348 = vmatpush.bf16.msra.mxu2 %v11161_v34 }
 0x205   : > { %1982 = vmatmul.bf16.gmra.mxu2 %v1840_v51  ;;  %v2801_v12 = vadd.f32 %v2718_v28, %v2408_v14  ;;  %v12282_v20 = vpop.f32.mrf.mxu0  ;;  %v2589_v28 = vrot.slane %v2587_v6, 1  ;;  %v2229_v46 = vsel %vm1815_vm4, %v2226_v61, %v2228_v59  ;;  %v2881_v51 = vrot.slane %v12272_v15, 2 }
 0x206   : > { %v2333_v45 = vpop.f32.mrf.mxu3 }
 0x207   : > { %v12274_v1 = vadd.f32 %v2978_v43, %v2801_v12  ;;  %v2593_v14 = vor.u32 %v2592_v21, %v2589_v28  ;;  %v2882_v12 = vsel %vm2853_vm5, %v2879_v63, %v2881_v51 }
 0x208   : > { %v1943_v10 = vpop.f32.mrf.mxu2 }
 0x209   : > { %v2024_v29 = vadd.f32 %v1943_v10, %v12144_v18  ;;  %v2594_v15 = vsel %vm2460_vm6, %v2584_v0, %v2593_v14  ;;  %v742_v0 = vrot.slane %v12073_v23, 4 }
 0x20b   : > { %v2409_v8 = vadd.f32 %v2328_v37, %v2024_v29  ;;  %v11169_v37 = vld [vmem:[#allocation7 + $0x1c8] sm:$0xff]  ;;  %1066 = vst [vmem:[#allocation1 + $0x20] ss:$4 sm:$0xff] %v742_v0  ;;  %v12321_v0 = vld [vmem:[#allocation2 + $0x88] sm:$0xff] }
 0x20c   : > { %3741 = vmatpush.bf16.msra.mxu3 %v11169_v37 }
 0x20d   : > { %v2802_v43 = vadd.f32 %v2721_v9, %v2409_v8  ;;  %v1842_v9 = vsel %vm1815_vm4, %v1839_v2, %v1841_v27  ;;  %v12291_v10 = vpop.f32.mrf.mxu0  ;;  %v2986_v8 = vpop.f32.mrf.mxu1  ;;  %v11177_v2 = vld [vmem:[#allocation7 + $0x208] sm:$0xff] }
 0x20e   : > { %v12280_v57 = vpop.f32.mrf.mxu3  ;;  %2770 = vmatmul.bf16.gmra.mxu0 %v2594_v15 }
 0x20f   : > { %v12286_v18 = vadd.f32 %v2981_v42, %v2802_v43  ;;  %v12294_v42 = vld [vmem:[#allocation2 + $0x80] sm:$0xff]  ;;  %4001 = vmatpush.bf16.msra.mxu0 %v11177_v2  ;;  %v743_v43 = vrot.slane %v12073_v23, 5 }
 0x210   : > { %v1945_v30 = vpop.f32.mrf.mxu2  ;;  %v2599_v63 = vshll.u32 %v12294_v42, 16  ;;  %v2883_v15 = vrot.slane %v12294_v42, 2 }
 0x211   : > { %v2025_v6 = vadd.f32 %v1945_v30, %v12148_v47  ;;  %v2596_v47 = vshrl.u32 %v12294_v42, 16  ;;  %1068 = vst [vmem:[#allocation1 + $0x21] ss:$4 sm:$0xff] %v743_v43 }
 0x212   : > { %3030 = vmatmul.bf16.gmra.mxu1 %v2882_v12  ;;  %v2601_v12 = vrot.slane %v2599_v63, 2 }
 0x213   : > { %2377 = vmatmul.bf16.gmra.mxu3 %v2229_v46  ;;  %v2410_v61 = vadd.f32 %v2330_v33, %v2025_v6  ;;  %v2230_v33 = vrot.slane %v12294_v42, 1  ;;  %v2598_v30 = vrot.slane %v2596_v47, 1  ;;  %v2884_v47 = vsel %vm2853_vm5, %v2881_v51, %v2883_v15 }
 0x215   : > { %1987 = vmatmul.bf16.gmra.mxu2 %v1842_v9  ;;  %v2803_v29 = vadd.f32 %v2723_v40, %v2410_v61  ;;  %v744_v40 = vrot.slane %v12073_v23, 6  ;;  %v12306_v37 = vpop.f32.mrf.mxu0  ;;  %v11419_v9 = vld [vmem:[#allocation2 + $0x70] sm:$0xff]  ;;  %v2988_v2 = vpop.f32.mrf.mxu1 }
 0x216   : > { %v2338_v13 = vpop.f32.mrf.mxu3  ;;  %v1843_v61 = vrot.slane %v11419_v9, 1 }
 0x217   : > { %v12296_v28 = vadd.f32 %v2983_v53, %v2803_v29  ;;  %v745_v53 = vrot.slane %v12073_v23, 7  ;;  %1070 = vst [vmem:[#allocation1 + $0x22] ss:$4 sm:$0xff] %v744_v40  ;;  %v2602_v23 = vor.u32 %v2601_v12, %v2598_v30 }
 0x218   : > { %v1948_v21 = vpop.f32.mrf.mxu2 }
 0x219   : > { %v2026_v34 = vadd.f32 %v1948_v21, %v12157_v58  ;;  %v2231_v58 = vsel %vm1815_vm4, %v2228_v59, %v2230_v33  ;;  %1072 = vst [vmem:[#allocation1 + $0x23] ss:$4 sm:$0xff] %v745_v53  ;;  %v2603_v42 = vsel %vm2460_vm6, %v2593_v14, %v2602_v23 }
 0x21b   : > { %v2411_v46 = vadd.f32 %v2333_v45, %v2026_v34 }
 0x21d   : > { %v2804_v6 = vadd.f32 %v12269_v26, %v2411_v46  ;;  %v1844_v26 = vsel %vm1815_vm4, %v1841_v27, %v1843_v61  ;;  %v12317_v34 = vpop.f32.mrf.mxu0  ;;  %v2608_v27 = vshll.u32 %v12321_v0, 16  ;;  %v2991_v53 = vpop.f32.mrf.mxu1 }
 0x21e   : > { %v2340_v56 = vpop.f32.mrf.mxu3  ;;  %2775 = vmatmul.bf16.gmra.mxu0 %v2603_v42 }
 0x21f   : > { %v12311_v29 = vadd.f32 %v2986_v8, %v2804_v6 }
 0x220   : > { %v1950_v45 = vpop.f32.mrf.mxu2  ;;  %v1074_v43 = vld [vmem:[#allocation1 + $0x20] sm:$0xff] }
 0x221   : > { %v2027_v63 = vadd.f32 %v1950_v45, %v12161_v7  ;;  %1150 = vst [vmem:[#allocation2 + $0x94] sm:$0xf] %v1074_v43  ;;  %v2605_v7 = vshrl.u32 %v12321_v0, 16 }
 0x222   : > { %3035 = vmatmul.bf16.gmra.mxu1 %v2884_v47 }
 0x223   : > { %2382 = vmatmul.bf16.gmra.mxu3 %v2231_v58  ;;  %v2412_v59 = vadd.f32 %v12280_v57, %v2027_v63  ;;  %v617_v57 = vsel %vm11793_vm2, %v12062_v22, 0  ;;  %v2607_v6 = vrot.slane %v2605_v7, 1  ;;  %v2610_v58 = vrot.slane %v2608_v27, 2  ;;  %v11160_v7 = vld [vmem:[#allocation7 + $0x180] sm:$0xff] }
 0x224   : > { %1076 = vst [vmem:[#allocation1] ss:$4 sm:$0xff] %v617_v57  ;;  %v2885_v22 = vrot.slane %v12321_v0, 2  ;;  %v11168_v27 = vld [vmem:[#allocation7 + $0x1c0] sm:$0xff]  ;;  %3349 = vmatpush.bf16.msra.mxu2 %v11160_v7 }
 0x225   : > { %1992 = vmatmul.bf16.gmra.mxu2 %v1844_v26  ;;  %v2805_v8 = vadd.f32 %v12282_v20, %v2412_v59  ;;  %v2232_v20 = vrot.slane %v12321_v0, 1  ;;  %v12332_v12 = vpop.f32.mrf.mxu0  ;;  %v2993_v57 = vpop.f32.mrf.mxu1  ;;  %3742 = vmatpush.bf16.msra.mxu3 %v11168_v27 }
 0x226   : > { %v2343_v21 = vpop.f32.mrf.mxu3 }
 0x227   : > { %v12323_v51 = vadd.f32 %v2988_v2, %v2805_v8  ;;  %v2233_v45 = vsel %vm1815_vm4, %v2230_v33, %v2232_v20  ;;  %v11420_v2 = vld [vmem:[#allocation2 + $0x78] sm:$0xff] }
 0x228   : > { %v1953_v40 = vpop.f32.mrf.mxu2  ;;  %v1845_v47 = vrot.slane %v11420_v2, 1 }
 0x229   : > { %v2028_v14 = vadd.f32 %v1953_v40, %v12170_v60  ;;  %v2611_v60 = vor.u32 %v2610_v58, %v2607_v6 }
 0x22a   : > { %v1846_v8 = vsel %vm1815_vm4, %v1843_v61, %v1845_v47 }
 0x22b   : > { %v2413_v46 = vadd.f32 %v2338_v13, %v2028_v14  ;;  %v1077_v26 = vld [vmem:[#allocation1] sm:$0xff]  ;;  %v2886_v13 = vsel %vm2853_vm5, %v2883_v15, %v2885_v22  ;;  %v2612_v0 = vsel %vm2460_vm6, %v2602_v23, %v2611_v60  ;;  %v12346_v14 = vld [vmem:[#allocation2 + $0x90] sm:$0xff] }
 0x22c   : > { %1151 = vst [vmem:[#allocation2 + $0x98] sm:$0x1] %v1077_v26  ;;  %v2617_v61 = vshll.u32 %v12346_v14, 16 }
 0x22d   : > { %v2806_v9 = vadd.f32 %v12291_v10, %v2413_v46  ;;  %v12342_v43 = vpop.f32.mrf.mxu0 }
 0x22e   : > { %v2345_v30 = vpop.f32.mrf.mxu3  ;;  %2780 = vmatmul.bf16.gmra.mxu0 %v2612_v0 }
 0x22f   : > { %v12337_v63 = vadd.f32 %v2991_v53, %v2806_v9  ;;  %v2234_v53 = vrot.slane %v12346_v14, 1  ;;  %v2619_v9 = vrot.slane %v2617_v61, 2 }
 0x230   : > { %v1955_v59 = vpop.f32.mrf.mxu2 }
 0x231   : > { %v2029_v42 = vadd.f32 %v1955_v59, %v12174_v48  ;;  %v2235_v59 = vsel %vm1815_vm4, %v2232_v20, %v2234_v53 }
 0x232   : > { %3040 = vmatmul.bf16.gmra.mxu1 %v2886_v13  ;;  %v11421_v13 = vld [vmem:[#allocation2 + $0x80] sm:$0xff] }
 0x233   : > { %2387 = vmatmul.bf16.gmra.mxu3 %v2233_v45  ;;  %v2414_v10 = vadd.f32 %v2340_v56, %v2029_v42  ;;  %v2614_v56 = vshrl.u32 %v12346_v14, 16  ;;  %v11176_v45 = vld [vmem:[#allocation7 + $0x200] sm:$0xff]  ;;  %v1847_v42 = vrot.slane %v11421_v13, 1 }
 0x234   : > { %v2439_v2 = vld [vmem:[#allocation2 + $0x98] sm:$0x3]  ;;  %4002 = vmatpush.bf16.msra.mxu0 %v11176_v45 }
 0x235   : > { %1997 = vmatmul.bf16.gmra.mxu2 %v1846_v8  ;;  %v2807_v40 = vadd.f32 %v12306_v37, %v2414_v10  ;;  %v12356_v37 = vpop.f32.mrf.mxu0  ;;  %v2616_v58 = vrot.slane %v2614_v56, 1  ;;  %v2887_v8 = vrot.slane %v12346_v14, 2  ;;  %v2458_v10 = vunpack.c.l.b16 %v2439_v2 }
 0x236   : > { %v2348_v33 = vpop.f32.mrf.mxu3 }
 0x237   : > { %v12348_v48 = vadd.f32 %v2993_v57, %v2807_v40  ;;  %v2888_v7 = vsel %vm2853_vm5, %v2885_v22, %v2887_v8 }
 0x238   : > { %v1958_v15 = vpop.f32.mrf.mxu2 }
 0x239   : > { %v2030_v23 = vadd.f32 %v1958_v15, %v12183_v24  ;;  %v2090_v24 = vld [vmem:[#allocation2 + $0x98] sm:$0x1]  ;;  %v2459_v15 = vpack.c.b16 %v2458_v10, %v2458_v10 }
 0x23a   : > { %v2181_v57 = vunpack.c.l.b16 %v2090_v24 }
 0x23b   : > { %v2415_v46 = vadd.f32 %v2343_v21, %v2030_v23  ;;  %v2620_v21 = vor.u32 %v2619_v9, %v2616_v58  ;;  %v3093_v58 = vld [vmem:[#allocation2 + $0x14] sm:$0xf]  ;;  %v2623_v22 = vshrl.u32 %v2459_v15, 16 }
 0x23c   : > { %v2200_v23 = vpack.c.b16 %v2181_v57, %v2181_v57  ;;  %v11422_v57 = vld [vmem:[#allocation2 + $0x88] sm:$0xff] }
 0x23d   : > { %v12359_v26 = vadd.f32 %v12317_v34, %v2415_v46  ;;  %v1848_v34 = vsel %vm1815_vm4, %v1845_v47, %v1847_v42  ;;  %v2746_v56 = vpop.f32.mrf.mxu0  ;;  %v2621_v61 = vsel %vm2460_vm6, %v2611_v60, %v2620_v21  ;;  %v3092_v46 = vld [vmem:[#allocation2 + $0x10] sm:$0xc]  ;;  %v3184_v47 = vunpack.c.l.b16 %v3093_v58 }
 0x23e   : > { %v12354_v6 = vpop.f32.mrf.mxu3  ;;  %2785 = vmatmul.bf16.gmra.mxu0 %v2621_v61  ;;  %v3183_v45 = vunpack.c.l.b16 %v3092_v46  ;;  %v2236_v2 = vrot.slane %v2200_v23, 1  ;;  %v2625_v24 = vrot.slane %v2623_v22, 1 }
 0x240   : > { %v1960_v0 = vpop.f32.mrf.mxu2 }
 0x241   : > { %v2031_v27 = vadd.f32 %v1960_v0, %v12187_v25  ;;  %v2626_v25 = vshll.u32 %v2459_v15, 16  ;;  %v12371_v0 = vpack.c.b16 %v3184_v47, %v3183_v45 }
 0x242   : > { %3045 = vmatmul.bf16.gmra.mxu1 %v2888_v7  ;;  %v2237_v7 = vsel %vm1815_vm4, %v2234_v53, %v2236_v2  ;;  %v3870_v2 = vld [vmem:[#allocation2 + $0x10] sm:$0x8] }
 0x243   : > { %2392 = vmatmul.bf16.gmra.mxu3 %v2235_v59  ;;  %v2416_v40 = vadd.f32 %v2345_v30, %v2031_v27  ;;  %v2628_v10 = vrot.slane %v2626_v25, 2  ;;  %v12377_v27 = vld [vmem:[#allocation2 + $0x18] sm:$0xff]  ;;  %v3503_v58 = vshll.u32 %v12371_v0, 16 }
 0x244   : > { %v3511_v53 = vshll.u32 %v12377_v27, 16 }
 0x245   : > { %2002 = vmatmul.bf16.gmra.mxu2 %v1848_v34  ;;  %v12368_v14 = vadd.f32 %v12332_v12, %v2416_v40  ;;  %v2748_v60 = vpop.f32.mrf.mxu0  ;;  %v1849_v34 = vrot.slane %v11422_v57, 1  ;;  %v2889_v40 = vrot.slane %v2459_v15, 2  ;;  %v2629_v61 = vor.u32 %v2628_v10, %v2625_v24 }
 0x246   : > { %v2353_v20 = vpop.f32.mrf.mxu3  ;;  %v3513_v24 = vrot.slane %v3511_v53, 3  ;;  %v3889_v10 = vunpack.c.l.b16 %v3870_v2 }
 0x247   : > { %v2890_v23 = vsel %vm2853_vm5, %v2887_v8, %v2889_v40  ;;  %v1850_v22 = vsel %vm1815_vm4, %v1847_v42, %v1849_v34  ;;  %v2630_v45 = vsel %vm2460_vm6, %v2620_v21, %v2629_v61  ;;  %v3505_v8 = vrot.slane %v3503_v58, 3 }
 0x248   : > { %v1963_v9 = vpop.f32.mrf.mxu2  ;;  %v3890_v61 = vpack.c.b16 %v3184_v47, %v3889_v10 }
 0x249   : > { %v2032_v30 = vadd.f32 %v1963_v9, %v12196_v41 }
 0x24a   : > { %v3892_v58 = vrot.slane %v3890_v61, 3 }
 0x24b   : > { %v2417_v59 = vadd.f32 %v2348_v33, %v2032_v30  ;;  %v3500_v33 = vshrl.u32 %v12371_v0, 16 }
 0x24d   : > { %v12374_v12 = vadd.f32 %v12342_v43, %v2417_v59  ;;  %v3508_v43 = vshrl.u32 %v12377_v27, 16  ;;  %v2751_v9 = vpop.f32.mrf.mxu0  ;;  %v3502_v30 = vrot.slane %v3500_v33, 2 }
 0x24e   : > { %v2355_v13 = vpop.f32.mrf.mxu3  ;;  %2790 = vmatmul.bf16.gmra.mxu0 %v2630_v45 }
 0x24f   : > { %v3510_v59 = vrot.slane %v3508_v43, 2  ;;  %v3506_v57 = vor.u32 %v3505_v8, %v3502_v30  ;;  %v3893_v43 = vrot.slane %v12377_v27, 3 }
 0x250   : > { %v1965_v41 = vpop.f32.mrf.mxu2 }
 0x251   : > { %v2033_v46 = vadd.f32 %v1965_v41, %v12200_v3  ;;  %v3894_v30 = vsel %vm3891_vm8, %v3892_v58, %v3893_v43 }
 0x252   : > { %3050 = vmatmul.bf16.gmra.mxu1 %v2890_v23  ;;  %v12395_v23 = vld [vmem:[#allocation2 + $0x20] sm:$0xff] }
 0x253   : > { %2397 = vmatmul.bf16.gmra.mxu3 %v2237_v7  ;;  %v2418_v15 = vadd.f32 %v12354_v6, %v2033_v46  ;;  %v3514_v6 = vor.u32 %v3513_v24, %v3510_v59  ;;  %v1851_v46 = vrot.slane %v12103_v39, 1  ;;  %v3520_v47 = vshll.u32 %v12395_v23, 16 }
 0x254   : > { %v3895_v61 = vrot.slane %v12395_v23, 3 }
 0x255   : > { %2007 = vmatmul.bf16.gmra.mxu2 %v1850_v22  ;;  %v12389_v3 = vadd.f32 %v12356_v37, %v2418_v15  ;;  %v2753_v21 = vpop.f32.mrf.mxu0  ;;  %v3515_v37 = vsel %vm3498_vm7, %v3506_v57, %v3514_v6  ;;  %v3522_v8 = vrot.slane %v3520_v47, 3 }
 0x256   : > { %v2358_v25 = vpop.f32.mrf.mxu3 }
 0x258   : > { %v1968_v7 = vpop.f32.mrf.mxu2 }
 0x259   : > { %v2034_v42 = vadd.f32 %v1968_v7, %v12209_v50 }
 0x25b   : > { %v2419_v40 = vadd.f32 %v2353_v20, %v2034_v42  ;;  %v3517_v20 = vshrl.u32 %v12395_v23, 16 }
 0x25d   : > { %v12392_v33 = vadd.f32 %v2746_v56, %v2419_v40  ;;  %v1852_v56 = vsel %vm1815_vm4, %v1849_v34, %v1851_v46  ;;  %v2756_v45 = vpop.f32.mrf.mxu0  ;;  %v3519_v2 = vrot.slane %v3517_v20, 2  ;;  %v12410_v34 = vld [vmem:[#allocation2 + $0x28] sm:$0xff]  ;;  %v3239_v40 = vrot.slane %v12371_v0, 2 }
 0x25e   : > { %v2360_v41 = vpop.f32.mrf.mxu3  ;;  %4003 = vmatmul.bf16.vlgmr.msra.gmra.mxu0 %v3894_v30  ;;  %v3529_v46 = vshll.u32 %v12410_v34, 16 }
 0x25f   : > { %v3523_v24 = vor.u32 %v3522_v8, %v3519_v2 }
 0x260   : > { %v1970_v53 = vpop.f32.mrf.mxu2  ;;  %v3531_v20 = vrot.slane %v3529_v46, 3 }
 0x261   : > { %v2035_v50 = vadd.f32 %v1970_v53, %v12213_v11 }
 0x263   : > { %3743 = vmatmul.bf16.vlgmr.msra.gmra.mxu3 %v3515_v37  ;;  %v2420_v22 = vadd.f32 %v2355_v13, %v2035_v50  ;;  %v3524_v13 = vsel %vm3498_vm7, %v3514_v6, %v3523_v24  ;;  %v3896_v50 = vsel %vm3891_vm8, %v3893_v43, %v3895_v61  ;;  %v3242_v43 = vrot.slane %v12395_v23, 2 }
 0x265   : > { %2012 = vmatmul.bf16.gmra.mxu2 %v1852_v56  ;;  %v12404_v39 = vadd.f32 %v2748_v60, %v2420_v22  ;;  %v2758_v42 = vpop.f32.mrf.mxu0  ;;  %v3240_v60 = vrot.slane %v12377_v27, 2 }
 0x266   : > { %v2363_v15 = vpop.f32.mrf.mxu3 }
 0x268   : > { %v1973_v59 = vpop.f32.mrf.mxu2 }
 0x269   : > { %v2036_v11 = vadd.f32 %v1973_v59, %v12115_v5  ;;  %v12426_v59 = vld [vmem:[#allocation2 + $0x30] sm:$0xff] }
 0x26b   : > { %v2421_v10 = vadd.f32 %v2358_v25, %v2036_v11  ;;  %v3526_v25 = vshrl.u32 %v12410_v34, 16 }
 0x26d   : > { %v12407_v57 = vadd.f32 %v2751_v9, %v2421_v10  ;;  %v3241_v9 = vsel %vm2853_vm5, %v3239_v40, %v3240_v60  ;;  %v2761_v53 = vpop.f32.mrf.mxu0  ;;  %v3528_v27 = vrot.slane %v3526_v25, 2 }
 0x26e   : > { %v2365_v7 = vpop.f32.mrf.mxu3  ;;  %4008 = vmatmul.bf16.gmra.mxu0 %v3896_v50 }
 0x26f   : > { %v3532_v56 = vor.u32 %v3531_v20, %v3528_v27 }
 0x270   : > { %v1975_v37 = vpop.f32.mrf.mxu2 }
 0x271   : > { %v2037_v5 = vadd.f32 %v1975_v37, %v12122_v31 }
 0x273   : > { %3748 = vmatmul.bf16.gmra.mxu3 %v3524_v13  ;;  %v2422_v58 = vadd.f32 %v2360_v41, %v2037_v5  ;;  %v3533_v41 = vsel %vm3498_vm7, %v3523_v24, %v3532_v56  ;;  %v3243_v13 = vsel %vm2853_vm5, %v3240_v60, %v3242_v43  ;;  %v12441_v60 = vld [vmem:[#allocation2 + $0x38] sm:$0xff] }
 0x275   : > { %3350 = vmatmul.bf16.vlgmr.msra.gmra.mxu2 %v3241_v9  ;;  %v12420_v0 = vadd.f32 %v2753_v21, %v2422_v58  ;;  %v2763_v2 = vpop.f32.mrf.mxu0  ;;  %v3897_v21 = vrot.slane %v12410_v34, 3 }
 0x276   : > { %v2368_v6 = vpop.f32.mrf.mxu3 }
 0x277   : > { %v3898_v24 = vsel %vm3891_vm8, %v3895_v61, %v3897_v21  ;;  %v3244_v61 = vrot.slane %v12410_v34, 2 }
 0x278   : > { %v1978_v47 = vpop.f32.mrf.mxu2 }
 0x279   : > { %v2038_v31 = vadd.f32 %v1978_v47, %v12133_v62  ;;  %v3535_v62 = vshrl.u32 %v12426_v59, 16 }
 0x27b   : > { %v2423_v22 = vadd.f32 %v2363_v15, %v2038_v31  ;;  %v3538_v15 = vshll.u32 %v12426_v59, 16  ;;  %v3537_v23 = vrot.slane %v3535_v62, 2 }
 0x27d   : > { %v12423_v8 = vadd.f32 %v2756_v45, %v2423_v22  ;;  %v2766_v37 = vpop.f32.mrf.mxu0  ;;  %v3540_v25 = vrot.slane %v3538_v15, 3  ;;  %v3245_v22 = vsel %vm2853_vm5, %v3242_v43, %v3244_v61  ;;  %v12456_v43 = vld [vmem:[#allocation2 + $0x40] sm:$0xff] }
 0x27e   : > { %v2370_v30 = vpop.f32.mrf.mxu3  ;;  %4013 = vmatmul.bf16.gmra.mxu0 %v3898_v24 }
 0x27f   : > { %v3541_v9 = vor.u32 %v3540_v25, %v3537_v23 }
 0x280   : > { %v1980_v11 = vpop.f32.mrf.mxu2 }
 0x281   : > { %v2039_v10 = vadd.f32 %v1980_v11, %v12140_v19 }
 0x283   : > { %3753 = vmatmul.bf16.gmra.mxu3 %v3533_v41  ;;  %v2424_v45 = vadd.f32 %v2365_v7, %v2039_v10  ;;  %v3542_v7 = vsel %vm3498_vm7, %v3532_v56, %v3541_v9 }
 0x285   : > { %3355 = vmatmul.bf16.gmra.mxu2 %v3243_v13  ;;  %v12435_v5 = vadd.f32 %v2758_v42, %v2424_v45  ;;  %v2768_v27 = vpop.f32.mrf.mxu0  ;;  %v3899_v42 = vrot.slane %v12426_v59, 3 }
 0x286   : > { %v2373_v40 = vpop.f32.mrf.mxu3 }
 0x287   : > { %v3900_v56 = vsel %vm3891_vm8, %v3897_v21, %v3899_v42  ;;  %v3246_v21 = vrot.slane %v12426_v59, 2 }
 0x288   : > { %v1983_v46 = vpop.f32.mrf.mxu2 }
 0x289   : > { %v2040_v19 = vadd.f32 %v1983_v46, %v12146_v35  ;;  %v3544_v35 = vshrl.u32 %v12441_v60, 16 }
 0x28b   : > { %v2425_v58 = vadd.f32 %v2368_v6, %v2040_v19  ;;  %v3547_v6 = vshll.u32 %v12441_v60, 16  ;;  %v3546_v34 = vrot.slane %v3544_v35, 2 }
 0x28d   : > { %v12438_v20 = vadd.f32 %v2761_v53, %v2425_v58  ;;  %v2771_v11 = vpop.f32.mrf.mxu0  ;;  %v3549_v62 = vrot.slane %v3547_v6, 3  ;;  %v3247_v58 = vsel %vm2853_vm5, %v3244_v61, %v3246_v21  ;;  %v12471_v61 = vld [vmem:[#allocation2 + $0x48] sm:$0xff] }
 0x28e   : > { %v2375_v50 = vpop.f32.mrf.mxu3  ;;  %4018 = vmatmul.bf16.gmra.mxu0 %v3900_v56 }
 0x28f   : > { %v3550_v13 = vor.u32 %v3549_v62, %v3546_v34 }
 0x290   : > { %v1985_v47 = vpop.f32.mrf.mxu2 }
 0x291   : > { %v2041_v31 = vadd.f32 %v1985_v47, %v12153_v55 }
 0x293   : > { %3758 = vmatmul.bf16.gmra.mxu3 %v3542_v7  ;;  %v2426_v53 = vadd.f32 %v2370_v30, %v2041_v31  ;;  %v3551_v30 = vsel %vm3498_vm7, %v3541_v9, %v3550_v13 }
 0x295   : > { %3360 = vmatmul.bf16.gmra.mxu2 %v3245_v22  ;;  %v12450_v10 = vadd.f32 %v2763_v2, %v2426_v53  ;;  %v2773_v23 = vpop.f32.mrf.mxu0  ;;  %v3901_v2 = vrot.slane %v12441_v60, 3 }
 0x296   : > { %v2378_v41 = vpop.f32.mrf.mxu3 }
 0x297   : > { %v3902_v9 = vsel %vm3891_vm8, %v3899_v42, %v3901_v2  ;;  %v3248_v42 = vrot.slane %v12441_v60, 2 }
 0x298   : > { %v1988_v15 = vpop.f32.mrf.mxu2 }
 0x299   : > { %v2042_v55 = vadd.f32 %v1988_v15, %v12159_v4  ;;  %v3553_v4 = vshrl.u32 %v12456_v43, 16 }
 0x29b   : > { %v2427_v45 = vadd.f32 %v2373_v40, %v2042_v55  ;;  %v3556_v40 = vshll.u32 %v12456_v43, 16  ;;  %v3555_v59 = vrot.slane %v3553_v4, 2 }
 0x29d   : > { %v12453_v25 = vadd.f32 %v2766_v37, %v2427_v45  ;;  %v2776_v47 = vpop.f32.mrf.mxu0  ;;  %v3558_v35 = vrot.slane %v3556_v40, 3  ;;  %v3249_v45 = vsel %vm2853_vm5, %v3246_v21, %v3248_v42  ;;  %v12486_v21 = vld [vmem:[#allocation2 + $0x50] sm:$0xff] }
 0x29e   : > { %v2380_v24 = vpop.f32.mrf.mxu3  ;;  %4023 = vmatmul.bf16.gmra.mxu0 %v3902_v9 }
 0x29f   : > { %v3559_v22 = vor.u32 %v3558_v35, %v3555_v59 }
 0x2a0   : > { %v1990_v46 = vpop.f32.mrf.mxu2 }
 0x2a1   : > { %v2043_v19 = vadd.f32 %v1990_v46, %v12166_v36 }
 0x2a3   : > { %3763 = vmatmul.bf16.gmra.mxu3 %v3551_v30  ;;  %v2428_v37 = vadd.f32 %v2375_v50, %v2043_v19  ;;  %v3560_v50 = vsel %vm3498_vm7, %v3550_v13, %v3559_v22 }
 0x2a5   : > { %3365 = vmatmul.bf16.gmra.mxu2 %v3247_v58  ;;  %v12465_v31 = vadd.f32 %v2768_v27, %v2428_v37  ;;  %v2778_v34 = vpop.f32.mrf.mxu0  ;;  %v3903_v27 = vrot.slane %v12456_v43, 3  ;;  %v15014_v58 = vld [vmem:[#allocation15_spill] sm:$0xff] }
 0x2a6   : > { %v2383_v7 = vpop.f32.mrf.mxu3 }
 0x2a7   : > { %v3904_v13 = vsel %vm3891_vm8, %v3901_v2, %v3903_v27  ;;  %v3250_v2 = vrot.slane %v12456_v43, 2 }
 0x2a8   : > { %v1993_v6 = vpop.f32.mrf.mxu2 }
 0x2a9   : > { %v2044_v36 = vadd.f32 %v1993_v6, %v12172_v44  ;;  %v3562_v44 = vshrl.u32 %v12471_v61, 16 }
 0x2ab   : > { %v2429_v53 = vadd.f32 %v2378_v41, %v2044_v36  ;;  %v3565_v41 = vshll.u32 %v12471_v61, 16  ;;  %v3564_v60 = vrot.slane %v3562_v44, 2 }
 0x2ad   : > { %v12468_v62 = vadd.f32 %v2771_v11, %v2429_v53  ;;  %v2781_v46 = vpop.f32.mrf.mxu0  ;;  %v3567_v4 = vrot.slane %v3565_v41, 3  ;;  %v15015_v53 = vld [vmem:[#allocation16_spill] sm:$0xff] }
 0x2ae   : > { %v2385_v56 = vpop.f32.mrf.mxu3  ;;  %4028 = vmatmul.bf16.gmra.mxu0 %v3904_v13 }
 0x2af   : > { %v3568_v37 = vor.u32 %v3567_v4, %v3564_v60  ;;  %v15017_v60 = vld [vmem:[#allocation17_spill] sm:$0xff] }
 0x2b0   : > { %v1995_v15 = vpop.f32.mrf.mxu2 }
 0x2b1   : > { %v2045_v55 = vadd.f32 %v1995_v15, %v12179_v52  ;;  %v3571_v15 = vshrl.u32 %v12486_v21, 16 }
 0x2b3   : > { %3768 = vmatmul.bf16.gmra.mxu3 %v3560_v50  ;;  %v2430_v11 = vadd.f32 %v2380_v24, %v2045_v55  ;;  %v3569_v24 = vsel %vm3498_vm7, %v3559_v22, %v3568_v37  ;;  %v3251_v55 = vsel %vm2853_vm5, %v3248_v42, %v3250_v2  ;;  %v3573_v43 = vrot.slane %v3571_v15, 2  ;;  %v12501_v42 = vld [vmem:[#allocation2 + $0x58] sm:$0xff] }
 0x2b4   : > { %v3580_v15 = vshrl.u32 %v12501_v42, 16 }
 0x2b5   : > { %3370 = vmatmul.bf16.gmra.mxu2 %v3249_v45  ;;  %v12480_v19 = vadd.f32 %v2773_v23, %v2430_v11  ;;  %v2783_v35 = vpop.f32.mrf.mxu0  ;;  %v3905_v23 = vrot.slane %v12471_v61, 3 }
 0x2b6   : > { %v2388_v30 = vpop.f32.mrf.mxu3 }
 0x2b7   : > { %v3906_v22 = vsel %vm3891_vm8, %v3903_v27, %v3905_v23  ;;  %v3252_v27 = vrot.slane %v12471_v61, 2  ;;  %v3582_v61 = vrot.slane %v3580_v15, 2  ;;  %v15023_v15 = vld [vmem:[#allocation20_spill] sm:$0xff] }
 0x2b8   : > { %v1998_v40 = vpop.f32.mrf.mxu2 }
 0x2b9   : > { %v2046_v52 = vadd.f32 %v1998_v40, %v15014_v58 }
 0x2bb   : > { %v2431_v9 = vadd.f32 %v2383_v7, %v2046_v52  ;;  %v3574_v7 = vshll.u32 %v12486_v21, 16 }
 0x2bd   : > { %v12483_v6 = vadd.f32 %v2776_v47, %v2431_v9  ;;  %v2786_v41 = vpop.f32.mrf.mxu0  ;;  %v3576_v11 = vrot.slane %v3574_v7, 3  ;;  %v3253_v7 = vsel %vm2853_vm5, %v3250_v2, %v3252_v27  ;;  %v12516_v2 = vld [vmem:[#allocation2 + $0x60] sm:$0xff] }
 0x2be   : > { %v2390_v59 = vpop.f32.mrf.mxu3  ;;  %4033 = vmatmul.bf16.gmra.mxu0 %v3906_v22 }
 0x2bf   : > { %v3577_v40 = vor.u32 %v3576_v11, %v3573_v43 }
 0x2c0   : > { %v2000_v36 = vpop.f32.mrf.mxu2 }
 0x2c1   : > { %v2047_v50 = vadd.f32 %v2000_v36, %v15015_v53  ;;  %v15019_v53 = vld [vmem:[#allocation18_spill] sm:$0xff] }
 0x2c3   : > { %3773 = vmatmul.bf16.gmra.mxu3 %v3569_v24  ;;  %v2432_v47 = vadd.f32 %v2385_v56, %v2047_v50  ;;  %v3578_v56 = vsel %vm3498_vm7, %v3568_v37, %v3577_v40 }
 0x2c5   : > { %3375 = vmatmul.bf16.gmra.mxu2 %v3251_v55  ;;  %v12495_v45 = vadd.f32 %v2778_v34, %v2432_v47  ;;  %v2788_v9 = vpop.f32.mrf.mxu0  ;;  %v3907_v34 = vrot.slane %v12486_v21, 3 }
 0x2c6   : > { %v2393_v44 = vpop.f32.mrf.mxu3 }
 0x2c7   : > { %15016 = vst [vmem:[#allocation15_spill] sm:$0xff] %v12495_v45  ;;  %v3908_v37 = vsel %vm3891_vm8, %v3905_v23, %v3907_v34  ;;  %v3254_v23 = vrot.slane %v12486_v21, 2 }
 0x2c8   : > { %v2003_v13 = vpop.f32.mrf.mxu2 }
 0x2c9   : > { %v2048_v4 = vadd.f32 %v2003_v13, %v15017_v60  ;;  %v15021_v13 = vld [vmem:[#allocation19_spill] sm:$0xff] }
 0x2cb   : > { %v2433_v58 = vadd.f32 %v2388_v30, %v2048_v4  ;;  %v3583_v30 = vshll.u32 %v12501_v42, 16 }
 0x2cd   : > { %v12498_v24 = vadd.f32 %v2781_v46, %v2433_v58  ;;  %v2791_v47 = vpop.f32.mrf.mxu0  ;;  %v3585_v43 = vrot.slane %v3583_v30, 3 }
 0x2ce   : > { %v2395_v52 = vpop.f32.mrf.mxu3  ;;  %4038 = vmatmul.bf16.gmra.mxu0 %v3908_v37 }
 0x2cf   : > { %15018 = vst [vmem:[#allocation16_spill] sm:$0xff] %v12498_v24  ;;  %v3586_v4 = vor.u32 %v3585_v43, %v3582_v61 }
 0x2d0   : > { %v2005_v36 = vpop.f32.mrf.mxu2 }
 0x2d1   : > { %v2049_v50 = vadd.f32 %v2005_v36, %v15019_v53 }
 0x2d3   : > { %3778 = vmatmul.bf16.gmra.mxu3 %v3578_v56  ;;  %v2434_v46 = vadd.f32 %v2390_v59, %v2049_v50  ;;  %v3587_v59 = vsel %vm3498_vm7, %v3577_v40, %v3586_v4 }
 0x2d5   : > { %3380 = vmatmul.bf16.gmra.mxu2 %v3253_v7  ;;  %v12510_v22 = vadd.f32 %v2783_v35, %v2434_v46  ;;  %v2793_v36 = vpop.f32.mrf.mxu0  ;;  %v3909_v35 = vrot.slane %v12501_v42, 3  ;;  %v3589_v7 = vshrl.u32 %v12516_v2, 16  ;;  %v3255_v46 = vsel %vm2853_vm5, %v3252_v27, %v3254_v23 }
 0x2d6   : > { %v2398_v55 = vpop.f32.mrf.mxu3 }
 0x2d7   : > { %15020 = vst [vmem:[#allocation17_spill] sm:$0xff] %v12510_v22  ;;  %v3910_v40 = vsel %vm3891_vm8, %v3907_v34, %v3909_v35  ;;  %v3591_v21 = vrot.slane %v3589_v7, 2  ;;  %v3911_v34 = vrot.slane %v12516_v2, 3 }
 0x2d8   : > { %v2008_v11 = vpop.f32.mrf.mxu2 }
 0x2d9   : > { %v2050_v60 = vadd.f32 %v2008_v11, %v15021_v13 }
 0x2db   : > { %v2435_v58 = vadd.f32 %v2393_v44, %v2050_v60  ;;  %v3592_v44 = vshll.u32 %v12516_v2, 16  ;;  %v15025_v60 = vld [vmem:[#allocation21_spill] sm:$0xff] }
 0x2dd   : > { %v12513_v53 = vadd.f32 %v2786_v41, %v2435_v58  ;;  %v4004_v61 = vpop.f32.mrf.mxu0  ;;  %v3594_v11 = vrot.slane %v3592_v44, 3  ;;  %v15027_v44 = vld [vmem:[#allocation22_spill] sm:$0xff] }
 0x2de   : > { %v2400_v56 = vpop.f32.mrf.mxu3  ;;  %4043 = vmatmul.bf16.gmra.mxu0 %v3910_v40 }
 0x2df   : > { %15022 = vst [vmem:[#allocation18_spill] sm:$0xff] %v12513_v53 }
 0x2e0   : > { %v2010_v50 = vpop.f32.mrf.mxu2 }
 0x2e1   : > { %v2051_v30 = vadd.f32 %v2010_v50, %v15023_v15 }
 0x2e3   : > { %3783 = vmatmul.bf16.gmra.mxu3 %v3587_v59  ;;  %v2436_v41 = vadd.f32 %v2395_v52, %v2051_v30  ;;  %v3595_v59 = vor.u32 %v3594_v11, %v3591_v21  ;;  %v12533_v30 = vld [vmem:[#allocation2 + $0x68] sm:$0xff]  ;;  %v3912_v11 = vsel %vm3891_vm8, %v3909_v35, %v3911_v34 }
 0x2e5   : > { %3385 = vmatmul.bf16.gmra.mxu2 %v3255_v46  ;;  %v12525_v43 = vadd.f32 %v2788_v9, %v2436_v41  ;;  %v12528_v32 = vpop.f32.mrf.mxu0  ;;  %v3596_v52 = vsel %vm3498_vm7, %v3586_v4, %v3595_v59  ;;  %v3256_v9 = vrot.slane %v12501_v42, 2  ;;  %v3598_v41 = vshrl.u32 %v12533_v30, 16 }
 0x2e6   : > { %v3744_v37 = vpop.f32.mrf.mxu3 }
 0x2e7   : > { %15024 = vst [vmem:[#allocation19_spill] sm:$0xff] %v12525_v43  ;;  %v3257_v40 = vsel %vm2853_vm5, %v3254_v23, %v3256_v9 }
 0x2e8   : > { %v2013_v13 = vpop.f32.mrf.mxu2 }
 0x2e9   : > { %v2052_v58 = vadd.f32 %v2013_v13, %v15025_v60  ;;  %v3600_v13 = vrot.slane %v3598_v41, 2 }
 0x2eb   : > { %v2437_v50 = vadd.f32 %v2398_v55, %v2052_v58  ;;  %v3601_v55 = vshll.u32 %v12533_v30, 16 }
 0x2ed   : > { %v12530_v27 = vadd.f32 %v2791_v47, %v2437_v50  ;;  %v12543_v4 = vpop.f32.mrf.mxu0  ;;  %v3603_v60 = vrot.slane %v3601_v55, 3  ;;  %v12551_v50 = vld [vmem:[%s14968_s2] ss:$0 sm:$0xff] }
 0x2ee   : > { %v3746_v15 = vpop.f32.mrf.mxu3  ;;  %4048 = vmatmul.bf16.gmra.mxu0 %v3912_v11  ;;  %v12566_v41 = vrot.slane %v12551_v50, 4  ;;  %v12569_v55 = vrot.slane %v12551_v50, 6 }
 0x2ef   : > { %15026 = vst [vmem:[#allocation20_spill] sm:$0xff] %v12530_v27  ;;  %v12554_v23 = vor.u32 %v3603_v60, %v3600_v13  ;;  %v15029_v27 = vrot.slane %v12516_v2, 2 }
 0x2f0   : > { %v2015_v7 = vpop.f32.mrf.mxu2 }
 0x2f1   : > { %v2053_v46 = vadd.f32 %v2015_v7, %v15027_v44  ;;  %v12563_v44 = vld [vmem:[#allocation2 + $0x70] sm:$0xff]  ;;  %v3259_v43 = vsel %vm2853_vm5, %v3256_v9, %v15029_v27 }
 0x2f3   : > { %3788 = vmatmul.bf16.gmra.mxu3 %v3596_v52  ;;  %v2438_v47 = vadd.f32 %v2400_v56, %v2053_v46 }
 0x2f5   : > { %3390 = vmatmul.bf16.gmra.mxu2 %v3257_v40  ;;  %v12546_v42 = vadd.f32 %v2793_v36, %v2438_v47  ;;  %v12558_v35 = vpop.f32.mrf.mxu0  ;;  %v12561_v36 = vrot.slane %v12551_v50, 2 }
 0x2f6   : > { %v12541_v21 = vpop.f32.mrf.mxu3 }
 0x2f7   : > { %15028 = vst [vmem:[#allocation21_spill] sm:$0xff] %v12546_v42 }
 0x2f8   : > { %v3351_v58 = vpop.f32.mrf.mxu2 }
 0x2f9   : > { %v3441_v56 = vadd.f32 %v3351_v58, %v12232_v38  ;;  %v3605_v38 = vsel %vm3498_vm7, %v3595_v59, %v12554_v23 }
 0x2fb   : > { %v3834_v52 = vadd.f32 %v3744_v37, %v3441_v56  ;;  %v3610_v56 = vshll.u32 %v12563_v44, 16 }
 0x2fd   : > { %v4094_v46 = vadd.f32 %v4004_v61, %v3834_v52  ;;  %v3607_v61 = vshrl.u32 %v12563_v44, 16  ;;  %v12587_v24 = vpop.f32.mrf.mxu0 }
 0x2fe   : > { %v12556_v7 = vpop.f32.mrf.mxu3 }
 0x2ff   : > { %v4166_v47 = vrot.slane %v4094_v46, 2  ;;  %v4167_v11 = vrot.slane %v4094_v46, 4  ;;  %v4168_v13 = vrot.slane %v4094_v46, 6  ;;  %v4368_v60 = vadd.f32 %v12551_v50, %v4094_v46 }
 0x300   : > { %v3353_v58 = vpop.f32.mrf.mxu2 }
 0x301   : > { %v4369_v52 = vadd.f32 %v12561_v36, %v4166_v47  ;;  %v4370_v42 = vadd.f32 %v12566_v41, %v4167_v11  ;;  %v4371_v59 = vadd.f32 %v12569_v55, %v4168_v13  ;;  %v4496_v37 = vmax.f32 %v4368_v60, 0.0 }
 0x302   : > { %v3442_v40 = vadd.f32 %v3353_v58, %v12240_v54  ;;  %v15030_v47 = vrot.slane %v12533_v30, 3  ;;  %v3609_v54 = vrot.slane %v3607_v61, 2  ;;  %v3612_v60 = vrot.slane %v3610_v56, 3 }
 0x303   : > { %3793 = vmatmul.bf16.gmra.mxu3 %v3605_v38  ;;  %v4497_v46 = vmax.f32 %v4369_v52, 0.0  ;;  %v4498_v53 = vmax.f32 %v4370_v42, 0.0  ;;  %v4499_v38 = vmax.f32 %v4371_v59, 0.0  ;;  %4752 = vst [vmem:[#allocation1] ss:$4 sm:$0xff] %v4496_v37 }
 0x304   : > { %v3914_v11 = vsel %vm3891_vm8, %v3911_v34, %v15030_v47  ;;  %v3835_v13 = vadd.f32 %v3746_v15, %v3442_v40  ;;  %v12595_v45 = vor.u32 %v3612_v60, %v3609_v54  ;;  %v3915_v54 = vrot.slane %v12563_v44, 3 }
 0x305   : > { %4754 = vst [vmem:[#allocation1 + $0x1] ss:$4 sm:$0xff] %v4497_v46  ;;  %3395 = vmatmul.bf16.gmra.mxu2 %v3259_v43  ;;  %4053 = vmatmul.bf16.gmra.mxu0 %v3914_v11  ;;  %v12603_v56 = vpop.f32.mrf.mxu0 }
 0x306   : > { %v12585_v22 = vpop.f32.mrf.mxu3  ;;  %4756 = vst [vmem:[#allocation1 + $0x2] ss:$4 sm:$0xff] %v4498_v53  ;;  %v4095_v27 = vadd.f32 %v12528_v32, %v3835_v13  ;;  %v11216_v32 = vld [vmem:[#allocation9 + $0x78] sm:$0xff]  ;;  %v3614_v13 = vsel %vm3498_vm7, %v12554_v23, %v12595_v45 }
 0x307   : > { %4758 = vst [vmem:[#allocation1 + $0x3] ss:$4 sm:$0xff] %v4499_v38  ;;  %6150 = vmatpush.bf16.msra.mxu1 %v11216_v32 }
 0x308   : > { %v4169_v9 = vrot.slane %v4095_v27, 2  ;;  %v4170_v42 = vrot.slane %v4095_v27, 4  ;;  %v4171_v37 = vrot.slane %v4095_v27, 6  ;;  %v4372_v58 = vadd.f32 %v12551_v50, %v4095_v27  ;;  %v3356_v52 = vpop.f32.mrf.mxu2 }
 0x309   : > { %v3443_v59 = vadd.f32 %v3356_v52, %v12248_v17  ;;  %v12605_v17 = vld [vmem:[#allocation2 + $0x78] sm:$0xff] }
 0x30a   : > { %v4373_v15 = vadd.f32 %v12561_v36, %v4169_v9  ;;  %v4374_v43 = vadd.f32 %v12566_v41, %v4170_v42  ;;  %v4375_v53 = vadd.f32 %v12569_v55, %v4171_v37  ;;  %v4500_v34 = vmax.f32 %v4372_v58, 0.0 }
 0x30b   : > { %v3836_v40 = vadd.f32 %v12541_v21, %v3443_v59  ;;  %v3260_v21 = vrot.slane %v12533_v30, 2  ;;  %v3616_v37 = vshrl.u32 %v12605_v17, 16 }
 0x30c   : > { %v4501_v46 = vmax.f32 %v4373_v15, 0.0  ;;  %v4502_v38 = vmax.f32 %v4374_v43, 0.0  ;;  %v4503_v47 = vmax.f32 %v4375_v53, 0.0  ;;  %4760 = vst [vmem:[#allocation1 + $0x20] ss:$4 sm:$0xff] %v4500_v34  ;;  %v15031_v15 = vrot.slane %v12516_v2, 2 }
 0x30d   : > { %v4096_v11 = vadd.f32 %v12543_v4, %v3836_v40  ;;  %v3619_v4 = vshll.u32 %v12605_v17, 16  ;;  %v15032_v53 = vrot.slane %v12533_v30, 3 }
 0x30e   : > { %v12601_v61 = vpop.f32.mrf.mxu3  ;;  %4762 = vst [vmem:[#allocation1 + $0x21] ss:$4 sm:$0xff] %v4501_v46  ;;  %v3261_v43 = vsel %vm2853_vm5, %v15031_v15, %v3260_v21 }
 0x30f   : > { %4764 = vst [vmem:[#allocation1 + $0x22] ss:$4 sm:$0xff] %v4502_v38  ;;  %v4172_v60 = vrot.slane %v4096_v11, 2  ;;  %v4173_v27 = vrot.slane %v4096_v11, 4  ;;  %v4174_v9 = vrot.slane %v4096_v11, 6  ;;  %v3916_v34 = vsel %vm3891_vm8, %v15032_v53, %v3915_v54 }
 0x310   : > { %4766 = vst [vmem:[#allocation1 + $0x23] ss:$4 sm:$0xff] %v4503_v47  ;;  %v3358_v42 = vpop.f32.mrf.mxu2  ;;  %v12634_v11 = vld.sshfl [vmem:[#allocation1] sm:$0xff pattern:$0x73625140] }
 0x311   : > { %v4376_v58 = vadd.f32 %v12551_v50, %v4172_v60  ;;  %v4377_v23 = vadd.f32 %v12561_v36, %v4173_v27  ;;  %v4378_v52 = vadd.f32 %v12566_v41, %v4174_v9  ;;  %v3444_v59 = vadd.f32 %v3358_v42, %v12256_v16  ;;  %v12632_v16 = vpop.f32.mrf.mxu0 }
 0x312   : > { %v3621_v60 = vrot.slane %v3619_v4, 3 }
 0x313   : > { %3798 = vmatmul.bf16.gmra.mxu3 %v3614_v13  ;;  %v4504_v32 = vmax.f32 %v4376_v58, 0.0  ;;  %v4505_v40 = vmax.f32 %v4377_v23, 0.0  ;;  %v4506_v46 = vmax.f32 %v4378_v52, 0.0  ;;  %v3837_v38 = vadd.f32 %v12556_v7, %v3444_v59 }
 0x314   : > { %v3618_v13 = vrot.slane %v3616_v37, 2 }
 0x315   : > { %4769 = vst [vmem:[#allocation1] ss:$4 sm:$0xff] %v4504_v32  ;;  %v4097_v2 = vadd.f32 %v12558_v35, %v3837_v38  ;;  %3400 = vmatmul.bf16.gmra.mxu2 %v3261_v43  ;;  %4058 = vmatmul.bf16.gmra.mxu0 %v3916_v34  ;;  %v12651_v38 = vld [vmem:[#allocation2 + $0x80] sm:$0xff] }
 0x316   : > { %v12630_v47 = vpop.f32.mrf.mxu3  ;;  %4770 = vst [vmem:[#allocation1 + $0x1] ss:$4 sm:$0xff] %v4505_v40  ;;  %v12640_v15 = vor.u32 %v3621_v60, %v3618_v13 }
 0x317   : > { %4771 = vst [vmem:[#allocation1 + $0x2] ss:$4 sm:$0xff] %v4506_v46  ;;  %v4175_v27 = vrot.slane %v4097_v2, 2  ;;  %v4379_v9 = vadd.f32 %v12569_v55, %v4097_v2  ;;  %v4176_v42 = vrot.slane %v4097_v2, 4  ;;  %v4177_v7 = vrot.slane %v4097_v2, 6 }
 0x318   : > { %v3361_v58 = vpop.f32.mrf.mxu2  ;;  %v12649_v32 = vld.sshfl [vmem:[#allocation1 + $0x20] sm:$0xff pattern:$0x73625140]  ;;  %v3623_v2 = vsel %vm3498_vm7, %v12595_v45, %v12640_v15 }
 0x319   : > { %v4380_v23 = vadd.f32 %v12551_v50, %v4175_v27  ;;  %v4507_v52 = vmax.f32 %v4379_v9, 0.0  ;;  %v3445_v59 = vadd.f32 %v3361_v58, %v12264_v49  ;;  %v4381_v35 = vadd.f32 %v12561_v36, %v4176_v42  ;;  %v12647_v34 = vpop.f32.mrf.mxu0 }
 0x31a   : > { %v4382_v37 = vadd.f32 %v12566_v41, %v4177_v7  ;;  %v3917_v9 = vrot.slane %v12605_v17, 3  ;;  %v3625_v7 = vshrl.u32 %v12651_v38, 16 }
 0x31b   : > { %v4508_v4 = vmax.f32 %v4380_v23, 0.0  ;;  %4772 = vst [vmem:[#allocation1 + $0x3] ss:$4 sm:$0xff] %v4507_v52  ;;  %v3838_v43 = vadd.f32 %v12585_v22, %v3445_v59  ;;  %v4509_v40 = vmax.f32 %v4381_v35, 0.0  ;;  %v3262_v22 = vrot.slane %v12563_v44, 2 }
 0x31c   : > { %v4510_v46 = vmax.f32 %v4382_v37, 0.0  ;;  %v3627_v30 = vrot.slane %v3625_v7, 2 }
 0x31d   : > { %4773 = vst [vmem:[#allocation1 + $0x20] ss:$4 sm:$0xff] %v4508_v4  ;;  %v4098_v49 = vadd.f32 %v12587_v24, %v3838_v43  ;;  %v3628_v24 = vshll.u32 %v12651_v38, 16  ;;  %v3263_v59 = vsel %vm2853_vm5, %v3260_v21, %v3262_v22 }
 0x31e   : > { %v12645_v53 = vpop.f32.mrf.mxu3  ;;  %4774 = vst [vmem:[#allocation1 + $0x21] ss:$4 sm:$0xff] %v4509_v40 }
 0x31f   : > { %4775 = vst [vmem:[#allocation1 + $0x22] ss:$4 sm:$0xff] %v4510_v46  ;;  %v4178_v13 = vrot.slane %v4098_v49, 4  ;;  %v4179_v60 = vrot.slane %v4098_v49, 6  ;;  %v4383_v27 = vadd.f32 %v12569_v55, %v4098_v49  ;;  %v3630_v49 = vrot.slane %v3628_v24, 3 }
 0x320   : > { %v3363_v42 = vpop.f32.mrf.mxu2 }
 0x321   : > { %v4384_v58 = vadd.f32 %v12551_v50, %v4178_v13  ;;  %v4385_v45 = vadd.f32 %v12561_v36, %v4179_v60  ;;  %v4511_v23 = vmax.f32 %v4383_v27, 0.0  ;;  %v3446_v52 = vadd.f32 %v3363_v42, %v12274_v1  ;;  %v12673_v40 = vpop.f32.mrf.mxu0 }
 0x322   : > { %v3918_v1 = vsel %vm3891_vm8, %v3915_v54, %v3917_v9  ;;  %v12680_v46 = vld.sshfl [vmem:[#allocation1] sm:$0xff pattern:$0x73625140] }
 0x323   : > { %3803 = vmatmul.bf16.gmra.mxu3 %v3623_v2  ;;  %v4512_v35 = vmax.f32 %v4384_v58, 0.0  ;;  %v4513_v37 = vmax.f32 %v4385_v45, 0.0  ;;  %4776 = vst [vmem:[#allocation1 + $0x23] ss:$4 sm:$0xff] %v4511_v23  ;;  %v3839_v4 = vadd.f32 %v12601_v61, %v3446_v52  ;;  %v12683_v2 = vpop.f32.mrf.mxu1  ;;  %v12686_v58 = vor.u32 %v3630_v49, %v3627_v30 }
 0x325   : > { %4779 = vst [vmem:[#allocation1] ss:$4 sm:$0xff] %v4512_v35  ;;  %v4099_v21 = vadd.f32 %v12603_v56, %v3839_v4  ;;  %3405 = vmatmul.bf16.gmra.mxu2 %v3263_v59  ;;  %4063 = vmatmul.bf16.gmra.mxu0 %v3918_v1  ;;  %v12696_v4 = vld [vmem:[#allocation2 + $0x88] sm:$0xff]  ;;  %v3632_v49 = vsel %vm3498_vm7, %v12640_v15, %v12686_v58 }
 0x326   : > { %v12671_v43 = vpop.f32.mrf.mxu3  ;;  %4780 = vst [vmem:[#allocation1 + $0x1] ss:$4 sm:$0xff] %v4513_v37  ;;  %v3637_v15 = vshll.u32 %v12696_v4, 16 }
 0x327   : > { %v4180_v61 = vrot.slane %v4099_v21, 2  ;;  %v4181_v13 = vrot.slane %v4099_v21, 4  ;;  %v4182_v60 = vrot.slane %v4099_v21, 6  ;;  %v4386_v27 = vadd.f32 %v12566_v41, %v4099_v21 }
 0x328   : > { %v3366_v42 = vpop.f32.mrf.mxu2  ;;  %v3264_v21 = vrot.slane %v12605_v17, 2  ;;  %v3639_v44 = vrot.slane %v3637_v15, 3 }
 0x329   : > { %v4387_v54 = vadd.f32 %v12569_v55, %v4180_v61  ;;  %v4388_v7 = vadd.f32 %v12551_v50, %v4181_v13  ;;  %v4389_v24 = vadd.f32 %v12561_v36, %v4182_v60  ;;  %v4514_v56 = vmax.f32 %v4386_v27, 0.0  ;;  %v12694_v37 = vpop.f32.mrf.mxu0 }
 0x32a   : > { %v3447_v45 = vadd.f32 %v3366_v42, %v12286_v18  ;;  %v12699_v30 = vld.sshfl [vmem:[#allocation1 + $0x20] sm:$0xff pattern:$0x73625140]  ;;  %v3919_v61 = vrot.slane %v12651_v38, 3  ;;  %v3634_v13 = vshrl.u32 %v12696_v4, 16 }
 0x32b   : > { %v4515_v23 = vmax.f32 %v4387_v54, 0.0  ;;  %v4516_v52 = vmax.f32 %v4388_v7, 0.0  ;;  %v4517_v59 = vmax.f32 %v4389_v24, 0.0  ;;  %4781 = vst [vmem:[#allocation1 + $0x2] ss:$4 sm:$0xff] %v4514_v56  ;;  %v12708_v60 = vpop.f32.mrf.mxu1 }
 0x32c   : > { %v3840_v1 = vadd.f32 %v12630_v47, %v3447_v45  ;;  %v3265_v45 = vsel %vm2853_vm5, %v3262_v22, %v3264_v21 }
 0x32d   : > { %4782 = vst [vmem:[#allocation1 + $0x3] ss:$4 sm:$0xff] %v4515_v23 }
 0x32e   : > { %v12692_v35 = vpop.f32.mrf.mxu3  ;;  %4783 = vst [vmem:[#allocation1 + $0x20] ss:$4 sm:$0xff] %v4516_v52  ;;  %v4100_v18 = vadd.f32 %v12632_v16, %v3840_v1  ;;  %v3636_v1 = vrot.slane %v3634_v13, 2 }
 0x32f   : > { %4784 = vst [vmem:[#allocation1 + $0x21] ss:$4 sm:$0xff] %v4517_v59 }
 0x330   : > { %v4183_v47 = vrot.slane %v4100_v18, 2  ;;  %v4184_v27 = vrot.slane %v4100_v18, 6  ;;  %v4390_v42 = vadd.f32 %v12566_v41, %v4100_v18  ;;  %v3368_v54 = vpop.f32.mrf.mxu2  ;;  %v12734_v13 = vor.u32 %v3639_v44, %v3636_v1  ;;  %v12746_v1 = vld [vmem:[#allocation2 + $0x90] sm:$0xff] }
 0x331   : > { %v3448_v7 = vadd.f32 %v3368_v54, %v12296_v28  ;;  %v12723_v59 = vpop.f32.mrf.mxu0  ;;  %v3920_v28 = vsel %vm3891_vm8, %v3917_v9, %v3919_v61 }
 0x332   : > { %v4391_v16 = vadd.f32 %v12569_v55, %v4183_v47  ;;  %v4392_v24 = vadd.f32 %v12551_v50, %v4184_v27  ;;  %v4518_v56 = vmax.f32 %v4390_v42, 0.0 }
 0x333   : > { %3808 = vmatmul.bf16.gmra.mxu3 %v3632_v49  ;;  %v3841_v23 = vadd.f32 %v12645_v53, %v3448_v7  ;;  %v11215_v53 = vld [vmem:[#allocation9 + $0x70] sm:$0xff] }
 0x334   : > { %v12730_v49 = vld.sshfl [vmem:[#allocation1] sm:$0xff pattern:$0x73625140]  ;;  %v4519_v18 = vmax.f32 %v4391_v16, 0.0  ;;  %v4520_v47 = vmax.f32 %v4392_v24, 0.0  ;;  %6151 = vmatpush.bf16.msra.mxu1 %v11215_v53 }
 0x335   : > { %15033 = vst [vmem:[#allocation22_spill] sm:$0xff] %v12730_v49  ;;  %v4101_v22 = vadd.f32 %v12647_v34, %v3841_v23  ;;  %3410 = vmatmul.bf16.gmra.mxu2 %v3265_v45  ;;  %4068 = vmatmul.bf16.gmra.mxu0 %v3920_v28 }
 0x336   : > { %v12721_v52 = vpop.f32.mrf.mxu3  ;;  %4785 = vst [vmem:[#allocation1 + $0x22] ss:$4 sm:$0xff] %v4518_v56  ;;  %v12739_v56 = vpop.f32.mrf.mxu1 }
 0x337   : > { %4786 = vst [vmem:[#allocation1 + $0x23] ss:$4 sm:$0xff] %v4519_v18  ;;  %v4185_v27 = vrot.slane %v4101_v22, 2  ;;  %v4186_v42 = vrot.slane %v4101_v22, 4  ;;  %v4187_v54 = vrot.slane %v4101_v22, 6  ;;  %v4393_v7 = vadd.f32 %v12561_v36, %v4101_v22 }
 0x338   : > { %4789 = vst [vmem:[#allocation1] ss:$4 sm:$0xff] %v4520_v47  ;;  %v3371_v9 = vpop.f32.mrf.mxu2 }
 0x339   : > { %v4394_v16 = vadd.f32 %v12566_v41, %v4185_v27  ;;  %v4395_v15 = vadd.f32 %v12569_v55, %v4186_v42  ;;  %v4396_v34 = vadd.f32 %v12551_v50, %v4187_v54  ;;  %v4521_v24 = vmax.f32 %v4393_v7, 0.0  ;;  %v12744_v22 = vpop.f32.mrf.mxu0 }
 0x33a   : > { %v3449_v45 = vadd.f32 %v3371_v9, %v12311_v29  ;;  %v3641_v27 = vsel %vm3498_vm7, %v12686_v58, %v12734_v13  ;;  %v14974_v42 = vrot.slane %v12651_v38, 2  ;;  %v14975_v54 = vrot.slane %v12696_v4, 3 }
 0x33b   : > { %v4522_v23 = vmax.f32 %v4394_v16, 0.0  ;;  %v4523_v28 = vmax.f32 %v4395_v15, 0.0  ;;  %v4524_v18 = vmax.f32 %v4396_v34, 0.0  ;;  %4790 = vst [vmem:[#allocation1 + $0x1] ss:$4 sm:$0xff] %v4521_v24  ;;  %v3643_v7 = vshrl.u32 %v12746_v1, 16 }
 0x33c   : > { %v3842_v44 = vadd.f32 %v12671_v43, %v3449_v45  ;;  %v3646_v34 = vshll.u32 %v12746_v1, 16 }
 0x33d   : > { %4791 = vst [vmem:[#allocation1 + $0x2] ss:$4 sm:$0xff] %v4522_v23  ;;  %v3267_v23 = vsel %vm2853_vm5, %v3264_v21, %v14974_v42  ;;  %v3645_v17 = vrot.slane %v3643_v7, 2 }
 0x33e   : > { %v12742_v47 = vpop.f32.mrf.mxu3  ;;  %v12749_v53 = vld.sshfl [vmem:[#allocation1 + $0x20] sm:$0xff pattern:$0x73625140]  ;;  %4792 = vst [vmem:[#allocation1 + $0x3] ss:$4 sm:$0xff] %v4523_v28  ;;  %v4102_v29 = vadd.f32 %v12673_v40, %v3842_v44 }
 0x33f   : > { %4793 = vst [vmem:[#allocation1 + $0x20] ss:$4 sm:$0xff] %v4524_v18 }
 0x340   : > { %v4188_v9 = vrot.slane %v4102_v29, 2  ;;  %v4189_v16 = vrot.slane %v4102_v29, 4  ;;  %v4397_v43 = vadd.f32 %v12561_v36, %v4102_v29  ;;  %v3373_v15 = vpop.f32.mrf.mxu2 }
 0x341   : > { %v3450_v58 = vadd.f32 %v3373_v15, %v12323_v51  ;;  %v12771_v44 = vpop.f32.mrf.mxu0  ;;  %v3922_v51 = vsel %vm3891_vm8, %v3919_v61, %v14975_v54  ;;  %v11214_v54 = vld [vmem:[#allocation9 + $0x68] sm:$0xff] }
 0x342   : > { %v4398_v24 = vadd.f32 %v12566_v41, %v4188_v9  ;;  %v4399_v40 = vadd.f32 %v12569_v55, %v4189_v16  ;;  %v4525_v45 = vmax.f32 %v4397_v43, 0.0  ;;  %v3648_v16 = vrot.slane %v3646_v34, 3  ;;  %6152 = vmatpush.bf16.msra.mxu1 %v11214_v54  ;;  %v3477_v54 = vld [vmem:[#allocation2 + $0xa0] sm:$0x7] }
 0x343   : > { %3813 = vmatmul.bf16.gmra.mxu3 %v3641_v27  ;;  %v3843_v28 = vadd.f32 %v12692_v35, %v3450_v58  ;;  %v12778_v27 = vpop.f32.mrf.mxu1 }
 0x344   : > { %v4526_v29 = vmax.f32 %v4398_v24, 0.0  ;;  %v4527_v9 = vmax.f32 %v4399_v40, 0.0  ;;  %4794 = vst [vmem:[#allocation1 + $0x21] ss:$4 sm:$0xff] %v4525_v45  ;;  %v12782_v61 = vor.u32 %v3648_v16, %v3645_v17  ;;  %v12794_v17 = vld [vmem:[#allocation2 + $0x98] sm:$0xff] }
 0x345   : > { %v4103_v21 = vadd.f32 %v12694_v37, %v3843_v28  ;;  %3415 = vmatmul.bf16.gmra.mxu2 %v3267_v23  ;;  %4073 = vmatmul.bf16.gmra.mxu0 %v3922_v51  ;;  %v12787_v37 = vld.sshfl [vmem:[#allocation1] sm:$0xff pattern:$0x73625140] }
 0x346   : > { %v12769_v18 = vpop.f32.mrf.mxu3  ;;  %4795 = vst [vmem:[#allocation1 + $0x22] ss:$4 sm:$0xff] %v4526_v29 }
 0x347   : > { %4796 = vst [vmem:[#allocation1 + $0x23] ss:$4 sm:$0xff] %v4527_v9  ;;  %v4190_v35 = vrot.slane %v4103_v21, 2  ;;  %v4191_v43 = vrot.slane %v4103_v21, 4  ;;  %v4192_v15 = vrot.slane %v4103_v21, 6  ;;  %v4400_v58 = vadd.f32 %v12551_v50, %v4103_v21 }
 0x348   : > { %v3376_v42 = vpop.f32.mrf.mxu2  ;;  %15034 = vst [vmem:[#allocation23_spill] sm:$0xff] %v12787_v37  ;;  %v14976_v21 = vrot.slane %v12696_v4, 2 }
 0x349   : > { %v4401_v24 = vadd.f32 %v12561_v36, %v4190_v35  ;;  %v4402_v40 = vadd.f32 %v12566_v41, %v4191_v43  ;;  %v4403_v7 = vadd.f32 %v12569_v55, %v4192_v15  ;;  %v4528_v34 = vmax.f32 %v4400_v58, 0.0  ;;  %v12792_v9 = vpop.f32.mrf.mxu0 }
 0x34a   : > { %v3451_v45 = vadd.f32 %v3376_v42, %v12337_v63  ;;  %v3650_v35 = vsel %vm3498_vm7, %v12734_v13, %v12782_v61  ;;  %v3652_v15 = vshrl.u32 %v12794_v17, 16  ;;  %v3655_v58 = vshll.u32 %v12794_v17, 16 }
 0x34b   : > { %v4529_v23 = vmax.f32 %v4401_v24, 0.0  ;;  %v4530_v28 = vmax.f32 %v4402_v40, 0.0  ;;  %v4531_v51 = vmax.f32 %v4403_v7, 0.0  ;;  %4799 = vst [vmem:[#allocation1] ss:$4 sm:$0xff] %v4528_v34  ;;  %v12801_v63 = vpop.f32.mrf.mxu1 }
 0x34c   : > { %v3844_v16 = vadd.f32 %v12721_v52, %v3451_v45 }
 0x34d   : > { %4800 = vst [vmem:[#allocation1 + $0x1] ss:$4 sm:$0xff] %v4529_v23 }
 0x34e   : > { %v12790_v29 = vpop.f32.mrf.mxu3  ;;  %4801 = vst [vmem:[#allocation1 + $0x2] ss:$4 sm:$0xff] %v4530_v28  ;;  %v4104_v42 = vadd.f32 %v12723_v59, %v3844_v16  ;;  %v15035_v59 = vrot.slane %v12651_v38, 2  ;;  %v12817_v43 = vld.sshfl [vmem:[#allocation1 + $0x20] sm:$0xff pattern:$0x73625140] }
 0x34f   : > { %4802 = vst [vmem:[#allocation1 + $0x3] ss:$4 sm:$0xff] %v4531_v51  ;;  %v15037_v38 = vrot.slane %v12746_v1, 3 }
 0x350   : > { %v4193_v52 = vrot.slane %v4104_v42, 2  ;;  %v4194_v24 = vrot.slane %v4104_v42, 4  ;;  %v4195_v40 = vrot.slane %v4104_v42, 6  ;;  %v4404_v7 = vadd.f32 %v12551_v50, %v4104_v42  ;;  %v3378_v34 = vpop.f32.mrf.mxu2  ;;  %15036 = vst [vmem:[#allocation24_spill] sm:$0xff] %v12817_v43 }
 0x351   : > { %v3452_v13 = vadd.f32 %v3378_v34, %v12348_v48  ;;  %v3269_v45 = vsel %vm2853_vm5, %v15035_v59, %v14976_v21  ;;  %v12822_v48 = vpop.f32.mrf.mxu0  ;;  %v15038_v34 = vrot.slane %v12696_v4, 3  ;;  %v3654_v59 = vrot.slane %v3652_v15, 2 }
 0x352   : > { %v4405_v23 = vadd.f32 %v12561_v36, %v4193_v52  ;;  %v4406_v28 = vadd.f32 %v12566_v41, %v4194_v24  ;;  %v4407_v51 = vadd.f32 %v12569_v55, %v4195_v40  ;;  %v4532_v16 = vmax.f32 %v4404_v7, 0.0 }
 0x353   : > { %3818 = vmatmul.bf16.gmra.mxu3 %v3650_v35  ;;  %v3845_v35 = vadd.f32 %v12742_v47, %v3452_v13  ;;  %v3924_v52 = vsel %vm3891_vm8, %v15038_v34, %v15037_v38  ;;  %v3657_v7 = vrot.slane %v3655_v58, 3  ;;  %v3068_v47 = vadd.f32 %v12683_v2, %v12359_v26  ;;  %v12832_v38 = vpop.f32.mrf.mxu1 }
 0x354   : > { %v4533_v24 = vmax.f32 %v4405_v23, 0.0  ;;  %v4534_v21 = vmax.f32 %v4406_v28, 0.0  ;;  %v4535_v40 = vmax.f32 %v4407_v51, 0.0  ;;  %4803 = vst [vmem:[#allocation1 + $0x20] ss:$4 sm:$0xff] %v4532_v16  ;;  %v3496_v51 = vunpack.c.l.b16 %v3477_v54 }
 0x355   : > { %v4105_v37 = vadd.f32 %v12744_v22, %v3845_v35  ;;  %3420 = vmatmul.bf16.gmra.mxu2 %v3269_v45  ;;  %4078 = vmatmul.bf16.gmra.mxu0 %v3924_v52  ;;  %v12834_v23 = vor.u32 %v3657_v7, %v3654_v59  ;;  %v3270_v59 = vrot.slane %v12746_v1, 2  ;;  %v3925_v7 = vrot.slane %v12794_v17, 3 }
 0x356   : > { %v12820_v42 = vpop.f32.mrf.mxu3  ;;  %4804 = vst [vmem:[#allocation1 + $0x21] ss:$4 sm:$0xff] %v4533_v24  ;;  %v12844_v34 = vld.sshfl [vmem:[#allocation1] sm:$0xff pattern:$0x73625140]  ;;  %v12846_v52 = vpack.c.b16 %v3496_v51, %v3496_v51 }
 0x357   : > { %4805 = vst [vmem:[#allocation1 + $0x22] ss:$4 sm:$0xff] %v4534_v21  ;;  %v4196_v13 = vrot.slane %v4105_v37, 2  ;;  %v4197_v43 = vrot.slane %v4105_v37, 4  ;;  %v4198_v49 = vrot.slane %v4105_v37, 6 }
 0x358   : > { %4806 = vst [vmem:[#allocation1 + $0x23] ss:$4 sm:$0xff] %v4535_v40  ;;  %v3381_v15 = vpop.f32.mrf.mxu2 }
 0x359   : > { %v4408_v58 = vadd.f32 %v12551_v50, %v4196_v13  ;;  %v4409_v22 = vadd.f32 %v12561_v36, %v4197_v43  ;;  %v4410_v45 = vadd.f32 %v12566_v41, %v4198_v49  ;;  %v3453_v28 = vadd.f32 %v3381_v15, %v3068_v47  ;;  %v12842_v35 = vpop.f32.mrf.mxu0 }
 0x35a   : > { %v3659_v49 = vsel %vm3498_vm7, %v12782_v61, %v12834_v23  ;;  %v3664_v61 = vshll.u32 %v12846_v52, 16 }
 0x35b   : > { %v4536_v26 = vmax.f32 %v4408_v58, 0.0  ;;  %v4537_v2 = vmax.f32 %v4409_v22, 0.0  ;;  %v4538_v21 = vmax.f32 %v4410_v45, 0.0  ;;  %v3846_v37 = vadd.f32 %v12769_v18, %v3453_v28  ;;  %v12860_v45 = vpop.f32.mrf.mxu1 }
 0x35c   : > { %v3069_v18 = vadd.f32 %v12708_v60, %v12368_v14  ;;  %v15039_v28 = vrot.slane %v12696_v4, 2 }
 0x35d   : > { %4809 = vst [vmem:[#allocation1] ss:$4 sm:$0xff] %v4536_v26  ;;  %v4106_v43 = vadd.f32 %v12771_v44, %v3846_v37  ;;  %v3661_v44 = vshrl.u32 %v12846_v52, 16 }
 0x35e   : > { %v12840_v16 = vpop.f32.mrf.mxu3  ;;  %4810 = vst [vmem:[#allocation1 + $0x1] ss:$4 sm:$0xff] %v4537_v2  ;;  %v3271_v51 = vsel %vm2853_vm5, %v15039_v28, %v3270_v59 }
 0x35f   : > { %4811 = vst [vmem:[#allocation1 + $0x2] ss:$4 sm:$0xff] %v4538_v21  ;;  %v4199_v24 = vrot.slane %v4106_v43, 2  ;;  %v4411_v40 = vadd.f32 %v12569_v55, %v4106_v43  ;;  %v4200_v47 = vrot.slane %v4106_v43, 4  ;;  %v4201_v13 = vrot.slane %v4106_v43, 6 }
 0x360   : > { %v3383_v15 = vpop.f32.mrf.mxu2  ;;  %v12869_v26 = vld.sshfl [vmem:[#allocation1 + $0x20] sm:$0xff pattern:$0x73625140] }
 0x361   : > { %v4412_v54 = vadd.f32 %v12551_v50, %v4199_v24  ;;  %v4539_v58 = vmax.f32 %v4411_v40, 0.0  ;;  %v3454_v22 = vadd.f32 %v3383_v15, %v3069_v18  ;;  %v4413_v14 = vadd.f32 %v12561_v36, %v4200_v47  ;;  %v12874_v43 = vpop.f32.mrf.mxu0 }
 0x362   : > { %v4414_v60 = vadd.f32 %v12566_v41, %v4201_v13  ;;  %v3663_v40 = vrot.slane %v3661_v44, 2  ;;  %v3666_v47 = vrot.slane %v3664_v61, 3 }
 0x363   : > { %3823 = vmatmul.bf16.gmra.mxu3 %v3659_v49  ;;  %v4540_v2 = vmax.f32 %v4412_v54, 0.0  ;;  %4812 = vst [vmem:[#allocation1 + $0x3] ss:$4 sm:$0xff] %v4539_v58  ;;  %v3847_v21 = vadd.f32 %v12790_v29, %v3454_v22  ;;  %v15040_v49 = vrot.slane %v12746_v1, 3  ;;  %v4541_v24 = vmax.f32 %v4413_v14, 0.0 }
 0x364   : > { %v4542_v4 = vmax.f32 %v4414_v60, 0.0  ;;  %v3070_v29 = vadd.f32 %v12739_v56, %v12374_v12  ;;  %v3667_v28 = vor.u32 %v3666_v47, %v3663_v40  ;;  %v12892_v56 = vpop.f32.mrf.mxu1  ;;  %v3927_v40 = vrot.slane %v12846_v52, 3 }
 0x365   : > { %v3926_v18 = vsel %vm3891_vm8, %v15040_v49, %v3925_v7  ;;  %4813 = vst [vmem:[#allocation1 + $0x20] ss:$4 sm:$0xff] %v4540_v2  ;;  %v4107_v13 = vadd.f32 %v12792_v9, %v3847_v21  ;;  %3425 = vmatmul.bf16.gmra.mxu2 %v3271_v51 }
 0x366   : > { %v12872_v37 = vpop.f32.mrf.mxu3  ;;  %4814 = vst [vmem:[#allocation1 + $0x21] ss:$4 sm:$0xff] %v4541_v24  ;;  %4083 = vmatmul.bf16.gmra.mxu0 %v3926_v18  ;;  %v3668_v24 = vsel %vm3498_vm7, %v12834_v23, %v3667_v28 }
 0x367   : > { %4815 = vst [vmem:[#allocation1 + $0x22] ss:$4 sm:$0xff] %v4542_v4  ;;  %v4202_v15 = vrot.slane %v4107_v13, 4  ;;  %v4203_v54 = vrot.slane %v4107_v13, 6  ;;  %v4415_v58 = vadd.f32 %v12569_v55, %v4107_v13  ;;  %v3272_v4 = vrot.slane %v12794_v17, 2 }
 0x368   : > { %v3386_v22 = vpop.f32.mrf.mxu2  ;;  %v3074_v17 = vadd.f32 %v12860_v45, %v12407_v57 }
 0x369   : > { %v4416_v14 = vadd.f32 %v12551_v50, %v4202_v15  ;;  %v4417_v44 = vadd.f32 %v12561_v36, %v4203_v54  ;;  %v4543_v61 = vmax.f32 %v4415_v58, 0.0  ;;  %v3455_v60 = vadd.f32 %v3386_v22, %v3070_v29  ;;  %v12890_v12 = vpop.f32.mrf.mxu0 }
 0x36a   : > { %v12894_v49 = vld.sshfl [vmem:[#allocation1] sm:$0xff pattern:$0x73625140]  ;;  %v3071_v15 = vadd.f32 %v12778_v27, %v12389_v3  ;;  %v3273_v52 = vsel %vm2853_vm5, %v3270_v59, %v3272_v4 }
 0x36b   : > { %v4544_v9 = vmax.f32 %v4416_v14, 0.0  ;;  %v4545_v51 = vmax.f32 %v4417_v44, 0.0  ;;  %4816 = vst [vmem:[#allocation1 + $0x23] ss:$4 sm:$0xff] %v4543_v61  ;;  %v3848_v2 = vadd.f32 %v12820_v42, %v3455_v60  ;;  %v3128_v14 = vld [vmem:[#allocation2 + $0xa0] sm:$0x3] }
 0x36c   : > { %v12922_v1 = vpop.f32.mrf.mxu1 }
 0x36d   : > { %4819 = vst [vmem:[#allocation1] ss:$4 sm:$0xff] %v4544_v9  ;;  %v4108_v18 = vadd.f32 %v12822_v48, %v3848_v2  ;;  %v3928_v9 = vsel %vm3891_vm8, %v3925_v7, %v3927_v40 }
 0x36e   : > { %v12888_v21 = vpop.f32.mrf.mxu3  ;;  %4820 = vst [vmem:[#allocation1 + $0x1] ss:$4 sm:$0xff] %v4545_v51 }
 0x36f   : > { %v4204_v42 = vrot.slane %v4108_v18, 2  ;;  %v4205_v47 = vrot.slane %v4108_v18, 4  ;;  %v4206_v13 = vrot.slane %v4108_v18, 6  ;;  %v4418_v29 = vadd.f32 %v12566_v41, %v4108_v18 }
 0x370   : > { %v3388_v54 = vpop.f32.mrf.mxu2  ;;  %v3219_v18 = vunpack.c.l.b16 %v3128_v14 }
 0x371   : > { %v4419_v48 = vadd.f32 %v12569_v55, %v4204_v42  ;;  %v4420_v58 = vadd.f32 %v12551_v50, %v4205_v47  ;;  %v4421_v23 = vadd.f32 %v12561_v36, %v4206_v13  ;;  %v4546_v22 = vmax.f32 %v4418_v29, 0.0  ;;  %v12914_v60 = vpop.f32.mrf.mxu0 }
 0x372   : > { %v3456_v28 = vadd.f32 %v3388_v54, %v3071_v15  ;;  %v12920_v2 = vld.sshfl [vmem:[#allocation1 + $0x20] sm:$0xff pattern:$0x73625140]  ;;  %v3238_v54 = vpack.c.b16 %v3219_v18, %v3219_v18 }
 0x373   : > { %3828 = vmatmul.bf16.gmra.mxu3 %v3668_v24  ;;  %v4547_v44 = vmax.f32 %v4419_v48, 0.0  ;;  %v4548_v61 = vmax.f32 %v4420_v58, 0.0  ;;  %v4549_v3 = vmax.f32 %v4421_v23, 0.0  ;;  %4821 = vst [vmem:[#allocation1 + $0x2] ss:$4 sm:$0xff] %v4546_v22  ;;  %v3072_v24 = vadd.f32 %v12801_v63, %v12392_v33 }
 0x374   : > { %v3849_v51 = vadd.f32 %v12840_v16, %v3456_v28  ;;  %v3274_v28 = vrot.slane %v3238_v54, 2 }
 0x375   : > { %4822 = vst [vmem:[#allocation1 + $0x3] ss:$4 sm:$0xff] %v4547_v44  ;;  %3430 = vmatmul.bf16.gmra.mxu2 %v3273_v52  ;;  %v11213_v52 = vld [vmem:[#allocation9 + $0x60] sm:$0xff] }
 0x376   : > { %v12912_v27 = vpop.f32.mrf.mxu3  ;;  %4823 = vst [vmem:[#allocation1 + $0x20] ss:$4 sm:$0xff] %v4548_v61  ;;  %v4109_v59 = vadd.f32 %v12842_v35, %v3849_v51  ;;  %4088 = vmatmul.bf16.gmra.mxu0 %v3928_v9  ;;  %v12941_v9 = vpop.f32.mrf.mxu1  ;;  %6153 = vmatpush.bf16.msra.mxu1 %v11213_v52 }
 0x377   : > { %4824 = vst [vmem:[#allocation1 + $0x21] ss:$4 sm:$0xff] %v4549_v3  ;;  %v3073_v3 = vadd.f32 %v12832_v38, %v12404_v39 }
 0x378   : > { %v4207_v42 = vrot.slane %v4109_v59, 2  ;;  %v4208_v47 = vrot.slane %v4109_v59, 6  ;;  %v4422_v7 = vadd.f32 %v12566_v41, %v4109_v59  ;;  %v3391_v16 = vpop.f32.mrf.mxu2 }
 0x379   : > { %v3457_v40 = vadd.f32 %v3391_v16, %v3072_v24  ;;  %v12933_v58 = vpop.f32.mrf.mxu0 }
 0x37a   : > { %v4423_v13 = vadd.f32 %v12569_v55, %v4207_v42  ;;  %v4424_v29 = vadd.f32 %v12551_v50, %v4208_v47  ;;  %v4550_v15 = vmax.f32 %v4422_v7, 0.0  ;;  %v3275_v47 = vsel %vm2853_vm5, %v3272_v4, %v3274_v28 }
 0x37b   : > { %v3850_v35 = vadd.f32 %v12872_v37, %v3457_v40 }
 0x37c   : > { %v12935_v33 = vld.sshfl [vmem:[#allocation1] sm:$0xff pattern:$0x73625140]  ;;  %v4551_v63 = vmax.f32 %v4423_v13, 0.0  ;;  %v4552_v23 = vmax.f32 %v4424_v29, 0.0 }
 0x37d   : > { %4825 = vst [vmem:[#allocation1 + $0x22] ss:$4 sm:$0xff] %v4550_v15  ;;  %v4110_v22 = vadd.f32 %v12874_v43, %v3850_v35 }
 0x37e   : > { %v12931_v48 = vpop.f32.mrf.mxu3  ;;  %4826 = vst [vmem:[#allocation1 + $0x23] ss:$4 sm:$0xff] %v4551_v63 }
 0x37f   : > { %4829 = vst [vmem:[#allocation1] ss:$4 sm:$0xff] %v4552_v23  ;;  %v4209_v14 = vrot.slane %v4110_v22, 2  ;;  %v4210_v44 = vrot.slane %v4110_v22, 4  ;;  %v4211_v61 = vrot.slane %v4110_v22, 6  ;;  %v4425_v37 = vadd.f32 %v12561_v36, %v4110_v22  ;;  %v12960_v23 = vpop.f32.mrf.mxu1 }
 0x380   : > { %v3393_v51 = vpop.f32.mrf.mxu2 }
 0x381   : > { %v4426_v59 = vadd.f32 %v12566_v41, %v4209_v14  ;;  %v4427_v43 = vadd.f32 %v12569_v55, %v4210_v44  ;;  %v4428_v18 = vadd.f32 %v12551_v50, %v4211_v61  ;;  %v4553_v24 = vmax.f32 %v4425_v37, 0.0 }
 0x382   : > { %v3458_v42 = vadd.f32 %v3393_v51, %v3073_v3  ;;  %v12951_v38 = vpop.f32.mrf.mxu0  ;;  %v12973_v51 = vld [vmem:[%s14968_s2] ss:$0 sm:$0xff] }
 0x383   : > { %v4554_v7 = vmax.f32 %v4426_v59, 0.0  ;;  %v4555_v16 = vmax.f32 %v4427_v43, 0.0  ;;  %v4556_v40 = vmax.f32 %v4428_v18, 0.0  ;;  %4830 = vst [vmem:[#allocation1 + $0x1] ss:$4 sm:$0xff] %v4553_v24  ;;  %v3075_v59 = vadd.f32 %v12892_v56, %v12420_v0 }
 0x384   : > { %v3851_v13 = vadd.f32 %v12888_v21, %v3458_v42 }
 0x385   : > { %v12954_v29 = vld.sshfl [vmem:[#allocation1 + $0x20] sm:$0xff pattern:$0x73625140]  ;;  %4831 = vst [vmem:[#allocation1 + $0x2] ss:$4 sm:$0xff] %v4554_v7  ;;  %3435 = vmatmul.bf16.gmra.mxu2 %v3275_v47 }
 0x386   : > { %v12949_v39 = vpop.f32.mrf.mxu3  ;;  %4832 = vst [vmem:[#allocation1 + $0x3] ss:$4 sm:$0xff] %v4555_v16  ;;  %v4111_v50 = vadd.f32 %v12890_v12, %v3851_v13 }
 0x387   : > { %4833 = vst [vmem:[#allocation1 + $0x20] ss:$4 sm:$0xff] %v4556_v40  ;;  %v12988_v56 = vpop.f32.mrf.mxu1 }
 0x388   : > { %v4212_v4 = vrot.slane %v4111_v50, 2  ;;  %v4213_v15 = vrot.slane %v4111_v50, 4  ;;  %v4429_v54 = vadd.f32 %v12561_v36, %v4111_v50  ;;  %v3396_v35 = vpop.f32.mrf.mxu2 }
 0x389   : > { %v3459_v63 = vadd.f32 %v3396_v35, %v3074_v17 }
 0x38a   : > { %v4430_v21 = vadd.f32 %v12566_v41, %v4212_v4  ;;  %v4431_v22 = vadd.f32 %v12569_v55, %v4213_v15  ;;  %v4557_v28 = vmax.f32 %v4429_v54, 0.0  ;;  %v12967_v14 = vpop.f32.mrf.mxu0  ;;  %v3076_v15 = vadd.f32 %v12922_v1, %v12423_v8 }
 0x38b   : > { %v3852_v52 = vadd.f32 %v12912_v27, %v3459_v63 }
 0x38c   : > { %v4558_v57 = vmax.f32 %v4430_v21, 0.0  ;;  %v4559_v45 = vmax.f32 %v4431_v22, 0.0  ;;  %4834 = vst [vmem:[#allocation1 + $0x21] ss:$4 sm:$0xff] %v4557_v28 }
 0x38d   : > { %v4112_v44 = vadd.f32 %v12914_v60, %v3852_v52  ;;  %v12981_v47 = vld.sshfl [vmem:[#allocation1] sm:$0xff pattern:$0x73625140] }
 0x38e   : > { %v12965_v12 = vpop.f32.mrf.mxu3  ;;  %4835 = vst [vmem:[#allocation1 + $0x22] ss:$4 sm:$0xff] %v4558_v57 }
 0x38f   : > { %4836 = vst [vmem:[#allocation1 + $0x23] ss:$4 sm:$0xff] %v4559_v45  ;;  %v4214_v61 = vrot.slane %v4112_v44, 2  ;;  %v4215_v37 = vrot.slane %v4112_v44, 4  ;;  %v4216_v3 = vrot.slane %v4112_v44, 6  ;;  %v4432_v27 = vadd.f32 %v12973_v51, %v4112_v44  ;;  %v11212_v44 = vld [vmem:[#allocation9 + $0x58] sm:$0xff] }
 0x390   : > { %v3398_v43 = vpop.f32.mrf.mxu2  ;;  %6154 = vmatpush.bf16.msra.mxu1 %v11212_v44 }
 0x391   : > { %v4433_v18 = vadd.f32 %v12561_v36, %v4214_v61  ;;  %v4434_v60 = vadd.f32 %v12566_v41, %v4215_v37  ;;  %v4435_v24 = vadd.f32 %v12569_v55, %v4216_v3  ;;  %v4560_v42 = vmax.f32 %v4432_v27, 0.0 }
 0x392   : > { %v3460_v7 = vadd.f32 %v3398_v43, %v3075_v59  ;;  %v12985_v17 = vpop.f32.mrf.mxu0  ;;  %v3077_v43 = vadd.f32 %v12941_v9, %v12435_v5 }
 0x393   : > { %v4561_v16 = vmax.f32 %v4433_v18, 0.0  ;;  %v4562_v40 = vmax.f32 %v4434_v60, 0.0  ;;  %v4563_v13 = vmax.f32 %v4435_v24, 0.0  ;;  %4839 = vst [vmem:[#allocation1] ss:$4 sm:$0xff] %v4560_v42  ;;  %v13007_v18 = vpop.f32.mrf.mxu1 }
 0x394   : > { %v3853_v0 = vadd.f32 %v12931_v48, %v3460_v7 }
 0x395   : > { %4840 = vst [vmem:[#allocation1 + $0x1] ss:$4 sm:$0xff] %v4561_v16 }
 0x396   : > { %v12983_v50 = vpop.f32.mrf.mxu3  ;;  %4841 = vst [vmem:[#allocation1 + $0x2] ss:$4 sm:$0xff] %v4562_v40  ;;  %v4113_v4 = vadd.f32 %v12933_v58, %v3853_v0  ;;  %v12997_v58 = vld.sshfl [vmem:[#allocation1 + $0x20] sm:$0xff pattern:$0x73625140] }
 0x397   : > { %4842 = vst [vmem:[#allocation1 + $0x3] ss:$4 sm:$0xff] %v4563_v13 }
 0x398   : > { %v4217_v54 = vrot.slane %v4113_v4, 2  ;;  %v4218_v35 = vrot.slane %v4113_v4, 4  ;;  %v4219_v63 = vrot.slane %v4113_v4, 6  ;;  %v4436_v21 = vadd.f32 %v12973_v51, %v4113_v4  ;;  %v3401_v22 = vpop.f32.mrf.mxu2 }
 0x399   : > { %v3461_v28 = vadd.f32 %v3401_v22, %v3076_v15 }
 0x39a   : > { %v4437_v52 = vadd.f32 %v12561_v36, %v4217_v54  ;;  %v4438_v48 = vadd.f32 %v12566_v41, %v4218_v35  ;;  %v4439_v57 = vadd.f32 %v12569_v55, %v4219_v63  ;;  %v4564_v45 = vmax.f32 %v4436_v21, 0.0  ;;  %v13003_v59 = vpop.f32.mrf.mxu0 }
 0x39b   : > { %v3854_v8 = vadd.f32 %v12949_v39, %v3461_v28  ;;  %v3078_v35 = vadd.f32 %v12960_v23, %v12438_v20 }
 0x39c   : > { %v4565_v61 = vmax.f32 %v4437_v52, 0.0  ;;  %v4566_v37 = vmax.f32 %v4438_v48, 0.0  ;;  %v4567_v3 = vmax.f32 %v4439_v57, 0.0  ;;  %4843 = vst [vmem:[#allocation1 + $0x20] ss:$4 sm:$0xff] %v4564_v45 }
 0x39d   : > { %v4114_v27 = vadd.f32 %v12951_v38, %v3854_v8 }
 0x39e   : > { %v13000_v1 = vpop.f32.mrf.mxu3  ;;  %4844 = vst [vmem:[#allocation1 + $0x21] ss:$4 sm:$0xff] %v4565_v61  ;;  %v13013_v9 = vld.sshfl [vmem:[#allocation1] sm:$0xff pattern:$0x73625140] }
 0x39f   : > { %4845 = vst [vmem:[#allocation1 + $0x22] ss:$4 sm:$0xff] %v4566_v37  ;;  %v4220_v60 = vrot.slane %v4114_v27, 2  ;;  %v4221_v39 = vrot.slane %v4114_v27, 4  ;;  %v4222_v24 = vrot.slane %v4114_v27, 6 }
 0x3a0   : > { %4846 = vst [vmem:[#allocation1 + $0x23] ss:$4 sm:$0xff] %v4567_v3  ;;  %v3403_v42 = vpop.f32.mrf.mxu2 }
 0x3a1   : > { %v4440_v7 = vadd.f32 %v12973_v51, %v4220_v60  ;;  %v4441_v16 = vadd.f32 %v12561_v36, %v4221_v39  ;;  %v4442_v38 = vadd.f32 %v12566_v41, %v4222_v24  ;;  %v3462_v40 = vadd.f32 %v3403_v42, %v3077_v43 }
 0x3a2   : > { %v4064_v22 = vpop.f32.mrf.mxu0  ;;  %v3079_v43 = vadd.f32 %v12988_v56, %v12450_v10 }
 0x3a3   : > { %v4568_v13 = vmax.f32 %v4440_v7, 0.0  ;;  %v4569_v0 = vmax.f32 %v4441_v16, 0.0  ;;  %v4570_v4 = vmax.f32 %v4442_v38, 0.0  ;;  %v3855_v5 = vadd.f32 %v12965_v12, %v3462_v40  ;;  %v3028_v12 = vpop.f32.mrf.mxu1 }
 0x3a5   : > { %4849 = vst [vmem:[#allocation1] ss:$4 sm:$0xff] %v4568_v13  ;;  %v4115_v15 = vadd.f32 %v12967_v14, %v3855_v5 }
 0x3a6   : > { %v13016_v54 = vpop.f32.mrf.mxu3  ;;  %4850 = vst [vmem:[#allocation1 + $0x1] ss:$4 sm:$0xff] %v4569_v0 }
 0x3a7   : > { %4851 = vst [vmem:[#allocation1 + $0x2] ss:$4 sm:$0xff] %v4570_v4  ;;  %v4223_v63 = vrot.slane %v4115_v15, 2  ;;  %v4443_v21 = vadd.f32 %v12569_v55, %v4115_v15  ;;  %v4224_v28 = vrot.slane %v4115_v15, 4  ;;  %v4225_v52 = vrot.slane %v4115_v15, 6 }
 0x3a8   : > { %v3406_v48 = vpop.f32.mrf.mxu2  ;;  %v13025_v23 = vld.sshfl [vmem:[#allocation1 + $0x20] sm:$0xff pattern:$0x73625140] }
 0x3a9   : > { %v4444_v57 = vadd.f32 %v12973_v51, %v4223_v63  ;;  %v4571_v45 = vmax.f32 %v4443_v21, 0.0  ;;  %v3463_v44 = vadd.f32 %v3406_v48, %v3078_v35  ;;  %v4445_v14 = vadd.f32 %v12561_v36, %v4224_v28 }
 0x3aa   : > { %v4446_v8 = vadd.f32 %v12566_v41, %v4225_v52  ;;  %v4066_v13 = vpop.f32.mrf.mxu0  ;;  %v3080_v28 = vadd.f32 %v13007_v18, %v12453_v25  ;;  %v3081_v18 = vadd.f32 %v3028_v12, %v12465_v31 }
 0x3ab   : > { %v4572_v61 = vmax.f32 %v4444_v57, 0.0  ;;  %4852 = vst [vmem:[#allocation1 + $0x3] ss:$4 sm:$0xff] %v4571_v45  ;;  %v3856_v20 = vadd.f32 %v12983_v50, %v3463_v44  ;;  %v4573_v37 = vmax.f32 %v4445_v14, 0.0  ;;  %v3031_v0 = vpop.f32.mrf.mxu1 }
 0x3ac   : > { %v4574_v3 = vmax.f32 %v4446_v8, 0.0 }
 0x3ad   : > { %4853 = vst [vmem:[#allocation1 + $0x20] ss:$4 sm:$0xff] %v4572_v61  ;;  %v4116_v27 = vadd.f32 %v12985_v17, %v3856_v20 }
 0x3ae   : > { %4854 = vst [vmem:[#allocation1 + $0x21] ss:$4 sm:$0xff] %v4573_v37  ;;  %v3806_v42 = vpop.f32.mrf.mxu3 }
 0x3af   : > { %4855 = vst [vmem:[#allocation1 + $0x22] ss:$4 sm:$0xff] %v4574_v3  ;;  %v4226_v60 = vrot.slane %v4116_v27, 4  ;;  %v4227_v39 = vrot.slane %v4116_v27, 6  ;;  %v4447_v24 = vadd.f32 %v12569_v55, %v4116_v27 }
 0x3b0   : > { %v3408_v7 = vpop.f32.mrf.mxu2 }
 0x3b1   : > { %v4448_v50 = vadd.f32 %v12973_v51, %v4226_v60  ;;  %v4449_v16 = vadd.f32 %v12561_v36, %v4227_v39  ;;  %v4575_v38 = vmax.f32 %v4447_v24, 0.0  ;;  %v3464_v40 = vadd.f32 %v3408_v7, %v3079_v43 }
 0x3b2   : > { %v13034_v56 = vld.sshfl [vmem:[#allocation1] sm:$0xff pattern:$0x73625140]  ;;  %v4069_v20 = vpop.f32.mrf.mxu0 }
 0x3b3   : > { %v4576_v17 = vmax.f32 %v4448_v50, 0.0  ;;  %v4577_v4 = vmax.f32 %v4449_v16, 0.0  ;;  %4856 = vst [vmem:[#allocation1 + $0x23] ss:$4 sm:$0xff] %v4575_v38  ;;  %v3857_v10 = vadd.f32 %v13000_v1, %v3464_v40  ;;  %v3033_v3 = vpop.f32.mrf.mxu1 }
 0x3b5   : > { %4859 = vst [vmem:[#allocation1] ss:$4 sm:$0xff] %v4576_v17  ;;  %v4117_v5 = vadd.f32 %v13003_v59, %v3857_v10  ;;  %v11211_v10 = vld [vmem:[#allocation9 + $0x50] sm:$0xff] }
 0x3b6   : > { %4860 = vst [vmem:[#allocation1 + $0x1] ss:$4 sm:$0xff] %v4577_v4  ;;  %v3809_v44 = vpop.f32.mrf.mxu3  ;;  %6155 = vmatpush.bf16.msra.mxu1 %v11211_v10 }
 0x3b7   : > { %v4228_v15 = vrot.slane %v4117_v5, 2  ;;  %v4229_v35 = vrot.slane %v4117_v5, 4  ;;  %v4230_v63 = vrot.slane %v4117_v5, 6  ;;  %v4450_v21 = vadd.f32 %v12566_v41, %v4117_v5 }
 0x3b8   : > { %v3411_v52 = vpop.f32.mrf.mxu2 }
 0x3b9   : > { %v4451_v48 = vadd.f32 %v12569_v55, %v4228_v15  ;;  %v4452_v57 = vadd.f32 %v12973_v51, %v4229_v35  ;;  %v4453_v1 = vadd.f32 %v12561_v36, %v4230_v63  ;;  %v4578_v45 = vmax.f32 %v4450_v21, 0.0 }
 0x3ba   : > { %v3465_v14 = vadd.f32 %v3411_v52, %v3080_v28  ;;  %v13044_v27 = vld.sshfl [vmem:[#allocation1 + $0x20] sm:$0xff pattern:$0x73625140]  ;;  %v4071_v12 = vpop.f32.mrf.mxu0  ;;  %v3082_v28 = vadd.f32 %v3031_v0, %v12468_v62  ;;  %v3083_v0 = vadd.f32 %v3033_v3, %v12480_v19 }
 0x3bb   : > { %v4579_v59 = vmax.f32 %v4451_v48, 0.0  ;;  %v4580_v8 = vmax.f32 %v4452_v57, 0.0  ;;  %v4581_v61 = vmax.f32 %v4453_v1, 0.0  ;;  %4861 = vst [vmem:[#allocation1 + $0x2] ss:$4 sm:$0xff] %v4578_v45  ;;  %v3036_v5 = vpop.f32.mrf.mxu1 }
 0x3bc   : > { %v3858_v37 = vadd.f32 %v13016_v54, %v3465_v14 }
 0x3bd   : > { %4862 = vst [vmem:[#allocation1 + $0x3] ss:$4 sm:$0xff] %v4579_v59 }
 0x3be   : > { %4863 = vst [vmem:[#allocation1 + $0x20] ss:$4 sm:$0xff] %v4580_v8  ;;  %v4118_v25 = vadd.f32 %v4064_v22, %v3858_v37  ;;  %v3811_v40 = vpop.f32.mrf.mxu3 }
 0x3bf   : > { %4864 = vst [vmem:[#allocation1 + $0x21] ss:$4 sm:$0xff] %v4581_v61 }
 0x3c0   : > { %v4231_v43 = vrot.slane %v4118_v25, 2  ;;  %v4232_v60 = vrot.slane %v4118_v25, 6  ;;  %v4454_v39 = vadd.f32 %v12566_v41, %v4118_v25  ;;  %v3413_v24 = vpop.f32.mrf.mxu2 }
 0x3c1   : > { %v3466_v7 = vadd.f32 %v3413_v24, %v3081_v18 }
 0x3c2   : > { %v4455_v50 = vadd.f32 %v12569_v55, %v4231_v43  ;;  %v4456_v16 = vadd.f32 %v12973_v51, %v4232_v60  ;;  %v4582_v54 = vmax.f32 %v4454_v39, 0.0  ;;  %v4074_v25 = vpop.f32.mrf.mxu0 }
 0x3c3   : > { %v3859_v38 = vadd.f32 %v3806_v42, %v3466_v7  ;;  %v3038_v24 = vpop.f32.mrf.mxu1 }
 0x3c4   : > { %v13050_v17 = vld.sshfl [vmem:[#allocation1] sm:$0xff pattern:$0x73625140]  ;;  %v4583_v4 = vmax.f32 %v4455_v50, 0.0  ;;  %v4584_v22 = vmax.f32 %v4456_v16, 0.0 }
 0x3c5   : > { %4865 = vst [vmem:[#allocation1 + $0x22] ss:$4 sm:$0xff] %v4582_v54  ;;  %v4119_v31 = vadd.f32 %v4066_v13, %v3859_v38 }
 0x3c6   : > { %4866 = vst [vmem:[#allocation1 + $0x23] ss:$4 sm:$0xff] %v4583_v4  ;;  %v3814_v37 = vpop.f32.mrf.mxu3 }
 0x3c7   : > { %4869 = vst [vmem:[#allocation1] ss:$4 sm:$0xff] %v4584_v22  ;;  %v4233_v15 = vrot.slane %v4119_v31, 2  ;;  %v4234_v35 = vrot.slane %v4119_v31, 4  ;;  %v4235_v63 = vrot.slane %v4119_v31, 6  ;;  %v4457_v21 = vadd.f32 %v12561_v36, %v4119_v31 }
 0x3c8   : > { %v3416_v42 = vpop.f32.mrf.mxu2 }
 0x3c9   : > { %v4458_v52 = vadd.f32 %v12566_v41, %v4233_v15  ;;  %v4459_v48 = vadd.f32 %v12569_v55, %v4234_v35  ;;  %v4460_v13 = vadd.f32 %v12973_v51, %v4235_v63  ;;  %v4585_v57 = vmax.f32 %v4457_v21, 0.0 }
 0x3ca   : > { %v3467_v1 = vadd.f32 %v3416_v42, %v3082_v28  ;;  %v3084_v15 = vadd.f32 %v3036_v5, %v12483_v6  ;;  %v4076_v42 = vpop.f32.mrf.mxu0  ;;  %v15041_v5 = vld [vmem:[#allocation15_spill] sm:$0xff] }
 0x3cb   : > { %v4586_v45 = vmax.f32 %v4458_v52, 0.0  ;;  %v4587_v14 = vmax.f32 %v4459_v48, 0.0  ;;  %v4588_v59 = vmax.f32 %v4460_v13, 0.0  ;;  %4870 = vst [vmem:[#allocation1 + $0x1] ss:$4 sm:$0xff] %v4585_v57  ;;  %v3041_v48 = vpop.f32.mrf.mxu1 }
 0x3cc   : > { %v3860_v8 = vadd.f32 %v3809_v44, %v3467_v1 }
 0x3cd   : > { %v13057_v61 = vld.sshfl [vmem:[#allocation1 + $0x20] sm:$0xff pattern:$0x73625140]  ;;  %4871 = vst [vmem:[#allocation1 + $0x2] ss:$4 sm:$0xff] %v4586_v45 }
 0x3ce   : > { %4872 = vst [vmem:[#allocation1 + $0x3] ss:$4 sm:$0xff] %v4587_v14  ;;  %v4120_v62 = vadd.f32 %v4069_v20, %v3860_v8  ;;  %v3816_v10 = vpop.f32.mrf.mxu3  ;;  %v3085_v14 = vadd.f32 %v3038_v24, %v15041_v5  ;;  %v15043_v5 = vld [vmem:[#allocation17_spill] sm:$0xff] }
 0x3cf   : > { %4873 = vst [vmem:[#allocation1 + $0x20] ss:$4 sm:$0xff] %v4588_v59 }
 0x3d0   : > { %v4236_v18 = vrot.slane %v4120_v62, 2  ;;  %v4237_v43 = vrot.slane %v4120_v62, 4  ;;  %v4461_v60 = vadd.f32 %v12561_v36, %v4120_v62  ;;  %v3418_v39 = vpop.f32.mrf.mxu2 }
 0x3d1   : > { %v3468_v7 = vadd.f32 %v3418_v39, %v3083_v0 }
 0x3d2   : > { %v4462_v50 = vadd.f32 %v12566_v41, %v4236_v18  ;;  %v4463_v44 = vadd.f32 %v12569_v55, %v4237_v43  ;;  %v4589_v16 = vmax.f32 %v4461_v60, 0.0 }
 0x3d3   : > { %v3861_v54 = vadd.f32 %v3811_v40, %v3468_v7 }
 0x3d4   : > { %v4590_v38 = vmax.f32 %v4462_v50, 0.0  ;;  %v4591_v4 = vmax.f32 %v4463_v44, 0.0  ;;  %4874 = vst [vmem:[#allocation1 + $0x21] ss:$4 sm:$0xff] %v4589_v16  ;;  %v11210_v44 = vld [vmem:[#allocation9 + $0x48] sm:$0xff]  ;;  %v4079_v16 = vpop.f32.mrf.mxu0 }
 0x3d5   : > { %v4121_v20 = vadd.f32 %v4071_v12, %v3861_v54  ;;  %v13068_v12 = vld.sshfl [vmem:[#allocation1] sm:$0xff pattern:$0x73625140]  ;;  %6156 = vmatpush.bf16.msra.mxu1 %v11210_v44 }
 0x3d6   : > { %4875 = vst [vmem:[#allocation1 + $0x22] ss:$4 sm:$0xff] %v4590_v38  ;;  %v3819_v60 = vpop.f32.mrf.mxu3 }
 0x3d7   : > { %4876 = vst [vmem:[#allocation1 + $0x23] ss:$4 sm:$0xff] %v4591_v4  ;;  %v4238_v19 = vrot.slane %v4121_v20, 2  ;;  %v4239_v3 = vrot.slane %v4121_v20, 4  ;;  %v4240_v22 = vrot.slane %v4121_v20, 6  ;;  %v4464_v31 = vadd.f32 %v12973_v51, %v4121_v20  ;;  %v3043_v20 = vpop.f32.mrf.mxu1 }
 0x3d8   : > { %v3421_v35 = vpop.f32.mrf.mxu2 }
 0x3d9   : > { %v4465_v63 = vadd.f32 %v12561_v36, %v4238_v19  ;;  %v4466_v21 = vadd.f32 %v12566_v41, %v4239_v3  ;;  %v4467_v40 = vadd.f32 %v12569_v55, %v4240_v22  ;;  %v4592_v28 = vmax.f32 %v4464_v31, 0.0  ;;  %v15042_v3 = vld [vmem:[#allocation16_spill] sm:$0xff] }
 0x3da   : > { %v3469_v52 = vadd.f32 %v3421_v35, %v3084_v15  ;;  %v3086_v22 = vadd.f32 %v3041_v48, %v15042_v3 }
 0x3db   : > { %v4593_v13 = vmax.f32 %v4465_v63, 0.0  ;;  %v4594_v57 = vmax.f32 %v4466_v21, 0.0  ;;  %v4595_v1 = vmax.f32 %v4467_v40, 0.0  ;;  %4879 = vst [vmem:[#allocation1] ss:$4 sm:$0xff] %v4592_v28 }
 0x3dc   : > { %v3862_v45 = vadd.f32 %v3814_v37, %v3469_v52 }
 0x3dd   : > { %4880 = vst [vmem:[#allocation1 + $0x1] ss:$4 sm:$0xff] %v4593_v13 }
 0x3de   : > { %4881 = vst [vmem:[#allocation1 + $0x2] ss:$4 sm:$0xff] %v4594_v57  ;;  %v4122_v6 = vadd.f32 %v4074_v25, %v3862_v45  ;;  %v13075_v25 = vld.sshfl [vmem:[#allocation1 + $0x20] sm:$0xff pattern:$0x73625140] }
 0x3df   : > { %4882 = vst [vmem:[#allocation1 + $0x3] ss:$4 sm:$0xff] %v4595_v1  ;;  %v3821_v1 = vpop.f32.mrf.mxu3 }
 0x3e0   : > { %v4241_v59 = vrot.slane %v4122_v6, 2  ;;  %v4242_v8 = vrot.slane %v4122_v6, 4  ;;  %v4243_v62 = vrot.slane %v4122_v6, 6  ;;  %v4468_v0 = vadd.f32 %v12973_v51, %v4122_v6  ;;  %v3423_v18 = vpop.f32.mrf.mxu2  ;;  %v4081_v6 = vpop.f32.mrf.mxu0 }
 0x3e1   : > { %v3470_v43 = vadd.f32 %v3423_v18, %v3085_v14  ;;  %v3087_v14 = vadd.f32 %v3043_v20, %v15043_v5 }
 0x3e2   : > { %v4469_v39 = vadd.f32 %v12561_v36, %v4241_v59  ;;  %v4470_v7 = vadd.f32 %v12566_v41, %v4242_v8  ;;  %v4471_v37 = vadd.f32 %v12569_v55, %v4243_v62  ;;  %v4596_v50 = vmax.f32 %v4468_v0, 0.0  ;;  %v3046_v59 = vpop.f32.mrf.mxu1 }
 0x3e3   : > { %v3863_v24 = vadd.f32 %v3816_v10, %v3470_v43 }
 0x3e4   : > { %v4597_v54 = vmax.f32 %v4469_v39, 0.0  ;;  %v4598_v38 = vmax.f32 %v4470_v7, 0.0  ;;  %v4599_v4 = vmax.f32 %v4471_v37, 0.0  ;;  %4883 = vst [vmem:[#allocation1 + $0x20] ss:$4 sm:$0xff] %v4596_v50 }
 0x3e5   : > { %v4123_v19 = vadd.f32 %v4076_v42, %v3863_v24 }
 0x3e6   : > { %4884 = vst [vmem:[#allocation1 + $0x21] ss:$4 sm:$0xff] %v4597_v54  ;;  %v13081_v45 = vld.sshfl [vmem:[#allocation1] sm:$0xff pattern:$0x73625140] }
 0x3e7   : > { %4885 = vst [vmem:[#allocation1 + $0x22] ss:$4 sm:$0xff] %v4598_v38  ;;  %v4244_v31 = vrot.slane %v4123_v19, 2  ;;  %v4245_v15 = vrot.slane %v4123_v19, 4  ;;  %v4246_v35 = vrot.slane %v4123_v19, 6  ;;  %v3824_v20 = vpop.f32.mrf.mxu3  ;;  %v15044_v19 = vld [vmem:[#allocation18_spill] sm:$0xff] }
 0x3e8   : > { %4886 = vst [vmem:[#allocation1 + $0x23] ss:$4 sm:$0xff] %v4599_v4  ;;  %v3426_v63 = vpop.f32.mrf.mxu2  ;;  %v3088_v3 = vadd.f32 %v3046_v59, %v15044_v19 }
 0x3e9   : > { %v4472_v21 = vadd.f32 %v12973_v51, %v4244_v31  ;;  %v4473_v10 = vadd.f32 %v12561_v36, %v4245_v15  ;;  %v4474_v40 = vadd.f32 %v12566_v41, %v4246_v35  ;;  %v3471_v28 = vadd.f32 %v3426_v63, %v3086_v22  ;;  %v4084_v35 = vpop.f32.mrf.mxu0 }
 0x3eb   : > { %v4600_v52 = vmax.f32 %v4472_v21, 0.0  ;;  %v4601_v13 = vmax.f32 %v4473_v10, 0.0  ;;  %v4602_v57 = vmax.f32 %v4474_v40, 0.0  ;;  %v3864_v42 = vadd.f32 %v3819_v60, %v3471_v28  ;;  %v11208_v21 = vld [vmem:[#allocation9 + $0x38] sm:$0xff]  ;;  %v3048_v10 = vpop.f32.mrf.mxu1 }
 0x3ec   : > { %6315 = vmatpush.bf16.msrb.mxu2 %v11208_v21 }
 0x3ed   : > { %4889 = vst [vmem:[#allocation1] ss:$4 sm:$0xff] %v4600_v52  ;;  %v4124_v48 = vadd.f32 %v4079_v16, %v3864_v42 }
 0x3ee   : > { %4890 = vst [vmem:[#allocation1 + $0x1] ss:$4 sm:$0xff] %v4601_v13 }
 0x3ef   : > { %4891 = vst [vmem:[#allocation1 + $0x2] ss:$4 sm:$0xff] %v4602_v57  ;;  %v4247_v8 = vrot.slane %v4124_v48, 2  ;;  %v4475_v62 = vadd.f32 %v12569_v55, %v4124_v48  ;;  %v4248_v0 = vrot.slane %v4124_v48, 4  ;;  %v4249_v18 = vrot.slane %v4124_v48, 6 }
 0x3f0   : > { %v3428_v43 = vpop.f32.mrf.mxu2  ;;  %v13088_v16 = vld.sshfl [vmem:[#allocation1 + $0x20] sm:$0xff pattern:$0x73625140] }
 0x3f1   : > { %v4476_v39 = vadd.f32 %v12973_v51, %v4247_v8  ;;  %v4603_v60 = vmax.f32 %v4475_v62, 0.0  ;;  %v3472_v7 = vadd.f32 %v3428_v43, %v3087_v14  ;;  %v4477_v37 = vadd.f32 %v12561_v36, %v4248_v0  ;;  %v3826_v0 = vpop.f32.mrf.mxu3 }
 0x3f2   : > { %v4478_v50 = vadd.f32 %v12566_v41, %v4249_v18  ;;  %v15045_v18 = vld [vmem:[#allocation19_spill] sm:$0xff] }
 0x3f3   : > { %v4604_v44 = vmax.f32 %v4476_v39, 0.0  ;;  %4892 = vst [vmem:[#allocation1 + $0x3] ss:$4 sm:$0xff] %v4603_v60  ;;  %v3865_v24 = vadd.f32 %v3821_v1, %v3472_v7  ;;  %v4605_v54 = vmax.f32 %v4477_v37, 0.0  ;;  %v3089_v43 = vadd.f32 %v3048_v10, %v15045_v18 }
 0x3f4   : > { %v4606_v38 = vmax.f32 %v4478_v50, 0.0  ;;  %v4952_v60 = vpack.c.bf16 %v12649_v32, %v12649_v32 }
 0x3f5   : > { %4893 = vst [vmem:[#allocation1 + $0x20] ss:$4 sm:$0xff] %v4604_v44  ;;  %v4125_v4 = vadd.f32 %v4081_v6, %v3865_v24  ;;  %v11207_v6 = vld [vmem:[#allocation9 + $0x30] sm:$0xff]  ;;  %v4086_v24 = vpop.f32.mrf.mxu0 }
 0x3f6   : > { %4894 = vst [vmem:[#allocation1 + $0x21] ss:$4 sm:$0xff] %v4605_v54  ;;  %6316 = vmatpush.bf16.msrb.mxu2 %v11207_v6 }
 0x3f7   : > { %4895 = vst [vmem:[#allocation1 + $0x22] ss:$4 sm:$0xff] %v4606_v38  ;;  %v4250_v22 = vrot.slane %v4125_v4, 4  ;;  %v4251_v31 = vrot.slane %v4125_v4, 6  ;;  %v4479_v15 = vadd.f32 %v12569_v55, %v4125_v4  ;;  %v4951_v38 = vpack.c.bf16 %v12634_v11, %v12634_v11  ;;  %v3051_v4 = vpop.f32.mrf.mxu1 }
 0x3f8   : > { %v3431_v63 = vpop.f32.mrf.mxu2 }
 0x3f9   : > { %v4480_v40 = vadd.f32 %v12973_v51, %v4250_v22  ;;  %v4481_v28 = vadd.f32 %v12561_v36, %v4251_v31  ;;  %v4607_v52 = vmax.f32 %v4479_v15, 0.0  ;;  %v3473_v13 = vadd.f32 %v3431_v63, %v3088_v3  ;;  %v15046_v63 = vld [vmem:[#allocation20_spill] sm:$0xff] }
 0x3fa   : > { %v13094_v48 = vld.sshfl [vmem:[#allocation1] sm:$0xff pattern:$0x73625140]  ;;  %v5016_v31 = vunpack.c.l.b16 %v4952_v60  ;;  %v3090_v21 = vadd.f32 %v3051_v4, %v15046_v63  ;;  %v4954_v60 = vpack.c.bf16 %v12699_v30, %v12699_v30  ;;  %v4953_v4 = vpack.c.bf16 %v12680_v46, %v12680_v46  ;;  %v11204_v63 = vld [vmem:[#allocation9 + $0x18] sm:$0xff] }
 0x3fb   : > { %v4608_v57 = vmax.f32 %v4480_v40, 0.0  ;;  %v4609_v42 = vmax.f32 %v4481_v28, 0.0  ;;  %4896 = vst [vmem:[#allocation1 + $0x23] ss:$4 sm:$0xff] %v4607_v52  ;;  %v3866_v1 = vadd.f32 %v3824_v20, %v3473_v13  ;;  %v3829_v13 = vpop.f32.mrf.mxu3 }
 0x3fd   : > { %4899 = vst [vmem:[#allocation1] ss:$4 sm:$0xff] %v4608_v57  ;;  %v4126_v5 = vadd.f32 %v4084_v35, %v3866_v1  ;;  %v5015_v35 = vunpack.c.l.b16 %v4951_v38 }
 0x3fe   : > { %4900 = vst [vmem:[#allocation1 + $0x1] ss:$4 sm:$0xff] %v4609_v42 }
 0x3ff   : > { %v4252_v14 = vrot.slane %v4126_v5, 2  ;;  %v4253_v59 = vrot.slane %v4126_v5, 4  ;;  %v4254_v8 = vrot.slane %v4126_v5, 6  ;;  %v4482_v62 = vadd.f32 %v12566_v41, %v4126_v5  ;;  %v11206_v5 = vld [vmem:[#allocation9 + $0x28] sm:$0xff] }
 0x400   : > { %v3433_v39 = vpop.f32.mrf.mxu2  ;;  %v5047_v28 = vpack.c.b16 %v5016_v31, %v5015_v35  ;;  %6317 = vmatpush.bf16.msrb.mxu2 %v11206_v5 }
 0x401   : > { %v4483_v7 = vadd.f32 %v12569_v55, %v4252_v14  ;;  %v4484_v37 = vadd.f32 %v12973_v51, %v4253_v59  ;;  %v4485_v50 = vadd.f32 %v12561_v36, %v4254_v8  ;;  %v4610_v44 = vmax.f32 %v4482_v62, 0.0  ;;  %v4089_v14 = vpop.f32.mrf.mxu0 }
 0x402   : > { %v3474_v54 = vadd.f32 %v3433_v39, %v3089_v43  ;;  %v13105_v32 = vld.sshfl [vmem:[#allocation1 + $0x20] sm:$0xff pattern:$0x73625140]  ;;  %v5064_v18 = vshrl.u32 %v5047_v28, 16  ;;  %v3053_v43 = vpop.f32.mrf.mxu1 }
 0x403   : > { %v4611_v20 = vmax.f32 %v4483_v7, 0.0  ;;  %v4612_v19 = vmax.f32 %v4484_v37, 0.0  ;;  %v4613_v3 = vmax.f32 %v4485_v50, 0.0  ;;  %4901 = vst [vmem:[#allocation1 + $0x2] ss:$4 sm:$0xff] %v4610_v44  ;;  %v11205_v7 = vld [vmem:[#allocation9 + $0x20] sm:$0xff]  ;;  %v3831_v46 = vpop.f32.mrf.mxu3 }
 0x404   : > { %v3867_v22 = vadd.f32 %v3826_v0, %v3474_v54  ;;  %v15047_v54 = vld [vmem:[#allocation21_spill] sm:$0xff]  ;;  %6318 = vmatpush.bf16.msrb.mxu2 %v11205_v7 }
 0x405   : > { %4902 = vst [vmem:[#allocation1 + $0x3] ss:$4 sm:$0xff] %v4611_v20  ;;  %v3091_v38 = vadd.f32 %v3053_v43, %v15047_v54  ;;  %v13119_v20 = vrot.slane %v5064_v18, 7  ;;  %v11223_v43 = vld [vmem:[#allocation9 + $0xb0] sm:$0xff] }
 0x406   : > { %4903 = vst [vmem:[#allocation1 + $0x20] ss:$4 sm:$0xff] %v4612_v19  ;;  %v4127_v15 = vadd.f32 %v4086_v24, %v3867_v22 }
 0x407   : > { %4904 = vst [vmem:[#allocation1 + $0x21] ss:$4 sm:$0xff] %v4613_v3 }
 0x408   : > { %v4255_v10 = vrot.slane %v4127_v15, 2  ;;  %v4256_v40 = vrot.slane %v4127_v15, 6  ;;  %v4486_v11 = vadd.f32 %v12566_v41, %v4127_v15  ;;  %v3436_v52 = vpop.f32.mrf.mxu2  ;;  %v5018_v15 = vunpack.c.l.b16 %v4954_v60  ;;  %6319 = vmatpush.bf16.msrb.mxu2 %v11204_v63 }
 0x409   : > { %v3475_v57 = vadd.f32 %v3436_v52, %v3090_v21  ;;  %v5067_v21 = vshll.u32 %v5047_v28, 16  ;;  %v5017_v52 = vunpack.c.l.b16 %v4953_v4  ;;  %v11249_v4 = vld [vmem:[#allocation9 + $0xf8] sm:$0xff] }
 0x40a   : > { %v4487_v42 = vadd.f32 %v12569_v55, %v4255_v10  ;;  %v4488_v1 = vadd.f32 %v12973_v51, %v4256_v40  ;;  %v4614_v6 = vmax.f32 %v4486_v11, 0.0  ;;  %6923 = vmatpush.bf16.msrb.mxu0 %v11249_v4 }
 0x40b   : > { %v3868_v59 = vadd.f32 %v3829_v13, %v3475_v57 }
 0x40c   : > { %v13111_v8 = vld.sshfl [vmem:[#allocation1] sm:$0xff pattern:$0x73625140]  ;;  %v4615_v62 = vmax.f32 %v4487_v42, 0.0  ;;  %v4616_v0 = vmax.f32 %v4488_v1, 0.0  ;;  %v5069_v42 = vor.u32 %v5067_v21, %v13119_v20  ;;  %v4091_v1 = vpop.f32.mrf.mxu0  ;;  %v13146_v21 = vld [vmem:[#allocation3] sm:$0xff]  }
 0x40d   : > { %4905 = vst [vmem:[#allocation1 + $0x22] ss:$4 sm:$0xff] %v4614_v6  ;;  %v4128_v39 = vadd.f32 %v4089_v14, %v3868_v59  ;;  %v5048_v6 = vpack.c.b16 %v5018_v15, %v5017_v52  ;;  %v11203_v14 = vld [vmem:[#allocation9 + $0x10] sm:$0xff]  ;;  %v11221_v15 = vld [vmem:[#allocation9 + $0xa0] sm:$0xff] }
 0x40e   : > { %4906 = vst [vmem:[#allocation1 + $0x23] ss:$4 sm:$0xff] %v4615_v62  ;;  %6320 = vmatpush.bf16.msrb.mxu2 %v11203_v14  ;;  %v13130_v18 = vsel %vm11793_vm2, 0, %v5069_v42 }
 0x40f   : > { %4909 = vst [vmem:[#allocation1] ss:$4 sm:$0xff] %v4616_v0  ;;  %v4257_v37 = vrot.slane %v4128_v39, 2  ;;  %v4258_v50 = vrot.slane %v4128_v39, 4  ;;  %v4259_v44 = vrot.slane %v4128_v39, 6  ;;  %v4489_v24 = vadd.f32 %v12561_v36, %v4128_v39 }
 0x410   : > { %v3438_v19 = vpop.f32.mrf.mxu2  ;;  %v5071_v39 = vshrl.u32 %v5048_v6, 16 }
 0x411   : > { %v4490_v3 = vadd.f32 %v12566_v41, %v4257_v37  ;;  %v4491_v30 = vadd.f32 %v12569_v55, %v4258_v50  ;;  %v4492_v22 = vadd.f32 %v12973_v51, %v4259_v44  ;;  %v4617_v31 = vmax.f32 %v4489_v24, 0.0  ;;  %v11224_v51 = vld [vmem:[#allocation9 + $0xb8] sm:$0xff]  ;;  %v11202_v50 = vld [vmem:[#allocation9 + $0x8] sm:$0xff] }
 0x412   : > { %v3476_v35 = vadd.f32 %v3438_v19, %v3091_v38  ;;  %6538 = vmatpush.bf16.msrb.mxu3 %v11224_v51  ;;  %v5255_v44 = vrot.slane %v13130_v18, 1  ;;  %6321 = vmatpush.bf16.msrb.mxu2 %v11202_v50  ;;  %v11222_v38 = vld [vmem:[#allocation9 + $0xa8] sm:$0xff]  ;;  %v13139_v19 = vrot.slane %v5071_v39, 7 }
 0x413   : > { %v4618_v10 = vmax.f32 %v4490_v3, 0.0  ;;  %v4619_v40 = vmax.f32 %v4491_v30, 0.0  ;;  %v4620_v11 = vmax.f32 %v4492_v22, 0.0  ;;  %4910 = vst [vmem:[#allocation1 + $0x1] ss:$4 sm:$0xff] %v4617_v31  ;;  %v11201_v3 = vld [vmem:[#allocation9] sm:$0xff] }
 0x414   : > { %v3869_v13 = vadd.f32 %v3831_v46, %v3476_v35  ;;  %v15049_v30 = vld [vmem:[#allocation22_spill] sm:$0xff]  ;;  %v11248_v35 = vld [vmem:[#allocation9 + $0xf0] sm:$0xff]  ;;  %v11247_v46 = vld [vmem:[#allocation9 + $0xe8] sm:$0xff] }
 0x415   : > { %v13124_v57 = vld.sshfl [vmem:[#allocation1 + $0x20] sm:$0xff pattern:$0x73625140]  ;;  %4911 = vst [vmem:[#allocation1 + $0x2] ss:$4 sm:$0xff] %v4618_v10  ;;  %v4955_v22 = vpack.c.bf16 %v15049_v30, %v15049_v30  ;;  %6924 = vmatpush.bf16.msrb.mxu0 %v11248_v35  ;;  %v15051_v39 = vld [vmem:[#allocation23_spill] sm:$0xff] }
 0x416   : > { %4912 = vst [vmem:[#allocation1 + $0x3] ss:$4 sm:$0xff] %v4619_v40  ;;  %v4129_v5 = vadd.f32 %v4091_v1, %v3869_v13  ;;  %6539 = vmatpush.bf16.msrb.mxu3 %v11223_v43  ;;  %6322 = vmatpush.bf16.msrb.mxu2 %v11201_v3  ;;  %v5261_v13 = vrot.slane %v13130_v18, 7  ;;  %v5223_v1 = vsel %vm11793_vm2, %v13119_v20, 0  ;;  %v5257_v43 = vrot.slane %v13130_v18, 3  ;;  %v11218_v50 = vld [vmem:[#allocation9 + $0x88] sm:$0xff] }
 0x417   : > { %4913 = vst [vmem:[#allocation1 + $0x20] ss:$4 sm:$0xff] %v4620_v11  ;;  %v5019_v10 = vunpack.c.l.b16 %v4955_v22  ;;  %v11220_v11 = vld [vmem:[#allocation9 + $0x98] sm:$0xff]  ;;  %v5258_v20 = vrot.slane %v13130_v18, 4  ;;  %v11217_v3 = vld [vmem:[#allocation9 + $0x80] sm:$0xff]  ;;  %v11244_v30 = vld [vmem:[#allocation9 + $0xd0] sm:$0xff] }
 0x418   : > { %v4260_v28 = vrot.slane %v4129_v5, 2  ;;  %v4261_v59 = vrot.slane %v4129_v5, 4  ;;  %v4493_v62 = vadd.f32 %v12561_v36, %v4129_v5  ;;  %v4956_v36 = vpack.c.bf16 %v12749_v53, %v12749_v53  ;;  %v11219_v5 = vld [vmem:[#allocation9 + $0x90] sm:$0xff] }
 0x419   : > { %v5074_v53 = vshll.u32 %v5048_v6, 16  ;;  %6323 = vmatmul.bf16.vlgmr.msrb.gmra.mxu2 %v13146_v21  ;;  %6925 = vmatpush.bf16.msrb.mxu0 %v11247_v46 }
 0x41a   : > { %v4494_v60 = vadd.f32 %v12566_v41, %v4260_v28  ;;  %v4495_v7 = vadd.f32 %v12569_v55, %v4261_v59  ;;  %v4621_v37 = vmax.f32 %v4493_v62, 0.0  ;;  %v5256_v41 = vrot.slane %v13130_v18, 2  ;;  %6540 = vmatpush.bf16.msrb.mxu3 %v11222_v38  ;;  %v11246_v28 = vld [vmem:[#allocation9 + $0xe0] sm:$0xff]  ;;  %v15050_v59 = vld [vmem:[#allocation24_spill] sm:$0xff] }
 0x41b   : > { %v5020_v31 = vunpack.c.l.b16 %v4956_v36  ;;  %v5076_v63 = vor.u32 %v5074_v53, %v13139_v19  ;;  %v4958_v62 = vpack.c.bf16 %v15050_v59, %v15050_v59  ;;  %v5260_v36 = vrot.slane %v13130_v18, 6  ;;  %v11320_v59 = vld [vmem:[#allocation3] sm:$0xe] }
 0x41c   : > { %4914 = vst [vmem:[#allocation1 + $0x21] ss:$4 sm:$0xff] %v4621_v37  ;;  %v4622_v54 = vmax.f32 %v4494_v60, 0.0  ;;  %v4623_v55 = vmax.f32 %v4495_v7, 0.0  ;;  %v4957_v60 = vpack.c.bf16 %v15051_v39, %v15051_v39  ;;  %v5259_v37 = vrot.slane %v13130_v18, 5 }
 0x41d   : > { %v13137_v24 = vld.sshfl [vmem:[#allocation1] sm:$0xff pattern:$0x73625140]  ;;  %v5049_v40 = vpack.c.b16 %v5020_v31, %v5019_v10  ;;  %v13151_v52 = vsel %vm11793_vm2, 0, %v5076_v63  ;;  %6926 = vmatpush.bf16.msrb.mxu0 %v11246_v28  ;;  %v11243_v63 = vld [vmem:[#allocation9 + $0xc8] sm:$0xff] }
 0x41e   : > { %5369 = vst [vmem:[#allocation1 + $0x1] ss:$4 sm:$0xff] %v13130_v18  ;;  %6541 = vmatpush.bf16.msrb.mxu3 %v11221_v15  ;;  %v5262_v6 = vrot.slane %v13151_v52, 1  ;;  %v5021_v4 = vunpack.c.l.b16 %v4957_v60  ;;  %v5268_v22 = vrot.slane %v13151_v52, 7  ;;  %v11209_v18 = vld [vmem:[#allocation9 + $0x40] sm:$0xff]  ;;  %v5224_v15 = vsel %vm11793_vm2, %v13139_v19, 0 }
 0x41f   : > { %5372 = vst [vmem:[#allocation1 + $0x2] ss:$4 sm:$0xff] %v5255_v44  ;;  %v5078_v51 = vshrl.u32 %v5049_v40, 16  ;;  %v11245_v44 = vld [vmem:[#allocation9 + $0xd8] sm:$0xff]  ;;  %v5081_v38 = vshll.u32 %v5049_v40, 16  ;;  %6157 = vmatpush.bf16.msra.mxu1 %v11209_v18  ;;  %v5263_v10 = vrot.slane %v13151_v52, 2  ;;  %v4960_v40 = vpack.c.bf16 %v12869_v26, %v12869_v26 }
 0x420   : > { %5375 = vst [vmem:[#allocation1 + $0x3] ss:$4 sm:$0xff] %v5256_v41  ;;  %v5264_v19 = vrot.slane %v13151_v52, 3  ;;  %v11319_v28 = vld [vmem:[#allocation3] sm:$0xf0] }
 0x421   : > { %4915 = vst [vmem:[#allocation1 + $0x22] ss:$4 sm:$0xff] %v4622_v54  ;;  %v13167_v7 = vrot.slane %v5078_v51, 7  ;;  %v5022_v54 = vunpack.c.l.b16 %v4958_v62  ;;  %6927 = vmatpush.bf16.msrb.mxu0 %v11245_v44  ;;  %v11242_v51 = vld [vmem:[#allocation9 + $0xc0] sm:$0xff] }
 0x422   : > { %4916 = vst [vmem:[#allocation1 + $0x23] ss:$4 sm:$0xff] %v4623_v55  ;;  %6542 = vmatpush.bf16.msrb.mxu3 %v11220_v11  ;;  %v5267_v55 = vrot.slane %v13151_v52, 6 }
 0x423   : > { %v5083_v41 = vor.u32 %v5081_v38, %v13167_v7  ;;  %v5050_v31 = vpack.c.b16 %v5022_v54, %v5021_v4  ;;  %v5225_v44 = vsel %vm11793_vm2, %v13167_v7, 0  ;;  %v5937_v54 = vshrl.u32 %v13146_v21, 16 }
 0x424   : > { %v4962_v7 = vpack.c.bf16 %v12920_v2, %v12920_v2 }
 0x425   : > { %6928 = vmatpush.bf16.msrb.mxu0 %v11244_v30  ;;  %v13179_v35 = vsel %vm11793_vm2, 0, %v5083_v41  ;;  %v5085_v11 = vshrl.u32 %v5050_v31, 16 }
 0x426   : > { %6543 = vmatpush.bf16.msrb.mxu3 %v11219_v5  ;;  %v5273_v26 = vrot.slane %v13179_v35, 5  ;;  %v5275_v39 = vrot.slane %v13179_v35, 7  ;;  %v5270_v4 = vrot.slane %v13179_v35, 2  ;;  %v5271_v41 = vrot.slane %v13179_v35, 3 }
 0x427   : > { %v5388_v42 = vld [vmem:[#allocation1] sm:$0xff]  ;;  %v13190_v5 = vrot.slane %v5085_v11, 7  ;;  %v5026_v11 = vunpack.c.l.b16 %v4962_v7 }
 0x428   : > { %5391 = vst [vmem:[#allocation1] ss:$4 sm:$0xff] %v5261_v13  ;;  %v5265_v13 = vrot.slane %v13151_v52, 4 }
 0x429   : > { %5393 = vst [vmem:[#allocation1 + $0x1] ss:$4 sm:$0xff] %v5223_v1  ;;  %v13159_v14 = vld.sshfl [vmem:[#allocation1 + $0x20] sm:$0xff pattern:$0x73625140]  ;;  %6929 = vmatpush.bf16.msrb.mxu0 %v11243_v63  ;;  %v5266_v1 = vrot.slane %v13151_v52, 5 }
 0x42a   : > { %5395 = vst [vmem:[#allocation1 + $0x2] ss:$4 sm:$0xff] %v13151_v52  ;;  %6544 = vmatpush.bf16.msrb.mxu3 %v11218_v50  ;;  %v5939_v52 = vshll.u32 %v13146_v21, 16  ;;  %v11321_v50 = vor.u32 %v11320_v59, %v11319_v28  ;;  %v5272_v21 = vrot.slane %v13179_v35, 4 }
 0x42b   : > { %5397 = vst [vmem:[#allocation1 + $0x3] ss:$4 sm:$0xff] %v5262_v6  ;;  %v5024_v6 = vunpack.c.l.b16 %v4960_v40 }
 0x42c   : > { %5736 = vst [vmem:[#allocation3 + $0x8] sm:$0xe] %v5388_v42  ;;  %v4959_v42 = vpack.c.bf16 %v12844_v34, %v12844_v34  ;;  %v5941_v38 = vrot.slane %v5939_v52, 1 }
 0x42d   : > { %5378 = vst [vmem:[#allocation1 + $0x20] ss:$4 sm:$0xff] %v5257_v43  ;;  %6930 = vmatpush.bf16.msrb.mxu0 %v11242_v51  ;;  %v5088_v43 = vshll.u32 %v5050_v31, 16  ;;  %v4961_v31 = vpack.c.bf16 %v12894_v49, %v12894_v49 }
 0x42e   : > { %5381 = vst [vmem:[#allocation1 + $0x21] ss:$4 sm:$0xff] %v5258_v20  ;;  %6545 = vmatpush.bf16.msrb.mxu3 %v11217_v3  ;;  %v5023_v62 = vunpack.c.l.b16 %v4959_v42  ;;  %v5274_v20 = vrot.slane %v13179_v35, 6  ;;  %v5942_v18 = vor.u32 %v5941_v38, %v5937_v54 }
 0x42f   : > { %5384 = vst [vmem:[#allocation1 + $0x22] ss:$4 sm:$0xff] %v5259_v37  ;;  %v5090_v37 = vor.u32 %v5088_v43, %v13190_v5 }
 0x430   : > { %5387 = vst [vmem:[#allocation1 + $0x23] ss:$4 sm:$0xff] %v5260_v36  ;;  %v5051_v60 = vpack.c.b16 %v5024_v6, %v5023_v62  ;;  %v5269_v36 = vrot.slane %v13179_v35, 1  ;;  %v5025_v6 = vunpack.c.l.b16 %v4961_v31 }
 0x431   : > { %v5210_v30 = vsel %vm11793_vm2, 0, %v5090_v37 }
 0x432   : > { %v5406_v53 = vld [vmem:[#allocation1] sm:$0xff]  ;;  %v5092_v3 = vshrl.u32 %v5051_v60, 16  ;;  %v5279_v2 = vrot.slane %v5210_v30, 4  ;;  %v5281_v51 = vrot.slane %v5210_v30, 6  ;;  %v5282_v28 = vrot.slane %v5210_v30, 7 }
 0x433   : > { %5409 = vst [vmem:[#allocation1] ss:$4 sm:$0xff] %v5267_v55  ;;  %v5052_v43 = vpack.c.b16 %v5026_v11, %v5025_v6  ;;  %v5278_v54 = vrot.slane %v5210_v30, 3 }
 0x434   : > { %5411 = vst [vmem:[#allocation1 + $0x1] ss:$4 sm:$0xff] %v5268_v22  ;;  %v13218_v40 = vrot.slane %v5092_v3, 7  ;;  %v11257_v3 = vld [vmem:[#allocation9 + $0x138] sm:$0xff] }
 0x435   : > { %5413 = vst [vmem:[#allocation1 + $0x2] ss:$4 sm:$0xff] %v5224_v15  ;;  %7315 = vmatpush.bf16.msrb.mxu1 %v11257_v3 }
 0x436   : > { %5415 = vst [vmem:[#allocation1 + $0x3] ss:$4 sm:$0xff] %v13179_v35 }
 0x437   : > { %5738 = vst [vmem:[#allocation3 + $0x10] sm:$0xf] %v5406_v53  ;;  %v5389_v46 = vld [vmem:[#allocation1 + $0x20] sm:$0xff]  ;;  %v6435_v53 = vrot.slane %v11321_v50, 1  ;;  %v4964_v50 = vpack.c.bf16 %v12954_v29, %v12954_v29 }
 0x438   : > { %5399 = vst [vmem:[#allocation1 + $0x20] ss:$4 sm:$0xff] %v5263_v10 }
 0x439   : > { %5401 = vst [vmem:[#allocation1 + $0x21] ss:$4 sm:$0xff] %v5264_v19  ;;  %v6673_v19 = vld [vmem:[#allocation3 + $0x8] sm:$0xe]  ;;  %v5028_v7 = vunpack.c.l.b16 %v4964_v50 }
 0x43a   : > { %5403 = vst [vmem:[#allocation1 + $0x22] ss:$4 sm:$0xff] %v5265_v13  ;;  %v6764_v59 = vunpack.c.l.b16 %v6673_v19 }
 0x43b   : > { %5405 = vst [vmem:[#allocation1 + $0x23] ss:$4 sm:$0xff] %v5266_v1  ;;  %v5095_v1 = vshll.u32 %v5051_v60, 16 }
 0x43c   : > { %5737 = vst [vmem:[#allocation3 + $0xc] sm:$0xf] %v5389_v46  ;;  %v5280_v46 = vrot.slane %v5210_v30, 5 }
 0x43d   : > { %v5424_v34 = vld [vmem:[#allocation1] sm:$0xff]  ;;  %v5097_v62 = vor.u32 %v5095_v1, %v13218_v40 }
 0x43e   : > { %5427 = vst [vmem:[#allocation1] ss:$4 sm:$0xff] %v5273_v26 }
 0x43f   : > { %5429 = vst [vmem:[#allocation1 + $0x1] ss:$4 sm:$0xff] %v5274_v20 }
 0x440   : > { %5431 = vst [vmem:[#allocation1 + $0x2] ss:$4 sm:$0xff] %v5275_v39  ;;  %v5277_v39 = vrot.slane %v5210_v30, 2 }
 0x441   : > { %5433 = vst [vmem:[#allocation1 + $0x3] ss:$4 sm:$0xff] %v5225_v44  ;;  %v13241_v44 = vsel %vm11793_vm2, 0, %v5097_v62 }
 0x442   : > { %5740 = vst [vmem:[#allocation3 + $0x18] sm:$0xf] %v5424_v34  ;;  %v5407_v55 = vld [vmem:[#allocation1 + $0x20] sm:$0xff]  ;;  %v5276_v34 = vrot.slane %v5210_v30, 1  ;;  %v5285_v29 = vrot.slane %v13241_v44, 3  ;;  %v5288_v11 = vrot.slane %v13241_v44, 6 }
 0x443   : > { %5417 = vst [vmem:[#allocation1 + $0x20] ss:$4 sm:$0xff] %v5269_v36  ;;  %v13208_v22 = vld [vmem:[#allocation3 + $0x8] sm:$0xff]  ;;  %v5099_v36 = vshrl.u32 %v5052_v43, 16  ;;  %v5289_v3 = vrot.slane %v13241_v44, 7 }
 0x444   : > { %5419 = vst [vmem:[#allocation1 + $0x21] ss:$4 sm:$0xff] %v5270_v4  ;;  %6328 = vmatmul.bf16.gmra.mxu2 %v13208_v22  ;;  %v6436_v15 = vrot.slane %v13208_v22, 1  ;;  %v5944_v63 = vshll.u32 %v13208_v22, 16  ;;  %v13216_v10 = vld [vmem:[#allocation3 + $0xc] sm:$0xf] }
 0x445   : > { %5421 = vst [vmem:[#allocation1 + $0x22] ss:$4 sm:$0xff] %v5271_v41  ;;  %v6765_v42 = vunpack.c.l.b16 %v13216_v10  ;;  %v4963_v41 = vpack.c.bf16 %v12935_v33, %v12935_v33  ;;  %v13253_v31 = vrot.slane %v5099_v36, 7  ;;  %v5948_v19 = vshrl.u32 %v13208_v22, 16 }
 0x446   : > { %5423 = vst [vmem:[#allocation1 + $0x23] ss:$4 sm:$0xff] %v5272_v21  ;;  %v6437_v49 = vsel %vm1815_vm4, %v6435_v53, %v6436_v15  ;;  %v13223_v35 = vrot.slane %v5944_v63, 1  ;;  %v5286_v53 = vrot.slane %v13241_v44, 4  ;;  %v11256_v63 = vld [vmem:[#allocation9 + $0x130] sm:$0xff]  ;;  %v5284_v22 = vrot.slane %v13241_v44, 2 }
 0x447   : > { %5739 = vst [vmem:[#allocation3 + $0x14] sm:$0xf] %v5407_v55  ;;  %6546 = vmatmul.bf16.vlgmr.msrb.gmra.mxu3 %v6437_v49  ;;  %v13231_v20 = vpack.c.b16 %v6765_v42, %v6764_v59  ;;  %v5102_v49 = vshll.u32 %v5052_v43, 16  ;;  %7316 = vmatpush.bf16.msrb.mxu1 %v11256_v63  ;;  %v5283_v59 = vrot.slane %v13241_v44, 1  ;;  %v5227_v63 = vsel %vm11793_vm2, %v13218_v40, 0 }
 0x448   : > { %v5442_v13 = vld [vmem:[#allocation1] sm:$0xff]  ;;  %v5947_v26 = vsel %vm1315_vm3, %v5942_v18, %v13223_v35  ;;  %v5287_v18 = vrot.slane %v13241_v44, 5  ;;  %v5950_v6 = vor.u32 %v5948_v19, %v13223_v35 }
 0x449   : > { %5445 = vst [vmem:[#allocation1] ss:$4 sm:$0xff] %v5279_v2  ;;  %6158 = vmatmul.bf16.vlgmr.msra.gmra.mxu1 %v5947_v26  ;;  %v6820_v38 = vrot.slane %v13231_v20, 1  ;;  %v5027_v2 = vunpack.c.l.b16 %v4963_v41  ;;  %v5104_v1 = vor.u32 %v5102_v49, %v13253_v31  ;;  %v5226_v26 = vsel %vm11793_vm2, %v13190_v5, 0  ;;  %v7450_v41 = vld [vmem:[#allocation3 + $0x8] sm:$0xc] }
 0x44a   : > { %5447 = vst [vmem:[#allocation1 + $0x1] ss:$4 sm:$0xff] %v5280_v46  ;;  %v7083_v40 = vshll.u32 %v13231_v20, 16 }
 0x44b   : > { %5449 = vst [vmem:[#allocation1 + $0x2] ss:$4 sm:$0xff] %v5281_v51  ;;  %v13281_v5 = vsel %vm11793_vm2, 0, %v5104_v1 }
 0x44c   : > { %5451 = vst [vmem:[#allocation1 + $0x3] ss:$4 sm:$0xff] %v5282_v28  ;;  %v5292_v36 = vrot.slane %v13281_v5, 3 }
 0x44d   : > { %5742 = vst [vmem:[#allocation3 + $0x20] sm:$0xf] %v5442_v13  ;;  %v5425_v52 = vld [vmem:[#allocation1 + $0x20] sm:$0xff]  ;;  %v5053_v13 = vpack.c.b16 %v5028_v7, %v5027_v2  ;;  %v4966_v2 = vpack.c.bf16 %v12997_v58, %v12997_v58  ;;  %v7080_v58 = vshrl.u32 %v13231_v20, 16 }
 0x44e   : > { %5435 = vst [vmem:[#allocation1 + $0x20] ss:$4 sm:$0xff] %v5210_v30  ;;  %v13233_v60 = vld [vmem:[#allocation3 + $0x10] sm:$0xff] }
 0x44f   : > { %v13235_v37 = vld [vmem:[#allocation3 + $0x10] sm:$0xff]  ;;  %5437 = vst [vmem:[#allocation1 + $0x21] ss:$4 sm:$0xff] %v5276_v34  ;;  %v6821_v4 = vrot.slane %v13233_v60, 1  ;;  %v5106_v35 = vshrl.u32 %v5053_v13, 16  ;;  %v5030_v1 = vunpack.c.l.b16 %v4966_v2  ;;  %v7472_v20 = vrot.slane %v13233_v60, 2 }
 0x450   : > { %5439 = vst [vmem:[#allocation1 + $0x22] ss:$4 sm:$0xff] %v5277_v39  ;;  %v5952_v55 = vshll.u32 %v13235_v37, 16  ;;  %v6438_v33 = vrot.slane %v13235_v37, 1 }
 0x451   : > { %5441 = vst [vmem:[#allocation1 + $0x23] ss:$4 sm:$0xff] %v5278_v54  ;;  %v6822_v30 = vsel %vm1815_vm4, %v6820_v38, %v6821_v4  ;;  %v13287_v50 = vrot.slane %v5106_v35, 7  ;;  %v5293_v54 = vrot.slane %v13281_v5, 4  ;;  %v5109_v38 = vshll.u32 %v5053_v13, 16 }
 0x452   : > { %5741 = vst [vmem:[#allocation3 + $0x1c] sm:$0xf] %v5425_v52  ;;  %6931 = vmatmul.bf16.vlgmr.msrb.gmra.mxu0 %v6822_v30  ;;  %v13260_v46 = vrot.slane %v5952_v55, 1  ;;  %v6439_v51 = vsel %vm1815_vm4, %v6436_v15, %v6438_v33  ;;  %v5291_v52 = vrot.slane %v13281_v5, 2  ;;  %v5294_v55 = vrot.slane %v13281_v5, 5 }
 0x453   : > { %v5460_v21 = vld [vmem:[#allocation1] sm:$0xff]  ;;  %v5111_v7 = vor.u32 %v5109_v38, %v13287_v50 }
 0x454   : > { %5463 = vst [vmem:[#allocation1] ss:$4 sm:$0xff] %v5285_v29  ;;  %6333 = vmatmul.bf16.gmra.mxu2 %v13235_v37  ;;  %v5955_v62 = vsel %vm1315_vm3, %v5950_v6, %v13260_v46 }
 0x455   : > { %5465 = vst [vmem:[#allocation1 + $0x1] ss:$4 sm:$0xff] %v5286_v53 }
 0x456   : > { %5467 = vst [vmem:[#allocation1 + $0x2] ss:$4 sm:$0xff] %v5287_v18  ;;  %v7469_v18 = vunpack.c.l.b16 %v7450_v41 }
 0x457   : > { %5469 = vst [vmem:[#allocation1 + $0x3] ss:$4 sm:$0xff] %v5288_v11  ;;  %6551 = vmatmul.bf16.gmra.mxu3 %v6439_v51  ;;  %v5956_v11 = vshrl.u32 %v13235_v37, 16 }
 0x458   : > { %5744 = vst [vmem:[#allocation3 + $0x28] sm:$0xf] %v5460_v21  ;;  %v5443_v28 = vld [vmem:[#allocation1 + $0x20] sm:$0xff]  ;;  %v7470_v19 = vpack.c.b16 %v6765_v42, %v7469_v18 }
 0x459   : > { %5453 = vst [vmem:[#allocation1 + $0x20] ss:$4 sm:$0xff] %v5226_v26  ;;  %6163 = vmatmul.bf16.gmra.mxu1 %v5955_v62  ;;  %v13277_v15 = vld [vmem:[#allocation3 + $0x18] sm:$0xff]  ;;  %v5958_v10 = vor.u32 %v5956_v11, %v13260_v46  ;;  %v7088_v46 = vshrl.u32 %v13233_v60, 16  ;;  %v7091_v62 = vshll.u32 %v13233_v60, 16  ;;  %v4968_v11 = vpack.c.bf16 %v13025_v23, %v13025_v23 }
 0x45a   : > { %5455 = vst [vmem:[#allocation1 + $0x21] ss:$4 sm:$0xff] %v13241_v44  ;;  %v13283_v43 = vld [vmem:[#allocation3 + $0x18] sm:$0xff]  ;;  %v6823_v39 = vrot.slane %v13277_v15, 1  ;;  %v4965_v44 = vpack.c.bf16 %v12981_v47, %v12981_v47  ;;  %v13318_v47 = vsel %vm11793_vm2, 0, %v5111_v7  ;;  %v7471_v26 = vrot.slane %v7470_v19, 2 }
 0x45b   : > { %5457 = vst [vmem:[#allocation1 + $0x22] ss:$4 sm:$0xff] %v5283_v59  ;;  %v5960_v29 = vshll.u32 %v13283_v43, 16  ;;  %v6440_v21 = vrot.slane %v13283_v43, 1  ;;  %v5297_v6 = vrot.slane %v13318_v47, 1  ;;  %v7082_v59 = vrot.slane %v7080_v58, 1 }
 0x45c   : > { %5459 = vst [vmem:[#allocation1 + $0x23] ss:$4 sm:$0xff] %v5284_v22  ;;  %v6824_v30 = vsel %vm1815_vm4, %v6821_v4, %v6823_v39  ;;  %v5290_v4 = vrot.slane %v13281_v5, 1  ;;  %v5029_v42 = vunpack.c.l.b16 %v4965_v44  ;;  %v5295_v22 = vrot.slane %v13281_v5, 6  ;;  %v8486_v60 = vld [vmem:[#allocation3 + $0x10] sm:$0x8] }
 0x45d   : > { %5743 = vst [vmem:[#allocation3 + $0x24] sm:$0xf] %v5443_v28  ;;  %v13311_v49 = vrot.slane %v5960_v29, 1  ;;  %v6441_v13 = vsel %vm1815_vm4, %v6438_v33, %v6440_v21  ;;  %v7085_v33 = vrot.slane %v7083_v40, 2  ;;  %v5298_v35 = vrot.slane %v13318_v47, 2  ;;  %v13365_v40 = vld [vmem:[#allocation3 + $0x18] sm:$0xff] }
 0x45e   : > { %v5478_v34 = vld [vmem:[#allocation1] sm:$0xff]  ;;  %v7090_v38 = vrot.slane %v7088_v46, 1  ;;  %v7093_v41 = vrot.slane %v7091_v62, 2  ;;  %v8505_v2 = vunpack.c.l.b16 %v8486_v60  ;;  %v7474_v58 = vrot.slane %v13277_v15, 2  ;;  %v11255_v23 = vld [vmem:[#allocation9 + $0x128] sm:$0xff] }
 0x45f   : > { %5746 = vst [vmem:[#allocation3 + $0x30] sm:$0xf] %v5478_v34  ;;  %v5963_v51 = vsel %vm1315_vm3, %v5958_v10, %v13311_v49  ;;  %v13339_v34 = vsel %vm2853_vm5, %v7471_v26, %v7472_v20  ;;  %7317 = vmatpush.bf16.msrb.mxu1 %v11255_v23  ;;  %v8508_v62 = vrot.slane %v13365_v40, 3  ;;  %v4970_v40 = vpack.c.bf16 %v13044_v27, %v13044_v27 }
 0x460   : > { %5481 = vst [vmem:[#allocation1] ss:$4 sm:$0xff] %v5291_v52  ;;  %v13341_v52 = vld [vmem:[#allocation3 + $0x14] sm:$0xf]  ;;  %v7094_v18 = vor.u32 %v7093_v41, %v7090_v38 }
 0x461   : > { %5483 = vst [vmem:[#allocation1 + $0x1] ss:$4 sm:$0xff] %v5292_v36  ;;  %v5299_v36 = vrot.slane %v13318_v47, 3  ;;  %v14977_v7 = vunpack.c.l.b16 %v13341_v52 }
 0x462   : > { %5485 = vst [vmem:[#allocation1 + $0x2] ss:$4 sm:$0xff] %v5293_v54  ;;  %6936 = vmatmul.bf16.gmra.mxu0 %v6824_v30  ;;  %v5054_v54 = vpack.c.b16 %v5030_v1, %v5029_v42  ;;  %v4967_v42 = vpack.c.bf16 %v13013_v9, %v13013_v9  ;;  %v13376_v1 = vsel %vm2853_vm5, %v7472_v20, %v7474_v58 }
 0x463   : > { %v5461_v53 = vld [vmem:[#allocation1 + $0x20] sm:$0xff]  ;;  %5487 = vst [vmem:[#allocation1 + $0x3] ss:$4 sm:$0xff] %v5294_v55  ;;  %v5296_v55 = vrot.slane %v13281_v5, 7 }
 0x464   : > { %5471 = vst [vmem:[#allocation1 + $0x20] ss:$4 sm:$0xff] %v5289_v3  ;;  %6338 = vmatmul.bf16.gmra.mxu2 %v13283_v43  ;;  %v13332_v28 = vld [vmem:[#allocation3 + $0x20] sm:$0xff]  ;;  %v5113_v44 = vshrl.u32 %v5054_v54, 16 }
 0x465   : > { %5473 = vst [vmem:[#allocation1 + $0x21] ss:$4 sm:$0xff] %v5227_v63  ;;  %v13345_v29 = vld [vmem:[#allocation3 + $0x20] sm:$0xff]  ;;  %v6825_v30 = vrot.slane %v13332_v28, 1  ;;  %v5228_v63 = vsel %vm11793_vm2, %v13253_v31, 0  ;;  %v5300_v31 = vrot.slane %v13318_v47, 4 }
 0x466   : > { %5475 = vst [vmem:[#allocation1 + $0x22] ss:$4 sm:$0xff] %v13281_v5  ;;  %v6442_v10 = vrot.slane %v13345_v29, 1 }
 0x467   : > { %5477 = vst [vmem:[#allocation1 + $0x23] ss:$4 sm:$0xff] %v5290_v4  ;;  %6556 = vmatmul.bf16.gmra.mxu3 %v6441_v13  ;;  %v5968_v4 = vshll.u32 %v13345_v29, 16  ;;  %v6826_v19 = vsel %vm1815_vm4, %v6823_v39, %v6825_v30  ;;  %v8506_v13 = vpack.c.b16 %v14977_v7, %v8505_v2  ;;  %v13373_v39 = vrot.slane %v5113_v44, 7 }
 0x468   : > { %5745 = vst [vmem:[#allocation3 + $0x2c] sm:$0xf] %v5461_v53  ;;  %v7086_v53 = vor.u32 %v7085_v33, %v7082_v59  ;;  %v7100_v59 = vshll.u32 %v13277_v15, 16  ;;  %v5116_v33 = vshll.u32 %v5054_v54, 16  ;;  %v6443_v20 = vsel %vm1815_vm4, %v6440_v21, %v6442_v10 }
 0x469   : > { %6168 = vmatmul.bf16.gmra.mxu1 %v5963_v51  ;;  %v7097_v51 = vshrl.u32 %v13277_v15, 16  ;;  %v13381_v26 = vrot.slane %v5968_v4, 1  ;;  %v8507_v46 = vrot.slane %v8506_v13, 3 }
 0x46a   : > { %v5496_v37 = vld [vmem:[#allocation1] sm:$0xff]  ;;  %v13353_v5 = vsel %vm2460_vm6, %v7086_v53, %v7094_v18  ;;  %v5118_v38 = vor.u32 %v5116_v33, %v13373_v39  ;;  %v5302_v53 = vrot.slane %v13318_v47, 6 }
 0x46b   : > { %5748 = vst [vmem:[#allocation3 + $0x38] sm:$0xf] %v5496_v37  ;;  %v5032_v37 = vunpack.c.l.b16 %v4968_v11  ;;  %v7099_v9 = vrot.slane %v7097_v51, 1  ;;  %v13393_v15 = vsel %vm3891_vm8, %v8507_v46, %v8508_v62 }
 0x46c   : > { %5499 = vst [vmem:[#allocation1] ss:$4 sm:$0xff] %v5297_v6  ;;  %v5964_v6 = vshrl.u32 %v13283_v43, 16  ;;  %v5301_v43 = vrot.slane %v13318_v47, 5  ;;  %v13407_v44 = vsel %vm11793_vm2, 0, %v5118_v38 }
 0x46d   : > { %5501 = vst [vmem:[#allocation1 + $0x1] ss:$4 sm:$0xff] %v5298_v35  ;;  %v5031_v35 = vunpack.c.l.b16 %v4967_v42  ;;  %v5304_v42 = vrot.slane %v13407_v44, 1  ;;  %v5305_v51 = vrot.slane %v13407_v44, 2  ;;  %v5306_v33 = vrot.slane %v13407_v44, 3 }
 0x46e   : > { %v5479_v3 = vld [vmem:[#allocation1 + $0x20] sm:$0xff]  ;;  %5503 = vst [vmem:[#allocation1 + $0x2] ss:$4 sm:$0xff] %v5299_v36  ;;  %v7102_v36 = vrot.slane %v7100_v59, 2 }
 0x46f   : > { %5489 = vst [vmem:[#allocation1 + $0x20] ss:$4 sm:$0xff] %v5295_v22  ;;  %v5966_v22 = vor.u32 %v5964_v6, %v13311_v49  ;;  %v5055_v41 = vpack.c.b16 %v5032_v37, %v5031_v35  ;;  %v13397_v60 = vld [vmem:[#allocation3 + $0x28] sm:$0xff]  ;;  %v7476_v49 = vrot.slane %v13332_v28, 2 }
 0x470   : > { %5491 = vst [vmem:[#allocation1 + $0x21] ss:$4 sm:$0xff] %v5296_v55  ;;  %v7103_v55 = vor.u32 %v7102_v36, %v7099_v9  ;;  %v13415_v11 = vld [vmem:[#allocation3 + $0x28] sm:$0xff]  ;;  %v6827_v13 = vrot.slane %v13397_v60, 1  ;;  %v7115_v38 = vshrl.u32 %v13397_v60, 16 }
 0x471   : > { %5493 = vst [vmem:[#allocation1 + $0x22] ss:$4 sm:$0xff] %v5228_v63  ;;  %v5971_v54 = vsel %vm1315_vm3, %v5966_v22, %v13381_v26  ;;  %v5303_v63 = vrot.slane %v13318_v47, 7  ;;  %v13410_v2 = vsel %vm2853_vm5, %v7474_v58, %v7476_v49  ;;  %v7106_v58 = vshrl.u32 %v13332_v28, 16  ;;  %v13445_v36 = vld [vmem:[#allocation3 + $0x28] sm:$0xff] }
 0x472   : > { %5747 = vst [vmem:[#allocation3 + $0x34] sm:$0xf] %v5479_v3  ;;  %6941 = vmatmul.bf16.gmra.mxu0 %v6826_v19  ;;  %v13401_v3 = vld [vmem:[#allocation3 + $0x20] sm:$0xff]  ;;  %v13413_v4 = vsel %vm2460_vm6, %v7094_v18, %v7103_v55  ;;  %v5229_v19 = vsel %vm11793_vm2, %v13287_v50, 0  ;;  %v7109_v18 = vshll.u32 %v13332_v28, 16  ;;  %v4969_v50 = vpack.c.bf16 %v13034_v56, %v13034_v56 }
 0x473   : > { %5495 = vst [vmem:[#allocation1 + $0x23] ss:$4 sm:$0xff] %v13318_v47  ;;  %v5120_v47 = vshrl.u32 %v5055_v41, 16  ;;  %v8510_v23 = vrot.slane %v13401_v3, 3  ;;  %v7108_v6 = vrot.slane %v7106_v58, 1  ;;  %v5976_v59 = vshll.u32 %v13415_v11, 16 }
 0x474   : > { %5505 = vst [vmem:[#allocation1 + $0x3] ss:$4 sm:$0xff] %v5300_v31  ;;  %6343 = vmatmul.bf16.gmra.mxu2 %v13345_v29  ;;  %v7111_v27 = vrot.slane %v7109_v18, 2  ;;  %v5123_v46 = vshll.u32 %v5055_v41, 16  ;;  %v6828_v56 = vsel %vm1815_vm4, %v6825_v30, %v6827_v13  ;;  %v6444_v35 = vrot.slane %v13415_v11, 1 }
 0x475   : > { %15052 = vst [vmem:[#allocation15_spill] sm:$0xff] %v13393_v15  ;;  %v13431_v37 = vsel %vm3891_vm8, %v8508_v62, %v8510_v23  ;;  %v13436_v9 = vrot.slane %v5120_v47, 7  ;;  %v7478_v62 = vrot.slane %v13397_v60, 2  ;;  %v5972_v41 = vshrl.u32 %v13345_v29, 16 }
 0x476   : > { %15053 = vst [vmem:[#allocation16_spill] sm:$0xff] %v13431_v37  ;;  %v7112_v22 = vor.u32 %v7111_v27, %v7108_v6  ;;  %v5033_v28 = vunpack.c.l.b16 %v4969_v50  ;;  %v13451_v30 = vrot.slane %v5976_v59, 1  ;;  %v5308_v47 = vrot.slane %v13407_v44, 5  ;;  %v11252_v37 = vld [vmem:[#allocation9 + $0x110] sm:$0xff] }
 0x477   : > { %6561 = vmatmul.bf16.gmra.mxu3 %v6443_v20  ;;  %v5034_v20 = vunpack.c.l.b16 %v4970_v40  ;;  %v7117_v58 = vrot.slane %v7115_v38, 1  ;;  %v8512_v18 = vrot.slane %v13445_v36, 3 }
 0x478   : > { %v13458_v3 = vsel %vm2460_vm6, %v7103_v55, %v7112_v22 }
 0x479   : > { %6173 = vmatmul.bf16.gmra.mxu1 %v5971_v54  ;;  %v7118_v54 = vshll.u32 %v13397_v60, 16  ;;  %v5056_v40 = vpack.c.b16 %v5034_v20, %v5033_v28  ;;  %v13480_v50 = vsel %vm3891_vm8, %v8510_v23, %v8512_v18  ;;  %v13483_v59 = vld [vmem:[#allocation3 + $0x30] sm:$0xff]  ;;  %v5230_v23 = vsel %vm11793_vm2, %v13373_v39, 0 }
 0x47a   : > { %v5497_v21 = vld [vmem:[#allocation1 + $0x20] sm:$0xff]  ;;  %15054 = vst [vmem:[#allocation17_spill] sm:$0xff] %v13480_v50  ;;  %v4972_v39 = vpack.c.bf16 %v13057_v61, %v13057_v61 }
 0x47b   : > { %5749 = vst [vmem:[#allocation3 + $0x3c] sm:$0xf] %v5497_v21  ;;  %v5514_v31 = vld [vmem:[#allocation1] sm:$0xff]  ;;  %v13455_v21 = vsel %vm2853_vm5, %v7476_v49, %v7478_v62  ;;  %v6445_v49 = vsel %vm1815_vm4, %v6442_v10, %v6444_v35  ;;  %v7120_v55 = vrot.slane %v7118_v54, 2  ;;  %v5127_v6 = vshrl.u32 %v5056_v40, 16 }
 0x47c   : > { %5507 = vst [vmem:[#allocation1 + $0x20] ss:$4 sm:$0xff] %v5301_v43  ;;  %v5125_v43 = vor.u32 %v5123_v46, %v13436_v9  ;;  %v13497_v38 = vld [vmem:[#allocation3 + $0x30] sm:$0xff] }
 0x47d   : > { %5509 = vst [vmem:[#allocation1 + $0x21] ss:$4 sm:$0xff] %v5302_v53  ;;  %v5974_v53 = vor.u32 %v5972_v41, %v13381_v26  ;;  %v5309_v26 = vrot.slane %v13407_v44, 6  ;;  %v7121_v10 = vor.u32 %v7120_v55, %v7117_v58 }
 0x47e   : > { %5511 = vst [vmem:[#allocation1 + $0x22] ss:$4 sm:$0xff] %v5303_v63  ;;  %v13461_v63 = vld [vmem:[#allocation3 + $0x30] sm:$0xff]  ;;  %v13477_v29 = vsel %vm11793_vm2, 0, %v5125_v43 }
 0x47f   : > { %5513 = vst [vmem:[#allocation1 + $0x23] ss:$4 sm:$0xff] %v5229_v19  ;;  %v7480_v27 = vrot.slane %v13461_v63, 2  ;;  %v7124_v46 = vshrl.u32 %v13461_v63, 16  ;;  %v5311_v20 = vrot.slane %v13477_v29, 1  ;;  %v5312_v54 = vrot.slane %v13477_v29, 2 }
 0x480   : > { %5750 = vst [vmem:[#allocation3 + $0x40] sm:$0xf] %v5514_v31  ;;  %v5307_v31 = vrot.slane %v13407_v44, 4  ;;  %v6829_v28 = vrot.slane %v13461_v63, 1  ;;  %v5313_v58 = vrot.slane %v13477_v29, 3 }
 0x481   : > { %5517 = vst [vmem:[#allocation1] ss:$4 sm:$0xff] %v13407_v44  ;;  %v13495_v36 = vsel %vm2853_vm5, %v7478_v62, %v7480_v27  ;;  %v8514_v62 = vrot.slane %v13483_v59, 3  ;;  %v5315_v59 = vrot.slane %v13477_v29, 5 }
 0x482   : > { %5519 = vst [vmem:[#allocation1 + $0x1] ss:$4 sm:$0xff] %v5304_v42  ;;  %6946 = vmatmul.bf16.gmra.mxu0 %v6828_v56  ;;  %v5310_v42 = vrot.slane %v13407_v44, 7  ;;  %v7127_v56 = vshll.u32 %v13461_v63, 16  ;;  %v13501_v43 = vld [vmem:[#allocation3 + $0x38] sm:$0xff]  ;;  %v6830_v61 = vsel %vm1815_vm4, %v6827_v13, %v6829_v28  ;;  %v5316_v13 = vrot.slane %v13477_v29, 6 }
 0x483   : > { %5521 = vst [vmem:[#allocation1 + $0x2] ss:$4 sm:$0xff] %v5305_v51  ;;  %v5979_v51 = vsel %vm1315_vm3, %v5974_v53, %v13451_v30  ;;  %v13504_v53 = vrot.slane %v5127_v6, 7  ;;  %v13526_v6 = vld [vmem:[#allocation3 + $0x38] sm:$0xff]  ;;  %v7133_v60 = vshrl.u32 %v13501_v43, 16 }
 0x484   : > { %5523 = vst [vmem:[#allocation1 + $0x3] ss:$4 sm:$0xff] %v5306_v33  ;;  %6348 = vmatmul.bf16.gmra.mxu2 %v13415_v11  ;;  %v13486_v33 = vsel %vm2460_vm6, %v7112_v22, %v7121_v10  ;;  %v7126_v22 = vrot.slane %v7124_v46, 1  ;;  %v7129_v41 = vrot.slane %v7127_v56, 2  ;;  %v7136_v56 = vshll.u32 %v13501_v43, 16 }
 0x486   : > { %v5515_v19 = vld [vmem:[#allocation1 + $0x20] sm:$0xff] }
 0x487   : > { %5751 = vst [vmem:[#allocation3 + $0x44] sm:$0xf] %v5515_v19  ;;  %6566 = vmatmul.bf16.gmra.mxu3 %v6445_v49  ;;  %v7130_v19 = vor.u32 %v7129_v41, %v7126_v22  ;;  %v5984_v49 = vshll.u32 %v13497_v38, 16  ;;  %v7135_v22 = vrot.slane %v7133_v60, 1 }
 0x488   : > { %5525 = vst [vmem:[#allocation1 + $0x20] ss:$4 sm:$0xff] %v5307_v31  ;;  %v5130_v31 = vshll.u32 %v5056_v40, 16 }
 0x489   : > { %5527 = vst [vmem:[#allocation1 + $0x21] ss:$4 sm:$0xff] %v5308_v47  ;;  %6178 = vmatmul.bf16.gmra.mxu1 %v5979_v51  ;;  %v4971_v47 = vpack.c.bf16 %v13050_v17, %v13050_v17  ;;  %v13514_v55 = vsel %vm2460_vm6, %v7121_v10, %v7130_v19  ;;  %v5036_v17 = vunpack.c.l.b16 %v4972_v39  ;;  %v7482_v51 = vrot.slane %v13501_v43, 2 }
 0x48a   : > { %5529 = vst [vmem:[#allocation1 + $0x22] ss:$4 sm:$0xff] %v5309_v26  ;;  %v13517_v26 = vsel %vm3891_vm8, %v8512_v18, %v8514_v62  ;;  %v6446_v10 = vrot.slane %v13497_v38, 1  ;;  %v5314_v18 = vrot.slane %v13477_v29, 4 }
 0x48b   : > { %5531 = vst [vmem:[#allocation1 + $0x23] ss:$4 sm:$0xff] %v5310_v42  ;;  %v5532_v44 = vld [vmem:[#allocation1] sm:$0xff]  ;;  %v5132_v42 = vor.u32 %v5130_v31, %v13504_v53  ;;  %v13534_v46 = vsel %vm2853_vm5, %v7480_v27, %v7482_v51  ;;  %v7138_v31 = vrot.slane %v7136_v56, 2 }
 0x48c   : > { %5752 = vst [vmem:[#allocation3 + $0x48] sm:$0xf] %v5532_v44  ;;  %v5035_v44 = vunpack.c.l.b16 %v4971_v47  ;;  %v8516_v47 = vrot.slane %v13526_v6, 3 }
 0x48d   : > { %5535 = vst [vmem:[#allocation1] ss:$4 sm:$0xff] %v5230_v23  ;;  %v5980_v23 = vshrl.u32 %v13415_v11, 16  ;;  %v13545_v39 = vsel %vm11793_vm2, 0, %v5132_v42  ;;  %v7139_v42 = vor.u32 %v7138_v31, %v7135_v22  ;;  %v5231_v11 = vsel %vm11793_vm2, %v13436_v9, 0 }
 0x48e   : > { %5537 = vst [vmem:[#allocation1 + $0x1] ss:$4 sm:$0xff] %v13477_v29  ;;  %v13541_v41 = vld [vmem:[#allocation3 + $0x40] sm:$0xff]  ;;  %v5057_v27 = vpack.c.b16 %v5036_v17, %v5035_v44  ;;  %v13556_v17 = vsel %vm3891_vm8, %v8514_v62, %v8516_v47  ;;  %v13577_v44 = vld [vmem:[#allocation3 + $0x38] sm:$0xff] }
 0x48f   : > { %5539 = vst [vmem:[#allocation1 + $0x2] ss:$4 sm:$0xff] %v5311_v20  ;;  %v13539_v20 = vrot.slane %v5984_v49, 1  ;;  %v6447_v49 = vsel %vm1815_vm4, %v6444_v35, %v6446_v10  ;;  %v5318_v35 = vrot.slane %v13545_v39, 1  ;;  %v13568_v62 = vsel %vm2460_vm6, %v7130_v19, %v7139_v42 }
 0x490   : > { %5541 = vst [vmem:[#allocation1 + $0x3] ss:$4 sm:$0xff] %v5312_v54  ;;  %v11254_v54 = vld [vmem:[#allocation9 + $0x120] sm:$0xff]  ;;  %v7142_v60 = vshrl.u32 %v13541_v41, 16  ;;  %v7145_v9 = vshll.u32 %v13541_v41, 16  ;;  %v14979_v19 = vrot.slane %v13501_v43, 1 }
 0x491   : > { %15055 = vst [vmem:[#allocation18_spill] sm:$0xff] %v13517_v26  ;;  %7318 = vmatpush.bf16.msrb.mxu1 %v11254_v54 }
 0x492   : > { %v5533_v40 = vld [vmem:[#allocation1 + $0x20] sm:$0xff]  ;;  %6951 = vmatmul.bf16.gmra.mxu0 %v6830_v61  ;;  %v5317_v61 = vrot.slane %v13477_v29, 7  ;;  %15056 = vst [vmem:[#allocation19_spill] sm:$0xff] %v13556_v17  ;;  %v4974_v29 = vpack.c.bf16 %v13075_v25, %v13075_v25  ;;  %v5319_v25 = vrot.slane %v13545_v39, 2 }
 0x493   : > { %5753 = vst [vmem:[#allocation3 + $0x4c] sm:$0xf] %v5533_v40 }
 0x494   : > { %5543 = vst [vmem:[#allocation1 + $0x20] ss:$4 sm:$0xff] %v5313_v58  ;;  %6353 = vmatmul.bf16.gmra.mxu2 %v13497_v38  ;;  %v5982_v58 = vor.u32 %v5980_v23, %v13451_v30  ;;  %v5134_v30 = vshrl.u32 %v5057_v27, 16  ;;  %v5038_v31 = vunpack.c.l.b16 %v4974_v29 }
 0x495   : > { %5545 = vst [vmem:[#allocation1 + $0x21] ss:$4 sm:$0xff] %v5314_v18  ;;  %v7484_v18 = vrot.slane %v13541_v41, 2 }
 0x496   : > { %5547 = vst [vmem:[#allocation1 + $0x22] ss:$4 sm:$0xff] %v5315_v59  ;;  %v5987_v6 = vsel %vm1315_vm3, %v5982_v58, %v13539_v20  ;;  %v13571_v59 = vld [vmem:[#allocation3 + $0x40] sm:$0xff]  ;;  %v13586_v22 = vrot.slane %v5134_v30, 7  ;;  %v5320_v58 = vrot.slane %v13545_v39, 3  ;;  %v5323_v30 = vrot.slane %v13545_v39, 6 }
 0x497   : > { %5549 = vst [vmem:[#allocation1 + $0x23] ss:$4 sm:$0xff] %v5316_v13  ;;  %v5550_v40 = vld [vmem:[#allocation1] sm:$0xff]  ;;  %6571 = vmatmul.bf16.gmra.mxu3 %v6447_v49  ;;  %v4973_v13 = vpack.c.bf16 %v13068_v12, %v13068_v12  ;;  %v13581_v56 = vsel %vm2853_vm5, %v7482_v51, %v7484_v18  ;;  %v7144_v49 = vrot.slane %v7142_v60, 1  ;;  %v7147_v12 = vrot.slane %v7145_v9, 2 }
 0x498   : > { %5754 = vst [vmem:[#allocation3 + $0x50] sm:$0xf] %v5550_v40  ;;  %v5321_v40 = vrot.slane %v13545_v39, 4  ;;  %v5322_v51 = vrot.slane %v13545_v39, 5 }
 0x499   : > { %5553 = vst [vmem:[#allocation1] ss:$4 sm:$0xff] %v5317_v61  ;;  %6183 = vmatmul.bf16.gmra.mxu1 %v5987_v6  ;;  %v8518_v61 = vrot.slane %v13571_v59, 3  ;;  %v5137_v6 = vshll.u32 %v5057_v27, 16  ;;  %v7148_v29 = vor.u32 %v7147_v12, %v7144_v49  ;;  %v6832_v59 = vsel %vm1815_vm4, %v6829_v28, %v14979_v19 }
 0x49a   : > { %5555 = vst [vmem:[#allocation1 + $0x1] ss:$4 sm:$0xff] %v5231_v11  ;;  %v13584_v23 = vld [vmem:[#allocation3 + $0x48] sm:$0xff]  ;;  %v5037_v11 = vunpack.c.l.b16 %v4973_v13  ;;  %v5988_v12 = vshrl.u32 %v13497_v38, 16 }
 0x49b   : > { %5557 = vst [vmem:[#allocation1 + $0x2] ss:$4 sm:$0xff] %v13545_v39  ;;  %v13595_v60 = vsel %vm3891_vm8, %v8516_v47, %v8518_v61  ;;  %v5139_v9 = vor.u32 %v5137_v6, %v13586_v22  ;;  %v7486_v13 = vrot.slane %v13584_v23, 2  ;;  %v13610_v49 = vsel %vm2460_vm6, %v7139_v42, %v7148_v29 }
 0x49c   : > { %5559 = vst [vmem:[#allocation1 + $0x3] ss:$4 sm:$0xff] %v5318_v35  ;;  %v5992_v35 = vshll.u32 %v13577_v44, 16  ;;  %v13603_v27 = vpack.c.b16 %v5038_v31, %v5037_v11  ;;  %v7151_v63 = vshrl.u32 %v13584_v23, 16  ;;  %v7154_v28 = vshll.u32 %v13584_v23, 16 }
 0x49d   : > { %15057 = vst [vmem:[#allocation20_spill] sm:$0xff] %v13595_v60  ;;  %v13616_v31 = vsel %vm2853_vm5, %v7484_v18, %v7486_v13  ;;  %v5217_v11 = vsel %vm11793_vm2, 0, %v5139_v9  ;;  %v4976_v9 = vpack.c.bf16 %v13088_v16, %v13088_v16 }
 0x49e   : > { %v5551_v54 = vld [vmem:[#allocation1 + $0x20] sm:$0xff]  ;;  %v7156_v42 = vrot.slane %v7154_v28, 2  ;;  %v5326_v16 = vrot.slane %v5217_v11, 2  ;;  %v5330_v19 = vrot.slane %v5217_v11, 6 }
 0x49f   : > { %5755 = vst [vmem:[#allocation3 + $0x54] sm:$0xf] %v5551_v54  ;;  %v14978_v54 = vrot.slane %v13577_v44, 1 }
 0x4a0   : > { %5561 = vst [vmem:[#allocation1 + $0x20] ss:$4 sm:$0xff] %v5319_v25  ;;  %v13606_v25 = vld [vmem:[#allocation3 + $0x48] sm:$0xff] }
 0x4a1   : > { %5563 = vst [vmem:[#allocation1 + $0x21] ss:$4 sm:$0xff] %v5320_v58  ;;  %v5324_v58 = vrot.slane %v13545_v39, 7  ;;  %v5232_v39 = vsel %vm11793_vm2, %v13504_v53, 0  ;;  %v8520_v18 = vrot.slane %v13606_v25, 3 }
 0x4a2   : > { %5565 = vst [vmem:[#allocation1 + $0x22] ss:$4 sm:$0xff] %v5321_v40  ;;  %6956 = vmatmul.bf16.gmra.mxu0 %v6832_v59  ;;  %v13620_v40 = vrot.slane %v5992_v35, 1  ;;  %v6449_v35 = vsel %vm1815_vm4, %v6446_v10, %v14978_v54  ;;  %v5141_v59 = vshrl.u32 %v13603_v27, 16 }
 0x4a3   : > { %5567 = vst [vmem:[#allocation1 + $0x23] ss:$4 sm:$0xff] %v5322_v51  ;;  %v5568_v47 = vld [vmem:[#allocation1] sm:$0xff]  ;;  %v7153_v51 = vrot.slane %v7151_v63, 1  ;;  %v13645_v38 = vsel %vm3891_vm8, %v8518_v61, %v8520_v18  ;;  %v4975_v63 = vpack.c.bf16 %v13081_v45, %v13081_v45  ;;  %v5040_v61 = vunpack.c.l.b16 %v4976_v9 }
 0x4a4   : > { %5756 = vst [vmem:[#allocation3 + $0x58] sm:$0xf] %v5568_v47  ;;  %6358 = vmatmul.bf16.gmra.mxu2 %v13577_v44  ;;  %v5328_v45 = vrot.slane %v5217_v11, 4  ;;  %v5329_v9 = vrot.slane %v5217_v11, 5 }
 0x4a5   : > { %5571 = vst [vmem:[#allocation1] ss:$4 sm:$0xff] %v5323_v30  ;;  %v5990_v30 = vor.u32 %v5988_v12, %v13539_v20  ;;  %v7157_v47 = vor.u32 %v7156_v42, %v7153_v51  ;;  %v5325_v20 = vrot.slane %v5217_v11, 1  ;;  %v13652_v12 = vrot.slane %v5141_v59, 7 }
 0x4a6   : > { %v13622_v6 = vld [vmem:[#allocation3 + $0x50] sm:$0xff]  ;;  %5573 = vst [vmem:[#allocation1 + $0x1] ss:$4 sm:$0xff] %v5324_v58  ;;  %v5327_v51 = vrot.slane %v5217_v11, 3  ;;  %v14980_v59 = vrot.slane %v13541_v41, 1 }
 0x4a7   : > { %5575 = vst [vmem:[#allocation1 + $0x2] ss:$4 sm:$0xff] %v5232_v39  ;;  %6576 = vmatmul.bf16.gmra.mxu3 %v6449_v35  ;;  %v5995_v53 = vsel %vm1315_vm3, %v5990_v30, %v13620_v40  ;;  %v13642_v25 = vsel %vm2460_vm6, %v7148_v29, %v7157_v47  ;;  %v7488_v28 = vrot.slane %v13622_v6, 2  ;;  %v13650_v58 = vld [vmem:[#allocation3 + $0x50] sm:$0xff]  ;;  %v7160_v29 = vshrl.u32 %v13622_v6, 16  ;;  %v13659_v35 = vld [vmem:[#allocation3 + $0x40] sm:$0xff] }
 0x4a8   : > { %5577 = vst [vmem:[#allocation1 + $0x3] ss:$4 sm:$0xff] %v5217_v11  ;;  %v7163_v39 = vshll.u32 %v13622_v6, 16  ;;  %v5144_v30 = vshll.u32 %v13603_v27, 16 }
 0x4a9   : > { %15058 = vst [vmem:[#allocation21_spill] sm:$0xff] %v13645_v38  ;;  %6188 = vmatmul.bf16.gmra.mxu1 %v5995_v53  ;;  %v13656_v42 = vsel %vm2853_vm5, %v7486_v13, %v7488_v28  ;;  %v7162_v53 = vrot.slane %v7160_v29, 1  ;;  %v5331_v29 = vrot.slane %v5217_v11, 7 }
 0x4aa   : > { %v5569_v10 = vld [vmem:[#allocation1 + $0x20] sm:$0xff]  ;;  %v7165_v7 = vrot.slane %v7163_v39, 2  ;;  %v5146_v54 = vor.u32 %v5144_v30, %v13652_v12 }
 0x4ab   : > { %5757 = vst [vmem:[#allocation3 + $0x5c] sm:$0xf] %v5569_v10  ;;  %v5039_v10 = vunpack.c.l.b16 %v4975_v63  ;;  %v15060_v63 = vrot.slane %v13501_v43, 1  ;;  %v5233_v43 = vsel %vm11793_vm2, %v13586_v22, 0  ;;  %v4977_v22 = vpack.c.bf16 %v13094_v48, %v13094_v48 }
 0x4ac   : > { %5579 = vst [vmem:[#allocation1 + $0x20] ss:$4 sm:$0xff] %v5325_v20  ;;  %v8522_v20 = vrot.slane %v13650_v58, 3  ;;  %v13665_v60 = vor.u32 %v7165_v7, %v7162_v53  ;;  %v5218_v11 = vsel %vm11793_vm2, 0, %v5146_v54 }
 0x4ad   : > { %5581 = vst [vmem:[#allocation1 + $0x21] ss:$4 sm:$0xff] %v5326_v16  ;;  %v5059_v38 = vpack.c.b16 %v5040_v61, %v5039_v10  ;;  %v6000_v16 = vshll.u32 %v13659_v35, 16  ;;  %v6834_v58 = vsel %vm1815_vm4, %v15060_v63, %v14980_v59  ;;  %v13688_v61 = vpop.f32.mrf.mxu2  ;;  %v5332_v10 = vrot.slane %v5218_v11, 1 }
 0x4ae   : > { %5583 = vst [vmem:[#allocation1 + $0x22] ss:$4 sm:$0xff] %v5327_v51  ;;  %v13668_v27 = vsel %vm3891_vm8, %v8520_v18, %v8522_v20  ;;  %v13680_v7 = vsel %vm2460_vm6, %v7157_v47, %v13665_v60  ;;  %v6450_v18 = vrot.slane %v13659_v35, 1  ;;  %v5996_v47 = vshrl.u32 %v13577_v44, 16 }
 0x4af   : > { %5585 = vst [vmem:[#allocation1 + $0x23] ss:$4 sm:$0xff] %v5328_v45  ;;  %v5586_v13 = vld [vmem:[#allocation1] sm:$0xff]  ;;  %v5148_v39 = vshrl.u32 %v5059_v38, 16  ;;  %v13694_v45 = vrot.slane %v6000_v16, 1 }
 0x4b0   : > { %5758 = vst [vmem:[#allocation3 + $0x60] sm:$0xf] %v5586_v13  ;;  %v5998_v16 = vor.u32 %v5996_v47, %v13620_v40  ;;  %v11253_v47 = vld [vmem:[#allocation9 + $0x118] sm:$0xff] }
 0x4b1   : > { %15059 = vst [vmem:[#allocation14_spill] sm:$0xff] %v13668_v27  ;;  %v5334_v27 = vrot.slane %v5218_v11, 3  ;;  %7319 = vmatpush.bf16.msrb.mxu1 %v11253_v47 }
 0x4b2   : > { %5589 = vst [vmem:[#allocation1] ss:$4 sm:$0xff] %v5329_v9  ;;  %v13676_v51 = vld [vmem:[#allocation3 + $0x58] sm:$0xff]  ;;  %6961 = vmatmul.bf16.gmra.mxu0 %v6834_v58  ;;  %v13711_v58 = vrot.slane %v5148_v39, 7 }
 0x4b3   : > { %5591 = vst [vmem:[#allocation1 + $0x1] ss:$4 sm:$0xff] %v5330_v19  ;;  %v4978_v19 = vpack.c.bf16 %v13105_v32, %v13105_v32  ;;  %v7490_v30 = vrot.slane %v13676_v51, 2  ;;  %v13697_v54 = vld [vmem:[#allocation3 + $0x58] sm:$0xff]  ;;  %v7169_v9 = vshrl.u32 %v13676_v51, 16  ;;  %v15061_v32 = vrot.slane %v13577_v44, 1 }
 0x4b4   : > { %5593 = vst [vmem:[#allocation1 + $0x2] ss:$4 sm:$0xff] %v5331_v29  ;;  %6363 = vmatmul.bf16.gmra.mxu2 %v13659_v35  ;;  %v5333_v29 = vrot.slane %v5218_v11, 2  ;;  %v7172_v59 = vshll.u32 %v13676_v51, 16  ;;  %v6003_v44 = vsel %vm1315_vm3, %v5998_v16, %v13694_v45  ;;  %v14982_v40 = vrot.slane %v13697_v54, 3 }
 0x4b5   : > { %5595 = vst [vmem:[#allocation1 + $0x3] ss:$4 sm:$0xff] %v5233_v43  ;;  %v6451_v13 = vsel %vm1815_vm4, %v15061_v32, %v6450_v18  ;;  %v13709_v63 = vsel %vm2853_vm5, %v7488_v28, %v7490_v30  ;;  %v5042_v48 = vunpack.c.l.b16 %v4978_v19  ;;  %v7171_v43 = vrot.slane %v7169_v9, 1  ;;  %7320 = vmatpush.bf16.msrb.mxu1 %v11252_v37 }
 0x4b6   : > { %v5587_v53 = vld [vmem:[#allocation1 + $0x20] sm:$0xff]  ;;  %v5151_v28 = vshll.u32 %v5059_v38, 16  ;;  %v7174_v32 = vrot.slane %v7172_v59, 2  ;;  %v13720_v19 = vsel %vm3891_vm8, %v8522_v20, %v14982_v40  ;;  %v5336_v9 = vrot.slane %v5218_v11, 5  ;;  %v13727_v59 = vpop.f32.mrf.mxu2 }
 0x4b7   : > { %5759 = vst [vmem:[#allocation3 + $0x64] sm:$0xf] %v5587_v53  ;;  %6581 = vmatmul.bf16.gmra.mxu3 %v6451_v13  ;;  %v5041_v53 = vunpack.c.l.b16 %v4977_v22  ;;  %v5335_v13 = vrot.slane %v5218_v11, 4  ;;  %v5337_v38 = vrot.slane %v5218_v11, 6  ;;  %v5338_v20 = vrot.slane %v5218_v11, 7 }
 0x4b8   : > { %5597 = vst [vmem:[#allocation1 + $0x20] ss:$4 sm:$0xff] %v5218_v11  ;;  %v15063_v11 = vrot.slane %v13541_v41, 1 }
 0x4b9   : > { %5599 = vst [vmem:[#allocation1 + $0x21] ss:$4 sm:$0xff] %v5332_v10  ;;  %6193 = vmatmul.bf16.gmra.mxu1 %v6003_v44  ;;  %v5153_v10 = vor.u32 %v5151_v28, %v13711_v58  ;;  %v5060_v16 = vpack.c.b16 %v5042_v48, %v5041_v53  ;;  %v13723_v44 = vor.u32 %v7174_v32, %v7171_v43 }
 0x4ba   : > { %5601 = vst [vmem:[#allocation1 + $0x22] ss:$4 sm:$0xff] %v5333_v29  ;;  %v13725_v29 = vld [vmem:[#allocation3 + $0x48] sm:$0xff] }
 0x4bb   : > { %5603 = vst [vmem:[#allocation1 + $0x23] ss:$4 sm:$0xff] %v5334_v27  ;;  %v14981_v27 = vrot.slane %v13584_v23, 1  ;;  %v13735_v47 = vsel %vm2460_vm6, %v13665_v60, %v13723_v44  ;;  %v13739_v48 = vsel %vm11793_vm2, 0, %v5153_v10  ;;  %v5155_v43 = vshrl.u32 %v5060_v16, 16 }
 0x4bc   : > { %v5604_v39 = vld [vmem:[#allocation1] sm:$0xff]  ;;  %15062 = vst [vmem:[#allocation22_spill] sm:$0xff] %v13720_v19  ;;  %v6008_v28 = vshll.u32 %v13725_v29, 16  ;;  %v5234_v10 = vsel %vm11793_vm2, %v13652_v12, 0  ;;  %v6004_v12 = vshrl.u32 %v13659_v35, 16  ;;  %v5340_v40 = vrot.slane %v13739_v48, 2 }
 0x4bd   : > { %5760 = vst [vmem:[#allocation3 + $0x68] sm:$0xf] %v5604_v39  ;;  %v6836_v60 = vsel %vm1815_vm4, %v15063_v11, %v14981_v27  ;;  %v13761_v41 = vrot.slane %v5155_v43, 7  ;;  %v4980_v11 = vpack.c.bf16 %v13124_v57, %v13124_v57  ;;  %v5341_v43 = vrot.slane %v13739_v48, 3 }
 0x4be   : > { %5607 = vst [vmem:[#allocation1] ss:$4 sm:$0xff] %v5335_v13  ;;  %v13730_v22 = vld [vmem:[#allocation3 + $0x60] sm:$0xff]  ;;  %v13768_v27 = vrot.slane %v6008_v28, 1  ;;  %v4979_v57 = vpack.c.bf16 %v13111_v8, %v13111_v8  ;;  %v6006_v19 = vor.u32 %v6004_v12, %v13694_v45  ;;  %v5342_v17 = vrot.slane %v13739_v48, 4 }
 0x4bf   : > { %5609 = vst [vmem:[#allocation1 + $0x1] ss:$4 sm:$0xff] %v5336_v9  ;;  %v14983_v53 = vrot.slane %v13730_v22, 2  ;;  %v13743_v32 = vld [vmem:[#allocation3 + $0x60] sm:$0xff]  ;;  %v7178_v39 = vshrl.u32 %v13730_v22, 16  ;;  %v14984_v9 = vrot.slane %v13725_v29, 1 }
 0x4c0   : > { %5611 = vst [vmem:[#allocation1 + $0x2] ss:$4 sm:$0xff] %v5337_v38  ;;  %v5339_v38 = vrot.slane %v13739_v48, 1  ;;  %v5343_v12 = vrot.slane %v13739_v48, 5 }
 0x4c1   : > { %5613 = vst [vmem:[#allocation1 + $0x3] ss:$4 sm:$0xff] %v5338_v20  ;;  %v13759_v20 = vsel %vm2853_vm5, %v7490_v30, %v14983_v53  ;;  %v6453_v28 = vsel %vm1815_vm4, %v6450_v18, %v14984_v9  ;;  %v5044_v18 = vunpack.c.l.b16 %v4980_v11 }
 0x4c2   : > { %v5605_v13 = vld [vmem:[#allocation1 + $0x20] sm:$0xff]  ;;  %6966 = vmatmul.bf16.gmra.mxu0 %v6836_v60  ;;  %v7180_v60 = vrot.slane %v7178_v39, 1 }
 0x4c3   : > { %5761 = vst [vmem:[#allocation3 + $0x6c] sm:$0xf] %v5605_v13  ;;  %v7181_v13 = vshll.u32 %v13730_v22, 16 }
 0x4c4   : > { %5615 = vst [vmem:[#allocation1 + $0x20] ss:$4 sm:$0xff] %v5234_v10  ;;  %6368 = vmatmul.bf16.gmra.mxu2 %v13725_v29  ;;  %v5158_v10 = vshll.u32 %v5060_v16, 16  ;;  %v15065_v16 = vrot.slane %v13697_v54, 3 }
 0x4c5   : > { %5617 = vst [vmem:[#allocation1 + $0x21] ss:$4 sm:$0xff] %v13739_v48  ;;  %v7183_v39 = vrot.slane %v7181_v13, 2 }
 0x4c6   : > { %5619 = vst [vmem:[#allocation1 + $0x22] ss:$4 sm:$0xff] %v5339_v38  ;;  %v6159_v53 = vpop.f32.mrf.mxu1  ;;  %v15064_v38 = vrot.slane %v13743_v32, 3  ;;  %v5160_v35 = vor.u32 %v5158_v10, %v13761_v41  ;;  %v13807_v10 = vld [vmem:[#allocation3 + $0x50] sm:$0xff] }
 0x4c7   : > { %5621 = vst [vmem:[#allocation1 + $0x23] ss:$4 sm:$0xff] %v5340_v40  ;;  %v6325_v13 = vadd.f32 %v13688_v61, %v6159_v53  ;;  %v13791_v26 = vpop.f32.mrf.mxu2  ;;  %6586 = vmatmul.bf16.gmra.mxu3 %v6453_v28  ;;  %v13794_v45 = vor.u32 %v7183_v39, %v7180_v60  ;;  %v6011_v40 = vsel %vm1315_vm3, %v6006_v19, %v13768_v27  ;;  %v5344_v61 = vrot.slane %v13739_v48, 6 }
 0x4c8   : > { %v5622_v30 = vld [vmem:[#allocation1] sm:$0xff]  ;;  %v13788_v8 = vsel %vm3891_vm8, %v15065_v16, %v15064_v38  ;;  %v5043_v53 = vunpack.c.l.b16 %v4979_v57  ;;  %v13811_v19 = vsel %vm11793_vm2, 0, %v5160_v35  ;;  %v14986_v57 = vrot.slane %v13622_v6, 1 }
 0x4c9   : > { %15066 = vst [vmem:[#allocation24_spill] sm:$0xff] %v13788_v8  ;;  %6198 = vmatmul.bf16.gmra.mxu1 %v6011_v40  ;;  %v5235_v16 = vsel %vm11793_vm2, %v13711_v58, 0  ;;  %v15067_v35 = vrot.slane %v13730_v22, 2  ;;  %v5348_v8 = vrot.slane %v13811_v19, 3 }
 0x4ca   : > { %5762 = vst [vmem:[#allocation3 + $0x70] sm:$0xf] %v5622_v30  ;;  %v13799_v54 = vld [vmem:[#allocation3 + $0x68] sm:$0xff]  ;;  %v13805_v30 = vsel %vm2460_vm6, %v13723_v44, %v13794_v45  ;;  %v6547_v11 = vpop.f32.mrf.mxu3  ;;  %v5345_v44 = vrot.slane %v13739_v48, 7 }
 0x4cb   : > { %5625 = vst [vmem:[#allocation1] ss:$4 sm:$0xff] %v5341_v43  ;;  %v6637_v60 = vadd.f32 %v6547_v11, %v6325_v13  ;;  %v5061_v43 = vpack.c.b16 %v5044_v18, %v5043_v53  ;;  %v14985_v39 = vrot.slane %v13799_v54, 2  ;;  %v5346_v13 = vrot.slane %v13811_v19, 1 }
 0x4cc   : > { %5627 = vst [vmem:[#allocation1 + $0x1] ss:$4 sm:$0xff] %v5342_v17  ;;  %v13814_v17 = vld [vmem:[#allocation3 + $0x68] sm:$0xff]  ;;  %v7187_v40 = vshrl.u32 %v13799_v54, 16  ;;  %v6016_v53 = vshll.u32 %v13807_v10, 16  ;;  %v4982_v11 = vpack.c.bf16 %v13159_v14, %v13159_v14 }
 0x4cd   : > { %5629 = vst [vmem:[#allocation1 + $0x2] ss:$4 sm:$0xff] %v5343_v12  ;;  %v13827_v18 = vsel %vm2853_vm5, %v15067_v35, %v14985_v39  ;;  %v5162_v58 = vshrl.u32 %v5061_v43, 16  ;;  %v7190_v35 = vshll.u32 %v13799_v54, 16  ;;  %v14987_v39 = vrot.slane %v13814_v17, 3 }
 0x4ce   : > { %5631 = vst [vmem:[#allocation1 + $0x3] ss:$4 sm:$0xff] %v5344_v61  ;;  %v5623_v28 = vld [vmem:[#allocation1 + $0x20] sm:$0xff]  ;;  %v6161_v38 = vpop.f32.mrf.mxu1  ;;  %v7189_v9 = vrot.slane %v7187_v40, 1 }
 0x4cf   : > { %5763 = vst [vmem:[#allocation3 + $0x74] sm:$0xf] %v5623_v28  ;;  %v6932_v12 = vpop.f32.mrf.mxu0  ;;  %v6327_v48 = vadd.f32 %v13727_v59, %v6161_v38  ;;  %v13831_v61 = vpop.f32.mrf.mxu2  ;;  %v15068_v59 = vrot.slane %v13584_v23, 1  ;;  %v15069_v23 = vrot.slane %v13743_v32, 3 }
 0x4d0   : > { %5633 = vst [vmem:[#allocation1 + $0x20] ss:$4 sm:$0xff] %v5345_v44  ;;  %v13836_v28 = vadd.f32 %v6932_v12, %v6637_v60  ;;  %v4981_v44 = vpack.c.bf16 %v13137_v24, %v13137_v24  ;;  %v7192_v12 = vrot.slane %v7190_v35, 2  ;;  %v13858_v24 = vrot.slane %v5162_v58, 7 }
 0x4d1   : > { %5635 = vst [vmem:[#allocation1 + $0x21] ss:$4 sm:$0xff] %v5235_v16  ;;  %v6838_v38 = vsel %vm1815_vm4, %v15068_v59, %v14986_v57  ;;  %v5347_v16 = vrot.slane %v13811_v19, 2  ;;  %v13855_v59 = vsel %vm3891_vm8, %v15069_v23, %v14987_v39  ;;  %v13862_v60 = vrot.slane %v6016_v53, 1 }
 0x4d2   : > { %5637 = vst [vmem:[#allocation1 + $0x22] ss:$4 sm:$0xff] %v13811_v19  ;;  %6971 = vmatmul.bf16.gmra.mxu0 %v6838_v38  ;;  %v6549_v14 = vpop.f32.mrf.mxu3  ;;  %v5046_v38 = vunpack.c.l.b16 %v4982_v11  ;;  %v5349_v35 = vrot.slane %v13811_v19, 4  ;;  %v13865_v32 = vor.u32 %v7192_v12, %v7189_v9  ;;  %v5045_v58 = vunpack.c.l.b16 %v4981_v44 }
 0x4d3   : > { %5639 = vst [vmem:[#allocation1 + $0x23] ss:$4 sm:$0xff] %v5346_v13  ;;  %v6638_v57 = vadd.f32 %v6549_v14, %v6327_v48  ;;  %v6012_v13 = vshrl.u32 %v13725_v29, 16  ;;  %v5350_v48 = vrot.slane %v13811_v19, 5  ;;  %v5165_v14 = vshll.u32 %v5061_v43, 16 }
 0x4d4   : > { %15070 = vst [vmem:[#allocation23_spill] sm:$0xff] %v13855_v59  ;;  %6373 = vmatmul.bf16.gmra.mxu2 %v13807_v10  ;;  %v15071_v11 = vrot.slane %v13807_v10, 1  ;;  %v15072_v39 = vrot.slane %v13725_v29, 1  ;;  %v13879_v9 = vsel %vm2460_vm6, %v13794_v45, %v13865_v32  ;;  %v5062_v29 = vpack.c.b16 %v5046_v38, %v5045_v58 }
 0x4d5   : > { %v5640_v40 = vld [vmem:[#allocation1] sm:$0xff]  ;;  %v6014_v59 = vor.u32 %v6012_v13, %v13768_v27  ;;  %15073 = vst [vmem:[#allocation25_spill] sm:$0xff] %v13879_v9  ;;  %v5167_v44 = vor.u32 %v5165_v14, %v13858_v24  ;;  %v5351_v45 = vrot.slane %v13811_v19, 6 }
 0x4d6   : > { %5764 = vst [vmem:[#allocation3 + $0x78] sm:$0xf] %v5640_v40  ;;  %v13867_v23 = vld [vmem:[#allocation3 + $0x70] sm:$0xff]  ;;  %v6164_v40 = vpop.f32.mrf.mxu1  ;;  %v6455_v53 = vsel %vm1815_vm4, %v15072_v39, %v15071_v11  ;;  %v5169_v58 = vshrl.u32 %v5062_v29, 16  ;;  %v13909_v11 = vld [vmem:[#allocation3 + $0x58] sm:$0xff] }
 0x4d7   : > { %5643 = vst [vmem:[#allocation1] ss:$4 sm:$0xff] %v5347_v16  ;;  %v6934_v16 = vpop.f32.mrf.mxu0  ;;  %v13882_v43 = vpop.f32.mrf.mxu2  ;;  %6591 = vmatmul.bf16.gmra.mxu3 %v6455_v53  ;;  %v6019_v27 = vsel %vm1315_vm3, %v6014_v59, %v13862_v60  ;;  %v14988_v39 = vrot.slane %v13867_v23, 2  ;;  %v13890_v13 = vld [vmem:[#allocation3 + $0x70] sm:$0xff]  ;;  %v7196_v59 = vshrl.u32 %v13867_v23, 16  ;;  %v13904_v14 = vsel %vm11793_vm2, 0, %v5167_v44 }
 0x4d8   : > { %5645 = vst [vmem:[#allocation1 + $0x1] ss:$4 sm:$0xff] %v5348_v8  ;;  %v6330_v8 = vadd.f32 %v13791_v26, %v6164_v40  ;;  %v13885_v12 = vadd.f32 %v6934_v16, %v6638_v57  ;;  %v5352_v40 = vrot.slane %v13811_v19, 7  ;;  %v15074_v57 = vrot.slane %v13799_v54, 2 }
 0x4d9   : > { %5647 = vst [vmem:[#allocation1 + $0x2] ss:$4 sm:$0xff] %v5349_v35  ;;  %6203 = vmatmul.bf16.gmra.mxu1 %v6019_v27  ;;  %v5236_v19 = vsel %vm11793_vm2, %v13761_v41, 0  ;;  %v7198_v53 = vrot.slane %v7196_v59, 1  ;;  %v7199_v16 = vshll.u32 %v13867_v23, 16  ;;  %v14989_v27 = vrot.slane %v13890_v13, 3 }
 0x4da   : > { %5649 = vst [vmem:[#allocation1 + $0x3] ss:$4 sm:$0xff] %v5350_v48  ;;  %v5641_v26 = vld [vmem:[#allocation1 + $0x20] sm:$0xff]  ;;  %v6552_v35 = vpop.f32.mrf.mxu3  ;;  %v13899_v38 = vsel %vm2853_vm5, %v15074_v57, %v14988_v39  ;;  %v5353_v44 = vrot.slane %v13904_v14, 1  ;;  %v15076_v41 = vrot.slane %v13814_v17, 3  ;;  %v5355_v17 = vrot.slane %v13904_v14, 3 }
 0x4db   : > { %5765 = vst [vmem:[#allocation3 + $0x7c] sm:$0xf] %v5641_v26  ;;  %v6639_v48 = vadd.f32 %v6552_v35, %v6330_v8  ;;  %v7201_v35 = vrot.slane %v7199_v16, 2  ;;  %v13927_v8 = vrot.slane %v5169_v58, 7  ;;  %v6024_v16 = vshll.u32 %v13909_v11, 16 }
 0x4dc   : > { %15075 = vst [vmem:[#allocation26_spill] sm:$0xff] %v13899_v38  ;;  %v5356_v58 = vrot.slane %v13904_v14, 4  ;;  %v5357_v37 = vrot.slane %v13904_v14, 5 }
 0x4dd   : > { %5651 = vst [vmem:[#allocation1 + $0x20] ss:$4 sm:$0xff] %v5351_v45 }
 0x4de   : > { %5653 = vst [vmem:[#allocation1 + $0x21] ss:$4 sm:$0xff] %v5352_v40  ;;  %v6166_v45 = vpop.f32.mrf.mxu1  ;;  %v13921_v40 = vsel %vm3891_vm8, %v15076_v41, %v14989_v27  ;;  %v13933_v41 = vor.u32 %v7201_v35, %v7198_v53  ;;  %v15078_v27 = vrot.slane %v13676_v51, 1 }
 0x4df   : > { %5655 = vst [vmem:[#allocation1 + $0x22] ss:$4 sm:$0xff] %v5236_v19  ;;  %v6937_v57 = vpop.f32.mrf.mxu0  ;;  %v6332_v59 = vadd.f32 %v13831_v61, %v6166_v45  ;;  %v13924_v39 = vpop.f32.mrf.mxu2  ;;  %v5354_v19 = vrot.slane %v13904_v14, 2  ;;  %v15079_v61 = vrot.slane %v13622_v6, 1 }
 0x4e0   : > { %5657 = vst [vmem:[#allocation1 + $0x23] ss:$4 sm:$0xff] %v13904_v14  ;;  %v13929_v50 = vadd.f32 %v6937_v57, %v6639_v48  ;;  %v5172_v48 = vshll.u32 %v5062_v29, 16  ;;  %v14991_v57 = vrot.slane %v13909_v11, 1  ;;  %v13947_v53 = vsel %vm2460_vm6, %v13865_v32, %v13933_v41 }
 0x4e1   : > { %v5658_v26 = vld [vmem:[#allocation1] sm:$0xff]  ;;  %15077 = vst [vmem:[#allocation27_spill] sm:$0xff] %v13921_v40  ;;  %v6840_v45 = vsel %vm1815_vm4, %v15079_v61, %v15078_v27  ;;  %v13952_v29 = vrot.slane %v6024_v16, 1  ;;  %v15082_v16 = vrot.slane %v13867_v23, 2 }
 0x4e2   : > { %5766 = vst [vmem:[#allocation3 + $0x80] sm:$0xf] %v5658_v26  ;;  %v13940_v40 = vld [vmem:[#allocation3 + $0x78] sm:$0xff]  ;;  %6976 = vmatmul.bf16.gmra.mxu0 %v6840_v45  ;;  %v6554_v26 = vpop.f32.mrf.mxu3  ;;  %v5174_v27 = vor.u32 %v5172_v48, %v13927_v8 }
 0x4e3   : > { %5661 = vst [vmem:[#allocation1] ss:$4 sm:$0xff] %v5353_v44  ;;  %v6640_v6 = vadd.f32 %v6554_v26, %v6332_v59  ;;  %v6020_v44 = vshrl.u32 %v13807_v10, 16  ;;  %v7498_v35 = vrot.slane %v13940_v40, 2  ;;  %v13957_v61 = vld [vmem:[#allocation3 + $0x78] sm:$0xff]  ;;  %v15081_v59 = vrot.slane %v13807_v10, 1 }
 0x4e4   : > { %5663 = vst [vmem:[#allocation1 + $0x1] ss:$4 sm:$0xff] %v5354_v19  ;;  %6378 = vmatmul.bf16.gmra.mxu2 %v13909_v11  ;;  %v5358_v19 = vrot.slane %v13904_v14, 6  ;;  %v7205_v26 = vshrl.u32 %v13940_v40, 16  ;;  %v5359_v10 = vrot.slane %v13904_v14, 7  ;;  %v14990_v14 = vrot.slane %v13957_v61, 3 }
 0x4e5   : > { %5665 = vst [vmem:[#allocation1 + $0x2] ss:$4 sm:$0xff] %v5355_v17  ;;  %v6457_v45 = vsel %vm1815_vm4, %v15081_v59, %v14991_v57  ;;  %v13970_v48 = vsel %vm2853_vm5, %v15082_v16, %v7498_v35  ;;  %v7208_v16 = vshll.u32 %v13940_v40, 16 }
 0x4e6   : > { %15080 = vst [vmem:[#allocation28_spill] sm:$0xff] %v13947_v53  ;;  %v6169_v32 = vpop.f32.mrf.mxu1  ;;  %v7207_v59 = vrot.slane %v7205_v26, 1 }
 0x4e7   : > { %5667 = vst [vmem:[#allocation1 + $0x3] ss:$4 sm:$0xff] %v5356_v58  ;;  %v5659_v17 = vld [vmem:[#allocation1 + $0x20] sm:$0xff]  ;;  %v6022_v58 = vor.u32 %v6020_v44, %v13862_v60  ;;  %v6939_v15 = vpop.f32.mrf.mxu0  ;;  %v6335_v53 = vadd.f32 %v13882_v43, %v6169_v32  ;;  %v13974_v9 = vpop.f32.mrf.mxu2  ;;  %6596 = vmatmul.bf16.gmra.mxu3 %v6457_v45  ;;  %v5222_v60 = vsel %vm11793_vm2, 0, %v5174_v27  ;;  %v5237_v43 = vsel %vm11793_vm2, %v13858_v24, 0 }
 0x4e8   : > { %5767 = vst [vmem:[#allocation3 + $0x84] sm:$0xf] %v5659_v17  ;;  %v13979_v44 = vadd.f32 %v6939_v15, %v6640_v6  ;;  %v7210_v15 = vrot.slane %v7208_v16, 2  ;;  %v5360_v32 = vrot.slane %v5222_v60, 1  ;;  %v5361_v26 = vrot.slane %v5222_v60, 2 }
 0x4e9   : > { %15083 = vst [vmem:[#allocation29_spill] sm:$0xff] %v13970_v48  ;;  %v6027_v17 = vsel %vm1315_vm3, %v6022_v58, %v13952_v29  ;;  %v13995_v58 = vld [vmem:[#allocation3 + $0x60] sm:$0xff]  ;;  %v5362_v16 = vrot.slane %v5222_v60, 3 }
 0x4ea   : > { %5669 = vst [vmem:[#allocation1 + $0x20] ss:$4 sm:$0xff] %v5357_v37  ;;  %6208 = vmatmul.bf16.gmra.mxu1 %v6027_v17  ;;  %v6557_v37 = vpop.f32.mrf.mxu3  ;;  %v7211_v24 = vor.u32 %v7210_v15, %v7207_v59  ;;  %v6032_v59 = vshll.u32 %v13995_v58, 16 }
 0x4eb   : > { %5671 = vst [vmem:[#allocation1 + $0x21] ss:$4 sm:$0xff] %v5358_v19  ;;  %v6641_v6 = vadd.f32 %v6557_v37, %v6335_v53  ;;  %v15084_v19 = vrot.slane %v13890_v13, 3 }
 0x4ec   : > { %5673 = vst [vmem:[#allocation1 + $0x22] ss:$4 sm:$0xff] %v5359_v10  ;;  %v14992_v10 = vrot.slane %v13730_v22, 1 }
 0x4ed   : > { %5675 = vst [vmem:[#allocation1 + $0x23] ss:$4 sm:$0xff] %v5237_v43  ;;  %v13993_v45 = vsel %vm3891_vm8, %v15084_v19, %v14990_v14  ;;  %v14002_v43 = vsel %vm2460_vm6, %v13933_v41, %v7211_v24  ;;  %v5363_v41 = vrot.slane %v5222_v60, 4 }
 0x4ee   : > { %v5676_v27 = vld [vmem:[#allocation1] sm:$0xff]  ;;  %15085 = vst [vmem:[#allocation30_spill] sm:$0xff] %v13993_v45  ;;  %v6171_v53 = vpop.f32.mrf.mxu1  ;;  %v5365_v45 = vrot.slane %v5222_v60, 6 }
 0x4ef   : > { %5768 = vst [vmem:[#allocation3 + $0x88] sm:$0xf] %v5676_v27  ;;  %v13998_v17 = vld [vmem:[#allocation3 + $0x80] sm:$0xff]  ;;  %v6942_v13 = vpop.f32.mrf.mxu0  ;;  %v6337_v37 = vadd.f32 %v13924_v39, %v6171_v53  ;;  %v6341_v27 = vpop.f32.mrf.mxu2 }
 0x4f0   : > { %5679 = vst [vmem:[#allocation1] ss:$4 sm:$0xff] %v5222_v60  ;;  %v14005_v19 = vadd.f32 %v6942_v13, %v6641_v6  ;;  %v7500_v15 = vrot.slane %v13998_v17, 2  ;;  %v14014_v57 = vld [vmem:[#allocation3 + $0x80] sm:$0xff]  ;;  %v5364_v6 = vrot.slane %v5222_v60, 5  ;;  %v7214_v13 = vshrl.u32 %v13998_v17, 16 }
 0x4f1   : > { %5681 = vst [vmem:[#allocation1 + $0x1] ss:$4 sm:$0xff] %v5360_v32  ;;  %v15087_v32 = vrot.slane %v13676_v51, 1 }
 0x4f2   : > { %5683 = vst [vmem:[#allocation1 + $0x2] ss:$4 sm:$0xff] %v5361_v26  ;;  %v6559_v39 = vpop.f32.mrf.mxu3  ;;  %v14020_v53 = vsel %vm2853_vm5, %v7498_v35, %v7500_v15  ;;  %v8534_v35 = vrot.slane %v14014_v57, 3  ;;  %v5238_v57 = vsel %vm11793_vm2, %v13927_v8, 0  ;;  %v14053_v8 = vld [vmem:[#allocation3 + $0x68] sm:$0xff] }
 0x4f3   : > { %15086 = vst [vmem:[#allocation31_spill] sm:$0xff] %v14002_v43  ;;  %v6842_v26 = vsel %vm1815_vm4, %v15087_v32, %v14992_v10  ;;  %v6642_v51 = vadd.f32 %v6559_v39, %v6337_v37  ;;  %v5366_v32 = vrot.slane %v5222_v60, 7  ;;  %v14025_v10 = vrot.slane %v6032_v59, 1 }
 0x4f4   : > { %5685 = vst [vmem:[#allocation1 + $0x3] ss:$4 sm:$0xff] %v5362_v16  ;;  %v5677_v14 = vld [vmem:[#allocation1 + $0x20] sm:$0xff]  ;;  %6981 = vmatmul.bf16.gmra.mxu0 %v6842_v26  ;;  %6383 = vmatmul.bf16.gmra.mxu2 %v13995_v58  ;;  %v6028_v26 = vshrl.u32 %v13909_v11, 16  ;;  %v7217_v16 = vshll.u32 %v13998_v17, 16  ;;  %v15090_v37 = vrot.slane %v13909_v11, 1 }
 0x4f5   : > { %5769 = vst [vmem:[#allocation3 + $0x8c] sm:$0xf] %v5677_v14  ;;  %v7216_v14 = vrot.slane %v7214_v13, 1 }
 0x4f6   : > { %15088 = vst [vmem:[#allocation32_spill] sm:$0xff] %v14020_v53  ;;  %v6174_v43 = vpop.f32.mrf.mxu1  ;;  %v15089_v53 = vrot.slane %v13995_v58, 1  ;;  %v7219_v59 = vrot.slane %v7217_v16, 2 }
 0x4f7   : > { %5687 = vst [vmem:[#allocation1 + $0x20] ss:$4 sm:$0xff] %v5363_v41  ;;  %v6030_v41 = vor.u32 %v6028_v26, %v13952_v29  ;;  %v6944_v48 = vpop.f32.mrf.mxu0  ;;  %v6344_v13 = vpop.f32.mrf.mxu2 }
 0x4f8   : > { %5689 = vst [vmem:[#allocation1 + $0x21] ss:$4 sm:$0xff] %v5364_v6  ;;  %v6459_v60 = vsel %vm1815_vm4, %v15090_v37, %v15089_v53  ;;  %v6340_v6 = vadd.f32 %v13974_v9, %v6174_v43  ;;  %v14044_v53 = vadd.f32 %v6944_v48, %v6642_v51  ;;  %v7220_v16 = vor.u32 %v7219_v59, %v7216_v14 }
 0x4f9   : > { %5691 = vst [vmem:[#allocation1 + $0x22] ss:$4 sm:$0xff] %v5365_v45  ;;  %6601 = vmatmul.bf16.gmra.mxu3 %v6459_v60  ;;  %v15091_v45 = vrot.slane %v13957_v61, 3  ;;  %v6035_v29 = vsel %vm1315_vm3, %v6030_v41, %v14025_v10  ;;  %v14993_v48 = vrot.slane %v13799_v54, 1 }
 0x4fa   : > { %5693 = vst [vmem:[#allocation1 + $0x23] ss:$4 sm:$0xff] %v5366_v32  ;;  %6213 = vmatmul.bf16.gmra.mxu1 %v6035_v29  ;;  %v6562_v43 = vpop.f32.mrf.mxu3  ;;  %v14051_v32 = vsel %vm2460_vm6, %v7211_v24, %v7220_v16 }
 0x4fb   : > { %v5694_v39 = vld [vmem:[#allocation1] sm:$0xff]  ;;  %v14042_v11 = vsel %vm3891_vm8, %v15091_v45, %v8534_v35  ;;  %15093 = vst [vmem:[#allocation34_spill] sm:$0xff] %v14051_v32  ;;  %v6643_v0 = vadd.f32 %v6562_v43, %v6340_v6  ;;  %v15096_v43 = vrot.slane %v13730_v22, 1 }
 0x4fc   : > { %5770 = vst [vmem:[#allocation3 + $0x90] sm:$0xf] %v5694_v39  ;;  %v14048_v9 = vld [vmem:[#allocation3 + $0x88] sm:$0xff] }
 0x4fd   : > { %15092 = vst [vmem:[#allocation33_spill] sm:$0xff] %v14042_v11  ;;  %v7502_v61 = vrot.slane %v14048_v9, 2  ;;  %v14057_v26 = vld [vmem:[#allocation3 + $0x88] sm:$0xff]  ;;  %v7223_v60 = vshrl.u32 %v14048_v9, 16  ;;  %v7226_v29 = vshll.u32 %v14048_v9, 16 }
 0x4fe   : > { %5697 = vst [vmem:[#allocation1] ss:$4 sm:$0xff] %v5238_v57  ;;  %v6176_v37 = vpop.f32.mrf.mxu1  ;;  %v6040_v57 = vshll.u32 %v14053_v8, 16 }
 0x4ff   : > { %v14060_v14 = vsel %vm2853_vm5, %v7500_v15, %v7502_v61  ;;  %v6947_v41 = vpop.f32.mrf.mxu0  ;;  %v6342_v24 = vadd.f32 %v6341_v27, %v6176_v37  ;;  %v6346_v39 = vpop.f32.mrf.mxu2  ;;  %v7225_v45 = vrot.slane %v7223_v60, 1  ;;  %v6844_v15 = vsel %vm1815_vm4, %v15096_v43, %v14993_v48 }
 0x500   : > { %15094 = vst [vmem:[#allocation35_spill] sm:$0xff] %v14060_v14  ;;  %v14063_v6 = vadd.f32 %v6947_v41, %v6643_v0  ;;  %v6460_v37 = vrot.slane %v14053_v8, 1  ;;  %v11251_v0 = vld [vmem:[#allocation9 + $0x108] sm:$0xff]  ;;  %v7228_v41 = vrot.slane %v7226_v29, 2  ;;  %v6036_v60 = vshrl.u32 %v13995_v58, 16 }
 0x501   : > { %v5695_v51 = vld [vmem:[#allocation1 + $0x20] sm:$0xff]  ;;  %v6042_v32 = vrot.slane %v6040_v57, 1  ;;  %7321 = vmatpush.bf16.msrb.mxu1 %v11251_v0  ;;  %v15098_v48 = vrot.slane %v13995_v58, 1 }
 0x502   : > { %5771 = vst [vmem:[#allocation3 + $0x94] sm:$0xf] %v5695_v51  ;;  %v8536_v51 = vrot.slane %v14057_v26, 3  ;;  %v6564_v27 = vpop.f32.mrf.mxu3  ;;  %v7229_v22 = vor.u32 %v7228_v41, %v7225_v45  ;;  %v8094_v26 = vld [vmem:[#allocation3 + $0xa0] sm:$0x7] }
 0x503   : > { %15095 = vst [vmem:[#allocation36_spill] sm:$0xff] %v14063_v6  ;;  %v6644_v11 = vadd.f32 %v6564_v27, %v6342_v24  ;;  %v6461_v14 = vsel %vm1815_vm4, %v15098_v48, %v6460_v37  ;;  %v6038_v24 = vor.u32 %v6036_v60, %v14025_v10  ;;  %v8113_v41 = vunpack.c.l.b16 %v8094_v26 }
 0x504   : > { %6986 = vmatmul.bf16.gmra.mxu0 %v6844_v15  ;;  %6388 = vmatmul.bf16.gmra.mxu2 %v14053_v8 }
 0x505   : > { %v5698_v59 = vld [vmem:[#allocation1] sm:$0xff]  ;;  %v6043_v0 = vsel %vm1315_vm3, %v6038_v24, %v6042_v32  ;;  %v14101_v60 = vpack.c.b16 %v8113_v41, %v8113_v41  ;;  %v15104_v41 = vrot.slane %v13799_v54, 1  ;;  %v6044_v54 = vshrl.u32 %v14053_v8, 16  ;;  %v11265_v8 = vld [vmem:[#allocation9 + $0x178] sm:$0xff] }
 0x506   : > { %5772 = vst [vmem:[#allocation3 + $0x98] sm:$0x1] %v5698_v59  ;;  %v14075_v59 = vsel %vm3891_vm8, %v8534_v35, %v8536_v51  ;;  %v6179_v15 = vpop.f32.mrf.mxu1  ;;  %v14086_v35 = vsel %vm2460_vm6, %v7220_v16, %v7229_v22  ;;  %7574 = vmatpush.bf16.msra.mxu2 %v11265_v8 }
 0x507   : > { %15097 = vst [vmem:[#allocation37_spill] sm:$0xff] %v14075_v59  ;;  %v6949_v29 = vpop.f32.mrf.mxu0  ;;  %v6345_v27 = vadd.f32 %v6344_v13, %v6179_v15  ;;  %v6349_v59 = vpop.f32.mrf.mxu2  ;;  %v14098_v13 = vld [vmem:[#allocation3 + $0x70] sm:$0xff] }
 0x508   : > { %15099 = vst [vmem:[#allocation38_spill] sm:$0xff] %v14086_v35  ;;  %v14089_v45 = vadd.f32 %v6949_v29, %v6644_v11  ;;  %v6845_v11 = vrot.slane %v13867_v23, 1 }
 0x509   : > { %v14079_v43 = vld [vmem:[#allocation3 + $0x90] sm:$0xff]  ;;  %6606 = vmatmul.bf16.gmra.mxu3 %v6461_v14  ;;  %15102 = vst [vmem:[#allocation41_spill] sm:$0xff] %v14101_v60 }
 0x50a   : > { %v14994_v57 = vrot.slane %v14079_v43, 2  ;;  %15100 = vst [vmem:[#allocation39_spill] sm:$0xff] %v14089_v45  ;;  %6218 = vmatmul.bf16.gmra.mxu1 %v6043_v0  ;;  %v6567_v10 = vpop.f32.mrf.mxu3  ;;  %v7232_v48 = vshrl.u32 %v14079_v43, 16  ;;  %v7235_v14 = vshll.u32 %v14079_v43, 16  ;;  %v11281_v15 = vld [vmem:[#allocation3 + $0x90] sm:$0xff]  ;;  %v8542_v45 = vrot.slane %v14101_v60, 3 }
 0x50b   : > { %v6645_v16 = vadd.f32 %v6567_v10, %v6345_v27  ;;  %v6048_v27 = vshll.u32 %v14098_v13, 16  ;;  %v6846_v23 = vsel %vm1815_vm4, %v15104_v41, %v6845_v11  ;;  %v8538_v6 = vrot.slane %v11281_v15, 3 }
 0x50c   : > { %v14095_v58 = vsel %vm2853_vm5, %v7502_v61, %v14994_v57  ;;  %v7234_v24 = vrot.slane %v7232_v48, 1  ;;  %v7237_v0 = vrot.slane %v7235_v14, 2  ;;  %v6462_v14 = vrot.slane %v14098_v13, 1 }
 0x50d   : > { %15101 = vst [vmem:[#allocation40_spill] sm:$0xff] %v14095_v58  ;;  %v11282_v26 = vld [vmem:[#allocation3 + $0x98] sm:$0xff] }
 0x50e   : > { %v6181_v29 = vpop.f32.mrf.mxu1  ;;  %v14107_v10 = vor.u32 %v7237_v0, %v7234_v24  ;;  %v8540_v38 = vrot.slane %v11282_v26, 3  ;;  %v6050_v24 = vrot.slane %v6048_v27, 1  ;;  %v6463_v0 = vsel %vm1815_vm4, %v6460_v37, %v6462_v14 }
 0x50f   : > { %v6952_v35 = vpop.f32.mrf.mxu0  ;;  %v6347_v61 = vadd.f32 %v6346_v39, %v6181_v29  ;;  %v6351_v57 = vpop.f32.mrf.mxu2 }
 0x510   : > { %v14104_v58 = vadd.f32 %v6952_v35, %v6645_v16  ;;  %15103 = vst [vmem:[#allocation42_spill] sm:$0xff] %v14107_v10  ;;  %v14116_v39 = vsel %vm2460_vm6, %v7229_v22, %v14107_v10  ;;  %v14119_v16 = vsel %vm3891_vm8, %v8536_v51, %v8538_v6  ;;  %v14124_v15 = vsel %vm3891_vm8, %v8538_v6, %v8540_v38  ;;  %v11264_v6 = vld [vmem:[#allocation9 + $0x170] sm:$0xff] }
 0x511   : > { %15105 = vst [vmem:[#allocation43_spill] sm:$0xff] %v14116_v39  ;;  %v14127_v26 = vsel %vm3891_vm8, %v8540_v38, %v8542_v45  ;;  %v6046_v22 = vor.u32 %v6044_v54, %v6042_v32  ;;  %v14133_v38 = vld [vmem:[#allocation3 + $0x78] sm:$0xff]  ;;  %v6847_v45 = vrot.slane %v13940_v40, 1  ;;  %7575 = vmatpush.bf16.msra.mxu2 %v11264_v6  ;;  %v6052_v40 = vshrl.u32 %v14098_v13, 16 }
 0x512   : > { %v6569_v48 = vpop.f32.mrf.mxu3  ;;  %15106 = vst [vmem:[#allocation44_spill] sm:$0xff] %v14119_v16  ;;  %v11293_v39 = vld [vmem:[#allocation9 + $0x1d0] sm:$0xff] }
 0x513   : > { %v6646_v35 = vadd.f32 %v6569_v48, %v6347_v61  ;;  %15107 = vst [vmem:[#allocation45_spill] sm:$0xff] %v14124_v15  ;;  %v6051_v48 = vsel %vm1315_vm3, %v6046_v22, %v6050_v24  ;;  %v6848_v22 = vsel %vm1815_vm4, %v6845_v11, %v6847_v45  ;;  %v6054_v6 = vor.u32 %v6052_v40, %v6050_v24 }
 0x514   : > { %6991 = vmatmul.bf16.gmra.mxu0 %v6846_v23  ;;  %6393 = vmatmul.bf16.gmra.mxu2 %v14098_v13  ;;  %15108 = vst [vmem:[#allocation46_spill] sm:$0xff] %v14127_v26  ;;  %v11250_v26 = vld [vmem:[#allocation9 + $0x100] sm:$0xff]  ;;  %v11260_v13 = vld [vmem:[#allocation9 + $0x150] sm:$0xff]  ;;  %v6849_v24 = vrot.slane %v13998_v17, 1  ;;  %v11298_v17 = vld [vmem:[#allocation9 + $0x1f8] sm:$0xff] }
 0x515   : > { %7322 = vmatpush.bf16.msrb.mxu1 %v11250_v26  ;;  %8351 = vmatpush.bf16.msra.mxu0 %v11298_v17  ;;  %v11296_v17 = vld [vmem:[#allocation9 + $0x1e8] sm:$0xff] }
 0x516   : > { %v6184_v29 = vpop.f32.mrf.mxu1  ;;  %v6850_v26 = vsel %vm1815_vm4, %v6847_v45, %v6849_v24 }
 0x517   : > { %v6954_v41 = vpop.f32.mrf.mxu0  ;;  %v6350_v61 = vadd.f32 %v6349_v59, %v6184_v29  ;;  %v6354_v23 = vpop.f32.mrf.mxu2 }
 0x518   : > { %v14130_v51 = vadd.f32 %v6954_v41, %v6646_v35  ;;  %v6056_v35 = vshll.u32 %v14133_v38, 16 }
 0x519   : > { %6611 = vmatmul.bf16.gmra.mxu3 %v6463_v0  ;;  %v11263_v0 = vld [vmem:[#allocation9 + $0x168] sm:$0xff] }
 0x51a   : > { %6223 = vmatmul.bf16.gmra.mxu1 %v6051_v48  ;;  %v6572_v27 = vpop.f32.mrf.mxu3  ;;  %7576 = vmatpush.bf16.msra.mxu2 %v11263_v0  ;;  %v11262_v48 = vld [vmem:[#allocation9 + $0x160] sm:$0xff] }
 0x51b   : > { %v6647_v15 = vadd.f32 %v6572_v27, %v6350_v61  ;;  %v6464_v61 = vrot.slane %v14133_v38, 1 }
 0x51e   : > { %v6186_v37 = vpop.f32.mrf.mxu1  ;;  %7577 = vmatpush.bf16.msra.mxu2 %v11262_v48 }
 0x51f   : > { %v6957_v32 = vpop.f32.mrf.mxu0  ;;  %v6352_v59 = vadd.f32 %v6351_v57, %v6186_v37  ;;  %v6356_v54 = vpop.f32.mrf.mxu2  ;;  %v6058_v57 = vrot.slane %v6056_v35, 1 }
 0x520   : > { %v14136_v29 = vadd.f32 %v6957_v32, %v6647_v15  ;;  %v6465_v15 = vsel %vm1815_vm4, %v6462_v14, %v6464_v61  ;;  %v14147_v14 = vld [vmem:[#allocation3 + $0x80] sm:$0xff] }
 0x521   : > { %v6059_v0 = vsel %vm1315_vm3, %v6054_v6, %v6058_v57  ;;  %v11289_v6 = vld [vmem:[#allocation9 + $0x1b0] sm:$0xff] }
 0x522   : > { %v6574_v41 = vpop.f32.mrf.mxu3 }
 0x523   : > { %v6648_v8 = vadd.f32 %v6574_v41, %v6352_v59  ;;  %v11261_v59 = vld [vmem:[#allocation9 + $0x158] sm:$0xff] }
 0x524   : > { %6996 = vmatmul.bf16.gmra.mxu0 %v6848_v22  ;;  %6398 = vmatmul.bf16.gmra.mxu2 %v14133_v38  ;;  %v11290_v41 = vld [vmem:[#allocation9 + $0x1b8] sm:$0xff] }
 0x525   : > { %7578 = vmatpush.bf16.msra.mxu2 %v11261_v59  ;;  %7959 = vmatpush.bf16.msra.mxu3 %v11290_v41  ;;  %v11258_v41 = vld [vmem:[#allocation9 + $0x140] sm:$0xff] }
 0x526   : > { %v6189_v27 = vpop.f32.mrf.mxu1 }
 0x527   : > { %v6959_v37 = vpop.f32.mrf.mxu0  ;;  %v6355_v32 = vadd.f32 %v6354_v23, %v6189_v27  ;;  %v6359_v11 = vpop.f32.mrf.mxu2 }
 0x528   : > { %v14144_v22 = vadd.f32 %v6959_v37, %v6648_v8  ;;  %v11259_v37 = vld [vmem:[#allocation9 + $0x148] sm:$0xff] }
 0x529   : > { %6616 = vmatmul.bf16.gmra.mxu3 %v6465_v15  ;;  %7579 = vmatpush.bf16.msra.mxu2 %v11260_v13  ;;  %v6064_v15 = vshll.u32 %v14147_v14, 16 }
 0x52a   : > { %6228 = vmatmul.bf16.gmra.mxu1 %v6059_v0  ;;  %v6577_v16 = vpop.f32.mrf.mxu3  ;;  %7960 = vmatpush.bf16.msra.mxu3 %v11289_v6  ;;  %v11288_v0 = vld [vmem:[#allocation9 + $0x1a8] sm:$0xff] }
 0x52b   : > { %v6649_v35 = vadd.f32 %v6577_v16, %v6355_v32  ;;  %v6466_v32 = vrot.slane %v14147_v14, 1  ;;  %v6066_v13 = vrot.slane %v6064_v15, 1  ;;  %v11286_v15 = vld [vmem:[#allocation9 + $0x198] sm:$0xff] }
 0x52d   : > { %7580 = vmatpush.bf16.msra.mxu2 %v11259_v37  ;;  %v11287_v37 = vld [vmem:[#allocation9 + $0x1a0] sm:$0xff] }
 0x52e   : > { %v6191_v23 = vpop.f32.mrf.mxu1  ;;  %7961 = vmatpush.bf16.msra.mxu3 %v11288_v0 }
 0x52f   : > { %v6962_v48 = vpop.f32.mrf.mxu0  ;;  %v6357_v8 = vadd.f32 %v6356_v54, %v6191_v23  ;;  %v6361_v40 = vpop.f32.mrf.mxu2  ;;  %v6060_v54 = vshrl.u32 %v14133_v38, 16  ;;  %v6467_v23 = vsel %vm1815_vm4, %v6464_v61, %v6466_v32 }
 0x530   : > { %v14150_v27 = vadd.f32 %v6962_v48, %v6649_v35 }
 0x531   : > { %v6062_v45 = vor.u32 %v6060_v54, %v6058_v57  ;;  %7581 = vmatpush.bf16.msra.mxu2 %v11258_v41  ;;  %v14161_v57 = vld [vmem:[#allocation3 + $0x88] sm:$0xff] }
 0x532   : > { %v6579_v16 = vpop.f32.mrf.mxu3  ;;  %7962 = vmatpush.bf16.msra.mxu3 %v11287_v37  ;;  %v6468_v37 = vrot.slane %v14161_v57, 1 }
 0x533   : > { %v6650_v59 = vadd.f32 %v6579_v16, %v6357_v8  ;;  %v6067_v8 = vsel %vm1315_vm3, %v6062_v45, %v6066_v13  ;;  %v11297_v16 = vld [vmem:[#allocation9 + $0x1f0] sm:$0xff] }
 0x534   : > { %7001 = vmatmul.bf16.gmra.mxu0 %v6850_v26  ;;  %6403 = vmatmul.bf16.gmra.mxu2 %v14147_v14  ;;  %v11285_v45 = vld [vmem:[#allocation9 + $0x190] sm:$0xff] }
 0x535   : > { %8352 = vmatpush.bf16.msra.mxu0 %v11297_v16 }
 0x536   : > { %v6194_v35 = vpop.f32.mrf.mxu1  ;;  %7963 = vmatpush.bf16.msra.mxu3 %v11286_v15 }
 0x537   : > { %v6964_v48 = vpop.f32.mrf.mxu0  ;;  %v6360_v26 = vadd.f32 %v6359_v11, %v6194_v35  ;;  %v6364_v10 = vpop.f32.mrf.mxu2  ;;  %v6851_v11 = vrot.slane %v14048_v9, 1  ;;  %v11284_v9 = vld [vmem:[#allocation9 + $0x188] sm:$0xff] }
 0x538   : > { %v14158_v6 = vadd.f32 %v6964_v48, %v6650_v59  ;;  %v11295_v48 = vld [vmem:[#allocation9 + $0x1e0] sm:$0xff] }
 0x539   : > { %6621 = vmatmul.bf16.gmra.mxu3 %v6467_v23  ;;  %8353 = vmatpush.bf16.msra.mxu0 %v11296_v17  ;;  %v6072_v23 = vshll.u32 %v14161_v57, 16  ;;  %v5825_v17 = vld [vmem:[#allocation3 + $0x90] sm:$0x1] }
 0x53a   : > { %6233 = vmatmul.bf16.gmra.mxu1 %v6067_v8  ;;  %v6582_v38 = vpop.f32.mrf.mxu3  ;;  %v6852_v8 = vsel %vm1815_vm4, %v6849_v24, %v6851_v11  ;;  %7964 = vmatpush.bf16.msra.mxu3 %v11285_v45 }
 0x53b   : > { %v6651_v61 = vadd.f32 %v6582_v38, %v6360_v26  ;;  %v11294_v38 = vld [vmem:[#allocation9 + $0x1d8] sm:$0xff]  ;;  %v6074_v15 = vrot.slane %v6072_v23, 1 }
 0x53d   : > { %8354 = vmatpush.bf16.msra.mxu0 %v11295_v48  ;;  %v5916_v48 = vunpack.c.l.b16 %v5825_v17 }
 0x53e   : > { %v6196_v0 = vpop.f32.mrf.mxu1  ;;  %7965 = vmatpush.bf16.msra.mxu3 %v11284_v9 }
 0x53f   : > { %v6967_v59 = vpop.f32.mrf.mxu0  ;;  %v6362_v41 = vadd.f32 %v6361_v40, %v6196_v0  ;;  %v6366_v54 = vpop.f32.mrf.mxu2  ;;  %v6068_v40 = vshrl.u32 %v14147_v14, 16  ;;  %v6469_v0 = vsel %vm1815_vm4, %v6466_v32, %v6468_v37  ;;  %v11306_v14 = vld [vmem:[#allocation9 + $0x238] sm:$0xff]  ;;  %v11292_v32 = vld [vmem:[#allocation9 + $0x1c8] sm:$0xff] }
 0x540   : > { %v14164_v35 = vadd.f32 %v6967_v59, %v6651_v61  ;;  %8610 = vmatpush.bf16.msra.mxu1 %v11306_v14 }
 0x541   : > { %v6070_v59 = vor.u32 %v6068_v40, %v6066_v13  ;;  %8355 = vmatpush.bf16.msra.mxu0 %v11294_v38  ;;  %v5935_v13 = vpack.c.b16 %v5916_v48, %v5916_v48 }
 0x542   : > { %15109 = vst [vmem:[#allocation47_spill] sm:$0xff] %v14164_v35  ;;  %v6584_v26 = vpop.f32.mrf.mxu3 }
 0x543   : > { %v6652_v16 = vadd.f32 %v6584_v26, %v6362_v41  ;;  %v6075_v41 = vsel %vm1315_vm3, %v6070_v59, %v6074_v15  ;;  %v11283_v26 = vld [vmem:[#allocation9 + $0x180] sm:$0xff]  ;;  %v6080_v17 = vshll.u32 %v5935_v13, 16 }
 0x544   : > { %7006 = vmatmul.bf16.gmra.mxu0 %v6852_v8  ;;  %6408 = vmatmul.bf16.gmra.mxu2 %v14161_v57 }
 0x545   : > { %7966 = vmatpush.bf16.msra.mxu3 %v11283_v26  ;;  %8356 = vmatpush.bf16.msra.mxu0 %v11293_v39  ;;  %v6076_v39 = vshrl.u32 %v14161_v57, 16 }
 0x546   : > { %v6199_v61 = vpop.f32.mrf.mxu1 }
 0x547   : > { %v6969_v24 = vpop.f32.mrf.mxu0  ;;  %v6365_v8 = vadd.f32 %v6364_v10, %v6199_v61  ;;  %v6369_v60 = vpop.f32.mrf.mxu2  ;;  %v6853_v10 = vrot.slane %v14079_v43, 1  ;;  %v6078_v26 = vor.u32 %v6076_v39, %v6074_v15 }
 0x548   : > { %v14172_v45 = vadd.f32 %v6969_v24, %v6652_v16 }
 0x549   : > { %6626 = vmatmul.bf16.gmra.mxu3 %v6469_v0  ;;  %8357 = vmatpush.bf16.msra.mxu0 %v11292_v32  ;;  %v11291_v0 = vld [vmem:[#allocation9 + $0x1c0] sm:$0xff]  ;;  %v6854_v59 = vsel %vm1815_vm4, %v6851_v11, %v6853_v10 }
 0x54a   : > { %6238 = vmatmul.bf16.gmra.mxu1 %v6075_v41  ;;  %v6587_v23 = vpop.f32.mrf.mxu3  ;;  %v6709_v41 = vld [vmem:[#allocation3 + $0x98] sm:$0x1] }
 0x54b   : > { %v6653_v35 = vadd.f32 %v6587_v23, %v6365_v8  ;;  %v6470_v8 = vrot.slane %v5935_v13, 1  ;;  %v6800_v14 = vunpack.c.l.b16 %v6709_v41 }
 0x54d   : > { %8358 = vmatpush.bf16.msra.mxu0 %v11291_v0  ;;  %v6819_v57 = vpack.c.b16 %v6800_v14, %v6800_v14 }
 0x54e   : > { %v6201_v9 = vpop.f32.mrf.mxu1 }
 0x54f   : > { %v6972_v38 = vpop.f32.mrf.mxu0  ;;  %v6367_v16 = vadd.f32 %v6366_v54, %v6201_v9  ;;  %v6371_v40 = vpop.f32.mrf.mxu2  ;;  %v6082_v54 = vrot.slane %v6080_v17, 1 }
 0x550   : > { %v14176_v61 = vadd.f32 %v6972_v38, %v6653_v35  ;;  %v6471_v35 = vsel %vm1815_vm4, %v6468_v37, %v6470_v8 }
 0x551   : > { %v6083_v13 = vsel %vm1315_vm3, %v6078_v26, %v6082_v54  ;;  %v11424_v54 = vld [vmem:[#allocation3 + $0x18] sm:$0xff] }
 0x552   : > { %v6589_v24 = vpop.f32.mrf.mxu3  ;;  %v7857_v14 = vrot.slane %v11424_v54, 2 }
 0x553   : > { %v6654_v48 = vadd.f32 %v6589_v24, %v6367_v16 }
 0x554   : > { %7011 = vmatmul.bf16.gmra.mxu0 %v6854_v59  ;;  %7582 = vmatmul.bf16.vlgmr.msra.gmra.mxu2 %v13339_v34  ;;  %v7709_v59 = vld [vmem:[#allocation3 + $0x10] sm:$0xc]  ;;  %v6855_v34 = vrot.slane %v6819_v57, 1 }
 0x555   : > { %v7800_v17 = vunpack.c.l.b16 %v7709_v59 }
 0x556   : > { %v6204_v23 = vpop.f32.mrf.mxu1 }
 0x557   : > { %v6974_v32 = vpop.f32.mrf.mxu0  ;;  %v6370_v9 = vadd.f32 %v6369_v60, %v6204_v23  ;;  %v6374_v38 = vpop.f32.mrf.mxu2  ;;  %v15110_v60 = vunpack.c.l.b16 %v13341_v52 }
 0x558   : > { %v14182_v11 = vadd.f32 %v6974_v32, %v6654_v48  ;;  %v6856_v48 = vsel %vm1815_vm4, %v6853_v10, %v6855_v34  ;;  %v8124_v32 = vshrl.u32 %v11424_v54, 16 }
 0x559   : > { %6631 = vmatmul.bf16.gmra.mxu3 %v6471_v35  ;;  %v7837_v8 = vpack.c.b16 %v15110_v60, %v7800_v17 }
 0x55a   : > { %6243 = vmatmul.bf16.gmra.mxu1 %v6083_v13  ;;  %v6592_v16 = vpop.f32.mrf.mxu3  ;;  %v8126_v34 = vrot.slane %v8124_v32, 2 }
 0x55b   : > { %v6655_v0 = vadd.f32 %v6592_v16, %v6370_v9  ;;  %v7856_v35 = vrot.slane %v7837_v8, 2  ;;  %v8127_v9 = vshll.u32 %v11424_v54, 16  ;;  %v8116_v52 = vshrl.u32 %v7837_v8, 16 }
 0x55c   : > { %v8119_v59 = vshll.u32 %v7837_v8, 16 }
 0x55e   : > { %v6206_v15 = vpop.f32.mrf.mxu1 }
 0x55f   : > { %v6977_v24 = vpop.f32.mrf.mxu0  ;;  %v6372_v39 = vadd.f32 %v6371_v40, %v6206_v15  ;;  %v6376_v41 = vpop.f32.mrf.mxu2  ;;  %v7858_v40 = vsel %vm2853_vm5, %v7856_v35, %v7857_v14  ;;  %v8129_v15 = vrot.slane %v8127_v9, 3 }
 0x560   : > { %v14185_v37 = vadd.f32 %v6977_v24, %v6655_v0  ;;  %v8118_v24 = vrot.slane %v8116_v52, 2 }
 0x561   : > { %v8130_v60 = vor.u32 %v8129_v15, %v8126_v34 }
 0x562   : > { %v6594_v26 = vpop.f32.mrf.mxu3 }
 0x563   : > { %v6656_v23 = vadd.f32 %v6594_v26, %v6372_v39  ;;  %v8121_v39 = vrot.slane %v8119_v59, 3 }
 0x564   : > { %7016 = vmatmul.bf16.gmra.mxu0 %v6856_v48  ;;  %7587 = vmatmul.bf16.gmra.mxu2 %v13376_v1 }
 0x567   : > { %v6209_v13 = vpop.f32.mrf.mxu1  ;;  %v6979_v57 = vpop.f32.mrf.mxu0 }
 0x568   : > { %v6375_v16 = vadd.f32 %v6374_v38, %v6209_v13  ;;  %v6379_v0 = vpop.f32.mrf.mxu2  ;;  %v14192_v10 = vadd.f32 %v6979_v57, %v6656_v23  ;;  %v8122_v38 = vor.u32 %v8121_v39, %v8118_v24 }
 0x569   : > { %7967 = vmatmul.bf16.vlgmr.msra.gmra.mxu3 %v7858_v40  ;;  %v11305_v40 = vld [vmem:[#allocation9 + $0x230] sm:$0xff] }
 0x56a   : > { %7323 = vmatmul.bf16.vlgmr.msrb.gmra.mxu1 %v13353_v5  ;;  %v6597_v17 = vpop.f32.mrf.mxu3  ;;  %v8131_v8 = vsel %vm3498_vm7, %v8122_v38, %v8130_v60  ;;  %v11425_v5 = vld [vmem:[#allocation3 + $0x20] sm:$0xff] }
 0x56b   : > { %v6657_v1 = vadd.f32 %v6597_v17, %v6375_v16  ;;  %v7859_v32 = vrot.slane %v11425_v5, 2  ;;  %8611 = vmatpush.bf16.msra.mxu1 %v11305_v40  ;;  %v8133_v57 = vshrl.u32 %v11425_v5, 16  ;;  %v8136_v16 = vshll.u32 %v11425_v5, 16 }
 0x56d   : > { %v8138_v24 = vrot.slane %v8136_v16, 3 }
 0x56f   : > { %v6211_v48 = vpop.f32.mrf.mxu1 }
 0x570   : > { %v6377_v54 = vadd.f32 %v6376_v41, %v6211_v48  ;;  %v6381_v35 = vpop.f32.mrf.mxu2  ;;  %v7860_v41 = vsel %vm2853_vm5, %v7857_v14, %v7859_v32 }
 0x571   : > { %v6982_v26 = vpop.f32.mrf.mxu0 }
 0x572   : > { %v14195_v13 = vadd.f32 %v6982_v26, %v6657_v1  ;;  %v6599_v23 = vpop.f32.mrf.mxu3  ;;  %v8135_v1 = vrot.slane %v8133_v57, 2 }
 0x573   : > { %v6658_v9 = vadd.f32 %v6599_v23, %v6377_v54  ;;  %v11426_v23 = vld [vmem:[#allocation3 + $0x28] sm:$0xff] }
 0x574   : > { %8359 = vmatmul.bf16.vlgmr.msra.gmra.mxu0 %v8131_v8  ;;  %7592 = vmatmul.bf16.gmra.mxu2 %v13410_v2  ;;  %v8139_v26 = vor.u32 %v8138_v24, %v8135_v1  ;;  %v7861_v5 = vrot.slane %v11426_v23, 2  ;;  %v8145_v57 = vshll.u32 %v11426_v23, 16 }
 0x576   : > { %v8140_v14 = vsel %vm3498_vm7, %v8130_v60, %v8139_v26  ;;  %v8147_v1 = vrot.slane %v8145_v57, 3 }
 0x577   : > { %v6214_v52 = vpop.f32.mrf.mxu1 }
 0x578   : > { %v6380_v34 = vadd.f32 %v6379_v0, %v6214_v52  ;;  %v6384_v15 = vpop.f32.mrf.mxu2  ;;  %v7862_v52 = vsel %vm2853_vm5, %v7859_v32, %v7861_v5 }
 0x579   : > { %v6984_v59 = vpop.f32.mrf.mxu0  ;;  %7972 = vmatmul.bf16.gmra.mxu3 %v7860_v41 }
 0x57a   : > { %v14200_v17 = vadd.f32 %v6984_v59, %v6658_v9  ;;  %7328 = vmatmul.bf16.gmra.mxu1 %v13413_v4  ;;  %v8142_v4 = vshrl.u32 %v11426_v23, 16 }
 0x57c   : > { %v6602_v39 = vpop.f32.mrf.mxu3  ;;  %v8144_v60 = vrot.slane %v8142_v4, 2 }
 0x57d   : > { %v6659_v48 = vadd.f32 %v6602_v39, %v6380_v34 }
 0x57f   : > { %v6216_v54 = vpop.f32.mrf.mxu1 }
 0x580   : > { %v6382_v38 = vadd.f32 %v6381_v35, %v6216_v54  ;;  %v6386_v40 = vpop.f32.mrf.mxu2 }
 0x581   : > { %v6987_v2 = vpop.f32.mrf.mxu0 }
 0x582   : > { %v14203_v8 = vadd.f32 %v6987_v2, %v6659_v48  ;;  %v8148_v48 = vor.u32 %v8147_v1, %v8144_v60 }
 0x584   : > { %8364 = vmatmul.bf16.gmra.mxu0 %v8140_v14  ;;  %v6604_v0 = vpop.f32.mrf.mxu3  ;;  %7597 = vmatmul.bf16.gmra.mxu2 %v13455_v21  ;;  %v8149_v32 = vsel %vm3498_vm7, %v8139_v26, %v8148_v48 }
 0x585   : > { %v6660_v9 = vadd.f32 %v6604_v0, %v6382_v38  ;;  %v11427_v0 = vld [vmem:[#allocation3 + $0x30] sm:$0xff] }
 0x586   : > { %v7863_v23 = vrot.slane %v11427_v0, 2  ;;  %v8154_v4 = vshll.u32 %v11427_v0, 16 }
 0x587   : > { %v6219_v16 = vpop.f32.mrf.mxu1 }
 0x588   : > { %v6385_v59 = vadd.f32 %v6384_v15, %v6219_v16  ;;  %v6389_v35 = vpop.f32.mrf.mxu2  ;;  %v8156_v1 = vrot.slane %v8154_v4, 3 }
 0x589   : > { %v6989_v41 = vpop.f32.mrf.mxu0  ;;  %7977 = vmatmul.bf16.gmra.mxu3 %v7862_v52  ;;  %v7864_v52 = vsel %vm2853_vm5, %v7861_v5, %v7863_v23 }
 0x58a   : > { %v14208_v34 = vadd.f32 %v6989_v41, %v6660_v9  ;;  %7333 = vmatmul.bf16.gmra.mxu1 %v13458_v3  ;;  %v11304_v9 = vld [vmem:[#allocation9 + $0x228] sm:$0xff]  ;;  %v8151_v3 = vshrl.u32 %v11427_v0, 16 }
 0x58b   : > { %8612 = vmatpush.bf16.msra.mxu1 %v11304_v9  ;;  %v11428_v0 = vld [vmem:[#allocation3 + $0x38] sm:$0xff] }
 0x58c   : > { %v6607_v24 = vpop.f32.mrf.mxu3  ;;  %v8153_v26 = vrot.slane %v8151_v3, 2  ;;  %v7865_v9 = vrot.slane %v11428_v0, 2  ;;  %v8163_v3 = vshll.u32 %v11428_v0, 16 }
 0x58d   : > { %v6661_v39 = vadd.f32 %v6607_v24, %v6385_v59 }
 0x58f   : > { %v6221_v54 = vpop.f32.mrf.mxu1 }
 0x590   : > { %v6387_v2 = vadd.f32 %v6386_v40, %v6221_v54  ;;  %v6391_v38 = vpop.f32.mrf.mxu2  ;;  %v8157_v54 = vor.u32 %v8156_v1, %v8153_v26  ;;  %v8165_v26 = vrot.slane %v8163_v3, 3 }
 0x591   : > { %v6992_v21 = vpop.f32.mrf.mxu0 }
 0x592   : > { %v14211_v14 = vadd.f32 %v6992_v21, %v6661_v39  ;;  %v8158_v5 = vsel %vm3498_vm7, %v8148_v48, %v8157_v54 }
 0x594   : > { %8369 = vmatmul.bf16.gmra.mxu0 %v8149_v32  ;;  %v6609_v15 = vpop.f32.mrf.mxu3  ;;  %7602 = vmatmul.bf16.gmra.mxu2 %v13495_v36 }
 0x595   : > { %v6662_v16 = vadd.f32 %v6609_v15, %v6387_v2 }
 0x597   : > { %v6224_v57 = vpop.f32.mrf.mxu1 }
 0x598   : > { %v6390_v41 = vadd.f32 %v6389_v35, %v6224_v57  ;;  %v6394_v59 = vpop.f32.mrf.mxu2  ;;  %v7866_v57 = vsel %vm2853_vm5, %v7863_v23, %v7865_v9 }
 0x599   : > { %v6994_v40 = vpop.f32.mrf.mxu0  ;;  %7982 = vmatmul.bf16.gmra.mxu3 %v7864_v52 }
 0x59a   : > { %v14216_v60 = vadd.f32 %v6994_v40, %v6662_v16  ;;  %7338 = vmatmul.bf16.gmra.mxu1 %v13486_v33  ;;  %v8160_v33 = vshrl.u32 %v11428_v0, 16 }
 0x59c   : > { %v6612_v24 = vpop.f32.mrf.mxu3  ;;  %v8162_v48 = vrot.slane %v8160_v33, 2 }
 0x59d   : > { %v6663_v39 = vadd.f32 %v6612_v24, %v6390_v41 }
 0x59f   : > { %v6226_v36 = vpop.f32.mrf.mxu1 }
 0x5a0   : > { %v6392_v2 = vadd.f32 %v6391_v38, %v6226_v36  ;;  %v6396_v32 = vpop.f32.mrf.mxu2 }
 0x5a1   : > { %v6997_v21 = vpop.f32.mrf.mxu0 }
 0x5a2   : > { %v14219_v15 = vadd.f32 %v6997_v21, %v6663_v39  ;;  %v8166_v39 = vor.u32 %v8165_v26, %v8162_v48  ;;  %v11303_v48 = vld [vmem:[#allocation9 + $0x220] sm:$0xff] }
 0x5a3   : > { %8613 = vmatpush.bf16.msra.mxu1 %v11303_v48 }
 0x5a4   : > { %8374 = vmatmul.bf16.gmra.mxu0 %v8158_v5  ;;  %v6614_v35 = vpop.f32.mrf.mxu3  ;;  %7607 = vmatmul.bf16.gmra.mxu2 %v13534_v46  ;;  %v8167_v23 = vsel %vm3498_vm7, %v8157_v54, %v8166_v39 }
 0x5a5   : > { %v6664_v16 = vadd.f32 %v6614_v35, %v6392_v2  ;;  %v11429_v35 = vld [vmem:[#allocation3 + $0x40] sm:$0xff] }
 0x5a6   : > { %v7867_v0 = vrot.slane %v11429_v35, 2  ;;  %v8172_v33 = vshll.u32 %v11429_v35, 16 }
 0x5a7   : > { %v6229_v4 = vpop.f32.mrf.mxu1 }
 0x5a8   : > { %v6395_v40 = vadd.f32 %v6394_v59, %v6229_v4  ;;  %v6399_v38 = vpop.f32.mrf.mxu2  ;;  %v7868_v4 = vsel %vm2853_vm5, %v7865_v9, %v7867_v0  ;;  %v8174_v26 = vrot.slane %v8172_v33, 3 }
 0x5a9   : > { %v6999_v52 = vpop.f32.mrf.mxu0  ;;  %7987 = vmatmul.bf16.gmra.mxu3 %v7866_v57 }
 0x5aa   : > { %v14224_v41 = vadd.f32 %v6999_v52, %v6664_v16  ;;  %7343 = vmatmul.bf16.gmra.mxu1 %v13514_v55  ;;  %v8169_v55 = vshrl.u32 %v11429_v35, 16  ;;  %v11430_v35 = vld [vmem:[#allocation3 + $0x48] sm:$0xff] }
 0x5ac   : > { %v6617_v1 = vpop.f32.mrf.mxu3  ;;  %v8171_v54 = vrot.slane %v8169_v55, 2  ;;  %v8181_v55 = vshll.u32 %v11430_v35, 16 }
 0x5ad   : > { %v6665_v24 = vadd.f32 %v6617_v1, %v6395_v40 }
 0x5af   : > { %v6231_v36 = vpop.f32.mrf.mxu1 }
 0x5b0   : > { %v6397_v21 = vadd.f32 %v6396_v32, %v6231_v36  ;;  %v6401_v2 = vpop.f32.mrf.mxu2 }
 0x5b1   : > { %v7002_v46 = vpop.f32.mrf.mxu0 }
 0x5b2   : > { %v14227_v5 = vadd.f32 %v7002_v46, %v6665_v24 }
 0x5b4   : > { %8379 = vmatmul.bf16.gmra.mxu0 %v8167_v23  ;;  %v6619_v59 = vpop.f32.mrf.mxu3  ;;  %7612 = vmatmul.bf16.gmra.mxu2 %v13581_v56  ;;  %v8175_v56 = vor.u32 %v8174_v26, %v8171_v54  ;;  %v8183_v54 = vrot.slane %v8181_v55, 3 }
 0x5b5   : > { %v6666_v16 = vadd.f32 %v6619_v59, %v6397_v21 }
 0x5b7   : > { %v6234_v3 = vpop.f32.mrf.mxu1 }
 0x5b8   : > { %v6400_v52 = vadd.f32 %v6399_v38, %v6234_v3  ;;  %v6404_v32 = vpop.f32.mrf.mxu2  ;;  %v8176_v38 = vsel %vm3498_vm7, %v8166_v39, %v8175_v56 }
 0x5b9   : > { %v7004_v57 = vpop.f32.mrf.mxu0  ;;  %7992 = vmatmul.bf16.gmra.mxu3 %v7868_v4 }
 0x5ba   : > { %v14232_v40 = vadd.f32 %v7004_v57, %v6666_v16  ;;  %7348 = vmatmul.bf16.gmra.mxu1 %v13568_v62  ;;  %v7869_v16 = vrot.slane %v11430_v35, 2  ;;  %v8178_v62 = vshrl.u32 %v11430_v35, 16 }
 0x5bc   : > { %v6622_v1 = vpop.f32.mrf.mxu3  ;;  %v7870_v4 = vsel %vm2853_vm5, %v7867_v0, %v7869_v16  ;;  %v8180_v39 = vrot.slane %v8178_v62, 2 }
 0x5bd   : > { %v6667_v24 = vadd.f32 %v6622_v1, %v6400_v52 }
 0x5bf   : > { %v6236_v36 = vpop.f32.mrf.mxu1 }
 0x5c0   : > { %v6402_v21 = vadd.f32 %v6401_v2, %v6236_v36  ;;  %v6406_v23 = vpop.f32.mrf.mxu2 }
 0x5c1   : > { %v7007_v46 = vpop.f32.mrf.mxu0 }
 0x5c2   : > { %v14235_v9 = vadd.f32 %v7007_v46, %v6667_v24  ;;  %v8184_v24 = vor.u32 %v8183_v54, %v8180_v39  ;;  %v11302_v54 = vld [vmem:[#allocation9 + $0x218] sm:$0xff] }
 0x5c3   : > { %8614 = vmatpush.bf16.msra.mxu1 %v11302_v54 }
 0x5c4   : > { %8384 = vmatmul.bf16.gmra.mxu0 %v8176_v38  ;;  %v6624_v59 = vpop.f32.mrf.mxu3  ;;  %7617 = vmatmul.bf16.gmra.mxu2 %v13616_v31  ;;  %v8185_v0 = vsel %vm3498_vm7, %v8175_v56, %v8184_v24 }
 0x5c5   : > { %v6668_v3 = vadd.f32 %v6624_v59, %v6402_v21  ;;  %v11431_v59 = vld [vmem:[#allocation3 + $0x50] sm:$0xff] }
 0x5c6   : > { %v7871_v35 = vrot.slane %v11431_v59, 2  ;;  %v8190_v62 = vshll.u32 %v11431_v59, 16 }
 0x5c7   : > { %v6239_v33 = vpop.f32.mrf.mxu1 }
 0x5c8   : > { %v6405_v52 = vadd.f32 %v6404_v32, %v6239_v33  ;;  %v6409_v2 = vpop.f32.mrf.mxu2  ;;  %v7872_v33 = vsel %vm2853_vm5, %v7869_v16, %v7871_v35  ;;  %v8192_v39 = vrot.slane %v8190_v62, 3 }
 0x5c9   : > { %v7009_v57 = vpop.f32.mrf.mxu0  ;;  %7997 = vmatmul.bf16.gmra.mxu3 %v7870_v4 }
 0x5ca   : > { %v14240_v48 = vadd.f32 %v7009_v57, %v6668_v3  ;;  %7353 = vmatmul.bf16.gmra.mxu1 %v13610_v49  ;;  %v8187_v49 = vshrl.u32 %v11431_v59, 16  ;;  %v11432_v59 = vld [vmem:[#allocation3 + $0x58] sm:$0xff] }
 0x5cb   : > { %v8199_v62 = vshll.u32 %v11432_v59, 16 }
 0x5cc   : > { %v6627_v26 = vpop.f32.mrf.mxu3  ;;  %v8189_v56 = vrot.slane %v8187_v49, 2  ;;  %v8196_v49 = vshrl.u32 %v11432_v59, 16 }
 0x5cd   : > { %v6669_v1 = vadd.f32 %v6627_v26, %v6405_v52  ;;  %v8201_v54 = vrot.slane %v8199_v62, 3 }
 0x5cf   : > { %v6241_v36 = vpop.f32.mrf.mxu1 }
 0x5d0   : > { %v6407_v46 = vadd.f32 %v6406_v23, %v6241_v36  ;;  %v6411_v21 = vpop.f32.mrf.mxu2 }
 0x5d1   : > { %v7012_v31 = vpop.f32.mrf.mxu0 }
 0x5d2   : > { %v14243_v38 = vadd.f32 %v7012_v31, %v6669_v1 }
 0x5d4   : > { %8389 = vmatmul.bf16.gmra.mxu0 %v8185_v0  ;;  %v6629_v32 = vpop.f32.mrf.mxu3  ;;  %7622 = vmatmul.bf16.gmra.mxu2 %v13656_v42  ;;  %v8193_v42 = vor.u32 %v8192_v39, %v8189_v56  ;;  %v8198_v39 = vrot.slane %v8196_v49, 2 }
 0x5d5   : > { %v6670_v3 = vadd.f32 %v6629_v32, %v6407_v46 }
 0x5d7   : > { %v6244_v55 = vpop.f32.mrf.mxu1 }
 0x5d8   : > { %v6410_v57 = vadd.f32 %v6409_v2, %v6244_v55  ;;  %v7583_v23 = vpop.f32.mrf.mxu2  ;;  %v8194_v2 = vsel %vm3498_vm7, %v8184_v24, %v8193_v42 }
 0x5d9   : > { %v7014_v4 = vpop.f32.mrf.mxu0  ;;  %8002 = vmatmul.bf16.gmra.mxu3 %v7872_v33 }
 0x5da   : > { %v14248_v52 = vadd.f32 %v7014_v4, %v6670_v3  ;;  %7358 = vmatmul.bf16.gmra.mxu1 %v13642_v25  ;;  %v7873_v3 = vrot.slane %v11432_v59, 2 }
 0x5dc   : > { %v6632_v26 = vpop.f32.mrf.mxu3  ;;  %v7874_v33 = vsel %vm2853_vm5, %v7871_v35, %v7873_v3 }
 0x5dd   : > { %v6671_v1 = vadd.f32 %v6632_v26, %v6410_v57 }
 0x5df   : > { %v6246_v36 = vpop.f32.mrf.mxu1 }
 0x5e0   : > { %v6412_v46 = vadd.f32 %v6411_v21, %v6246_v36  ;;  %v7585_v0 = vpop.f32.mrf.mxu2 }
 0x5e1   : > { %v7017_v31 = vpop.f32.mrf.mxu0 }
 0x5e2   : > { %v14251_v16 = vadd.f32 %v7017_v31, %v6671_v1 }
 0x5e4   : > { %8394 = vmatmul.bf16.gmra.mxu0 %v8194_v2  ;;  %v6634_v32 = vpop.f32.mrf.mxu3  ;;  %7627 = vmatmul.bf16.gmra.mxu2 %v13709_v63  ;;  %v8202_v63 = vor.u32 %v8201_v54, %v8198_v39 }
 0x5e5   : > { %v6672_v25 = vadd.f32 %v6634_v32, %v6412_v46 }
 0x5e7   : > { %v7324_v55 = vpop.f32.mrf.mxu1 }
 0x5e8   : > { %v7414_v21 = vadd.f32 %v7324_v55, %v13836_v28  ;;  %v7588_v57 = vpop.f32.mrf.mxu2  ;;  %v8203_v28 = vsel %vm3498_vm7, %v8193_v42, %v8202_v63 }
 0x5e9   : > { %v7019_v4 = vpop.f32.mrf.mxu0  ;;  %8007 = vmatmul.bf16.gmra.mxu3 %v7874_v33 }
 0x5ea   : > { %v14257_v56 = vadd.f32 %v7019_v4, %v6672_v25  ;;  %7363 = vmatmul.bf16.gmra.mxu1 %v13680_v7  ;;  %v7673_v24 = vadd.f32 %v7583_v23, %v7414_v21  ;;  %v11433_v25 = vld [vmem:[#allocation3 + $0x60] sm:$0xff] }
 0x5eb   : > { %v7875_v7 = vrot.slane %v11433_v25, 2  ;;  %v8205_v49 = vshrl.u32 %v11433_v25, 16  ;;  %v8208_v62 = vshll.u32 %v11433_v25, 16 }
 0x5ec   : > { %v7968_v26 = vpop.f32.mrf.mxu3 }
 0x5ed   : > { %v8058_v1 = vadd.f32 %v7968_v26, %v7673_v24  ;;  %v7876_v33 = vsel %vm2853_vm5, %v7873_v3, %v7875_v7  ;;  %v8210_v24 = vrot.slane %v8208_v62, 3 }
 0x5ef   : > { %v7326_v36 = vpop.f32.mrf.mxu1 }
 0x5f0   : > { %v7415_v46 = vadd.f32 %v7326_v36, %v13885_v12  ;;  %v7590_v2 = vpop.f32.mrf.mxu2 }
 0x5f1   : > { %v8360_v31 = vpop.f32.mrf.mxu0 }
 0x5f2   : > { %v14261_v35 = vadd.f32 %v8360_v31, %v8058_v1  ;;  %v7674_v32 = vadd.f32 %v7585_v0, %v7415_v46  ;;  %v8207_v0 = vrot.slane %v8205_v49, 2  ;;  %v11301_v46 = vld [vmem:[#allocation9 + $0x210] sm:$0xff] }
 0x5f3   : > { %8615 = vmatpush.bf16.msra.mxu1 %v11301_v46  ;;  %v11435_v46 = vld [vmem:[#allocation3 + $0x70] sm:$0xff] }
 0x5f4   : > { %8399 = vmatmul.bf16.gmra.mxu0 %v8203_v28  ;;  %v7970_v59 = vpop.f32.mrf.mxu3  ;;  %7632 = vmatmul.bf16.gmra.mxu2 %v13759_v20  ;;  %v8211_v20 = vor.u32 %v8210_v24, %v8207_v0 }
 0x5f5   : > { %v8059_v23 = vadd.f32 %v7970_v59, %v7674_v32 }
 0x5f7   : > { %v7329_v55 = vpop.f32.mrf.mxu1 }
 0x5f8   : > { %v7416_v12 = vadd.f32 %v7329_v55, %v13929_v50  ;;  %v7593_v39 = vpop.f32.mrf.mxu2  ;;  %v8212_v50 = vsel %vm3498_vm7, %v8202_v63, %v8211_v20 }
 0x5f9   : > { %v8362_v4 = vpop.f32.mrf.mxu0  ;;  %8012 = vmatmul.bf16.gmra.mxu3 %v7876_v33 }
 0x5fa   : > { %v14267_v21 = vadd.f32 %v8362_v4, %v8059_v23  ;;  %7368 = vmatmul.bf16.gmra.mxu1 %v13735_v47  ;;  %v7675_v42 = vadd.f32 %v7588_v57, %v7416_v12  ;;  %v11434_v47 = vld [vmem:[#allocation3 + $0x68] sm:$0xff] }
 0x5fb   : > { %v7877_v57 = vrot.slane %v11434_v47, 2  ;;  %v8214_v23 = vshrl.u32 %v11434_v47, 16  ;;  %v8217_v49 = vshll.u32 %v11434_v47, 16 }
 0x5fc   : > { %v7973_v54 = vpop.f32.mrf.mxu3 }
 0x5fd   : > { %v8060_v26 = vadd.f32 %v7973_v54, %v7675_v42  ;;  %v8216_v4 = vrot.slane %v8214_v23, 2  ;;  %v8219_v12 = vrot.slane %v8217_v49, 3  ;;  %v15112_v49 = vld [vmem:[#allocation36_spill] sm:$0xff] }
 0x5ff   : > { %v7331_v1 = vpop.f32.mrf.mxu1  ;;  %v8220_v24 = vor.u32 %v8219_v12, %v8216_v4 }
 0x600   : > { %v7417_v31 = vadd.f32 %v7331_v1, %v13979_v44  ;;  %v7595_v25 = vpop.f32.mrf.mxu2  ;;  %v7878_v44 = vsel %vm2853_vm5, %v7875_v7, %v7877_v57 }
 0x601   : > { %v8365_v36 = vpop.f32.mrf.mxu0 }
 0x602   : > { %v14271_v3 = vadd.f32 %v8365_v36, %v8060_v26  ;;  %v7676_v28 = vadd.f32 %v7590_v2, %v7417_v31 }
 0x604   : > { %8404 = vmatmul.bf16.gmra.mxu0 %v8212_v50  ;;  %v7975_v32 = vpop.f32.mrf.mxu3  ;;  %7637 = vmatmul.bf16.gmra.mxu2 %v13827_v18  ;;  %v15111_v50 = vld [vmem:[#allocation26_spill] sm:$0xff] }
 0x605   : > { %v8061_v59 = vadd.f32 %v7975_v32, %v7676_v28  ;;  %v8223_v28 = vshrl.u32 %v11435_v46, 16  ;;  %v8226_v32 = vshll.u32 %v11435_v46, 16 }
 0x607   : > { %v7334_v62 = vpop.f32.mrf.mxu1 }
 0x608   : > { %v7418_v33 = vadd.f32 %v7334_v62, %v14005_v19  ;;  %v7598_v18 = vpop.f32.mrf.mxu2  ;;  %v8221_v19 = vsel %vm3498_vm7, %v8211_v20, %v8220_v24  ;;  %v15113_v20 = vld [vmem:[#allocation25_spill] sm:$0xff] }
 0x609   : > { %v8367_v55 = vpop.f32.mrf.mxu0  ;;  %8017 = vmatmul.bf16.gmra.mxu3 %v7878_v44 }
 0x60a   : > { %v14277_v63 = vadd.f32 %v8367_v55, %v8061_v59  ;;  %7373 = vmatmul.bf16.gmra.mxu1 %v13805_v30  ;;  %v7677_v2 = vadd.f32 %v7593_v39, %v7418_v33  ;;  %v7879_v30 = vrot.slane %v11435_v46, 2  ;;  %v8225_v55 = vrot.slane %v8223_v28, 2  ;;  %v11436_v46 = vld [vmem:[#allocation3 + $0x78] sm:$0xff]  ;;  %v15115_v28 = vld [vmem:[#allocation29_spill] sm:$0xff] }
 0x60b   : > { %v8228_v33 = vrot.slane %v8226_v32, 3  ;;  %v8232_v32 = vshrl.u32 %v11436_v46, 16 }
 0x60c   : > { %v7978_v42 = vpop.f32.mrf.mxu3  ;;  %v7880_v59 = vsel %vm2853_vm5, %v7877_v57, %v7879_v30 }
 0x60d   : > { %v8062_v0 = vadd.f32 %v7978_v42, %v7677_v2  ;;  %v8229_v12 = vor.u32 %v8228_v33, %v8225_v55 }
 0x60f   : > { %v7336_v54 = vpop.f32.mrf.mxu1 }
 0x610   : > { %v7419_v1 = vadd.f32 %v7336_v54, %v14044_v53  ;;  %v7600_v62 = vpop.f32.mrf.mxu2  ;;  %v15114_v54 = vld [vmem:[#allocation39_spill] sm:$0xff] }
 0x611   : > { %v8370_v26 = vpop.f32.mrf.mxu0 }
 0x612   : > { %v14281_v7 = vadd.f32 %v8370_v26, %v8062_v0  ;;  %v7678_v36 = vadd.f32 %v7595_v25, %v7419_v1  ;;  %v8230_v1 = vsel %vm3498_vm7, %v8220_v24, %v8229_v12 }
 0x614   : > { %8409 = vmatmul.bf16.gmra.mxu0 %v8221_v19  ;;  %v7980_v31 = vpop.f32.mrf.mxu3  ;;  %7642 = vmatmul.bf16.gmra.mxu2 %v15111_v50 }
 0x615   : > { %v8063_v39 = vadd.f32 %v7980_v31, %v7678_v36 }
 0x617   : > { %v7339_v47 = vpop.f32.mrf.mxu1 }
 0x618   : > { %v7420_v53 = vadd.f32 %v7339_v47, %v15112_v49  ;;  %v7603_v36 = vpop.f32.mrf.mxu2  ;;  %v8235_v47 = vshll.u32 %v11436_v46, 16 }
 0x619   : > { %v8372_v23 = vpop.f32.mrf.mxu0  ;;  %8022 = vmatmul.bf16.gmra.mxu3 %v7880_v59 }
 0x61a   : > { %v14287_v44 = vadd.f32 %v8372_v23, %v8063_v39  ;;  %7378 = vmatmul.bf16.gmra.mxu1 %v15113_v20  ;;  %v7679_v25 = vadd.f32 %v7598_v18, %v7420_v53  ;;  %v7881_v39 = vrot.slane %v11436_v46, 2  ;;  %v11300_v18 = vld [vmem:[#allocation9 + $0x208] sm:$0xff]  ;;  %v8237_v55 = vrot.slane %v8235_v47, 3 }
 0x61b   : > { %8616 = vmatpush.bf16.msra.mxu1 %v11300_v18  ;;  %v15117_v18 = vld [vmem:[#allocation32_spill] sm:$0xff] }
 0x61c   : > { %v7983_v2 = vpop.f32.mrf.mxu3  ;;  %v7882_v23 = vsel %vm2853_vm5, %v7879_v30, %v7881_v39 }
 0x61d   : > { %v8064_v4 = vadd.f32 %v7983_v2, %v7679_v25  ;;  %v8234_v25 = vrot.slane %v8232_v32, 2 }
 0x61f   : > { %v7341_v42 = vpop.f32.mrf.mxu1 }
 0x620   : > { %v7421_v26 = vadd.f32 %v7341_v42, %v15114_v54  ;;  %v8238_v42 = vor.u32 %v8237_v55, %v8234_v25 }
 0x621   : > { %v8375_v0 = vpop.f32.mrf.mxu0 }
 0x622   : > { %v14291_v57 = vadd.f32 %v8375_v0, %v8064_v4  ;;  %v7680_v19 = vadd.f32 %v7600_v62, %v7421_v26  ;;  %v15116_v62 = vld [vmem:[#allocation28_spill] sm:$0xff]  ;;  %v7605_v4 = vpop.f32.mrf.mxu2 }
 0x624   : > { %8414 = vmatmul.bf16.gmra.mxu0 %v8230_v1  ;;  %v7985_v31 = vpop.f32.mrf.mxu3  ;;  %7647 = vmatmul.bf16.gmra.mxu2 %v15115_v28 }
 0x625   : > { %v8065_v50 = vadd.f32 %v7985_v31, %v7680_v19  ;;  %v11437_v31 = vld [vmem:[#allocation3 + $0x80] sm:$0xff] }
 0x626   : > { %v7883_v46 = vrot.slane %v11437_v31, 2  ;;  %v8244_v28 = vshll.u32 %v11437_v31, 16 }
 0x627   : > { %v7344_v59 = vpop.f32.mrf.mxu1 }
 0x628   : > { %v7422_v53 = vadd.f32 %v7344_v59, %v14104_v58  ;;  %v8239_v58 = vsel %vm3498_vm7, %v8229_v12, %v8238_v42  ;;  %v7884_v59 = vsel %vm2853_vm5, %v7881_v39, %v7883_v46  ;;  %v15118_v12 = vld [vmem:[#allocation31_spill] sm:$0xff] }
 0x629   : > { %v8377_v49 = vpop.f32.mrf.mxu0  ;;  %8027 = vmatmul.bf16.gmra.mxu3 %v7882_v23 }
 0x62a   : > { %v14297_v24 = vadd.f32 %v8377_v49, %v8065_v50  ;;  %7383 = vmatmul.bf16.gmra.mxu1 %v15116_v62  ;;  %v7681_v20 = vadd.f32 %v7603_v36, %v7422_v53  ;;  %v8241_v50 = vshrl.u32 %v11437_v31, 16  ;;  %v7608_v32 = vpop.f32.mrf.mxu2 }
 0x62c   : > { %v7988_v33 = vpop.f32.mrf.mxu3  ;;  %v8243_v62 = vrot.slane %v8241_v50, 2 }
 0x62d   : > { %v8066_v2 = vadd.f32 %v7988_v33, %v7681_v20  ;;  %v8246_v20 = vrot.slane %v8244_v28, 3 }
 0x62f   : > { %v7346_v0 = vpop.f32.mrf.mxu1  ;;  %v8247_v33 = vor.u32 %v8246_v20, %v8243_v62 }
 0x630   : > { %v7423_v26 = vadd.f32 %v7346_v0, %v14130_v51 }
 0x631   : > { %v8380_v54 = vpop.f32.mrf.mxu0 }
 0x632   : > { %v14301_v30 = vadd.f32 %v8380_v54, %v8066_v2  ;;  %v7682_v1 = vadd.f32 %v7605_v4, %v7423_v26  ;;  %v7610_v54 = vpop.f32.mrf.mxu2 }
 0x634   : > { %8419 = vmatmul.bf16.gmra.mxu0 %v8239_v58  ;;  %v7990_v19 = vpop.f32.mrf.mxu3  ;;  %7652 = vmatmul.bf16.gmra.mxu2 %v15117_v18 }
 0x635   : > { %v8067_v36 = vadd.f32 %v7990_v19, %v7682_v1  ;;  %v11438_v1 = vld [vmem:[#allocation3 + $0x88] sm:$0xff] }
 0x636   : > { %v7885_v19 = vrot.slane %v11438_v1, 2  ;;  %v8250_v18 = vshrl.u32 %v11438_v1, 16  ;;  %v8253_v50 = vshll.u32 %v11438_v1, 16 }
 0x637   : > { %v7349_v47 = vpop.f32.mrf.mxu1 }
 0x638   : > { %v7424_v51 = vadd.f32 %v7349_v47, %v14136_v29  ;;  %v8248_v29 = vsel %vm3498_vm7, %v8238_v42, %v8247_v33  ;;  %v11299_v42 = vld [vmem:[#allocation9 + $0x200] sm:$0xff] }
 0x639   : > { %v8382_v23 = vpop.f32.mrf.mxu0  ;;  %8032 = vmatmul.bf16.gmra.mxu3 %v7884_v59  ;;  %8617 = vmatpush.bf16.msra.mxu1 %v11299_v42 }
 0x63a   : > { %v14307_v49 = vadd.f32 %v8382_v23, %v8067_v36  ;;  %7388 = vmatmul.bf16.gmra.mxu1 %v15118_v12  ;;  %v7683_v53 = vadd.f32 %v7608_v32, %v7424_v51  ;;  %v15119_v36 = vld [vmem:[#allocation35_spill] sm:$0xff]  ;;  %v7886_v32 = vsel %vm2853_vm5, %v7883_v46, %v7885_v19  ;;  %v15120_v23 = vld [vmem:[#allocation34_spill] sm:$0xff]  ;;  %v8252_v51 = vrot.slane %v8250_v18, 2 }
 0x63b   : > { %v8255_v12 = vrot.slane %v8253_v50, 3 }
 0x63c   : > { %v7993_v25 = vpop.f32.mrf.mxu3 }
 0x63d   : > { %v8068_v55 = vadd.f32 %v7993_v25, %v7683_v53  ;;  %v8256_v53 = vor.u32 %v8255_v12, %v8252_v51  ;;  %v11439_v25 = vld [vmem:[#allocation3 + $0x90] sm:$0xff] }
 0x63f   : > { %v7351_v2 = vpop.f32.mrf.mxu1  ;;  %v8257_v46 = vsel %vm3498_vm7, %v8247_v33, %v8256_v53 }
 0x640   : > { %v7425_v0 = vadd.f32 %v7351_v2, %v14144_v22  ;;  %v7058_v2 = vld [vmem:[#allocation3 + $0x98] sm:$0x3] }
 0x641   : > { %v8385_v4 = vpop.f32.mrf.mxu0  ;;  %v7077_v1 = vunpack.c.l.b16 %v7058_v2  ;;  %v15125_v2 = vld [vmem:[#allocation43_spill] sm:$0xff] }
 0x642   : > { %v14311_v39 = vadd.f32 %v8385_v4, %v8068_v55  ;;  %v7684_v26 = vadd.f32 %v7610_v54, %v7425_v0  ;;  %v15121_v55 = vld [vmem:[#allocation40_spill] sm:$0xff]  ;;  %v8259_v4 = vshrl.u32 %v11439_v25, 16  ;;  %v8262_v0 = vshll.u32 %v11439_v25, 16 }
 0x644   : > { %8424 = vmatmul.bf16.gmra.mxu0 %v8248_v29  ;;  %v7995_v58 = vpop.f32.mrf.mxu3  ;;  %7657 = vmatmul.bf16.gmra.mxu2 %v15119_v36  ;;  %v8264_v33 = vrot.slane %v8262_v0, 3  ;;  %v7078_v36 = vpack.c.b16 %v7077_v1, %v7077_v1 }
 0x645   : > { %v8069_v31 = vadd.f32 %v7995_v58, %v7684_v26  ;;  %v15122_v26 = vld [vmem:[#allocation47_spill] sm:$0xff] }
 0x647   : > { %v7354_v28 = vpop.f32.mrf.mxu1 }
 0x648   : > { %v14317_v22 = vadd.f32 %v7354_v28, %v14150_v27  ;;  %v7887_v27 = vrot.slane %v11439_v25, 2 }
 0x649   : > { %v8387_v47 = vpop.f32.mrf.mxu0  ;;  %8037 = vmatmul.bf16.gmra.mxu3 %v7886_v32  ;;  %v7506_v32 = vrot.slane %v7078_v36, 2 }
 0x64a   : > { %v14319_v59 = vadd.f32 %v8387_v47, %v8069_v31  ;;  %7393 = vmatmul.bf16.gmra.mxu1 %v15120_v23  ;;  %v7888_v29 = vsel %vm2853_vm5, %v7885_v19, %v7887_v27  ;;  %v8261_v31 = vrot.slane %v8259_v4, 2  ;;  %v11440_v19 = vld [vmem:[#allocation3 + $0x98] sm:$0xff]  ;;  %v15124_v23 = vrot.slane %v14079_v43, 2 }
 0x64b   : > { %v7889_v42 = vrot.slane %v11440_v19, 2  ;;  %v8268_v12 = vshrl.u32 %v11440_v19, 16  ;;  %v7244_v43 = vshll.u32 %v7078_v36, 16 }
 0x64c   : > { %v8265_v18 = vor.u32 %v8264_v33, %v8261_v31  ;;  %v7507_v51 = vsel %vm2853_vm5, %v15124_v23, %v7506_v32  ;;  %v15126_v32 = vld [vmem:[#allocation41_spill] sm:$0xff] }
 0x64d   : > { %v7890_v25 = vsel %vm2853_vm5, %v7887_v27, %v7889_v42  ;;  %v7246_v27 = vrot.slane %v7244_v43, 2 }
 0x64e   : > { %v8266_v47 = vsel %vm3498_vm7, %v8256_v53, %v8265_v18  ;;  %v8270_v53 = vrot.slane %v8268_v12, 2 }
 0x64f   : > { %v7356_v62 = vpop.f32.mrf.mxu1 }
 0x650   : > { %v14323_v20 = vadd.f32 %v7356_v62, %v14158_v6  ;;  %v15123_v6 = vld [vmem:[#allocation38_spill] sm:$0xff]  ;;  %v8271_v62 = vshll.u32 %v11440_v19, 16  ;;  %v8280_v19 = vshll.u32 %v15126_v32, 16 }
 0x652   : > { %v8273_v4 = vrot.slane %v8271_v62, 3 }
 0x654   : > { %8429 = vmatmul.bf16.gmra.mxu0 %v8257_v46  ;;  %7662 = vmatmul.bf16.gmra.mxu2 %v15121_v55 }
 0x657   : > { %v7359_v54 = vpop.f32.mrf.mxu1 }
 0x658   : > { %v14329_v58 = vadd.f32 %v7359_v54, %v15122_v26  ;;  %v7241_v54 = vshrl.u32 %v7078_v36, 16 }
 0x659   : > { %8042 = vmatmul.bf16.gmra.mxu3 %v7888_v29  ;;  %v8274_v29 = vor.u32 %v8273_v4, %v8270_v53 }
 0x65a   : > { %7398 = vmatmul.bf16.gmra.mxu1 %v15123_v6  ;;  %v7243_v31 = vrot.slane %v7241_v54, 1 }
 0x65f   : > { %v7361_v50 = vpop.f32.mrf.mxu1 }
 0x660   : > { %v14333_v28 = vadd.f32 %v7361_v50, %v14172_v45  ;;  %v7745_v45 = vld [vmem:[#allocation3 + $0xa0] sm:$0x3]  ;;  %v7247_v50 = vor.u32 %v7246_v27, %v7243_v31  ;;  %v15131_v31 = vld [vmem:[#allocation17_spill] sm:$0xff] }
 0x661   : > { %v7836_v0 = vunpack.c.l.b16 %v7745_v45 }
 0x663   : > { %v7855_v1 = vpack.c.b16 %v7836_v0, %v7836_v0 }
 0x664   : > { %8434 = vmatmul.bf16.gmra.mxu0 %v8266_v47  ;;  %7667 = vmatmul.bf16.gmra.mxu2 %v7507_v51  ;;  %v8277_v47 = vshrl.u32 %v15126_v32, 16 }
 0x665   : > { %v7891_v33 = vrot.slane %v7855_v1, 2 }
 0x666   : > { %v8279_v62 = vrot.slane %v8277_v47, 2  ;;  %v15137_v47 = vld [vmem:[#allocation19_spill] sm:$0xff] }
 0x667   : > { %v7364_v46 = vpop.f32.mrf.mxu1  ;;  %v7892_v36 = vsel %vm2853_vm5, %v7889_v42, %v7891_v33  ;;  %v15134_v33 = vld [vmem:[#allocation18_spill] sm:$0xff] }
 0x668   : > { %v14341_v55 = vadd.f32 %v7364_v46, %v14176_v61  ;;  %v8275_v61 = vsel %vm3498_vm7, %v8265_v18, %v8274_v29  ;;  %v8282_v18 = vrot.slane %v8280_v19, 3 }
 0x669   : > { %8047 = vmatmul.bf16.gmra.mxu3 %v7890_v25 }
 0x66a   : > { %7403 = vmatmul.bf16.gmra.mxu1 %v15125_v2  ;;  %v8283_v46 = vor.u32 %v8282_v18, %v8279_v62  ;;  %v15143_v62 = vld [vmem:[#allocation21_spill] sm:$0xff] }
 0x66c   : > { %v8284_v2 = vsel %vm3498_vm7, %v8274_v29, %v8283_v46 }
 0x66f   : > { %v7366_v26 = vpop.f32.mrf.mxu1 }
 0x670   : > { %v14345_v6 = vadd.f32 %v7366_v26, %v14182_v11  ;;  %v15127_v11 = vld [vmem:[#allocation42_spill] sm:$0xff]  ;;  %v15129_v26 = vld [vmem:[#allocation16_spill] sm:$0xff] }
 0x671   : > { %v7248_v12 = vsel %vm2460_vm6, %v15127_v11, %v7247_v50 }
 0x674   : > { %8439 = vmatmul.bf16.gmra.mxu0 %v8275_v61 }
 0x677   : > { %v7369_v23 = vpop.f32.mrf.mxu1 }
 0x678   : > { %v14352_v51 = vadd.f32 %v7369_v23, %v14185_v37  ;;  %v15128_v37 = vld [vmem:[#allocation15_spill] sm:$0xff] }
 0x679   : > { %8052 = vmatmul.bf16.gmra.mxu3 %v7892_v36  ;;  %v15140_v36 = vld [vmem:[#allocation20_spill] sm:$0xff] }
 0x67a   : > { %7408 = vmatmul.bf16.gmra.mxu1 %v7248_v12 }
 0x67f   : > { %v7371_v25 = vpop.f32.mrf.mxu1 }
 0x680   : > { %v14357_v45 = vadd.f32 %v7371_v25, %v14192_v10  ;;  %v15146_v25 = vld [vmem:[#allocation14_spill] sm:$0xff] }
 0x684   : > { %8444 = vmatmul.bf16.gmra.mxu0 %v8284_v2 }
 0x687   : > { %v7374_v53 = vpop.f32.mrf.mxu1 }
 0x688   : > { %v14361_v42 = vadd.f32 %v7374_v53, %v14195_v13 }
 0x68a   : > { %8618 = vmatmul.bf16.vlgmr.msra.gmra.mxu1 %v15128_v37 }
 0x68f   : > { %v7376_v4 = vpop.f32.mrf.mxu1 }
 0x690   : > { %v14365_v0 = vadd.f32 %v7376_v4, %v14200_v17 }
 0x697   : > { %v7379_v54 = vpop.f32.mrf.mxu1 }
 0x698   : > { %v14368_v43 = vadd.f32 %v7379_v54, %v14203_v8  ;;  %v11441_v54 = vld [vmem:[%s11777_s16] sm:$0xff] }
 0x69a   : > { %8623 = vmatmul.bf16.gmra.mxu1 %v15129_v26  ;;  %v9144_v26 = vrot.slane %v11441_v54, 4 }
 0x69f   : > { %v7381_v10 = vpop.f32.mrf.mxu1 }
 0x6a0   : > { %v14372_v29 = vadd.f32 %v7381_v10, %v14208_v34  ;;  %v9145_v10 = vrot.slane %v11441_v54, 6 }
 0x6a7   : > { %v7384_v1 = vpop.f32.mrf.mxu1 }
 0x6a8   : > { %v14375_v13 = vadd.f32 %v7384_v1, %v14211_v14 }
 0x6aa   : > { %15130 = vst [vmem:[#allocation26_spill] sm:$0xff] %v14375_v13  ;;  %8628 = vmatmul.bf16.gmra.mxu1 %v15131_v31 }
 0x6af   : > { %v7386_v27 = vpop.f32.mrf.mxu1 }
 0x6b0   : > { %v14379_v17 = vadd.f32 %v7386_v27, %v14216_v60 }
 0x6b2   : > { %15132 = vst [vmem:[#allocation36_spill] sm:$0xff] %v14379_v17 }
 0x6b7   : > { %v7389_v61 = vpop.f32.mrf.mxu1 }
 0x6b8   : > { %v14382_v8 = vadd.f32 %v7389_v61, %v14219_v15 }
 0x6ba   : > { %15133 = vst [vmem:[#allocation25_spill] sm:$0xff] %v14382_v8  ;;  %8633 = vmatmul.bf16.gmra.mxu1 %v15134_v33  ;;  %v15148_v33 = vld [vmem:[#allocation22_spill] sm:$0xff] }
 0x6bf   : > { %v7391_v50 = vpop.f32.mrf.mxu1 }
 0x6c0   : > { %v14386_v34 = vadd.f32 %v7391_v50, %v14224_v41 }
 0x6c2   : > { %15135 = vst [vmem:[#allocation39_spill] sm:$0xff] %v14386_v34 }
 0x6c7   : > { %v7394_v32 = vpop.f32.mrf.mxu1 }
 0x6c8   : > { %v14389_v14 = vadd.f32 %v7394_v32, %v14227_v5 }
 0x6ca   : > { %15136 = vst [vmem:[#allocation29_spill] sm:$0xff] %v14389_v14  ;;  %8638 = vmatmul.bf16.gmra.mxu1 %v15137_v47  ;;  %v15153_v14 = vld [vmem:[#allocation33_spill] sm:$0xff] }
 0x6cf   : > { %v7396_v19 = vpop.f32.mrf.mxu1 }
 0x6d0   : > { %v14393_v60 = vadd.f32 %v7396_v19, %v14232_v40 }
 0x6d2   : > { %15138 = vst [vmem:[#allocation28_spill] sm:$0xff] %v14393_v60 }
 0x6d7   : > { %v7399_v23 = vpop.f32.mrf.mxu1 }
 0x6d8   : > { %v14396_v15 = vadd.f32 %v7399_v23, %v14235_v9 }
 0x6da   : > { %15139 = vst [vmem:[#allocation32_spill] sm:$0xff] %v14396_v15  ;;  %8643 = vmatmul.bf16.gmra.mxu1 %v15140_v36 }
 0x6df   : > { %v7401_v11 = vpop.f32.mrf.mxu1 }
 0x6e0   : > { %v14400_v41 = vadd.f32 %v7401_v11, %v14240_v48 }
 0x6e2   : > { %15141 = vst [vmem:[#allocation31_spill] sm:$0xff] %v14400_v41 }
 0x6e7   : > { %v7404_v12 = vpop.f32.mrf.mxu1 }
 0x6e8   : > { %v14403_v5 = vadd.f32 %v7404_v12, %v14243_v38  ;;  %v14419_v38 = vld [vmem:[%s14970_s4] ss:$0 sm:$0xff] }
 0x6e9   : > { %v14429_v4 = vrot.slane %v14419_v38, 6 }
 0x6ea   : > { %15142 = vst [vmem:[#allocation35_spill] sm:$0xff] %v14403_v5  ;;  %8648 = vmatmul.bf16.gmra.mxu1 %v15143_v62 }
 0x6ef   : > { %v7406_v18 = vpop.f32.mrf.mxu1 }
 0x6f0   : > { %v14407_v40 = vadd.f32 %v7406_v18, %v14248_v52  ;;  %v14423_v52 = vrot.slane %v14419_v38, 2 }
 0x6f2   : > { %15144 = vst [vmem:[#allocation34_spill] sm:$0xff] %v14407_v40 }
 0x6f7   : > { %v7409_v46 = vpop.f32.mrf.mxu1 }
 0x6f8   : > { %v14410_v9 = vadd.f32 %v7409_v46, %v14251_v16  ;;  %v14426_v16 = vrot.slane %v14419_v38, 4 }
 0x6fa   : > { %15145 = vst [vmem:[#allocation40_spill] sm:$0xff] %v14410_v9  ;;  %8653 = vmatmul.bf16.gmra.mxu1 %v15146_v25 }
 0x6ff   : > { %v7411_v2 = vpop.f32.mrf.mxu1 }
 0x700   : > { %v14414_v48 = vadd.f32 %v7411_v2, %v14257_v56  ;;  %v9143_v56 = vrot.slane %v11441_v54, 2  ;;  %v11442_v2 = vld [vmem:[%s11777_s16 + $0x8] sm:$0xff] }
 0x702   : > { %15147 = vst [vmem:[#allocation47_spill] sm:$0xff] %v14414_v48 }
 0x707   : > { %v8619_v53 = vpop.f32.mrf.mxu1 }
 0x708   : > { %v8709_v37 = vadd.f32 %v8619_v53, %v14261_v35  ;;  %v9146_v53 = vrot.slane %v11442_v2, 2 }
 0x70a   : > { %v8781_v1 = vrot.slane %v8709_v37, 2  ;;  %v8782_v31 = vrot.slane %v8709_v37, 4  ;;  %v8783_v27 = vrot.slane %v8709_v37, 6  ;;  %v8983_v61 = vadd.f32 %v14419_v38, %v8709_v37  ;;  %8658 = vmatmul.bf16.gmra.mxu1 %v15148_v33 }
 0x70b   : > { %v9147_v37 = vrot.slane %v11442_v2, 4 }
 0x70c   : > { %v8984_v35 = vadd.f32 %v14423_v52, %v8781_v1  ;;  %v8985_v50 = vadd.f32 %v14426_v16, %v8782_v31  ;;  %v8986_v32 = vadd.f32 %v14429_v4, %v8783_v27  ;;  %v9335_v47 = vadd.f32 %v11441_v54, %v8983_v61 }
 0x70d   : > { %v9148_v1 = vrot.slane %v11442_v2, 6 }
 0x70e   : > { %v9336_v19 = vadd.f32 %v9143_v56, %v8984_v35  ;;  %v9337_v23 = vadd.f32 %v9144_v26, %v8985_v50  ;;  %v9338_v36 = vadd.f32 %v9145_v10, %v8986_v32  ;;  %v9463_v11 = vmax.f32 %v9335_v47, 0.0 }
 0x70f   : > { %v8621_v12 = vpop.f32.mrf.mxu1 }
 0x710   : > { %v9464_v62 = vmax.f32 %v9336_v19, 0.0  ;;  %v9465_v18 = vmax.f32 %v9337_v23, 0.0  ;;  %v9466_v46 = vmax.f32 %v9338_v36, 0.0  ;;  %9719 = vst [vmem:[#allocation1] ss:$4 sm:$0xff] %v9463_v11  ;;  %v8710_v25 = vadd.f32 %v8621_v12, %v14267_v21  ;;  %v15149_v11 = vld [vmem:[#allocation24_spill] sm:$0xff] }
 0x712   : > { %9721 = vst [vmem:[#allocation1 + $0x1] ss:$4 sm:$0xff] %v9464_v62  ;;  %v8784_v31 = vrot.slane %v8710_v25, 2  ;;  %v8785_v33 = vrot.slane %v8710_v25, 4  ;;  %v8786_v27 = vrot.slane %v8710_v25, 6  ;;  %v8987_v54 = vadd.f32 %v14419_v38, %v8710_v25  ;;  %v14446_v25 = vpop.f32.mrf.mxu2 }
 0x713   : > { %9723 = vst [vmem:[#allocation1 + $0x2] ss:$4 sm:$0xff] %v9465_v18  ;;  %v15150_v18 = vld [vmem:[#allocation23_spill] sm:$0xff] }
 0x714   : > { %9725 = vst [vmem:[#allocation1 + $0x3] ss:$4 sm:$0xff] %v9466_v46  ;;  %v8988_v56 = vadd.f32 %v14423_v52, %v8784_v31  ;;  %v8989_v26 = vadd.f32 %v14426_v16, %v8785_v33  ;;  %v8990_v10 = vadd.f32 %v14429_v4, %v8786_v27  ;;  %v9339_v61 = vadd.f32 %v11442_v2, %v8987_v54  ;;  %v14452_v54 = vpop.f32.mrf.mxu0 }
 0x716   : > { %v9340_v21 = vadd.f32 %v9146_v53, %v8988_v56  ;;  %v9341_v35 = vadd.f32 %v9147_v37, %v8989_v26  ;;  %v9342_v50 = vadd.f32 %v9148_v1, %v8990_v10  ;;  %v9467_v32 = vmax.f32 %v9339_v61, 0.0  ;;  %v14448_v37 = vpop.f32.mrf.mxu3  ;;  %v11443_v26 = vld [vmem:[%s11777_s16 + $0x10] sm:$0xff] }
 0x717   : > { %v8624_v47 = vpop.f32.mrf.mxu1  ;;  %v9149_v10 = vrot.slane %v11443_v26, 2  ;;  %v9150_v61 = vrot.slane %v11443_v26, 4 }
 0x718   : > { %v9468_v19 = vmax.f32 %v9340_v21, 0.0  ;;  %v9469_v23 = vmax.f32 %v9341_v35, 0.0  ;;  %v9470_v36 = vmax.f32 %v9342_v50, 0.0  ;;  %9727 = vst [vmem:[#allocation1 + $0x20] ss:$4 sm:$0xff] %v9467_v32  ;;  %v8711_v46 = vadd.f32 %v8624_v47, %v14271_v3 }
 0x719   : > { %v9151_v35 = vrot.slane %v11443_v26, 6 }
 0x71a   : > { %9729 = vst [vmem:[#allocation1 + $0x21] ss:$4 sm:$0xff] %v9468_v19  ;;  %8663 = vmatmul.bf16.gmra.mxu1 %v15149_v11  ;;  %v8787_v53 = vrot.slane %v8711_v46, 2  ;;  %v8788_v1 = vrot.slane %v8711_v46, 4  ;;  %v8789_v31 = vrot.slane %v8711_v46, 6 }
 0x71b   : > { %9731 = vst [vmem:[#allocation1 + $0x22] ss:$4 sm:$0xff] %v9469_v23 }
 0x71c   : > { %9733 = vst [vmem:[#allocation1 + $0x23] ss:$4 sm:$0xff] %v9470_v36  ;;  %v8991_v27 = vadd.f32 %v14419_v38, %v8787_v53  ;;  %v8992_v56 = vadd.f32 %v14423_v52, %v8788_v1  ;;  %v8993_v3 = vadd.f32 %v14426_v16, %v8789_v31 }
 0x71e   : > { %v9343_v32 = vadd.f32 %v11443_v26, %v8991_v27  ;;  %v9344_v19 = vadd.f32 %v9149_v10, %v8992_v56  ;;  %v9345_v36 = vadd.f32 %v9150_v61, %v8993_v3  ;;  %v11444_v26 = vld [vmem:[%s11777_s16 + $0x18] sm:$0xff] }
 0x71f   : > { %v8626_v12 = vpop.f32.mrf.mxu1  ;;  %v9152_v9 = vrot.slane %v11444_v26, 2  ;;  %v9153_v10 = vrot.slane %v11444_v26, 4 }
 0x720   : > { %v8712_v33 = vadd.f32 %v8626_v12, %v14277_v63  ;;  %v14460_v63 = vpop.f32.mrf.mxu2  ;;  %v15151_v12 = vld [vmem:[#allocation27_spill] sm:$0xff]  ;;  %v9471_v1 = vmax.f32 %v9343_v32, 0.0  ;;  %v9472_v48 = vmax.f32 %v9344_v19, 0.0  ;;  %v9473_v40 = vmax.f32 %v9345_v36, 0.0 }
 0x722   : > { %v8994_v21 = vadd.f32 %v14429_v4, %v8712_v33  ;;  %v8790_v47 = vrot.slane %v8712_v33, 2  ;;  %v8791_v23 = vrot.slane %v8712_v33, 4  ;;  %v8792_v11 = vrot.slane %v8712_v33, 6  ;;  %v14470_v33 = vpop.f32.mrf.mxu0 }
 0x724   : > { %v9346_v46 = vadd.f32 %v9151_v35, %v8994_v21  ;;  %v8995_v31 = vadd.f32 %v14419_v38, %v8790_v47  ;;  %v8996_v27 = vadd.f32 %v14423_v52, %v8791_v23  ;;  %v8997_v56 = vadd.f32 %v14426_v16, %v8792_v11 }
 0x725   : > { %v9154_v21 = vrot.slane %v11444_v26, 6 }
 0x726   : > { %v9474_v3 = vmax.f32 %v9346_v46, 0.0  ;;  %v9347_v35 = vadd.f32 %v11444_v26, %v8995_v31  ;;  %v9348_v32 = vadd.f32 %v9152_v9, %v8996_v27  ;;  %v9349_v47 = vadd.f32 %v9153_v10, %v8997_v56  ;;  %v9735_v27 = vld.sshfl [vmem:[#allocation1 + $0x20] sm:$0xff pattern:$0x73625140] }
 0x727   : > { %v8629_v62 = vpop.f32.mrf.mxu1  ;;  %9919 = vst [vmem:[%s14479_s27 + $0x8] sm:$0xff] %v9735_v27 }
 0x728   : > { %v8713_v53 = vadd.f32 %v8629_v62, %v14281_v7  ;;  %v9734_v62 = vld.sshfl [vmem:[#allocation1] sm:$0xff pattern:$0x73625140]  ;;  %v14475_v19 = vpop.f32.mrf.mxu2  ;;  %v9475_v36 = vmax.f32 %v9347_v35, 0.0  ;;  %v9477_v9 = vmax.f32 %v9349_v47, 0.0 }
 0x729   : > { %9736 = vst [vmem:[#allocation1] ss:$4 sm:$0xff] %v9471_v1 }
 0x72a   : > { %8668 = vmatmul.bf16.gmra.mxu1 %v15150_v18  ;;  %v14463_v18 = vpop.f32.mrf.mxu3  ;;  %v8998_v61 = vadd.f32 %v14429_v4, %v8713_v53  ;;  %9737 = vst [vmem:[#allocation1 + $0x1] ss:$4 sm:$0xff] %v9472_v48  ;;  %v8793_v48 = vrot.slane %v8713_v53, 4  ;;  %v8794_v1 = vrot.slane %v8713_v53, 6  ;;  %v14487_v26 = vpop.f32.mrf.mxu0 }
 0x72b   : > { %9738 = vst [vmem:[#allocation1 + $0x2] ss:$4 sm:$0xff] %v9473_v40 }
 0x72c   : > { %v9350_v23 = vadd.f32 %v9154_v21, %v8998_v61  ;;  %9739 = vst [vmem:[#allocation1 + $0x3] ss:$4 sm:$0xff] %v9474_v3  ;;  %v8999_v10 = vadd.f32 %v14419_v38, %v8793_v48  ;;  %v15152_v3 = vld [vmem:[#allocation30_spill] sm:$0xff] }
 0x72d   : > { %9918 = vst [vmem:[%s14479_s27] sm:$0xff] %v9734_v62 }
 0x72e   : > { %v9478_v40 = vmax.f32 %v9350_v23, 0.0  ;;  %9740 = vst [vmem:[#allocation1 + $0x20] ss:$4 sm:$0xff] %v9475_v36 }
 0x72f   : > { %v8631_v2 = vpop.f32.mrf.mxu1  ;;  %9742 = vst [vmem:[#allocation1 + $0x22] ss:$4 sm:$0xff] %v9477_v9 }
 0x730   : > { %v8714_v46 = vadd.f32 %v8631_v2, %v14287_v44  ;;  %v9000_v44 = vadd.f32 %v14423_v52, %v8794_v1  ;;  %v11445_v2 = vld [vmem:[%s11777_s16 + $0x20] sm:$0xff]  ;;  %9743 = vst [vmem:[#allocation1 + $0x23] ss:$4 sm:$0xff] %v9478_v40  ;;  %v14495_v62 = vpop.f32.mrf.mxu2 }
 0x731   : > { %v9155_v61 = vrot.slane %v11445_v2, 2  ;;  %v9156_v21 = vrot.slane %v11445_v2, 4  ;;  %v9351_v23 = vadd.f32 %v11445_v2, %v8999_v10 }
 0x732   : > { %v14482_v11 = vpop.f32.mrf.mxu3  ;;  %v8795_v56 = vrot.slane %v8714_v46, 2  ;;  %v9001_v53 = vadd.f32 %v14426_v16, %v8714_v46  ;;  %v8796_v36 = vrot.slane %v8714_v46, 4  ;;  %v8797_v48 = vrot.slane %v8714_v46, 6 }
 0x733   : > { %v9352_v9 = vadd.f32 %v9155_v61, %v9000_v44  ;;  %v9479_v5 = vmax.f32 %v9351_v23, 0.0 }
 0x734   : > { %v9002_v35 = vadd.f32 %v14429_v4, %v8795_v56  ;;  %v9353_v40 = vadd.f32 %v9156_v21, %v9001_v53  ;;  %v9003_v41 = vadd.f32 %v14419_v38, %v8796_v36  ;;  %v14505_v56 = vpop.f32.mrf.mxu0  ;;  %v9004_v60 = vadd.f32 %v14423_v52, %v8797_v48  ;;  %v9744_v21 = vld.sshfl [vmem:[#allocation1] sm:$0xff pattern:$0x73625140] }
 0x735   : > { %v9480_v15 = vmax.f32 %v9352_v9, 0.0  ;;  %9746 = vst [vmem:[#allocation1] ss:$4 sm:$0xff] %v9479_v5 }
 0x736   : > { %v9481_v10 = vmax.f32 %v9353_v40, 0.0  ;;  %9920 = vst [vmem:[%s14479_s27 + $0x10] sm:$0xff] %v9744_v21 }
 0x737   : > { %v14458_v50 = vpop.f32.mrf.mxu1  ;;  %9747 = vst [vmem:[#allocation1 + $0x1] ss:$4 sm:$0xff] %v9480_v15 }
 0x738   : > { %v8715_v47 = vadd.f32 %v14458_v50, %v14291_v57  ;;  %v11446_v57 = vld [vmem:[%s11777_s16 + $0x28] sm:$0xff]  ;;  %v14513_v23 = vpop.f32.mrf.mxu2  ;;  %9748 = vst [vmem:[#allocation1 + $0x2] ss:$4 sm:$0xff] %v9481_v10  ;;  %v11447_v10 = vld [vmem:[%s11777_s16 + $0x30] sm:$0xff] }
 0x739   : > { %v9158_v50 = vrot.slane %v11446_v57, 2  ;;  %v9159_v44 = vrot.slane %v11446_v57, 4  ;;  %v9160_v53 = vrot.slane %v11446_v57, 6  ;;  %v9163_v21 = vrot.slane %v11447_v10, 6 }
 0x73a   : > { %8673 = vmatmul.bf16.gmra.mxu1 %v15151_v12  ;;  %v9476_v12 = vmax.f32 %v9348_v32, 0.0  ;;  %v9157_v32 = vrot.slane %v11445_v2, 6  ;;  %v8798_v27 = vrot.slane %v8715_v47, 2  ;;  %v9005_v2 = vadd.f32 %v14426_v16, %v8715_v47 }
 0x73b   : > { %v9356_v36 = vadd.f32 %v9158_v50, %v9004_v60  ;;  %v8799_v48 = vrot.slane %v8715_v47, 6 }
 0x73c   : > { %9741 = vst [vmem:[#allocation1 + $0x21] ss:$4 sm:$0xff] %v9476_v12  ;;  %v14500_v12 = vpop.f32.mrf.mxu3  ;;  %v9006_v61 = vadd.f32 %v14429_v4, %v8798_v27  ;;  %v9357_v40 = vadd.f32 %v9159_v44, %v9005_v2  ;;  %v14522_v50 = vpop.f32.mrf.mxu0  ;;  %v9161_v2 = vrot.slane %v11447_v10, 2 }
 0x73d   : > { %v9007_v60 = vadd.f32 %v14419_v38, %v8799_v48 }
 0x73e   : > { %v9358_v27 = vadd.f32 %v9160_v53, %v9006_v61  ;;  %v9162_v61 = vrot.slane %v11447_v10, 4 }
 0x73f   : > { %v14473_v7 = vpop.f32.mrf.mxu1 }
 0x740   : > { %v9486_v15 = vmax.f32 %v9358_v27, 0.0 }
 0x743   : > { %v9745_v44 = vld.sshfl [vmem:[#allocation1 + $0x20] sm:$0xff pattern:$0x73625140] }
 0x744   : > { %9753 = vst [vmem:[#allocation1 + $0x23] ss:$4 sm:$0xff] %v9486_v15 }
 0x745   : > { %9921 = vst [vmem:[%s14479_s27 + $0x18] sm:$0xff] %v9745_v44 }
 0x747   : > { %v14485_v31 = vpop.f32.mrf.mxu1 }
 0x74a   : > { %8678 = vmatmul.bf16.gmra.mxu1 %v15152_v3  ;;  %v9354_v3 = vadd.f32 %v9157_v32, %v9002_v35  ;;  %v9355_v35 = vadd.f32 %v11446_v57, %v9003_v41  ;;  %v8716_v32 = vadd.f32 %v14473_v7, %v14297_v24  ;;  %v9484_v24 = vmax.f32 %v9356_v36, 0.0 }
 0x74b   : > { %v9485_v7 = vmax.f32 %v9357_v40, 0.0  ;;  %v9359_v36 = vadd.f32 %v11447_v10, %v9007_v60  ;;  %v14532_v40 = vpop.f32.mrf.mxu2  ;;  %v11448_v60 = vld [vmem:[%s11777_s16 + $0x38] sm:$0xff] }
 0x74c   : > { %v9482_v46 = vmax.f32 %v9354_v3, 0.0  ;;  %v14517_v3 = vpop.f32.mrf.mxu3  ;;  %v9483_v41 = vmax.f32 %v9355_v35, 0.0  ;;  %v8800_v57 = vrot.slane %v8716_v32, 2  ;;  %v8801_v5 = vrot.slane %v8716_v32, 4  ;;  %9751 = vst [vmem:[#allocation1 + $0x21] ss:$4 sm:$0xff] %v9484_v24 }
 0x74d   : > { %v9008_v47 = vadd.f32 %v14423_v52, %v8716_v32  ;;  %v8802_v48 = vrot.slane %v8716_v32, 6  ;;  %9752 = vst [vmem:[#allocation1 + $0x22] ss:$4 sm:$0xff] %v9485_v7  ;;  %v9164_v32 = vrot.slane %v11448_v60, 2  ;;  %v9165_v10 = vrot.slane %v11448_v60, 4 }
 0x74e   : > { %9749 = vst [vmem:[#allocation1 + $0x3] ss:$4 sm:$0xff] %v9482_v46  ;;  %v9009_v46 = vadd.f32 %v14426_v16, %v8800_v57  ;;  %v9010_v53 = vadd.f32 %v14429_v4, %v8801_v5 }
 0x74f   : > { %v14502_v1 = vpop.f32.mrf.mxu1  ;;  %9750 = vst [vmem:[#allocation1 + $0x20] ss:$4 sm:$0xff] %v9483_v41  ;;  %v9360_v27 = vadd.f32 %v9161_v2, %v9008_v47  ;;  %v9487_v41 = vmax.f32 %v9359_v36, 0.0  ;;  %v9011_v5 = vadd.f32 %v14419_v38, %v8802_v48  ;;  %v14543_v2 = vpop.f32.mrf.mxu0 }
 0x750   : > { %v9361_v57 = vadd.f32 %v9162_v61, %v9009_v46  ;;  %v8718_v7 = vadd.f32 %v14502_v1, %v14307_v49  ;;  %v9166_v61 = vrot.slane %v11448_v60, 6 }
 0x751   : > { %v9488_v17 = vmax.f32 %v9360_v27, 0.0 }
 0x752   : > { %v9489_v47 = vmax.f32 %v9361_v57, 0.0  ;;  %v8805_v48 = vrot.slane %v8718_v7, 2  ;;  %v8806_v1 = vrot.slane %v8718_v7, 4  ;;  %v9015_v13 = vadd.f32 %v14419_v38, %v8718_v7 }
 0x753   : > { %v14549_v27 = vpop.f32.mrf.mxu2 }
 0x754   : > { %v14535_v8 = vpop.f32.mrf.mxu3 }
 0x757   : > { %v14515_v9 = vpop.f32.mrf.mxu1 }
 0x75a   : > { %8683 = vmatmul.bf16.gmra.mxu1 %v15153_v14  ;;  %v8717_v14 = vadd.f32 %v14485_v31, %v14301_v30  ;;  %v9362_v30 = vadd.f32 %v9163_v21, %v9010_v53  ;;  %v9754_v21 = vld.sshfl [vmem:[#allocation1] sm:$0xff pattern:$0x73625140] }
 0x75b   : > { %9756 = vst [vmem:[#allocation1] ss:$4 sm:$0xff] %v9487_v41 }
 0x75c   : > { %v8803_v34 = vrot.slane %v8717_v14, 2  ;;  %v8804_v31 = vrot.slane %v8717_v14, 4  ;;  %v9012_v24 = vadd.f32 %v14423_v52, %v8717_v14  ;;  %v9490_v44 = vmax.f32 %v9362_v30, 0.0  ;;  %9757 = vst [vmem:[#allocation1 + $0x1] ss:$4 sm:$0xff] %v9488_v17  ;;  %v11449_v17 = vld [vmem:[%s11777_s16 + $0x40] sm:$0xff] }
 0x75d   : > { %v9363_v14 = vadd.f32 %v11448_v60, %v9011_v5  ;;  %9758 = vst [vmem:[#allocation1 + $0x2] ss:$4 sm:$0xff] %v9489_v47  ;;  %v8807_v30 = vrot.slane %v8718_v7, 6  ;;  %v14553_v5 = vpop.f32.mrf.mxu3  ;;  %v9167_v60 = vrot.slane %v11449_v17, 2 }
 0x75e   : > { %v9013_v15 = vadd.f32 %v14426_v16, %v8803_v34  ;;  %v9014_v46 = vadd.f32 %v14429_v4, %v8804_v31  ;;  %v9364_v36 = vadd.f32 %v9164_v32, %v9012_v24  ;;  %v15154_v34 = vld [vmem:[#allocation37_spill] sm:$0xff]  ;;  %9759 = vst [vmem:[#allocation1 + $0x3] ss:$4 sm:$0xff] %v9490_v44  ;;  %v9016_v24 = vadd.f32 %v14423_v52, %v8805_v48  ;;  %v14565_v48 = vpop.f32.mrf.mxu0 }
 0x75f   : > { %v14530_v35 = vpop.f32.mrf.mxu1  ;;  %v9491_v31 = vmax.f32 %v9363_v14, 0.0  ;;  %9922 = vst [vmem:[%s14479_s27 + $0x20] sm:$0xff] %v9754_v21  ;;  %v8719_v32 = vadd.f32 %v14515_v9, %v14311_v39  ;;  %v9018_v44 = vadd.f32 %v14429_v4, %v8807_v30  ;;  %v9755_v21 = vld.sshfl [vmem:[#allocation1 + $0x20] sm:$0xff pattern:$0x73625140]  ;;  %v9367_v14 = vadd.f32 %v11449_v17, %v9015_v13 }
 0x760   : > { %v9365_v49 = vadd.f32 %v9165_v10, %v9013_v15  ;;  %v9366_v57 = vadd.f32 %v9166_v61, %v9014_v46  ;;  %v9492_v41 = vmax.f32 %v9364_v36, 0.0  ;;  %v9017_v15 = vadd.f32 %v14426_v16, %v8806_v1  ;;  %9923 = vst [vmem:[%s14479_s27 + $0x28] sm:$0xff] %v9755_v21 }
 0x761   : > { %v9168_v10 = vrot.slane %v11449_v17, 4  ;;  %v9169_v61 = vrot.slane %v11449_v17, 6  ;;  %9760 = vst [vmem:[#allocation1 + $0x20] ss:$4 sm:$0xff] %v9491_v31  ;;  %v7685_v36 = vadd.f32 %v14446_v25, %v14317_v22  ;;  %v9368_v39 = vadd.f32 %v9167_v60, %v9016_v24  ;;  %v14572_v25 = vpop.f32.mrf.mxu2  ;;  %v11450_v17 = vld [vmem:[%s11777_s16 + $0x48] sm:$0xff] }
 0x762   : > { %v9493_v47 = vmax.f32 %v9365_v49, 0.0  ;;  %v9494_v46 = vmax.f32 %v9366_v57, 0.0  ;;  %v8808_v9 = vrot.slane %v8719_v32, 2  ;;  %9761 = vst [vmem:[#allocation1 + $0x21] ss:$4 sm:$0xff] %v9492_v41  ;;  %v8809_v1 = vrot.slane %v8719_v32, 4 }
 0x763   : > { %v9369_v49 = vadd.f32 %v9168_v10, %v9017_v15  ;;  %v8810_v57 = vrot.slane %v8719_v32, 6  ;;  %v9495_v30 = vmax.f32 %v9367_v14, 0.0  ;;  %v9019_v13 = vadd.f32 %v14419_v38, %v8719_v32 }
 0x764   : > { %9762 = vst [vmem:[#allocation1 + $0x22] ss:$4 sm:$0xff] %v9493_v47  ;;  %v8720_v31 = vadd.f32 %v14530_v35, %v14319_v59  ;;  %v8070_v22 = vadd.f32 %v14448_v37, %v7685_v36  ;;  %v9496_v24 = vmax.f32 %v9368_v39, 0.0  ;;  %v9020_v41 = vadd.f32 %v14423_v52, %v8808_v9 }
 0x765   : > { %9763 = vst [vmem:[#allocation1 + $0x23] ss:$4 sm:$0xff] %v9494_v46  ;;  %v9170_v60 = vrot.slane %v11450_v17, 2  ;;  %v9497_v47 = vmax.f32 %v9369_v49, 0.0  ;;  %v9021_v15 = vadd.f32 %v14426_v16, %v8809_v1  ;;  %v9171_v10 = vrot.slane %v11450_v17, 4  ;;  %v14577_v46 = vpop.f32.mrf.mxu3 }
 0x766   : > { %v9172_v59 = vrot.slane %v11450_v17, 6  ;;  %v9764_v37 = vld.sshfl [vmem:[#allocation1] sm:$0xff pattern:$0x73625140]  ;;  %v8811_v21 = vrot.slane %v8720_v31, 2  ;;  %v8462_v14 = vadd.f32 %v14452_v54, %v8070_v22  ;;  %v7686_v36 = vadd.f32 %v14460_v63, %v14323_v20 }
 0x767   : > { %v14546_v53 = vpop.f32.mrf.mxu1  ;;  %9766 = vst [vmem:[#allocation1] ss:$4 sm:$0xff] %v9495_v30  ;;  %v9372_v39 = vadd.f32 %v9170_v60, %v9020_v41  ;;  %v8812_v9 = vrot.slane %v8720_v31, 4  ;;  %v9373_v49 = vadd.f32 %v9171_v10, %v9021_v15  ;;  %v8813_v1 = vrot.slane %v8720_v31, 6 }
 0x768   : > { %9767 = vst [vmem:[#allocation1 + $0x1] ss:$4 sm:$0xff] %v9496_v24  ;;  %v8721_v30 = vadd.f32 %v14546_v53, %v8462_v14  ;;  %v9023_v54 = vadd.f32 %v14419_v38, %v8811_v21  ;;  %v8071_v20 = vadd.f32 %v14463_v18, %v7686_v36  ;;  %v11451_v24 = vld [vmem:[%s11777_s16 + $0x50] sm:$0xff] }
 0x769   : > { %9768 = vst [vmem:[#allocation1 + $0x2] ss:$4 sm:$0xff] %v9497_v47  ;;  %v9500_v63 = vmax.f32 %v9372_v39, 0.0  ;;  %v9024_v22 = vadd.f32 %v14423_v52, %v8812_v9  ;;  %v9173_v31 = vrot.slane %v11451_v24, 2  ;;  %v9501_v41 = vmax.f32 %v9373_v49, 0.0  ;;  %v14595_v15 = vpop.f32.mrf.mxu2 }
 0x76a   : > { %8688 = vmatmul.bf16.gmra.mxu1 %v15154_v34  ;;  %v9370_v34 = vadd.f32 %v9169_v61, %v9018_v44  ;;  %v9022_v44 = vadd.f32 %v14429_v4, %v8810_v57  ;;  %v9371_v61 = vadd.f32 %v11450_v17, %v9019_v13  ;;  %v14586_v57 = vpop.f32.mrf.mxu0  ;;  %9924 = vst [vmem:[%s14479_s27 + $0x30] sm:$0xff] %v9764_v37  ;;  %v9174_v47 = vrot.slane %v11451_v24, 4 }
 0x76b   : > { %v9025_v60 = vadd.f32 %v14426_v16, %v8813_v1  ;;  %v9026_v53 = vadd.f32 %v14429_v4, %v8721_v30  ;;  %v9375_v37 = vadd.f32 %v11451_v24, %v9023_v54  ;;  %v8814_v18 = vrot.slane %v8721_v30, 2 }
 0x76c   : > { %v9498_v32 = vmax.f32 %v9370_v34, 0.0  ;;  %v15155_v34 = vld [vmem:[#allocation44_spill] sm:$0xff]  ;;  %v9374_v13 = vadd.f32 %v9172_v59, %v9022_v44  ;;  %v9499_v17 = vmax.f32 %v9371_v61, 0.0  ;;  %v9765_v59 = vld.sshfl [vmem:[#allocation1 + $0x20] sm:$0xff pattern:$0x73625140]  ;;  %v8463_v61 = vadd.f32 %v14470_v33, %v8071_v20 }
 0x76d   : > { %v14601_v21 = vpop.f32.mrf.mxu3  ;;  %v9376_v14 = vadd.f32 %v9173_v31, %v9024_v22  ;;  %v8815_v36 = vrot.slane %v8721_v30, 4  ;;  %9771 = vst [vmem:[#allocation1 + $0x21] ss:$4 sm:$0xff] %v9500_v63  ;;  %v9377_v39 = vadd.f32 %v9174_v47, %v9025_v60  ;;  %v8816_v9 = vrot.slane %v8721_v30, 6  ;;  %v11452_v63 = vld [vmem:[%s11777_s16 + $0x58] sm:$0xff] }
 0x76e   : > { %9769 = vst [vmem:[#allocation1 + $0x3] ss:$4 sm:$0xff] %v9498_v32  ;;  %v9502_v10 = vmax.f32 %v9374_v13, 0.0  ;;  %v9175_v32 = vrot.slane %v11451_v24, 6  ;;  %v7687_v49 = vadd.f32 %v14475_v19, %v14329_v58  ;;  %v9503_v13 = vmax.f32 %v9375_v37, 0.0  ;;  %v15156_v37 = vld [vmem:[#allocation45_spill] sm:$0xff] }
 0x76f   : > { %v14561_v7 = vpop.f32.mrf.mxu1  ;;  %9770 = vst [vmem:[#allocation1 + $0x20] ss:$4 sm:$0xff] %v9499_v17  ;;  %v9027_v17 = vadd.f32 %v14419_v38, %v8814_v18  ;;  %v9504_v54 = vmax.f32 %v9376_v14, 0.0  ;;  %v9028_v20 = vadd.f32 %v14423_v52, %v8815_v36  ;;  %v9176_v22 = vrot.slane %v11452_v63, 2 }
 0x770   : > { %9772 = vst [vmem:[#allocation1 + $0x22] ss:$4 sm:$0xff] %v9501_v41  ;;  %v9378_v1 = vadd.f32 %v9175_v32, %v9026_v53  ;;  %v9505_v30 = vmax.f32 %v9377_v39, 0.0  ;;  %v9029_v24 = vadd.f32 %v14426_v16, %v8816_v9  ;;  %v9177_v31 = vrot.slane %v11452_v63, 4 }
 0x771   : > { %9773 = vst [vmem:[#allocation1 + $0x23] ss:$4 sm:$0xff] %v9502_v10  ;;  %v8072_v58 = vadd.f32 %v14482_v11, %v7687_v49  ;;  %v9178_v41 = vrot.slane %v11452_v63, 6  ;;  %v9379_v10 = vadd.f32 %v11452_v63, %v9027_v17  ;;  %v14617_v53 = vpop.f32.mrf.mxu2  ;;  %v9380_v32 = vadd.f32 %v9176_v22, %v9028_v20 }
 0x772   : > { %9925 = vst [vmem:[%s14479_s27 + $0x38] sm:$0xff] %v9765_v59  ;;  %v14608_v33 = vpop.f32.mrf.mxu0  ;;  %v9506_v19 = vmax.f32 %v9378_v1, 0.0  ;;  %v9381_v59 = vadd.f32 %v9177_v31, %v9029_v24  ;;  %v7688_v18 = vadd.f32 %v14495_v62, %v14333_v28  ;;  %v7689_v22 = vadd.f32 %v14513_v23, %v14341_v55 }
 0x773   : > { %v8464_v11 = vadd.f32 %v14487_v26, %v8072_v58  ;;  %v9507_v36 = vmax.f32 %v9379_v10, 0.0  ;;  %v9508_v39 = vmax.f32 %v9380_v32, 0.0 }
 0x774   : > { %v9509_v49 = vmax.f32 %v9381_v59, 0.0  ;;  %v8074_v23 = vadd.f32 %v14517_v3, %v7689_v22  ;;  %v11454_v3 = vld [vmem:[%s11777_s16 + $0x68] sm:$0xff] }
 0x775   : > { %v9774_v47 = vld.sshfl [vmem:[#allocation1] sm:$0xff pattern:$0x73625140] }
 0x776   : > { %9776 = vst [vmem:[#allocation1] ss:$4 sm:$0xff] %v9503_v13  ;;  %v8073_v13 = vadd.f32 %v14500_v12, %v7688_v18 }
 0x777   : > { %v14580_v35 = vpop.f32.mrf.mxu1  ;;  %9777 = vst [vmem:[#allocation1 + $0x1] ss:$4 sm:$0xff] %v9504_v54 }
 0x778   : > { %9778 = vst [vmem:[#allocation1 + $0x2] ss:$4 sm:$0xff] %v9505_v30  ;;  %v8723_v9 = vadd.f32 %v14580_v35, %v8464_v11  ;;  %v9775_v28 = vld.sshfl [vmem:[#allocation1 + $0x20] sm:$0xff pattern:$0x73625140]  ;;  %v8465_v35 = vadd.f32 %v14505_v56, %v8073_v13 }
 0x779   : > { %9779 = vst [vmem:[#allocation1 + $0x3] ss:$4 sm:$0xff] %v9506_v19  ;;  %v14636_v12 = vpop.f32.mrf.mxu2  ;;  %v11453_v30 = vld [vmem:[%s11777_s16 + $0x60] sm:$0xff] }
 0x77a   : > { %8693 = vmatmul.bf16.gmra.mxu1 %v15155_v34  ;;  %v8722_v34 = vadd.f32 %v14561_v7, %v8463_v61  ;;  %v14623_v61 = vpop.f32.mrf.mxu3  ;;  %9926 = vst [vmem:[%s14479_s27 + $0x40] sm:$0xff] %v9774_v47  ;;  %v14628_v17 = vpop.f32.mrf.mxu0  ;;  %v8819_v62 = vrot.slane %v8723_v9, 2  ;;  %v9179_v24 = vrot.slane %v11453_v30, 2  ;;  %v9033_v31 = vadd.f32 %v14426_v16, %v8723_v9 }
 0x77b   : > { %9780 = vst [vmem:[#allocation1 + $0x20] ss:$4 sm:$0xff] %v9507_v36  ;;  %v9180_v58 = vrot.slane %v11453_v30, 4  ;;  %v8820_v55 = vrot.slane %v8723_v9, 4  ;;  %v8821_v32 = vrot.slane %v8723_v9, 6  ;;  %v7690_v9 = vadd.f32 %v14532_v40, %v14345_v6 }
 0x77c   : > { %v9030_v7 = vadd.f32 %v14429_v4, %v8722_v34  ;;  %v8817_v1 = vrot.slane %v8722_v34, 4  ;;  %v8818_v26 = vrot.slane %v8722_v34, 6  ;;  %9781 = vst [vmem:[#allocation1 + $0x21] ss:$4 sm:$0xff] %v9508_v39 }
 0x77d   : > { %9782 = vst [vmem:[#allocation1 + $0x22] ss:$4 sm:$0xff] %v9509_v49  ;;  %v9035_v39 = vadd.f32 %v14419_v38, %v8820_v55  ;;  %v15157_v49 = vld [vmem:[#allocation46_spill] sm:$0xff]  ;;  %v9036_v13 = vadd.f32 %v14423_v52, %v8821_v32  ;;  %v8075_v40 = vadd.f32 %v14535_v8, %v7690_v9 }
 0x77e   : > { %v9382_v14 = vadd.f32 %v9178_v41, %v9030_v7  ;;  %v9031_v63 = vadd.f32 %v14419_v38, %v8817_v1  ;;  %v9032_v34 = vadd.f32 %v14423_v52, %v8818_v26  ;;  %9927 = vst [vmem:[%s14479_s27 + $0x48] sm:$0xff] %v9775_v28  ;;  %v9034_v7 = vadd.f32 %v14429_v4, %v8819_v62 }
 0x77f   : > { %v14598_v44 = vpop.f32.mrf.mxu1  ;;  %v9181_v41 = vrot.slane %v11453_v30, 6  ;;  %v9182_v26 = vrot.slane %v11454_v3, 2  ;;  %v9183_v62 = vrot.slane %v11454_v3, 4 }
 0x780   : > { %v9510_v54 = vmax.f32 %v9382_v14, 0.0  ;;  %v8724_v56 = vadd.f32 %v14598_v44, %v8465_v35  ;;  %v9383_v47 = vadd.f32 %v11453_v30, %v9031_v63  ;;  %v9384_v10 = vadd.f32 %v9179_v24, %v9032_v34  ;;  %v9784_v30 = vld.sshfl [vmem:[#allocation1] sm:$0xff pattern:$0x73625140] }
 0x781   : > { %v9386_v18 = vadd.f32 %v9181_v41, %v9034_v7  ;;  %v8466_v44 = vadd.f32 %v14522_v50, %v8074_v23  ;;  %v14659_v63 = vpop.f32.mrf.mxu2  ;;  %v9184_v34 = vrot.slane %v11454_v3, 6  ;;  %v9387_v50 = vadd.f32 %v11454_v3, %v9035_v39  ;;  %9928 = vst [vmem:[%s14479_s27 + $0x50] sm:$0xff] %v9784_v30  ;;  %v11455_v39 = vld [vmem:[%s11777_s16 + $0x70] sm:$0xff] }
 0x782   : > { %9783 = vst [vmem:[#allocation1 + $0x23] ss:$4 sm:$0xff] %v9510_v54  ;;  %v14642_v19 = vpop.f32.mrf.mxu3  ;;  %v14649_v11 = vpop.f32.mrf.mxu0  ;;  %v8822_v14 = vrot.slane %v8724_v56, 2  ;;  %v9511_v36 = vmax.f32 %v9383_v47, 0.0  ;;  %v9512_v1 = vmax.f32 %v9384_v10, 0.0  ;;  %v9037_v28 = vadd.f32 %v14426_v16, %v8724_v56 }
 0x783   : > { %v9514_v35 = vmax.f32 %v9386_v18, 0.0  ;;  %v8823_v7 = vrot.slane %v8724_v56, 6  ;;  %v9515_v55 = vmax.f32 %v9387_v50, 0.0  ;;  %v8467_v18 = vadd.f32 %v14543_v2, %v8075_v40 }
 0x784   : > { %v9038_v22 = vadd.f32 %v14429_v4, %v8822_v14  ;;  %9786 = vst [vmem:[#allocation1] ss:$4 sm:$0xff] %v9511_v36  ;;  %v9389_v41 = vadd.f32 %v9183_v62, %v9037_v28 }
 0x785   : > { %9787 = vst [vmem:[#allocation1 + $0x1] ss:$4 sm:$0xff] %v9512_v1  ;;  %v9039_v8 = vadd.f32 %v14419_v38, %v8823_v7 }
 0x786   : > { %v9390_v47 = vadd.f32 %v9184_v34, %v9038_v22  ;;  %9789 = vst [vmem:[#allocation1 + $0x3] ss:$4 sm:$0xff] %v9514_v35  ;;  %v9517_v56 = vmax.f32 %v9389_v41, 0.0  ;;  %v7692_v34 = vadd.f32 %v14572_v25, %v14357_v45 }
 0x787   : > { %v14615_v60 = vpop.f32.mrf.mxu1 }
 0x788   : > { %v8725_v24 = vadd.f32 %v14615_v60, %v8466_v44  ;;  %v7691_v60 = vadd.f32 %v14549_v27, %v14352_v51  ;;  %v9518_v14 = vmax.f32 %v9390_v47, 0.0  ;;  %v11456_v47 = vld [vmem:[%s11777_s16 + $0x78] sm:$0xff]  ;;  %v8077_v45 = vadd.f32 %v14577_v46, %v7692_v34 }
 0x789   : > { %v9785_v44 = vld.sshfl [vmem:[#allocation1 + $0x20] sm:$0xff pattern:$0x73625140]  ;;  %v14680_v3 = vpop.f32.mrf.mxu2 }
 0x78a   : > { %8698 = vmatmul.bf16.gmra.mxu1 %v15156_v37  ;;  %v9385_v37 = vadd.f32 %v9180_v58, %v9033_v31  ;;  %v14663_v31 = vpop.f32.mrf.mxu3  ;;  %v9388_v58 = vadd.f32 %v9182_v26, %v9036_v13  ;;  %v8824_v23 = vrot.slane %v8725_v24, 2  ;;  %v14671_v10 = vpop.f32.mrf.mxu0  ;;  %v9040_v36 = vadd.f32 %v14423_v52, %v8725_v24  ;;  %9790 = vst [vmem:[#allocation1 + $0x20] ss:$4 sm:$0xff] %v9515_v55 }
 0x78b   : > { %v9186_v13 = vrot.slane %v11455_v39, 4  ;;  %v8076_v27 = vadd.f32 %v14553_v5, %v7691_v60  ;;  %v9187_v26 = vrot.slane %v11455_v39, 6  ;;  %v8826_v28 = vrot.slane %v8725_v24, 6  ;;  %9792 = vst [vmem:[#allocation1 + $0x22] ss:$4 sm:$0xff] %v9517_v56 }
 0x78c   : > { %v9513_v54 = vmax.f32 %v9385_v37, 0.0  ;;  %v9516_v32 = vmax.f32 %v9388_v58, 0.0  ;;  %v8825_v37 = vrot.slane %v8725_v24, 4  ;;  %v9041_v1 = vadd.f32 %v14426_v16, %v8824_v23  ;;  %9793 = vst [vmem:[#allocation1 + $0x23] ss:$4 sm:$0xff] %v9518_v14 }
 0x78d   : > { %9929 = vst [vmem:[%s14479_s27 + $0x58] sm:$0xff] %v9785_v44  ;;  %v8468_v5 = vadd.f32 %v14565_v48, %v8076_v27  ;;  %v9043_v40 = vadd.f32 %v14419_v38, %v8826_v28  ;;  %v9188_v55 = vrot.slane %v11456_v47, 2 }
 0x78e   : > { %9788 = vst [vmem:[#allocation1 + $0x2] ss:$4 sm:$0xff] %v9513_v54  ;;  %v9042_v2 = vadd.f32 %v14429_v4, %v8825_v37  ;;  %v9391_v54 = vadd.f32 %v11455_v39, %v9039_v8 }
 0x78f   : > { %v14630_v20 = vpop.f32.mrf.mxu1  ;;  %9791 = vst [vmem:[#allocation1 + $0x21] ss:$4 sm:$0xff] %v9516_v32  ;;  %v9189_v32 = vrot.slane %v11456_v47, 4  ;;  %v9395_v14 = vadd.f32 %v11456_v47, %v9043_v40 }
 0x790   : > { %v8726_v51 = vadd.f32 %v14630_v20, %v8467_v18  ;;  %v9393_v20 = vadd.f32 %v9186_v13, %v9041_v1  ;;  %v9394_v30 = vadd.f32 %v9187_v26, %v9042_v2  ;;  %v9519_v58 = vmax.f32 %v9391_v54, 0.0 }
 0x791   : > { %v9190_v18 = vrot.slane %v11456_v47, 6  ;;  %v8469_v1 = vadd.f32 %v14586_v57, %v8077_v45  ;;  %v9523_v2 = vmax.f32 %v9395_v14, 0.0  ;;  %v11459_v14 = vld [vmem:[%s11777_s16 + $0x88] sm:$0xff] }
 0x792   : > { %v14685_v62 = vpop.f32.mrf.mxu3  ;;  %v8827_v22 = vrot.slane %v8726_v51, 2  ;;  %v8828_v50 = vrot.slane %v8726_v51, 4  ;;  %v14692_v24 = vpop.f32.mrf.mxu0  ;;  %v9044_v41 = vadd.f32 %v14423_v52, %v8726_v51  ;;  %v9521_v60 = vmax.f32 %v9393_v20, 0.0 }
 0x793   : > { %v9522_v25 = vmax.f32 %v9394_v30, 0.0 }
 0x794   : > { %v9045_v48 = vadd.f32 %v14426_v16, %v8827_v22  ;;  %v9046_v37 = vadd.f32 %v14429_v4, %v8828_v50 }
 0x795   : > { %v9794_v56 = vld.sshfl [vmem:[#allocation1] sm:$0xff pattern:$0x73625140] }
 0x796   : > { %9796 = vst [vmem:[#allocation1] ss:$4 sm:$0xff] %v9519_v58  ;;  %v9397_v46 = vadd.f32 %v9189_v32, %v9045_v48  ;;  %v9398_v51 = vadd.f32 %v9190_v18, %v9046_v37  ;;  %v9795_v40 = vld.sshfl [vmem:[#allocation1 + $0x20] sm:$0xff pattern:$0x73625140] }
 0x797   : > { %v14647_v59 = vpop.f32.mrf.mxu1  ;;  %9798 = vst [vmem:[#allocation1 + $0x2] ss:$4 sm:$0xff] %v9521_v60 }
 0x798   : > { %v8727_v23 = vadd.f32 %v14647_v59, %v8468_v5  ;;  %9799 = vst [vmem:[#allocation1 + $0x3] ss:$4 sm:$0xff] %v9522_v25  ;;  %v9525_v22 = vmax.f32 %v9397_v46, 0.0  ;;  %v9526_v30 = vmax.f32 %v9398_v51, 0.0  ;;  %v9195_v46 = vrot.slane %v11459_v14, 4 }
 0x799   : > { %9930 = vst [vmem:[%s14479_s27 + $0x60] sm:$0xff] %v9794_v56  ;;  %v9196_v51 = vrot.slane %v11459_v14, 6 }
 0x79a   : > { %8703 = vmatmul.bf16.gmra.mxu1 %v15157_v49  ;;  %v9185_v49 = vrot.slane %v11455_v39, 2  ;;  %v9396_v39 = vadd.f32 %v9188_v55, %v9044_v41  ;;  %v8829_v59 = vrot.slane %v8727_v23, 2  ;;  %v8830_v44 = vrot.slane %v8727_v23, 4  ;;  %v14707_v13 = vpop.f32.mrf.mxu3  ;;  %v14716_v34 = vpop.f32.mrf.mxu0  ;;  %9800 = vst [vmem:[#allocation1 + $0x20] ss:$4 sm:$0xff] %v9523_v2 }
 0x79b   : > { %v8831_v27 = vrot.slane %v8727_v23, 6  ;;  %v9047_v26 = vadd.f32 %v14419_v38, %v8727_v23  ;;  %9802 = vst [vmem:[#allocation1 + $0x22] ss:$4 sm:$0xff] %v9525_v22 }
 0x79c   : > { %v9392_v35 = vadd.f32 %v9185_v49, %v9040_v36  ;;  %v14702_v36 = vpop.f32.mrf.mxu2  ;;  %v7693_v49 = vadd.f32 %v14595_v15, %v14361_v42  ;;  %v9524_v54 = vmax.f32 %v9396_v39, 0.0  ;;  %v9048_v28 = vadd.f32 %v14423_v52, %v8829_v59  ;;  %9803 = vst [vmem:[#allocation1 + $0x23] ss:$4 sm:$0xff] %v9526_v30 }
 0x79d   : > { %v9049_v57 = vadd.f32 %v14426_v16, %v8830_v44  ;;  %v9050_v50 = vadd.f32 %v14429_v4, %v8831_v27  ;;  %9931 = vst [vmem:[%s14479_s27 + $0x68] sm:$0xff] %v9795_v40  ;;  %v9194_v39 = vrot.slane %v11459_v14, 2 }
 0x79e   : > { %v9520_v7 = vmax.f32 %v9392_v35, 0.0  ;;  %v11457_v35 = vld [vmem:[%s11777_s16 + $0x80] sm:$0xff]  ;;  %v8078_v15 = vadd.f32 %v14601_v21, %v7693_v49  ;;  %9801 = vst [vmem:[#allocation1 + $0x21] ss:$4 sm:$0xff] %v9524_v54  ;;  %v7695_v54 = vadd.f32 %v14636_v12, %v14368_v43 }
 0x79f   : > { %v14665_v6 = vpop.f32.mrf.mxu1  ;;  %v9191_v20 = vrot.slane %v11457_v35, 2  ;;  %v9192_v5 = vrot.slane %v11457_v35, 4  ;;  %v9193_v38 = vrot.slane %v11457_v35, 6 }
 0x7a0   : > { %9797 = vst [vmem:[#allocation1 + $0x1] ss:$4 sm:$0xff] %v9520_v7  ;;  %v8728_v42 = vadd.f32 %v14665_v6, %v8469_v1  ;;  %v9399_v7 = vadd.f32 %v11457_v35, %v9047_v26  ;;  %v7694_v6 = vadd.f32 %v14617_v53, %v14365_v0  ;;  %v8470_v47 = vadd.f32 %v14608_v33, %v8078_v15  ;;  %v14729_v0 = vld [vmem:[%s14970_s4] ss:$0 sm:$0xff] }
 0x7a1   : > { %v9400_v21 = vadd.f32 %v9191_v20, %v9048_v28  ;;  %v9401_v55 = vadd.f32 %v9192_v5, %v9049_v57  ;;  %v9402_v48 = vadd.f32 %v9193_v38, %v9050_v50  ;;  %v11460_v38 = vld [vmem:[%s11777_s16 + $0x90] sm:$0xff] }
 0x7a2   : > { %v8832_v41 = vrot.slane %v8728_v42, 2  ;;  %v8833_v23 = vrot.slane %v8728_v42, 4  ;;  %v8834_v32 = vrot.slane %v8728_v42, 6  ;;  %v9527_v45 = vmax.f32 %v9399_v7, 0.0  ;;  %v14735_v37 = vpop.f32.mrf.mxu3  ;;  %v14746_v28 = vpop.f32.mrf.mxu0 }
 0x7a3   : > { %v9051_v53 = vadd.f32 %v14729_v0, %v8728_v42  ;;  %v8079_v33 = vadd.f32 %v14623_v61, %v7694_v6  ;;  %v9528_v18 = vmax.f32 %v9400_v21, 0.0  ;;  %v9529_v59 = vmax.f32 %v9401_v55, 0.0 }
 0x7a4   : > { %v14724_v60 = vpop.f32.mrf.mxu2  ;;  %v9052_v56 = vadd.f32 %v14423_v52, %v8832_v41  ;;  %v9053_v49 = vadd.f32 %v14426_v16, %v8833_v23  ;;  %v9530_v44 = vmax.f32 %v9402_v48, 0.0  ;;  %v9054_v1 = vadd.f32 %v14429_v4, %v8834_v32 }
 0x7a5   : > { %v9403_v2 = vadd.f32 %v11459_v14, %v9051_v53  ;;  %v8471_v26 = vadd.f32 %v14628_v17, %v8079_v33  ;;  %v8080_v17 = vadd.f32 %v14642_v19, %v7695_v54  ;;  %v9197_v40 = vrot.slane %v11460_v38, 2  ;;  %v9805_v19 = vld.sshfl [vmem:[#allocation1 + $0x20] sm:$0xff pattern:$0x73625140] }
 0x7a6   : > { %v9404_v35 = vadd.f32 %v9194_v39, %v9052_v56  ;;  %v9405_v42 = vadd.f32 %v9195_v46, %v9053_v49  ;;  %v9406_v22 = vadd.f32 %v9196_v51, %v9054_v1  ;;  %v9198_v21 = vrot.slane %v11460_v38, 4  ;;  %9933 = vst [vmem:[%s14479_s27 + $0x78] sm:$0xff] %v9805_v19  ;;  %v11461_v1 = vld [vmem:[%s11777_s16 + $0x98] sm:$0xff] }
 0x7a7   : > { %v14683_v9 = vpop.f32.mrf.mxu1  ;;  %v9531_v5 = vmax.f32 %v9403_v2, 0.0  ;;  %v9199_v55 = vrot.slane %v11460_v38, 6  ;;  %v7696_v56 = vadd.f32 %v14659_v63, %v14372_v29  ;;  %v9200_v51 = vrot.slane %v11461_v1, 2 }
 0x7a8   : > { %v8729_v25 = vadd.f32 %v14683_v9, %v8470_v47  ;;  %v9804_v9 = vld.sshfl [vmem:[#allocation1] sm:$0xff pattern:$0x73625140]  ;;  %v9532_v12 = vmax.f32 %v9404_v35, 0.0  ;;  %v9533_v7 = vmax.f32 %v9405_v42, 0.0  ;;  %v9202_v54 = vrot.slane %v11461_v1, 6 }
 0x7a9   : > { %9806 = vst [vmem:[#allocation1] ss:$4 sm:$0xff] %v9527_v45  ;;  %v8472_v45 = vadd.f32 %v14649_v11, %v8080_v17  ;;  %v8081_v29 = vadd.f32 %v14663_v31, %v7696_v56 }
 0x7aa   : > { %v8835_v61 = vrot.slane %v8729_v25, 2  ;;  %v8836_v20 = vrot.slane %v8729_v25, 4  ;;  %9807 = vst [vmem:[#allocation1 + $0x1] ss:$4 sm:$0xff] %v9528_v18  ;;  %v8837_v15 = vrot.slane %v8729_v25, 6  ;;  %v14757_v41 = vpop.f32.mrf.mxu3  ;;  %v14765_v14 = vpop.f32.mrf.mxu0 }
 0x7ab   : > { %9808 = vst [vmem:[#allocation1 + $0x2] ss:$4 sm:$0xff] %v9529_v59  ;;  %v8473_v31 = vadd.f32 %v14671_v10, %v8081_v29 }
 0x7ac   : > { %9809 = vst [vmem:[#allocation1 + $0x3] ss:$4 sm:$0xff] %v9530_v44  ;;  %v9055_v30 = vadd.f32 %v14729_v0, %v8835_v61  ;;  %v14752_v43 = vpop.f32.mrf.mxu2  ;;  %v9056_v50 = vadd.f32 %v14423_v52, %v8836_v20  ;;  %v9057_v6 = vadd.f32 %v14426_v16, %v8837_v15  ;;  %v9201_v61 = vrot.slane %v11461_v1, 4 }
 0x7ad   : > { %9932 = vst [vmem:[%s14479_s27 + $0x70] sm:$0xff] %v9804_v9 }
 0x7ae   : > { %v9407_v48 = vadd.f32 %v11460_v38, %v9055_v30  ;;  %9810 = vst [vmem:[#allocation1 + $0x20] ss:$4 sm:$0xff] %v9531_v5  ;;  %v9408_v53 = vadd.f32 %v9197_v40, %v9056_v50  ;;  %v9409_v33 = vadd.f32 %v9198_v21, %v9057_v6  ;;  %v15158_v5 = vld [vmem:[#allocation26_spill] sm:$0xff] }
 0x7af   : > { %v14700_v8 = vpop.f32.mrf.mxu1  ;;  %9811 = vst [vmem:[#allocation1 + $0x21] ss:$4 sm:$0xff] %v9532_v12  ;;  %v7697_v30 = vadd.f32 %v14680_v3, %v15158_v5 }
 0x7b0   : > { %v8730_v57 = vadd.f32 %v14700_v8, %v8471_v26  ;;  %v9534_v8 = vmax.f32 %v9406_v22, 0.0  ;;  %9812 = vst [vmem:[#allocation1 + $0x22] ss:$4 sm:$0xff] %v9533_v7  ;;  %v9535_v49 = vmax.f32 %v9407_v48, 0.0  ;;  %v9536_v11 = vmax.f32 %v9408_v53, 0.0 }
 0x7b1   : > { %v9537_v9 = vmax.f32 %v9409_v33, 0.0  ;;  %v8082_v21 = vadd.f32 %v14685_v62, %v7697_v30 }
 0x7b2   : > { %v9058_v47 = vadd.f32 %v14429_v4, %v8730_v57  ;;  %v8838_v32 = vrot.slane %v8730_v57, 2  ;;  %v8839_v25 = vrot.slane %v8730_v57, 4  ;;  %v8840_v18 = vrot.slane %v8730_v57, 6  ;;  %9813 = vst [vmem:[#allocation1 + $0x23] ss:$4 sm:$0xff] %v9534_v8  ;;  %v14779_v15 = vpop.f32.mrf.mxu3  ;;  %v14785_v50 = vpop.f32.mrf.mxu0 }
 0x7b3   : > { %v9814_v20 = vld.sshfl [vmem:[#allocation1] sm:$0xff pattern:$0x73625140] }
 0x7b4   : > { %v9410_v39 = vadd.f32 %v9199_v55, %v9058_v47  ;;  %v9059_v46 = vadd.f32 %v14729_v0, %v8838_v32  ;;  %v9060_v44 = vadd.f32 %v14423_v52, %v8839_v25  ;;  %v9061_v2 = vadd.f32 %v14426_v16, %v8840_v18  ;;  %v14774_v63 = vpop.f32.mrf.mxu2  ;;  %9816 = vst [vmem:[#allocation1] ss:$4 sm:$0xff] %v9535_v49  ;;  %v15159_v32 = vld [vmem:[#allocation36_spill] sm:$0xff]  ;;  %v11462_v25 = vld [vmem:[%s11777_s16 + $0xa0] sm:$0xff] }
 0x7b5   : > { %9817 = vst [vmem:[#allocation1 + $0x1] ss:$4 sm:$0xff] %v9536_v11  ;;  %v9203_v33 = vrot.slane %v11462_v25, 2  ;;  %v9204_v56 = vrot.slane %v11462_v25, 4 }
 0x7b6   : > { %v9538_v26 = vmax.f32 %v9410_v39, 0.0  ;;  %v9411_v42 = vadd.f32 %v11461_v1, %v9059_v46  ;;  %v9412_v22 = vadd.f32 %v9200_v51, %v9060_v44  ;;  %v9413_v57 = vadd.f32 %v9201_v61, %v9061_v2  ;;  %9818 = vst [vmem:[#allocation1 + $0x2] ss:$4 sm:$0xff] %v9537_v9 }
 0x7b7   : > { %v14719_v58 = vpop.f32.mrf.mxu1  ;;  %9934 = vst [vmem:[%s14479_s27 + $0x80] sm:$0xff] %v9814_v20 }
 0x7b8   : > { %v8731_v59 = vadd.f32 %v14719_v58, %v8472_v45  ;;  %9819 = vst [vmem:[#allocation1 + $0x3] ss:$4 sm:$0xff] %v9538_v26  ;;  %v9539_v12 = vmax.f32 %v9411_v42, 0.0  ;;  %v9540_v38 = vmax.f32 %v9412_v22, 0.0  ;;  %v9541_v7 = vmax.f32 %v9413_v57, 0.0  ;;  %v15160_v22 = vld [vmem:[#allocation25_spill] sm:$0xff] }
 0x7b9   : > { %v9815_v55 = vld.sshfl [vmem:[#allocation1 + $0x20] sm:$0xff pattern:$0x73625140]  ;;  %v7698_v45 = vadd.f32 %v14702_v36, %v15159_v32  ;;  %v7699_v57 = vadd.f32 %v14724_v60, %v15160_v22 }
 0x7ba   : > { %v9062_v58 = vadd.f32 %v14429_v4, %v8731_v59  ;;  %v8841_v6 = vrot.slane %v8731_v59, 4  ;;  %v8842_v8 = vrot.slane %v8731_v59, 6  ;;  %9820 = vst [vmem:[#allocation1 + $0x20] ss:$4 sm:$0xff] %v9539_v12  ;;  %v14797_v62 = vpop.f32.mrf.mxu3  ;;  %v9205_v59 = vrot.slane %v11462_v25, 6  ;;  %v14806_v11 = vpop.f32.mrf.mxu0 }
 0x7bb   : > { %9821 = vst [vmem:[#allocation1 + $0x21] ss:$4 sm:$0xff] %v9540_v38  ;;  %v8083_v36 = vadd.f32 %v14707_v13, %v7698_v45  ;;  %v11463_v13 = vld [vmem:[%s11777_s16 + $0xa8] sm:$0xff]  ;;  %v8084_v60 = vadd.f32 %v14735_v37, %v7699_v57 }
 0x7bc   : > { %v9414_v17 = vadd.f32 %v9202_v54, %v9062_v58  ;;  %v14791_v3 = vpop.f32.mrf.mxu2  ;;  %v9063_v48 = vadd.f32 %v14729_v0, %v8841_v6  ;;  %9822 = vst [vmem:[#allocation1 + $0x22] ss:$4 sm:$0xff] %v9541_v7  ;;  %v9064_v53 = vadd.f32 %v14423_v52, %v8842_v8  ;;  %v9206_v42 = vrot.slane %v11463_v13, 2  ;;  %v15161_v45 = vld [vmem:[#allocation39_spill] sm:$0xff] }
 0x7bd   : > { %9935 = vst [vmem:[%s14479_s27 + $0x88] sm:$0xff] %v9815_v55  ;;  %v8475_v58 = vadd.f32 %v14716_v34, %v8083_v36  ;;  %v9207_v30 = vrot.slane %v11463_v13, 4  ;;  %v9208_v34 = vrot.slane %v11463_v13, 6 }
 0x7be   : > { %v9542_v47 = vmax.f32 %v9414_v17, 0.0  ;;  %v9416_v44 = vadd.f32 %v9203_v33, %v9064_v53  ;;  %v8476_v33 = vadd.f32 %v14746_v28, %v8084_v60 }
 0x7bf   : > { %v14741_v27 = vpop.f32.mrf.mxu1 }
 0x7c0   : > { %v8732_v40 = vadd.f32 %v14741_v27, %v8473_v31  ;;  %v8474_v27 = vadd.f32 %v14692_v24, %v8082_v21  ;;  %9823 = vst [vmem:[#allocation1 + $0x23] ss:$4 sm:$0xff] %v9542_v47  ;;  %v9415_v24 = vadd.f32 %v11462_v25, %v9063_v48  ;;  %v9544_v54 = vmax.f32 %v9416_v44, 0.0 }
 0x7c2   : > { %v8843_v19 = vrot.slane %v8732_v40, 2  ;;  %v9065_v18 = vadd.f32 %v14426_v16, %v8732_v40  ;;  %v8844_v46 = vrot.slane %v8732_v40, 4  ;;  %v8845_v1 = vrot.slane %v8732_v40, 6  ;;  %v14819_v17 = vpop.f32.mrf.mxu3  ;;  %v9824_v40 = vld.sshfl [vmem:[#allocation1] sm:$0xff pattern:$0x73625140] }
 0x7c3   : > { %v9543_v29 = vmax.f32 %v9415_v24, 0.0  ;;  %9827 = vst [vmem:[#allocation1 + $0x1] ss:$4 sm:$0xff] %v9544_v54 }
 0x7c4   : > { %v9066_v39 = vadd.f32 %v14429_v4, %v8843_v19  ;;  %v9417_v9 = vadd.f32 %v9204_v56, %v9065_v18  ;;  %v9067_v26 = vadd.f32 %v14729_v0, %v8844_v46  ;;  %v9068_v20 = vadd.f32 %v14423_v52, %v8845_v1  ;;  %v14826_v19 = vpop.f32.mrf.mxu0  ;;  %9936 = vst [vmem:[%s14479_s27 + $0x90] sm:$0xff] %v9824_v40  ;;  %v11465_v40 = vld [vmem:[%s11777_s16 + $0xb8] sm:$0xff] }
 0x7c5   : > { %9826 = vst [vmem:[#allocation1] ss:$4 sm:$0xff] %v9543_v29  ;;  %v15162_v29 = vld [vmem:[#allocation29_spill] sm:$0xff] }
 0x7c6   : > { %v9418_v2 = vadd.f32 %v9205_v59, %v9066_v39  ;;  %v9545_v31 = vmax.f32 %v9417_v9, 0.0  ;;  %v9419_v7 = vadd.f32 %v11463_v13, %v9067_v26  ;;  %v9420_v21 = vadd.f32 %v9206_v42, %v9068_v20  ;;  %v15163_v42 = vld [vmem:[#allocation28_spill] sm:$0xff] }
 0x7c7   : > { %v14760_v23 = vpop.f32.mrf.mxu1  ;;  %v9825_v46 = vld.sshfl [vmem:[#allocation1 + $0x20] sm:$0xff pattern:$0x73625140]  ;;  %v7701_v26 = vadd.f32 %v14774_v63, %v15162_v29  ;;  %v7702_v22 = vadd.f32 %v14791_v3, %v15163_v42  ;;  %v9213_v3 = vrot.slane %v11465_v40, 4 }
 0x7c8   : > { %v8733_v49 = vadd.f32 %v14760_v23, %v8474_v27  ;;  %v14812_v23 = vpop.f32.mrf.mxu2  ;;  %v9546_v12 = vmax.f32 %v9418_v2, 0.0  ;;  %9828 = vst [vmem:[#allocation1 + $0x2] ss:$4 sm:$0xff] %v9545_v31  ;;  %v9547_v27 = vmax.f32 %v9419_v7, 0.0  ;;  %v9548_v53 = vmax.f32 %v9420_v21, 0.0 }
 0x7c9   : > { %9937 = vst [vmem:[%s14479_s27 + $0x98] sm:$0xff] %v9825_v46  ;;  %v8086_v63 = vadd.f32 %v14779_v15, %v7701_v26  ;;  %v9212_v7 = vrot.slane %v11465_v40, 2  ;;  %v8087_v60 = vadd.f32 %v14797_v62, %v7702_v22 }
 0x7ca   : > { %v8846_v61 = vrot.slane %v8733_v49, 2  ;;  %v9069_v5 = vadd.f32 %v14426_v16, %v8733_v49  ;;  %v8847_v47 = vrot.slane %v8733_v49, 6  ;;  %9829 = vst [vmem:[#allocation1 + $0x3] ss:$4 sm:$0xff] %v9546_v12  ;;  %v11464_v49 = vld [vmem:[%s11777_s16 + $0xb0] sm:$0xff]  ;;  %v14840_v1 = vpop.f32.mrf.mxu3 }
 0x7cb   : > { %v9209_v24 = vrot.slane %v11464_v49, 2  ;;  %v9210_v44 = vrot.slane %v11464_v49, 4  ;;  %9830 = vst [vmem:[#allocation1 + $0x20] ss:$4 sm:$0xff] %v9547_v27  ;;  %v9211_v2 = vrot.slane %v11464_v49, 6 }
 0x7cc   : > { %v9070_v38 = vadd.f32 %v14429_v4, %v8846_v61  ;;  %v9421_v55 = vadd.f32 %v9207_v30, %v9069_v5  ;;  %v9071_v37 = vadd.f32 %v14729_v0, %v8847_v47  ;;  %9831 = vst [vmem:[#allocation1 + $0x21] ss:$4 sm:$0xff] %v9548_v53  ;;  %v14851_v57 = vpop.f32.mrf.mxu0 }
 0x7ce   : > { %v9422_v48 = vadd.f32 %v9208_v34, %v9070_v38  ;;  %v9549_v18 = vmax.f32 %v9421_v55, 0.0 }
 0x7cf   : > { %v14777_v35 = vpop.f32.mrf.mxu1 }
 0x7d0   : > { %v8734_v6 = vadd.f32 %v14777_v35, %v8475_v58  ;;  %v7700_v35 = vadd.f32 %v14752_v43, %v15161_v45  ;;  %v14833_v56 = vpop.f32.mrf.mxu2  ;;  %v9550_v39 = vmax.f32 %v9422_v48, 0.0  ;;  %v9423_v58 = vadd.f32 %v11464_v49, %v9071_v37  ;;  %9832 = vst [vmem:[#allocation1 + $0x22] ss:$4 sm:$0xff] %v9549_v18 }
 0x7d1   : > { %v9214_v48 = vrot.slane %v11465_v40, 6  ;;  %v8478_v45 = vadd.f32 %v14785_v50, %v8086_v63 }
 0x7d2   : > { %v8848_v32 = vrot.slane %v8734_v6, 2  ;;  %v8849_v25 = vrot.slane %v8734_v6, 4  ;;  %v9072_v59 = vadd.f32 %v14423_v52, %v8734_v6  ;;  %v8085_v28 = vadd.f32 %v14757_v41, %v7700_v35  ;;  %9833 = vst [vmem:[#allocation1 + $0x23] ss:$4 sm:$0xff] %v9550_v39  ;;  %v15164_v35 = vld [vmem:[#allocation32_spill] sm:$0xff] }
 0x7d3   : > { %v8850_v54 = vrot.slane %v8734_v6, 6  ;;  %v9551_v30 = vmax.f32 %v9423_v58, 0.0  ;;  %v7703_v53 = vadd.f32 %v14812_v23, %v15164_v35  ;;  %v8479_v39 = vadd.f32 %v14806_v11, %v8087_v60  ;;  %v11466_v11 = vld [vmem:[%s11777_s16 + $0xc0] sm:$0xff] }
 0x7d4   : > { %v9073_v36 = vadd.f32 %v14426_v16, %v8848_v32  ;;  %v9074_v9 = vadd.f32 %v14429_v4, %v8849_v25  ;;  %v8477_v41 = vadd.f32 %v14765_v14, %v8085_v28  ;;  %v9834_v32 = vld.sshfl [vmem:[#allocation1] sm:$0xff pattern:$0x73625140]  ;;  %v8048_v25 = vpop.f32.mrf.mxu3  ;;  %v9215_v29 = vrot.slane %v11466_v11, 2 }
 0x7d5   : > { %v9075_v12 = vadd.f32 %v14729_v0, %v8850_v54  ;;  %9836 = vst [vmem:[#allocation1] ss:$4 sm:$0xff] %v9551_v30  ;;  %v8088_v23 = vadd.f32 %v14819_v17, %v7703_v53  ;;  %v9216_v58 = vrot.slane %v11466_v11, 4  ;;  %v9217_v54 = vrot.slane %v11466_v11, 6 }
 0x7d6   : > { %v9425_v20 = vadd.f32 %v9210_v44, %v9073_v36  ;;  %v9426_v31 = vadd.f32 %v9211_v2, %v9074_v9  ;;  %9938 = vst [vmem:[%s14479_s27 + $0xa0] sm:$0xff] %v9834_v32 }
 0x7d7   : > { %v14789_v10 = vpop.f32.mrf.mxu1  ;;  %v8480_v63 = vadd.f32 %v14826_v19, %v8088_v23 }
 0x7d8   : > { %v8735_v43 = vadd.f32 %v14789_v10, %v8476_v33  ;;  %v9424_v10 = vadd.f32 %v9209_v24, %v9072_v59  ;;  %v9553_v14 = vmax.f32 %v9425_v20, 0.0  ;;  %v7663_v47 = vpop.f32.mrf.mxu2  ;;  %v9554_v55 = vmax.f32 %v9426_v31, 0.0  ;;  %v15165_v24 = vld [vmem:[#allocation31_spill] sm:$0xff] }
 0x7d9   : > { %v7704_v46 = vadd.f32 %v14833_v56, %v15165_v24  ;;  %v9835_v42 = vld.sshfl [vmem:[#allocation1 + $0x20] sm:$0xff pattern:$0x73625140] }
 0x7da   : > { %v8851_v13 = vrot.slane %v8735_v43, 2  ;;  %v8852_v5 = vrot.slane %v8735_v43, 4  ;;  %v9552_v38 = vmax.f32 %v9424_v10, 0.0  ;;  %v9076_v34 = vadd.f32 %v14423_v52, %v8735_v43  ;;  %9838 = vst [vmem:[#allocation1 + $0x2] ss:$4 sm:$0xff] %v9553_v14  ;;  %v15166_v43 = vld [vmem:[#allocation35_spill] sm:$0xff] }
 0x7db   : > { %9839 = vst [vmem:[#allocation1 + $0x3] ss:$4 sm:$0xff] %v9554_v55  ;;  %v7705_v28 = vadd.f32 %v7663_v47, %v15166_v43 }
 0x7dc   : > { %v9077_v21 = vadd.f32 %v14426_v16, %v8851_v13  ;;  %v9078_v15 = vadd.f32 %v14429_v4, %v8852_v5  ;;  %v9428_v33 = vadd.f32 %v9212_v7, %v9076_v34  ;;  %9837 = vst [vmem:[#allocation1 + $0x1] ss:$4 sm:$0xff] %v9552_v38 }
 0x7dd   : > { %9939 = vst [vmem:[%s14479_s27 + $0xa8] sm:$0xff] %v9835_v42 }
 0x7de   : > { %v9429_v62 = vadd.f32 %v9213_v3, %v9077_v21  ;;  %v9430_v59 = vadd.f32 %v9214_v48, %v9078_v15  ;;  %v9556_v9 = vmax.f32 %v9428_v33, 0.0  ;;  %v8050_v3 = vpop.f32.mrf.mxu3 }
 0x7df   : > { %v14808_v51 = vpop.f32.mrf.mxu1 }
 0x7e0   : > { %v8736_v6 = vadd.f32 %v14808_v51, %v8477_v41  ;;  %v9427_v51 = vadd.f32 %v11465_v40, %v9075_v12  ;;  %v9557_v26 = vmax.f32 %v9429_v62, 0.0  ;;  %v9558_v17 = vmax.f32 %v9430_v59, 0.0  ;;  %v7665_v30 = vpop.f32.mrf.mxu2  ;;  %9841 = vst [vmem:[#allocation1 + $0x21] ss:$4 sm:$0xff] %v9556_v9 }
 0x7e1   : > { %v8089_v12 = vadd.f32 %v14840_v1, %v7704_v46  ;;  %v8090_v40 = vadd.f32 %v8048_v25, %v7705_v28 }
 0x7e2   : > { %v8853_v37 = vrot.slane %v8736_v6, 2  ;;  %v8854_v49 = vrot.slane %v8736_v6, 4  ;;  %v8855_v50 = vrot.slane %v8736_v6, 6  ;;  %v9555_v36 = vmax.f32 %v9427_v51, 0.0  ;;  %9842 = vst [vmem:[#allocation1 + $0x22] ss:$4 sm:$0xff] %v9557_v26 }
 0x7e3   : > { %v9079_v44 = vadd.f32 %v14729_v0, %v8736_v6  ;;  %v11467_v6 = vld [vmem:[%s11777_s16 + $0xc8] sm:$0xff]  ;;  %9843 = vst [vmem:[#allocation1 + $0x23] ss:$4 sm:$0xff] %v9558_v17  ;;  %v8481_v53 = vadd.f32 %v14851_v57, %v8089_v12  ;;  %v9844_v24 = vld.sshfl [vmem:[#allocation1] sm:$0xff pattern:$0x73625140] }
 0x7e4   : > { %v9080_v2 = vadd.f32 %v14423_v52, %v8853_v37  ;;  %v9081_v20 = vadd.f32 %v14426_v16, %v8854_v49  ;;  %v9082_v56 = vadd.f32 %v14429_v4, %v8855_v50  ;;  %9840 = vst [vmem:[#allocation1 + $0x20] ss:$4 sm:$0xff] %v9555_v36  ;;  %v9218_v14 = vrot.slane %v11467_v6, 2  ;;  %v15167_v37 = vld [vmem:[#allocation34_spill] sm:$0xff]  ;;  %v11468_v49 = vld [vmem:[%s11777_s16 + $0xd0] sm:$0xff] }
 0x7e5   : > { %v9431_v22 = vadd.f32 %v11466_v11, %v9079_v44  ;;  %v9219_v21 = vrot.slane %v11467_v6, 4  ;;  %v9220_v47 = vrot.slane %v11467_v6, 6  ;;  %v7706_v62 = vadd.f32 %v7665_v30, %v15167_v37  ;;  %v11469_v30 = vld [vmem:[%s11777_s16 + $0xd8] sm:$0xff]  ;;  %9940 = vst [vmem:[%s14479_s27 + $0xb0] sm:$0xff] %v9844_v24 }
 0x7e6   : > { %v9432_v38 = vadd.f32 %v9215_v29, %v9080_v2  ;;  %v9434_v60 = vadd.f32 %v9217_v54, %v9082_v56  ;;  %v9221_v50 = vrot.slane %v11468_v49, 2  ;;  %v9222_v28 = vrot.slane %v11468_v49, 4 }
 0x7e7   : > { %v14823_v8 = vpop.f32.mrf.mxu1  ;;  %v9559_v1 = vmax.f32 %v9431_v22, 0.0  ;;  %v9223_v17 = vrot.slane %v11468_v49, 6  ;;  %v9224_v12 = vrot.slane %v11469_v30, 2 }
 0x7e8   : > { %v8737_v18 = vadd.f32 %v14823_v8, %v8478_v45  ;;  %v8440_v8 = vpop.f32.mrf.mxu0  ;;  %v9560_v32 = vmax.f32 %v9432_v38, 0.0  ;;  %v9562_v46 = vmax.f32 %v9434_v60, 0.0  ;;  %v7668_v26 = vpop.f32.mrf.mxu2  ;;  %v9225_v38 = vrot.slane %v11469_v30, 4 }
 0x7e9   : > { %v8482_v51 = vadd.f32 %v8440_v8, %v8090_v40  ;;  %9846 = vst [vmem:[#allocation1] ss:$4 sm:$0xff] %v9559_v1 }
 0x7ea   : > { %v8856_v10 = vrot.slane %v8737_v18, 2  ;;  %v8857_v13 = vrot.slane %v8737_v18, 4  ;;  %v8858_v31 = vrot.slane %v8737_v18, 6  ;;  %v9083_v34 = vadd.f32 %v14729_v0, %v8737_v18  ;;  %9847 = vst [vmem:[#allocation1 + $0x1] ss:$4 sm:$0xff] %v9560_v32 }
 0x7eb   : > { %9849 = vst [vmem:[#allocation1 + $0x3] ss:$4 sm:$0xff] %v9562_v46 }
 0x7ec   : > { %v9084_v7 = vadd.f32 %v14423_v52, %v8856_v10  ;;  %v9085_v19 = vadd.f32 %v14426_v16, %v8857_v13  ;;  %v9086_v55 = vadd.f32 %v14429_v4, %v8858_v31  ;;  %v9435_v45 = vadd.f32 %v11467_v6, %v9083_v34  ;;  %v9845_v31 = vld.sshfl [vmem:[#allocation1 + $0x20] sm:$0xff pattern:$0x73625140] }
 0x7ed   : > { %v9226_v6 = vrot.slane %v11469_v30, 6  ;;  %9941 = vst [vmem:[%s14479_s27 + $0xb8] sm:$0xff] %v9845_v31 }
 0x7ee   : > { %v9436_v25 = vadd.f32 %v9218_v14, %v9084_v7  ;;  %v9437_v59 = vadd.f32 %v9219_v21, %v9085_v19  ;;  %v9563_v43 = vmax.f32 %v9435_v45, 0.0 }
 0x7ef   : > { %v14843_v61 = vpop.f32.mrf.mxu1 }
 0x7f0   : > { %v8738_v5 = vadd.f32 %v14843_v61, %v8479_v39  ;;  %v9433_v61 = vadd.f32 %v9216_v58, %v9081_v20  ;;  %v8442_v18 = vpop.f32.mrf.mxu0  ;;  %v9564_v9 = vmax.f32 %v9436_v25, 0.0  ;;  %v8091_v58 = vadd.f32 %v8050_v3, %v7706_v62  ;;  %v15168_v20 = vld [vmem:[#allocation40_spill] sm:$0xff]  ;;  %9850 = vst [vmem:[#allocation1 + $0x20] ss:$4 sm:$0xff] %v9563_v43 }
 0x7f1   : > { %v9565_v54 = vmax.f32 %v9437_v59, 0.0  ;;  %v7707_v56 = vadd.f32 %v7668_v26, %v15168_v20 }
 0x7f2   : > { %v8859_v15 = vrot.slane %v8738_v5, 2  ;;  %v8860_v35 = vrot.slane %v8738_v5, 4  ;;  %v8861_v33 = vrot.slane %v8738_v5, 6  ;;  %v9561_v39 = vmax.f32 %v9433_v61, 0.0  ;;  %v8053_v5 = vpop.f32.mrf.mxu3  ;;  %9851 = vst [vmem:[#allocation1 + $0x21] ss:$4 sm:$0xff] %v9564_v9 }
 0x7f3   : > { %9852 = vst [vmem:[#allocation1 + $0x22] ss:$4 sm:$0xff] %v9565_v54  ;;  %v8483_v1 = vadd.f32 %v8442_v18, %v8091_v58  ;;  %v8092_v32 = vadd.f32 %v8053_v5, %v7707_v56  ;;  %v11470_v18 = vld [vmem:[%s11777_s16 + $0xe0] sm:$0xff]  ;;  %v11471_v56 = vld [vmem:[%s11777_s16 + $0xe8] sm:$0xff] }
 0x7f4   : > { %v9087_v36 = vadd.f32 %v14729_v0, %v8859_v15  ;;  %v9088_v57 = vadd.f32 %v14423_v52, %v8860_v35  ;;  %v9089_v2 = vadd.f32 %v14426_v16, %v8861_v33  ;;  %9848 = vst [vmem:[#allocation1 + $0x2] ss:$4 sm:$0xff] %v9561_v39 }
 0x7f6   : > { %v9439_v42 = vadd.f32 %v11468_v49, %v9087_v36  ;;  %v9441_v34 = vadd.f32 %v9222_v28, %v9089_v2  ;;  %v9227_v49 = vrot.slane %v11470_v18, 2  ;;  %v9228_v36 = vrot.slane %v11470_v18, 4 }
 0x7f7   : > { %v14861_v27 = vpop.f32.mrf.mxu1 }
 0x7f8   : > { %v8739_v48 = vadd.f32 %v14861_v27, %v8480_v63  ;;  %v9438_v27 = vadd.f32 %v9220_v47, %v9086_v55  ;;  %v9440_v63 = vadd.f32 %v9221_v50, %v9088_v57  ;;  %v9567_v60 = vmax.f32 %v9439_v42, 0.0  ;;  %v8445_v55 = vpop.f32.mrf.mxu0 }
 0x7f9   : > { %v9569_v45 = vmax.f32 %v9441_v34, 0.0  ;;  %v8484_v9 = vadd.f32 %v8445_v55, %v8092_v32 }
 0x7fa   : > { %v8862_v44 = vrot.slane %v8739_v48, 2  ;;  %v8863_v8 = vrot.slane %v8739_v48, 4  ;;  %v8864_v11 = vrot.slane %v8739_v48, 6  ;;  %v9090_v10 = vadd.f32 %v14429_v4, %v8739_v48  ;;  %v8055_v2 = vpop.f32.mrf.mxu3 }
 0x7fb   : > { %v9566_v13 = vmax.f32 %v9438_v27, 0.0  ;;  %v9568_v15 = vmax.f32 %v9440_v63, 0.0  ;;  %v9854_v62 = vld.sshfl [vmem:[#allocation1] sm:$0xff pattern:$0x73625140]  ;;  %v9231_v63 = vrot.slane %v11471_v56, 4 }
 0x7fc   : > { %v9091_v22 = vadd.f32 %v14729_v0, %v8862_v44  ;;  %v9093_v40 = vadd.f32 %v14426_v16, %v8864_v11  ;;  %v9442_v14 = vadd.f32 %v9223_v17, %v9090_v10  ;;  %9856 = vst [vmem:[#allocation1] ss:$4 sm:$0xff] %v9567_v60  ;;  %v15169_v44 = vld [vmem:[#allocation47_spill] sm:$0xff] }
 0x7fd   : > { %9853 = vst [vmem:[#allocation1 + $0x23] ss:$4 sm:$0xff] %v9566_v13  ;;  %v9230_v13 = vrot.slane %v11471_v56, 2 }
 0x7fe   : > { %v9443_v19 = vadd.f32 %v11469_v30, %v9091_v22  ;;  %v9445_v35 = vadd.f32 %v9225_v38, %v9093_v40  ;;  %v9570_v25 = vmax.f32 %v9442_v14, 0.0  ;;  %9857 = vst [vmem:[#allocation1 + $0x1] ss:$4 sm:$0xff] %v9568_v15 }
 0x7ff   : > { %v8696_v41 = vpop.f32.mrf.mxu1  ;;  %9858 = vst [vmem:[#allocation1 + $0x2] ss:$4 sm:$0xff] %v9569_v45 }
 0x800   : > { %v8740_v29 = vadd.f32 %v8696_v41, %v8481_v53  ;;  %v9092_v41 = vadd.f32 %v14423_v52, %v8863_v8  ;;  %v9571_v39 = vmax.f32 %v9443_v19, 0.0  ;;  %v9573_v57 = vmax.f32 %v9445_v35, 0.0  ;;  %9859 = vst [vmem:[#allocation1 + $0x3] ss:$4 sm:$0xff] %v9570_v25  ;;  %v8447_v30 = vpop.f32.mrf.mxu0 }
 0x801   : > { %v9229_v8 = vrot.slane %v11470_v18, 6  ;;  %9942 = vst [vmem:[%s14479_s27 + $0xc0] sm:$0xff] %v9854_v62 }
 0x802   : > { %v9094_v7 = vadd.f32 %v14429_v4, %v8740_v29  ;;  %v8865_v21 = vrot.slane %v8740_v29, 4  ;;  %v8866_v47 = vrot.slane %v8740_v29, 6  ;;  %v9444_v48 = vadd.f32 %v9224_v12, %v9092_v41 }
 0x803   : > { %v9232_v41 = vrot.slane %v11471_v56, 6 }
 0x804   : > { %v9446_v53 = vadd.f32 %v9226_v6, %v9094_v7  ;;  %v9096_v59 = vadd.f32 %v14423_v52, %v8866_v47  ;;  %v9572_v24 = vmax.f32 %v9444_v48, 0.0  ;;  %v9855_v54 = vld.sshfl [vmem:[#allocation1 + $0x20] sm:$0xff pattern:$0x73625140] }
 0x805   : > { %9860 = vst [vmem:[#allocation1 + $0x20] ss:$4 sm:$0xff] %v9571_v39 }
 0x806   : > { %v9574_v28 = vmax.f32 %v9446_v53, 0.0  ;;  %v9448_v10 = vadd.f32 %v9227_v49, %v9096_v59  ;;  %9861 = vst [vmem:[#allocation1 + $0x21] ss:$4 sm:$0xff] %v9572_v24  ;;  %v11472_v53 = vld [vmem:[%s11777_s16 + $0xf0] sm:$0xff] }
 0x807   : > { %v8699_v23 = vpop.f32.mrf.mxu1  ;;  %9862 = vst [vmem:[#allocation1 + $0x22] ss:$4 sm:$0xff] %v9573_v57  ;;  %v9864_v47 = vld.sshfl [vmem:[#allocation1] sm:$0xff pattern:$0x73625140]  ;;  %v9233_v25 = vrot.slane %v11472_v53, 2 }
 0x808   : > { %v8741_v3 = vadd.f32 %v8699_v23, %v8482_v51  ;;  %v9095_v51 = vadd.f32 %v14729_v0, %v8865_v21  ;;  %v7670_v23 = vpop.f32.mrf.mxu2  ;;  %9863 = vst [vmem:[#allocation1 + $0x23] ss:$4 sm:$0xff] %v9574_v28  ;;  %v9576_v7 = vmax.f32 %v9448_v10, 0.0  ;;  %v9234_v62 = vrot.slane %v11472_v53, 4 }
 0x809   : > { %v7708_v43 = vadd.f32 %v7670_v23, %v15169_v44  ;;  %9943 = vst [vmem:[%s14479_s27 + $0xc8] sm:$0xff] %v9855_v54  ;;  %v9235_v39 = vrot.slane %v11472_v53, 6 }
 0x80a   : > { %v8867_v33 = vrot.slane %v8741_v3, 2  ;;  %v8868_v50 = vrot.slane %v8741_v3, 4  ;;  %v8869_v46 = vrot.slane %v8741_v3, 6  ;;  %v9097_v27 = vadd.f32 %v14426_v16, %v8741_v3  ;;  %9867 = vst [vmem:[#allocation1 + $0x1] ss:$4 sm:$0xff] %v9576_v7 }
 0x80b   : > { %v9447_v11 = vadd.f32 %v11470_v18, %v9095_v51  ;;  %v8093_v31 = vadd.f32 %v8055_v2, %v7708_v43  ;;  %9944 = vst [vmem:[%s14479_s27 + $0xd0] sm:$0xff] %v9864_v47  ;;  %v11473_v43 = vld [vmem:[%s11777_s16 + $0xf8] sm:$0xff]  ;;  %s9965_s16 = sshll.u32 %s9962_s13, 4  ;;  %s9966_s16 = int_to_ptr.hbm [resolvable:$true] %s9965_s16 }
 0x80c   : > { %v9098_v29 = vadd.f32 %v14429_v4, %v8867_v33  ;;  %v9099_v17 = vadd.f32 %v14729_v0, %v8868_v50  ;;  %v9100_v20 = vadd.f32 %v14423_v52, %v8869_v46  ;;  %v9449_v42 = vadd.f32 %v9228_v36, %v9097_v27  ;;  %s11578_s24 = sshra.s32 %s9966_s16, 4  ;;  %s11579_s24 = int_to_ptr.hbm [resolvable:$true] %s11578_s24 }
 0x80d   : > { %v9575_v12 = vmax.f32 %v9447_v11, 0.0  ;;  %v9236_v57 = vrot.slane %v11473_v43, 2  ;;  %s11580_s29 = scalar_lea.hbm %s11579_s24, 256  ;;  %p11585_p11 = scmp.lt.s32.totalorder %s11579_s24, %s14971_s5 }
 0x80e   : > { %v9450_v38 = vadd.f32 %v9229_v8, %v9098_v29  ;;  %v9451_v6 = vadd.f32 %v11471_v56, %v9099_v17  ;;  %v9452_v14 = vadd.f32 %v9230_v13, %v9100_v20  ;;  %v9577_v21 = vmax.f32 %v9449_v42, 0.0  ;;  %p11581_p1 = scmp.ne.s32.totalorder %s11579_s24, %s11580_s29  ;;  %p11586_p2 = scmp.lt.s32.totalorder %s11584_s11, %s11580_s29 }
 0x80f   : > { %v8701_v61 = vpop.f32.mrf.mxu1  ;;  %9866 = vst [vmem:[#allocation1] ss:$4 sm:$0xff] %v9575_v12  ;;  %v9865_v27 = vld.sshfl [vmem:[#allocation1 + $0x20] sm:$0xff pattern:$0x73625140]  ;;  %v9238_v29 = vrot.slane %v11473_v43, 6 }
 0x810   : > { %v8742_v37 = vadd.f32 %v8701_v61, %v8483_v1  ;;  %v8485_v61 = vadd.f32 %v8447_v30, %v8093_v31  ;;  %v9578_v1 = vmax.f32 %v9450_v38, 0.0  ;;  %v9579_v45 = vmax.f32 %v9451_v6, 0.0  ;;  %9868 = vst [vmem:[#allocation1 + $0x2] ss:$4 sm:$0xff] %v9577_v21  ;;  %p11582_p4 = pnand %p11581_p1, %p11741_p3  ;;  %p11587_p9 = por %p11586_p2, %p11585_p11 }
 0x811   : > { %v9580_v33 = vmax.f32 %v9452_v14, 0.0  ;;  %9945 = vst [vmem:[%s14479_s27 + $0xd8] sm:$0xff] %v9865_v27 }
 0x812   : > { %v8870_v26 = vrot.slane %v8742_v37, 2  ;;  %v9101_v5 = vadd.f32 %v14426_v16, %v8742_v37  ;;  %v8871_v34 = vrot.slane %v8742_v37, 6  ;;  %9869 = vst [vmem:[#allocation1 + $0x3] ss:$4 sm:$0xff] %v9578_v1  ;;  %p11583_p8 = pneg %p11582_p4 }
 0x813   : > { %9870 = vst [vmem:[#allocation1 + $0x20] ss:$4 sm:$0xff] %v9579_v45 }
 0x814   : > { %v9102_v40 = vadd.f32 %v14429_v4, %v8870_v26  ;;  %v9453_v60 = vadd.f32 %v9231_v63, %v9101_v5  ;;  %v9103_v55 = vadd.f32 %v14729_v0, %v8871_v34  ;;  %9871 = vst [vmem:[#allocation1 + $0x21] ss:$4 sm:$0xff] %v9580_v33  ;;  %p11588_p10 = pnand %p11587_p9, %p11583_p8 }
 0x816   : > { %v9454_v15 = vadd.f32 %v9232_v41, %v9102_v40  ;;  %v9581_v59 = vmax.f32 %v9453_v60, 0.0  ;;  %v9455_v23 = vadd.f32 %v11472_v53, %v9103_v55 }
 0x817   : > { %v8704_v58 = vpop.f32.mrf.mxu1 }
 0x818   : > { %v8743_v22 = vadd.f32 %v8704_v58, %v8484_v9  ;;  %v9582_v24 = vmax.f32 %v9454_v15, 0.0  ;;  %v9237_v9 = vrot.slane %v11473_v43, 4  ;;  %9872 = vst [vmem:[#allocation1 + $0x22] ss:$4 sm:$0xff] %v9581_v59 }
 0x819   : > { %v9874_v56 = vld.sshfl [vmem:[#allocation1] sm:$0xff pattern:$0x73625140] }
 0x81a   : > { %v8872_v3 = vrot.slane %v8743_v22, 2  ;;  %v8873_v19 = vrot.slane %v8743_v22, 4  ;;  %v8874_v48 = vrot.slane %v8743_v22, 6  ;;  %v9104_v35 = vadd.f32 %v14423_v52, %v8743_v22  ;;  %9873 = vst [vmem:[#allocation1 + $0x23] ss:$4 sm:$0xff] %v9582_v24 }
 0x81b   : > { %9946 = vst [vmem:[%s14479_s27 + $0xe0] sm:$0xff] %v9874_v56 }
 0x81c   : > { %v9105_v37 = vadd.f32 %v14426_v16, %v8872_v3  ;;  %v9106_v18 = vadd.f32 %v14429_v4, %v8873_v19  ;;  %v9107_v46 = vadd.f32 %v14729_v0, %v8874_v48  ;;  %v9456_v36 = vadd.f32 %v9233_v25, %v9104_v35 }
 0x81d   : > { %v9583_v0 = vmax.f32 %v9455_v23, 0.0 }
 0x81e   : > { %v9457_v28 = vadd.f32 %v9234_v62, %v9105_v37  ;;  %v9458_v2 = vadd.f32 %v9235_v39, %v9106_v18  ;;  %v9459_v26 = vadd.f32 %v11473_v43, %v9107_v46  ;;  %v9584_v58 = vmax.f32 %v9456_v36, 0.0 }
 0x81f   : > { %v8706_v32 = vpop.f32.mrf.mxu1  ;;  %9876 = vst [vmem:[#allocation1] ss:$4 sm:$0xff] %v9583_v0 }
 0x820   : > { %v8744_v51 = vadd.f32 %v8706_v32, %v8485_v61  ;;  %v9585_v54 = vmax.f32 %v9457_v28, 0.0  ;;  %v9586_v17 = vmax.f32 %v9458_v2, 0.0  ;;  %9877 = vst [vmem:[#allocation1 + $0x1] ss:$4 sm:$0xff] %v9584_v58 }
 0x821   : > { %v9875_v22 = vld.sshfl [vmem:[#allocation1 + $0x20] sm:$0xff pattern:$0x73625140] }
 0x822   : > { %v8875_v49 = vrot.slane %v8744_v51, 2  ;;  %v8876_v50 = vrot.slane %v8744_v51, 4  ;;  %v9108_v44 = vadd.f32 %v14423_v52, %v8744_v51  ;;  %9878 = vst [vmem:[#allocation1 + $0x2] ss:$4 sm:$0xff] %v9585_v54 }
 0x823   : > { %9879 = vst [vmem:[#allocation1 + $0x3] ss:$4 sm:$0xff] %v9586_v17 }
 0x824   : > { %v9109_v8 = vadd.f32 %v14426_v16, %v8875_v49  ;;  %v9110_v11 = vadd.f32 %v14429_v4, %v8876_v50  ;;  %v9460_v52 = vadd.f32 %v9236_v57, %v9108_v44  ;;  %v9587_v16 = vmax.f32 %v9459_v26, 0.0  ;;  %9947 = vst [vmem:[%s14479_s27 + $0xe8] sm:$0xff] %v9875_v22 }
 0x826   : > { %v9461_v10 = vadd.f32 %v9237_v9, %v9109_v8  ;;  %v9462_v20 = vadd.f32 %v9238_v29, %v9110_v11  ;;  %v9588_v4 = vmax.f32 %v9460_v52, 0.0  ;;  %9880 = vst [vmem:[#allocation1 + $0x20] ss:$4 sm:$0xff] %v9587_v16 }
 0x828   : > { %v9589_v13 = vmax.f32 %v9461_v10, 0.0  ;;  %v9590_v42 = vmax.f32 %v9462_v20, 0.0  ;;  %9881 = vst [vmem:[#allocation1 + $0x21] ss:$4 sm:$0xff] %v9588_v4 }
 0x82a   : > { %9882 = vst [vmem:[#allocation1 + $0x22] ss:$4 sm:$0xff] %v9589_v13  ;;  %v9884_v31 = vld.sshfl [vmem:[#allocation1] sm:$0xff pattern:$0x73625140] }
 0x82b   : > { %9883 = vst [vmem:[#allocation1 + $0x23] ss:$4 sm:$0xff] %v9590_v42 }
 0x82c   : > { %9948 = vst [vmem:[%s14479_s27 + $0xf0] sm:$0xff] %v9884_v31 }
 0x832   : > { %v9885_v5 = vld.sshfl [vmem:[#allocation1 + $0x20] sm:$0xff pattern:$0x73625140] }
 0x833   : > { %9949 = vst [vmem:[%s14479_s27 + $0xf8] sm:$0xff] %v9885_v5 }
 0x834   : > { %11591 = shalt.err (!%p11588_p10)
}
 0x835   : > { %s11643_s8 = smov 128   ;;  %s11644_s27 = smov 8  }
 0x836   : > { %11348 = dma.vmem_to_hbm [thread:$0]  (%p11741_p3), %s9964_s15, 4096, %s9966_s16, %s9951_s22, %s11643_s8, %s11643_s8, %s11644_s27  }
 0x837 PF: > { %s9980_s30 = sand.u32 1, %s11622_s18   ;;  %p15170_p12 = scmp.ge.s32.totalorder %s11634_s21, 2 }
 0x838   : > { %s9981_s6 = scalar_lea.sflag [#allocation6], %s9980_s30 }
 0x839   : > { %p11362_p13 = pnand %p15170_p12, %p11710_p6 }
 0x83b   : > { %p11363_p0 = pneg %p11362_p13 }
 0x83d   : > { %11617 = dma.done.wait (%p11363_p0), %s9981_s6, 4096  }
 0x83e   : > { %11619 = vsyncadd (%p11363_p0), %s9981_s6, 4294963200  ;;  %p19_p5 = scmp.ge.s32.totalorder %s11731_s14, 4   ;;  %s15171_s18 = smov %s11626_s19 }
 0x83f   : > { %s15172_s19 = smov %s11630_s20  ;;  %s15173_s20 = smov %s11747_s23 }
 0x840   : > { %s15174_s21 = smov %s11731_s14  ;;  %21 = sbr.rel (!%p19_p5) target bundleno = 6 (0x6), region = 137 }
 0x845   :  { %9987 = vsyncpa [#allocation5], 1 }
 0x846   :  { %9989 = vsyncpa [#allocation5 + $0x1], 1 }
 0x847   :  { %9990 = vsyncpa [#allocation8], 1 }
 0x848   :  { %9991 = vsyncpa [#allocation6], 1 }
 0x849   :  { %9993 = vsyncpa [#allocation6 + $0x1], 1 }

</bundles_post_ra>
